<compile_context>
chip_gen: v7x
topology: tpu7x:2x2x1
jax: 0.10.0
libtpu: 0.0.40
codegen_flags: <defaults>
</compile_context>

<pallas_src>
import jax
import jax.numpy as jnp
from jax.experimental import pallas as pl
from jax.experimental.pallas import tpu as pltpu


def _round_up(n, m):
    return ((n + m - 1) // m) * m


def _pick_block_b(B, cap=256):
    # >=2 grid steps whenever possible (the "parallel" batch axis only shards
    # across v7x's two TensorCores if the grid has >=2 steps); the cap keeps the
    # default config inside v5e's 16 MiB scoped-VMEM default with no override.
    return max(8, min(cap, _round_up(pl.cdiv(B, 2), 8)))


def _make_kernel(d, R, R1):
    n_groups = d // R
    n_parts = R // R1

    def kernel(x_ref, w1_ref, b1_ref, w2_ref, b2_ref,
               w3_ref, b3_ref, w4_ref, b4_ref, o_ref, acc_ref):
        # x_ref : (TB, d//R, R*d) f32  -- R spatial rows side by side on lanes
        # w1_ref: (R1*d, R1*64) bf16   -- block-diagonal conv1 weight
        # w2_ref: (d//R, R*64, 128) bf16
        for g in range(n_groups):                       # static unroll: d/R big-K steps
            parts = []
            for c in range(n_parts):                    # conv1: R1 rows per MXU pass
                xc = x_ref[:, g, c * R1 * d:(c + 1) * R1 * d].astype(jnp.bfloat16)
                tc = jnp.dot(xc, w1_ref[...], preferred_element_type=jnp.float32)
                tc = jnp.maximum(tc + b1_ref[...], 0.0)          # bias + ReLU (f32)
                parts.append(tc.astype(jnp.bfloat16))            # (TB, R1*64)
            # lane-concat at 128-aligned boundaries -> (TB, R*64) slab for conv2
            t_slab = parts[0] if n_parts == 1 else jnp.concatenate(parts, axis=-1)
            contrib = jnp.dot(t_slab, w2_ref[g],                 # conv2: K = R*64
                              preferred_element_type=jnp.float32)
            if g == 0:
                acc_ref[...] = contrib                  # only d/R partial updates
            else:
                acc_ref[...] += contrib

        h2 = jnp.maximum(acc_ref[...] + b2_ref[...], 0.0)        # conv2 bias + ReLU
        h3 = jnp.dot(h2.astype(jnp.bfloat16), w3_ref[...],
                     preferred_element_type=jnp.float32) + b3_ref[...]
        h3 = jnp.maximum(h3, 0.0)                                # fc1 + ReLU
        h4 = jnp.dot(h3.astype(jnp.bfloat16), w4_ref[...],
                     preferred_element_type=jnp.float32) + b4_ref[...]
        o_ref[...] = jnp.maximum(h4, 0.0)                        # fc2 + ReLU

    return kernel


def encoder2_forward(x, params, *, block_b=None, rows_per_group=8,
                     rows_per_conv1_pass=2):
    """x: (B, 1, d, d) float -> (B, 64) f32 (encoder2 inference forward)."""
    B, C, d, d2 = x.shape
    assert C == 1 and d == d2
    R = rows_per_group if d % rows_per_group == 0 else d
    R1 = rows_per_conv1_pass if R % rows_per_conv1_pass == 0 else 1
    n_groups = d // R

    if block_b is None:
        block_b = _pick_block_b(B)
    grid_b = pl.cdiv(B, block_b)

    # Free contiguous reshape (no transpose / cast pre-pass, no extra HBM traffic).
    xg = x.reshape(B, n_groups, R * d)

    # conv1 weight as a block-diagonal (R1*d, R1*64): one MXU pass handles R1
    # spatial rows with K = R1*d and emits them already in conv2's lane layout.
    w1 = params["w1"].astype(jnp.float32)                        # (d, 64)
    w1b = jnp.zeros((R1 * d, R1 * 64), jnp.float32)
    for r in range(R1):
        w1b = w1b.at[r * d:(r + 1) * d, r * 64:(r + 1) * 64].set(w1)
    w1b = w1b.astype(jnp.bfloat16)
    b1b = jnp.tile(params["b1"].astype(jnp.float32), (1, R1))    # (1, R1*64)

    # conv2 weight grouped so each group is a single K = R*64 contraction.
    w2g = params["w2"].reshape(n_groups, R * 64, 128).astype(jnp.bfloat16)
    w3 = params["w3"].astype(jnp.bfloat16)                       # (128, 96)
    w4 = params["w4"].astype(jnp.bfloat16)                       # (96, 64)
    b2, b3, b4 = params["b2"], params["b3"], params["b4"]        # f32 (1, F)

    def resident(shape):        # full-array block, constant index_map: DMA'd once,
        n = len(shape)          # stays resident in VMEM across batch-tile steps
        return pl.BlockSpec(shape, lambda i, n=n: (0,) * n)

    return pl.pallas_call(
        _make_kernel(d, R, R1),
        out_shape=jax.ShapeDtypeStruct((B, 64), jnp.float32),
        grid_spec=pltpu.PrefetchScalarGridSpec(
            num_scalar_prefetch=0,
            grid=(grid_b,),
            in_specs=[
                pl.BlockSpec((block_b, n_groups, R * d), lambda i: (i, 0, 0)),
                resident(w1b.shape), resident(b1b.shape),
                resident(w2g.shape), resident(b2.shape),
                resident(w3.shape), resident(b3.shape),
                resident(w4.shape), resident(b4.shape),
            ],
            out_specs=pl.BlockSpec((block_b, 64), lambda i: (i, 0)),
            scratch_shapes=[pltpu.VMEM((block_b, 128), jnp.float32)],
        ),
        compiler_params=pltpu.CompilerParams(
            dimension_semantics=("parallel",),          # megacore sharding on v7x
            # default block_b (<=256) fits v5e's 16 MiB scoped default; larger
            # batch tiles (e.g. block_b=512 on v6e/v7x) get a raised limit.
            vmem_limit_bytes=(48 * 1024 * 1024) if block_b > 256 else None,
        ),
    )(xg, w1b, b1b, w2g, b2, w3, b3, w4, b4)


def init_params(key, d=64):
    """Deterministic synthetic parameters matching encoder2's shapes (pre-transposed):
       w1[j,c]   = conv1.weight[c,0,0,j]      (d, 64)
       w2[i,c,k] = conv2.weight[k,c,i,0]      (d, 64, 128)
       w3 = fc1.weight.T (128, 96), w4 = fc2.weight.T (96, 64); biases as (1, F)."""
    ks = jax.random.split(key, 8)
    s1 = 1.0 / jnp.sqrt(float(d))             # conv1 fan_in = 1*1*d
    s2 = 1.0 / jnp.sqrt(64.0 * d)             # conv2 fan_in = 64*d*1
    s3 = 1.0 / jnp.sqrt(128.0)                # fc1 fan_in
    s4 = 1.0 / jnp.sqrt(96.0)                 # fc2 fan_in
    w1 = jax.random.normal(ks[0], (d, 64), jnp.float32) * s1
    b1 = jax.random.normal(ks[1], (1, 64), jnp.float32) * s1
    w2 = jax.random.normal(ks[2], (d, 64, 128), jnp.float32) * s2
    b2 = jax.random.normal(ks[3], (1, 128), jnp.float32) * s2
    w3 = jax.random.normal(ks[4], (128, 96), jnp.float32) * s3
    b3 = jax.random.normal(ks[5], (1, 96), jnp.float32) * s3
    w4 = jax.random.normal(ks[6], (96, 64), jnp.float32) * s4
    b4 = jax.random.normal(ks[7], (1, 64), jnp.float32) * s4
    return dict(w1=w1, b1=b1, w2=w2, b2=b2, w3=w3, b3=b3, w4=w4, b4=b4)


def reference_forward(x, p):
    """Pure-JAX f32 reference of the same inference-mode forward."""
    xs = x[:, 0].astype(jnp.float32)                                        # (B, d, d)
    h1 = jnp.maximum(jnp.einsum("bij,jc->bic", xs, p["w1"]) + p["b1"], 0.0) # (B, d, 64)
    h2 = jnp.maximum(jnp.einsum("bic,ick->bk", h1, p["w2"]) + p["b2"], 0.0) # (B, 128)
    h3 = jnp.maximum(h2 @ p["w3"] + p["b3"], 0.0)                           # (B, 96)
    return jnp.maximum(h3 @ p["w4"] + p["b4"], 0.0)                         # (B, 64)


if __name__ == "__main__":
    key = jax.random.PRNGKey(0)
    k_x, k_p = jax.random.split(key)
    B, d = 24, 64                       # B=24 -> 2 grid steps (one full, one partial tile)
    x = jax.random.normal(k_x, (B, 1, d, d), jnp.float32)
    params = init_params(k_p, d=d)

    out = jax.block_until_ready(encoder2_forward(x, params))
    ref = reference_forward(x, params)

    assert out.shape == (B, 64)
    max_err = float(jnp.max(jnp.abs(out - ref)))
    # bf16 MXU operands with f32 accumulation -> loose tolerance vs the f32 reference.
    assert jnp.allclose(out, ref, atol=6e-2, rtol=6e-2), (
        f"mismatch vs reference: max abs diff {max_err}")
    print("KERNEL_OK")
</pallas_src>

<mosaic_0001>
module attributes {stable_mosaic.version = 11 : i64} {
  func.func @kernel(%arg0: i32, %arg1: memref<16x8x512xf32, #tpu.memory_space<vmem>>, %arg2: memref<128x128xbf16, #tpu.memory_space<vmem>>, %arg3: memref<1x128xf32, #tpu.memory_space<vmem>>, %arg4: memref<8x512x128xbf16, #tpu.memory_space<vmem>>, %arg5: memref<1x128xf32, #tpu.memory_space<vmem>>, %arg6: memref<128x96xbf16, #tpu.memory_space<vmem>>, %arg7: memref<1x96xf32, #tpu.memory_space<vmem>>, %arg8: memref<96x64xbf16, #tpu.memory_space<vmem>>, %arg9: memref<1x64xf32, #tpu.memory_space<vmem>>, %arg10: memref<16x64xf32, #tpu.memory_space<vmem>>, %arg11: memref<16x128xf32, #tpu.memory_space<vmem>>) attributes {dimension_semantics = [#tpu.dimension_semantics<parallel>], iteration_bounds = array<i64: 2>, scalar_prefetch = 0 : i64, scratch_operands = 1 : i64, tpu.core_type = #tpu.core_type<tc>, window_params = [{transform_indices = @transform_0, window_bounds = array<i64: 16, 8, 512>}, {pipeline_mode = #tpu.pipeline_mode<synchronous>, transform_indices = @transform_1, window_bounds = array<i64: 128, 128>}, {pipeline_mode = #tpu.pipeline_mode<synchronous>, transform_indices = @transform_2, window_bounds = array<i64: 1, 128>}, {pipeline_mode = #tpu.pipeline_mode<synchronous>, transform_indices = @transform_3, window_bounds = array<i64: 8, 512, 128>}, {pipeline_mode = #tpu.pipeline_mode<synchronous>, transform_indices = @transform_4, window_bounds = array<i64: 1, 128>}, {pipeline_mode = #tpu.pipeline_mode<synchronous>, transform_indices = @transform_5, window_bounds = array<i64: 128, 96>}, {pipeline_mode = #tpu.pipeline_mode<synchronous>, transform_indices = @transform_6, window_bounds = array<i64: 1, 96>}, {pipeline_mode = #tpu.pipeline_mode<synchronous>, transform_indices = @transform_7, window_bounds = array<i64: 96, 64>}, {pipeline_mode = #tpu.pipeline_mode<synchronous>, transform_indices = @transform_8, window_bounds = array<i64: 1, 64>}, {transform_indices = @transform_9, window_bounds = array<i64: 16, 64>}]} {
    %c0 = arith.constant 0 : index
    %c0_0 = arith.constant 0 : index
    %c0_1 = arith.constant 0 : index
    %0 = vector.load %arg1[%c0, %c0_0, %c0_1] : memref<16x8x512xf32, #tpu.memory_space<vmem>>, vector<16x1x128xf32>
    %1 = vector.shape_cast %0 : vector<16x1x128xf32> to vector<16x128xf32>
    %2 = arith.truncf %1 : vector<16x128xf32> to vector<16x128xbf16>
    %c0_2 = arith.constant 0 : index
    %c0_3 = arith.constant 0 : index
    %3 = vector.load %arg2[%c0_2, %c0_3] : memref<128x128xbf16, #tpu.memory_space<vmem>>, vector<128x128xbf16>
    %cst = arith.constant dense<0.000000e+00> : vector<16x128xf32>
    %4 = tpu.matmul %2, %3, %cst {dimension_numbers = #tpu.dot_dimension_numbers<[1], [0], [0], [1], [0, 0, 1, 1], [], []>} : vector<16x128xbf16>, vector<128x128xbf16>, vector<16x128xf32> -> vector<16x128xf32>
    %c0_4 = arith.constant 0 : index
    %c0_5 = arith.constant 0 : index
    %5 = vector.load %arg3[%c0_4, %c0_5] : memref<1x128xf32, #tpu.memory_space<vmem>>, vector<1x128xf32>
    %6 = vector.broadcast %5 : vector<1x128xf32> to vector<16x128xf32>
    %7 = arith.addf %4, %6 : vector<16x128xf32>
    %cst_6 = arith.constant 0.000000e+00 : f32
    %8 = vector.broadcast %cst_6 : f32 to vector<16x128xf32>
    %9 = arith.maximumf %7, %8 : vector<16x128xf32>
    %10 = arith.truncf %9 : vector<16x128xf32> to vector<16x128xbf16>
    %c0_7 = arith.constant 0 : index
    %c0_8 = arith.constant 0 : index
    %c128 = arith.constant 128 : index
    %11 = vector.load %arg1[%c0_7, %c0_8, %c128] : memref<16x8x512xf32, #tpu.memory_space<vmem>>, vector<16x1x128xf32>
    %12 = vector.shape_cast %11 : vector<16x1x128xf32> to vector<16x128xf32>
    %13 = arith.truncf %12 : vector<16x128xf32> to vector<16x128xbf16>
    %c0_9 = arith.constant 0 : index
    %c0_10 = arith.constant 0 : index
    %14 = vector.load %arg2[%c0_9, %c0_10] : memref<128x128xbf16, #tpu.memory_space<vmem>>, vector<128x128xbf16>
    %cst_11 = arith.constant dense<0.000000e+00> : vector<16x128xf32>
    %15 = tpu.matmul %13, %14, %cst_11 {dimension_numbers = #tpu.dot_dimension_numbers<[1], [0], [0], [1], [0, 0, 1, 1], [], []>} : vector<16x128xbf16>, vector<128x128xbf16>, vector<16x128xf32> -> vector<16x128xf32>
    %c0_12 = arith.constant 0 : index
    %c0_13 = arith.constant 0 : index
    %16 = vector.load %arg3[%c0_12, %c0_13] : memref<1x128xf32, #tpu.memory_space<vmem>>, vector<1x128xf32>
    %17 = vector.broadcast %16 : vector<1x128xf32> to vector<16x128xf32>
    %18 = arith.addf %15, %17 : vector<16x128xf32>
    %cst_14 = arith.constant 0.000000e+00 : f32
    %19 = vector.broadcast %cst_14 : f32 to vector<16x128xf32>
    %20 = arith.maximumf %18, %19 : vector<16x128xf32>
    %21 = arith.truncf %20 : vector<16x128xf32> to vector<16x128xbf16>
    %c0_15 = arith.constant 0 : index
    %c0_16 = arith.constant 0 : index
    %c256 = arith.constant 256 : index
    %22 = vector.load %arg1[%c0_15, %c0_16, %c256] : memref<16x8x512xf32, #tpu.memory_space<vmem>>, vector<16x1x128xf32>
    %23 = vector.shape_cast %22 : vector<16x1x128xf32> to vector<16x128xf32>
    %24 = arith.truncf %23 : vector<16x128xf32> to vector<16x128xbf16>
    %c0_17 = arith.constant 0 : index
    %c0_18 = arith.constant 0 : index
    %25 = vector.load %arg2[%c0_17, %c0_18] : memref<128x128xbf16, #tpu.memory_space<vmem>>, vector<128x128xbf16>
    %cst_19 = arith.constant dense<0.000000e+00> : vector<16x128xf32>
    %26 = tpu.matmul %24, %25, %cst_19 {dimension_numbers = #tpu.dot_dimension_numbers<[1], [0], [0], [1], [0, 0, 1, 1], [], []>} : vector<16x128xbf16>, vector<128x128xbf16>, vector<16x128xf32> -> vector<16x128xf32>
    %c0_20 = arith.constant 0 : index
    %c0_21 = arith.constant 0 : index
    %27 = vector.load %arg3[%c0_20, %c0_21] : memref<1x128xf32, #tpu.memory_space<vmem>>, vector<1x128xf32>
    %28 = vector.broadcast %27 : vector<1x128xf32> to vector<16x128xf32>
    %29 = arith.addf %26, %28 : vector<16x128xf32>
    %cst_22 = arith.constant 0.000000e+00 : f32
    %30 = vector.broadcast %cst_22 : f32 to vector<16x128xf32>
    %31 = arith.maximumf %29, %30 : vector<16x128xf32>
    %32 = arith.truncf %31 : vector<16x128xf32> to vector<16x128xbf16>
    %c0_23 = arith.constant 0 : index
    %c0_24 = arith.constant 0 : index
    %c384 = arith.constant 384 : index
    %33 = vector.load %arg1[%c0_23, %c0_24, %c384] : memref<16x8x512xf32, #tpu.memory_space<vmem>>, vector<16x1x128xf32>
    %34 = vector.shape_cast %33 : vector<16x1x128xf32> to vector<16x128xf32>
    %35 = arith.truncf %34 : vector<16x128xf32> to vector<16x128xbf16>
    %c0_25 = arith.constant 0 : index
    %c0_26 = arith.constant 0 : index
    %36 = vector.load %arg2[%c0_25, %c0_26] : memref<128x128xbf16, #tpu.memory_space<vmem>>, vector<128x128xbf16>
    %cst_27 = arith.constant dense<0.000000e+00> : vector<16x128xf32>
    %37 = tpu.matmul %35, %36, %cst_27 {dimension_numbers = #tpu.dot_dimension_numbers<[1], [0], [0], [1], [0, 0, 1, 1], [], []>} : vector<16x128xbf16>, vector<128x128xbf16>, vector<16x128xf32> -> vector<16x128xf32>
    %c0_28 = arith.constant 0 : index
    %c0_29 = arith.constant 0 : index
    %38 = vector.load %arg3[%c0_28, %c0_29] : memref<1x128xf32, #tpu.memory_space<vmem>>, vector<1x128xf32>
    %39 = vector.broadcast %38 : vector<1x128xf32> to vector<16x128xf32>
    %40 = arith.addf %37, %39 : vector<16x128xf32>
    %cst_30 = arith.constant 0.000000e+00 : f32
    %41 = vector.broadcast %cst_30 : f32 to vector<16x128xf32>
    %42 = arith.maximumf %40, %41 : vector<16x128xf32>
    %43 = arith.truncf %42 : vector<16x128xf32> to vector<16x128xbf16>
    %44 = tpu.concatenate %10, %21, %32, %43 in 1 : vector<16x128xbf16>, vector<16x128xbf16>, vector<16x128xbf16>, vector<16x128xbf16> -> vector<16x512xbf16>
    %c0_31 = arith.constant 0 : index
    %c0_32 = arith.constant 0 : index
    %c0_33 = arith.constant 0 : index
    %45 = vector.load %arg4[%c0_31, %c0_32, %c0_33] : memref<8x512x128xbf16, #tpu.memory_space<vmem>>, vector<1x512x128xbf16>
    %46 = vector.shape_cast %45 : vector<1x512x128xbf16> to vector<512x128xbf16>
    %cst_34 = arith.constant dense<0.000000e+00> : vector<16x128xf32>
    %47 = tpu.matmul %44, %46, %cst_34 {dimension_numbers = #tpu.dot_dimension_numbers<[1], [0], [0], [1], [0, 0, 1, 1], [], []>} : vector<16x512xbf16>, vector<512x128xbf16>, vector<16x128xf32> -> vector<16x128xf32>
    %c0_35 = arith.constant 0 : index
    %c0_36 = arith.constant 0 : index
    %48 = vector.load %arg11[%c0_35, %c0_36] : memref<16x128xf32, #tpu.memory_space<vmem>>, vector<16x128xf32>
    tpu.vector_store %arg11[%c0_35, %c0_36], %47 {strides = array<i32>} : memref<16x128xf32, #tpu.memory_space<vmem>>, vector<16x128xf32>,
    %c0_37 = arith.constant 0 : index
    %c1 = arith.constant 1 : index
    %c0_38 = arith.constant 0 : index
    %49 = vector.load %arg1[%c0_37, %c1, %c0_38] : memref<16x8x512xf32, #tpu.memory_space<vmem>>, vector<16x1x128xf32>
    %50 = vector.shape_cast %49 : vector<16x1x128xf32> to vector<16x128xf32>
    %51 = arith.truncf %50 : vector<16x128xf32> to vector<16x128xbf16>
    %c0_39 = arith.constant 0 : index
    %c0_40 = arith.constant 0 : index
    %52 = vector.load %arg2[%c0_39, %c0_40] : memref<128x128xbf16, #tpu.memory_space<vmem>>, vector<128x128xbf16>
    %cst_41 = arith.constant dense<0.000000e+00> : vector<16x128xf32>
    %53 = tpu.matmul %51, %52, %cst_41 {dimension_numbers = #tpu.dot_dimension_numbers<[1], [0], [0], [1], [0, 0, 1, 1], [], []>} : vector<16x128xbf16>, vector<128x128xbf16>, vector<16x128xf32> -> vector<16x128xf32>
    %c0_42 = arith.constant 0 : index
    %c0_43 = arith.constant 0 : index
    %54 = vector.load %arg3[%c0_42, %c0_43] : memref<1x128xf32, #tpu.memory_space<vmem>>, vector<1x128xf32>
    %55 = vector.broadcast %54 : vector<1x128xf32> to vector<16x128xf32>
    %56 = arith.addf %53, %55 : vector<16x128xf32>
    %cst_44 = arith.constant 0.000000e+00 : f32
    %57 = vector.broadcast %cst_44 : f32 to vector<16x128xf32>
    %58 = arith.maximumf %56, %57 : vector<16x128xf32>
    %59 = arith.truncf %58 : vector<16x128xf32> to vector<16x128xbf16>
    %c0_45 = arith.constant 0 : index
    %c1_46 = arith.constant 1 : index
    %c128_47 = arith.constant 128 : index
    %60 = vector.load %arg1[%c0_45, %c1_46, %c128_47] : memref<16x8x512xf32, #tpu.memory_space<vmem>>, vector<16x1x128xf32>
    %61 = vector.shape_cast %60 : vector<16x1x128xf32> to vector<16x128xf32>
    %62 = arith.truncf %61 : vector<16x128xf32> to vector<16x128xbf16>
    %c0_48 = arith.constant 0 : index
    %c0_49 = arith.constant 0 : index
    %63 = vector.load %arg2[%c0_48, %c0_49] : memref<128x128xbf16, #tpu.memory_space<vmem>>, vector<128x128xbf16>
    %cst_50 = arith.constant dense<0.000000e+00> : vector<16x128xf32>
    %64 = tpu.matmul %62, %63, %cst_50 {dimension_numbers = #tpu.dot_dimension_numbers<[1], [0], [0], [1], [0, 0, 1, 1], [], []>} : vector<16x128xbf16>, vector<128x128xbf16>, vector<16x128xf32> -> vector<16x128xf32>
    %c0_51 = arith.constant 0 : index
    %c0_52 = arith.constant 0 : index
    %65 = vector.load %arg3[%c0_51, %c0_52] : memref<1x128xf32, #tpu.memory_space<vmem>>, vector<1x128xf32>
    %66 = vector.broadcast %65 : vector<1x128xf32> to vector<16x128xf32>
    %67 = arith.addf %64, %66 : vector<16x128xf32>
    %cst_53 = arith.constant 0.000000e+00 : f32
    %68 = vector.broadcast %cst_53 : f32 to vector<16x128xf32>
    %69 = arith.maximumf %67, %68 : vector<16x128xf32>
    %70 = arith.truncf %69 : vector<16x128xf32> to vector<16x128xbf16>
    %c0_54 = arith.constant 0 : index
    %c1_55 = arith.constant 1 : index
    %c256_56 = arith.constant 256 : index
    %71 = vector.load %arg1[%c0_54, %c1_55, %c256_56] : memref<16x8x512xf32, #tpu.memory_space<vmem>>, vector<16x1x128xf32>
    %72 = vector.shape_cast %71 : vector<16x1x128xf32> to vector<16x128xf32>
    %73 = arith.truncf %72 : vector<16x128xf32> to vector<16x128xbf16>
    %c0_57 = arith.constant 0 : index
    %c0_58 = arith.constant 0 : index
    %74 = vector.load %arg2[%c0_57, %c0_58] : memref<128x128xbf16, #tpu.memory_space<vmem>>, vector<128x128xbf16>
    %cst_59 = arith.constant dense<0.000000e+00> : vector<16x128xf32>
    %75 = tpu.matmul %73, %74, %cst_59 {dimension_numbers = #tpu.dot_dimension_numbers<[1], [0], [0], [1], [0, 0, 1, 1], [], []>} : vector<16x128xbf16>, vector<128x128xbf16>, vector<16x128xf32> -> vector<16x128xf32>
    %c0_60 = arith.constant 0 : index
    %c0_61 = arith.constant 0 : index
    %76 = vector.load %arg3[%c0_60, %c0_61] : memref<1x128xf32, #tpu.memory_space<vmem>>, vector<1x128xf32>
    %77 = vector.broadcast %76 : vector<1x128xf32> to vector<16x128xf32>
    %78 = arith.addf %75, %77 : vector<16x128xf32>
    %cst_62 = arith.constant 0.000000e+00 : f32
    %79 = vector.broadcast %cst_62 : f32 to vector<16x128xf32>
    %80 = arith.maximumf %78, %79 : vector<16x128xf32>
    %81 = arith.truncf %80 : vector<16x128xf32> to vector<16x128xbf16>
    %c0_63 = arith.constant 0 : index
    %c1_64 = arith.constant 1 : index
    %c384_65 = arith.constant 384 : index
    %82 = vector.load %arg1[%c0_63, %c1_64, %c384_65] : memref<16x8x512xf32, #tpu.memory_space<vmem>>, vector<16x1x128xf32>
    %83 = vector.shape_cast %82 : vector<16x1x128xf32> to vector<16x128xf32>
    %84 = arith.truncf %83 : vector<16x128xf32> to vector<16x128xbf16>
    %c0_66 = arith.constant 0 : index
    %c0_67 = arith.constant 0 : index
    %85 = vector.load %arg2[%c0_66, %c0_67] : memref<128x128xbf16, #tpu.memory_space<vmem>>, vector<128x128xbf16>
    %cst_68 = arith.constant dense<0.000000e+00> : vector<16x128xf32>
    %86 = tpu.matmul %84, %85, %cst_68 {dimension_numbers = #tpu.dot_dimension_numbers<[1], [0], [0], [1], [0, 0, 1, 1], [], []>} : vector<16x128xbf16>, vector<128x128xbf16>, vector<16x128xf32> -> vector<16x128xf32>
    %c0_69 = arith.constant 0 : index
    %c0_70 = arith.constant 0 : index
    %87 = vector.load %arg3[%c0_69, %c0_70] : memref<1x128xf32, #tpu.memory_space<vmem>>, vector<1x128xf32>
    %88 = vector.broadcast %87 : vector<1x128xf32> to vector<16x128xf32>
    %89 = arith.addf %86, %88 : vector<16x128xf32>
    %cst_71 = arith.constant 0.000000e+00 : f32
    %90 = vector.broadcast %cst_71 : f32 to vector<16x128xf32>
    %91 = arith.maximumf %89, %90 : vector<16x128xf32>
    %92 = arith.truncf %91 : vector<16x128xf32> to vector<16x128xbf16>
    %93 = tpu.concatenate %59, %70, %81, %92 in 1 : vector<16x128xbf16>, vector<16x128xbf16>, vector<16x128xbf16>, vector<16x128xbf16> -> vector<16x512xbf16>
    %c1_72 = arith.constant 1 : index
    %c0_73 = arith.constant 0 : index
    %c0_74 = arith.constant 0 : index
    %94 = vector.load %arg4[%c1_72, %c0_73, %c0_74] : memref<8x512x128xbf16, #tpu.memory_space<vmem>>, vector<1x512x128xbf16>
    %95 = vector.shape_cast %94 : vector<1x512x128xbf16> to vector<512x128xbf16>
    %cst_75 = arith.constant dense<0.000000e+00> : vector<16x128xf32>
    %96 = tpu.matmul %93, %95, %cst_75 {dimension_numbers = #tpu.dot_dimension_numbers<[1], [0], [0], [1], [0, 0, 1, 1], [], []>} : vector<16x512xbf16>, vector<512x128xbf16>, vector<16x128xf32> -> vector<16x128xf32>
    %c0_76 = arith.constant 0 : index
    %c0_77 = arith.constant 0 : index
    %97 = vector.load %arg11[%c0_76, %c0_77] : memref<16x128xf32, #tpu.memory_space<vmem>>, vector<16x128xf32>
    %98 = arith.addf %97, %96 : vector<16x128xf32>
    %c0_78 = arith.constant 0 : index
    %c0_79 = arith.constant 0 : index
    %99 = vector.load %arg11[%c0_78, %c0_79] : memref<16x128xf32, #tpu.memory_space<vmem>>, vector<16x128xf32>
    tpu.vector_store %arg11[%c0_78, %c0_79], %98 {strides = array<i32>} : memref<16x128xf32, #tpu.memory_space<vmem>>, vector<16x128xf32>,
    %c0_80 = arith.constant 0 : index
    %c2 = arith.constant 2 : index
    %c0_81 = arith.constant 0 : index
    %100 = vector.load %arg1[%c0_80, %c2, %c0_81] : memref<16x8x512xf32, #tpu.memory_space<vmem>>, vector<16x1x128xf32>
    %101 = vector.shape_cast %100 : vector<16x1x128xf32> to vector<16x128xf32>
    %102 = arith.truncf %101 : vector<16x128xf32> to vector<16x128xbf16>
    %c0_82 = arith.constant 0 : index
    %c0_83 = arith.constant 0 : index
    %103 = vector.load %arg2[%c0_82, %c0_83] : memref<128x128xbf16, #tpu.memory_space<vmem>>, vector<128x128xbf16>
    %cst_84 = arith.constant dense<0.000000e+00> : vector<16x128xf32>
    %104 = tpu.matmul %102, %103, %cst_84 {dimension_numbers = #tpu.dot_dimension_numbers<[1], [0], [0], [1], [0, 0, 1, 1], [], []>} : vector<16x128xbf16>, vector<128x128xbf16>, vector<16x128xf32> -> vector<16x128xf32>
    %c0_85 = arith.constant 0 : index
    %c0_86 = arith.constant 0 : index
    %105 = vector.load %arg3[%c0_85, %c0_86] : memref<1x128xf32, #tpu.memory_space<vmem>>, vector<1x128xf32>
    %106 = vector.broadcast %105 : vector<1x128xf32> to vector<16x128xf32>
    %107 = arith.addf %104, %106 : vector<16x128xf32>
    %cst_87 = arith.constant 0.000000e+00 : f32
    %108 = vector.broadcast %cst_87 : f32 to vector<16x128xf32>
    %109 = arith.maximumf %107, %108 : vector<16x128xf32>
    %110 = arith.truncf %109 : vector<16x128xf32> to vector<16x128xbf16>
    %c0_88 = arith.constant 0 : index
    %c2_89 = arith.constant 2 : index
    %c128_90 = arith.constant 128 : index
    %111 = vector.load %arg1[%c0_88, %c2_89, %c128_90] : memref<16x8x512xf32, #tpu.memory_space<vmem>>, vector<16x1x128xf32>
    %112 = vector.shape_cast %111 : vector<16x1x128xf32> to vector<16x128xf32>
    %113 = arith.truncf %112 : vector<16x128xf32> to vector<16x128xbf16>
    %c0_91 = arith.constant 0 : index
    %c0_92 = arith.constant 0 : index
    %114 = vector.load %arg2[%c0_91, %c0_92] : memref<128x128xbf16, #tpu.memory_space<vmem>>, vector<128x128xbf16>
    %cst_93 = arith.constant dense<0.000000e+00> : vector<16x128xf32>
    %115 = tpu.matmul %113, %114, %cst_93 {dimension_numbers = #tpu.dot_dimension_numbers<[1], [0], [0], [1], [0, 0, 1, 1], [], []>} : vector<16x128xbf16>, vector<128x128xbf16>, vector<16x128xf32> -> vector<16x128xf32>
    %c0_94 = arith.constant 0 : index
    %c0_95 = arith.constant 0 : index
    %116 = vector.load %arg3[%c0_94, %c0_95] : memref<1x128xf32, #tpu.memory_space<vmem>>, vector<1x128xf32>
    %117 = vector.broadcast %116 : vector<1x128xf32> to vector<16x128xf32>
    %118 = arith.addf %115, %117 : vector<16x128xf32>
    %cst_96 = arith.constant 0.000000e+00 : f32
    %119 = vector.broadcast %cst_96 : f32 to vector<16x128xf32>
    %120 = arith.maximumf %118, %119 : vector<16x128xf32>
    %121 = arith.truncf %120 : vector<16x128xf32> to vector<16x128xbf16>
    %c0_97 = arith.constant 0 : index
    %c2_98 = arith.constant 2 : index
    %c256_99 = arith.constant 256 : index
    %122 = vector.load %arg1[%c0_97, %c2_98, %c256_99] : memref<16x8x512xf32, #tpu.memory_space<vmem>>, vector<16x1x128xf32>
    %123 = vector.shape_cast %122 : vector<16x1x128xf32> to vector<16x128xf32>
    %124 = arith.truncf %123 : vector<16x128xf32> to vector<16x128xbf16>
    %c0_100 = arith.constant 0 : index
    %c0_101 = arith.constant 0 : index
    %125 = vector.load %arg2[%c0_100, %c0_101] : memref<128x128xbf16, #tpu.memory_space<vmem>>, vector<128x128xbf16>
    %cst_102 = arith.constant dense<0.000000e+00> : vector<16x128xf32>
    %126 = tpu.matmul %124, %125, %cst_102 {dimension_numbers = #tpu.dot_dimension_numbers<[1], [0], [0], [1], [0, 0, 1, 1], [], []>} : vector<16x128xbf16>, vector<128x128xbf16>, vector<16x128xf32> -> vector<16x128xf32>
    %c0_103 = arith.constant 0 : index
    %c0_104 = arith.constant 0 : index
    %127 = vector.load %arg3[%c0_103, %c0_104] : memref<1x128xf32, #tpu.memory_space<vmem>>, vector<1x128xf32>
    %128 = vector.broadcast %127 : vector<1x128xf32> to vector<16x128xf32>
    %129 = arith.addf %126, %128 : vector<16x128xf32>
    %cst_105 = arith.constant 0.000000e+00 : f32
    %130 = vector.broadcast %cst_105 : f32 to vector<16x128xf32>
    %131 = arith.maximumf %129, %130 : vector<16x128xf32>
    %132 = arith.truncf %131 : vector<16x128xf32> to vector<16x128xbf16>
    %c0_106 = arith.constant 0 : index
    %c2_107 = arith.constant 2 : index
    %c384_108 = arith.constant 384 : index
    %133 = vector.load %arg1[%c0_106, %c2_107, %c384_108] : memref<16x8x512xf32, #tpu.memory_space<vmem>>, vector<16x1x128xf32>
    %134 = vector.shape_cast %133 : vector<16x1x128xf32> to vector<16x128xf32>
    %135 = arith.truncf %134 : vector<16x128xf32> to vector<16x128xbf16>
    %c0_109 = arith.constant 0 : index
    %c0_110 = arith.constant 0 : index
    %136 = vector.load %arg2[%c0_109, %c0_110] : memref<128x128xbf16, #tpu.memory_space<vmem>>, vector<128x128xbf16>
    %cst_111 = arith.constant dense<0.000000e+00> : vector<16x128xf32>
    %137 = tpu.matmul %135, %136, %cst_111 {dimension_numbers = #tpu.dot_dimension_numbers<[1], [0], [0], [1], [0, 0, 1, 1], [], []>} : vector<16x128xbf16>, vector<128x128xbf16>, vector<16x128xf32> -> vector<16x128xf32>
    %c0_112 = arith.constant 0 : index
    %c0_113 = arith.constant 0 : index
    %138 = vector.load %arg3[%c0_112, %c0_113] : memref<1x128xf32, #tpu.memory_space<vmem>>, vector<1x128xf32>
    %139 = vector.broadcast %138 : vector<1x128xf32> to vector<16x128xf32>
    %140 = arith.addf %137, %139 : vector<16x128xf32>
    %cst_114 = arith.constant 0.000000e+00 : f32
    %141 = vector.broadcast %cst_114 : f32 to vector<16x128xf32>
    %142 = arith.maximumf %140, %141 : vector<16x128xf32>
    %143 = arith.truncf %142 : vector<16x128xf32> to vector<16x128xbf16>
    %144 = tpu.concatenate %110, %121, %132, %143 in 1 : vector<16x128xbf16>, vector<16x128xbf16>, vector<16x128xbf16>, vector<16x128xbf16> -> vector<16x512xbf16>
    %c2_115 = arith.constant 2 : index
    %c0_116 = arith.constant 0 : index
    %c0_117 = arith.constant 0 : index
    %145 = vector.load %arg4[%c2_115, %c0_116, %c0_117] : memref<8x512x128xbf16, #tpu.memory_space<vmem>>, vector<1x512x128xbf16>
    %146 = vector.shape_cast %145 : vector<1x512x128xbf16> to vector<512x128xbf16>
    %cst_118 = arith.constant dense<0.000000e+00> : vector<16x128xf32>
    %147 = tpu.matmul %144, %146, %cst_118 {dimension_numbers = #tpu.dot_dimension_numbers<[1], [0], [0], [1], [0, 0, 1, 1], [], []>} : vector<16x512xbf16>, vector<512x128xbf16>, vector<16x128xf32> -> vector<16x128xf32>
    %c0_119 = arith.constant 0 : index
    %c0_120 = arith.constant 0 : index
    %148 = vector.load %arg11[%c0_119, %c0_120] : memref<16x128xf32, #tpu.memory_space<vmem>>, vector<16x128xf32>
    %149 = arith.addf %148, %147 : vector<16x128xf32>
    %c0_121 = arith.constant 0 : index
    %c0_122 = arith.constant 0 : index
    %150 = vector.load %arg11[%c0_121, %c0_122] : memref<16x128xf32, #tpu.memory_space<vmem>>, vector<16x128xf32>
    tpu.vector_store %arg11[%c0_121, %c0_122], %149 {strides = array<i32>} : memref<16x128xf32, #tpu.memory_space<vmem>>, vector<16x128xf32>,
    %c0_123 = arith.constant 0 : index
    %c3 = arith.constant 3 : index
    %c0_124 = arith.constant 0 : index
    %151 = vector.load %arg1[%c0_123, %c3, %c0_124] : memref<16x8x512xf32, #tpu.memory_space<vmem>>, vector<16x1x128xf32>
    %152 = vector.shape_cast %151 : vector<16x1x128xf32> to vector<16x128xf32>
    %153 = arith.truncf %152 : vector<16x128xf32> to vector<16x128xbf16>
    %c0_125 = arith.constant 0 : index
    %c0_126 = arith.constant 0 : index
    %154 = vector.load %arg2[%c0_125, %c0_126] : memref<128x128xbf16, #tpu.memory_space<vmem>>, vector<128x128xbf16>
    %cst_127 = arith.constant dense<0.000000e+00> : vector<16x128xf32>
    %155 = tpu.matmul %153, %154, %cst_127 {dimension_numbers = #tpu.dot_dimension_numbers<[1], [0], [0], [1], [0, 0, 1, 1], [], []>} : vector<16x128xbf16>, vector<128x128xbf16>, vector<16x128xf32> -> vector<16x128xf32>
    %c0_128 = arith.constant 0 : index
    %c0_129 = arith.constant 0 : index
    %156 = vector.load %arg3[%c0_128, %c0_129] : memref<1x128xf32, #tpu.memory_space<vmem>>, vector<1x128xf32>
    %157 = vector.broadcast %156 : vector<1x128xf32> to vector<16x128xf32>
    %158 = arith.addf %155, %157 : vector<16x128xf32>
    %cst_130 = arith.constant 0.000000e+00 : f32
    %159 = vector.broadcast %cst_130 : f32 to vector<16x128xf32>
    %160 = arith.maximumf %158, %159 : vector<16x128xf32>
    %161 = arith.truncf %160 : vector<16x128xf32> to vector<16x128xbf16>
    %c0_131 = arith.constant 0 : index
    %c3_132 = arith.constant 3 : index
    %c128_133 = arith.constant 128 : index
    %162 = vector.load %arg1[%c0_131, %c3_132, %c128_133] : memref<16x8x512xf32, #tpu.memory_space<vmem>>, vector<16x1x128xf32>
    %163 = vector.shape_cast %162 : vector<16x1x128xf32> to vector<16x128xf32>
    %164 = arith.truncf %163 : vector<16x128xf32> to vector<16x128xbf16>
    %c0_134 = arith.constant 0 : index
    %c0_135 = arith.constant 0 : index
    %165 = vector.load %arg2[%c0_134, %c0_135] : memref<128x128xbf16, #tpu.memory_space<vmem>>, vector<128x128xbf16>
    %cst_136 = arith.constant dense<0.000000e+00> : vector<16x128xf32>
    %166 = tpu.matmul %164, %165, %cst_136 {dimension_numbers = #tpu.dot_dimension_numbers<[1], [0], [0], [1], [0, 0, 1, 1], [], []>} : vector<16x128xbf16>, vector<128x128xbf16>, vector<16x128xf32> -> vector<16x128xf32>
    %c0_137 = arith.constant 0 : index
    %c0_138 = arith.constant 0 : index
    %167 = vector.load %arg3[%c0_137, %c0_138] : memref<1x128xf32, #tpu.memory_space<vmem>>, vector<1x128xf32>
    %168 = vector.broadcast %167 : vector<1x128xf32> to vector<16x128xf32>
    %169 = arith.addf %166, %168 : vector<16x128xf32>
    %cst_139 = arith.constant 0.000000e+00 : f32
    %170 = vector.broadcast %cst_139 : f32 to vector<16x128xf32>
    %171 = arith.maximumf %169, %170 : vector<16x128xf32>
    %172 = arith.truncf %171 : vector<16x128xf32> to vector<16x128xbf16>
    %c0_140 = arith.constant 0 : index
    %c3_141 = arith.constant 3 : index
    %c256_142 = arith.constant 256 : index
    %173 = vector.load %arg1[%c0_140, %c3_141, %c256_142] : memref<16x8x512xf32, #tpu.memory_space<vmem>>, vector<16x1x128xf32>
    %174 = vector.shape_cast %173 : vector<16x1x128xf32> to vector<16x128xf32>
    %175 = arith.truncf %174 : vector<16x128xf32> to vector<16x128xbf16>
    %c0_143 = arith.constant 0 : index
    %c0_144 = arith.constant 0 : index
    %176 = vector.load %arg2[%c0_143, %c0_144] : memref<128x128xbf16, #tpu.memory_space<vmem>>, vector<128x128xbf16>
    %cst_145 = arith.constant dense<0.000000e+00> : vector<16x128xf32>
    %177 = tpu.matmul %175, %176, %cst_145 {dimension_numbers = #tpu.dot_dimension_numbers<[1], [0], [0], [1], [0, 0, 1, 1], [], []>} : vector<16x128xbf16>, vector<128x128xbf16>, vector<16x128xf32> -> vector<16x128xf32>
    %c0_146 = arith.constant 0 : index
    %c0_147 = arith.constant 0 : index
    %178 = vector.load %arg3[%c0_146, %c0_147] : memref<1x128xf32, #tpu.memory_space<vmem>>, vector<1x128xf32>
    %179 = vector.broadcast %178 : vector<1x128xf32> to vector<16x128xf32>
    %180 = arith.addf %177, %179 : vector<16x128xf32>
    %cst_148 = arith.constant 0.000000e+00 : f32
    %181 = vector.broadcast %cst_148 : f32 to vector<16x128xf32>
    %182 = arith.maximumf %180, %181 : vector<16x128xf32>
    %183 = arith.truncf %182 : vector<16x128xf32> to vector<16x128xbf16>
    %c0_149 = arith.constant 0 : index
    %c3_150 = arith.constant 3 : index
    %c384_151 = arith.constant 384 : index
    %184 = vector.load %arg1[%c0_149, %c3_150, %c384_151] : memref<16x8x512xf32, #tpu.memory_space<vmem>>, vector<16x1x128xf32>
    %185 = vector.shape_cast %184 : vector<16x1x128xf32> to vector<16x128xf32>
    %186 = arith.truncf %185 : vector<16x128xf32> to vector<16x128xbf16>
    %c0_152 = arith.constant 0 : index
    %c0_153 = arith.constant 0 : index
    %187 = vector.load %arg2[%c0_152, %c0_153] : memref<128x128xbf16, #tpu.memory_space<vmem>>, vector<128x128xbf16>
    %cst_154 = arith.constant dense<0.000000e+00> : vector<16x128xf32>
    %188 = tpu.matmul %186, %187, %cst_154 {dimension_numbers = #tpu.dot_dimension_numbers<[1], [0], [0], [1], [0, 0, 1, 1], [], []>} : vector<16x128xbf16>, vector<128x128xbf16>, vector<16x128xf32> -> vector<16x128xf32>
    %c0_155 = arith.constant 0 : index
    %c0_156 = arith.constant 0 : index
    %189 = vector.load %arg3[%c0_155, %c0_156] : memref<1x128xf32, #tpu.memory_space<vmem>>, vector<1x128xf32>
    %190 = vector.broadcast %189 : vector<1x128xf32> to vector<16x128xf32>
    %191 = arith.addf %188, %190 : vector<16x128xf32>
    %cst_157 = arith.constant 0.000000e+00 : f32
    %192 = vector.broadcast %cst_157 : f32 to vector<16x128xf32>
    %193 = arith.maximumf %191, %192 : vector<16x128xf32>
    %194 = arith.truncf %193 : vector<16x128xf32> to vector<16x128xbf16>
    %195 = tpu.concatenate %161, %172, %183, %194 in 1 : vector<16x128xbf16>, vector<16x128xbf16>, vector<16x128xbf16>, vector<16x128xbf16> -> vector<16x512xbf16>
    %c3_158 = arith.constant 3 : index
    %c0_159 = arith.constant 0 : index
    %c0_160 = arith.constant 0 : index
    %196 = vector.load %arg4[%c3_158, %c0_159, %c0_160] : memref<8x512x128xbf16, #tpu.memory_space<vmem>>, vector<1x512x128xbf16>
    %197 = vector.shape_cast %196 : vector<1x512x128xbf16> to vector<512x128xbf16>
    %cst_161 = arith.constant dense<0.000000e+00> : vector<16x128xf32>
    %198 = tpu.matmul %195, %197, %cst_161 {dimension_numbers = #tpu.dot_dimension_numbers<[1], [0], [0], [1], [0, 0, 1, 1], [], []>} : vector<16x512xbf16>, vector<512x128xbf16>, vector<16x128xf32> -> vector<16x128xf32>
    %c0_162 = arith.constant 0 : index
    %c0_163 = arith.constant 0 : index
    %199 = vector.load %arg11[%c0_162, %c0_163] : memref<16x128xf32, #tpu.memory_space<vmem>>, vector<16x128xf32>
    %200 = arith.addf %199, %198 : vector<16x128xf32>
    %c0_164 = arith.constant 0 : index
    %c0_165 = arith.constant 0 : index
    %201 = vector.load %arg11[%c0_164, %c0_165] : memref<16x128xf32, #tpu.memory_space<vmem>>, vector<16x128xf32>
    tpu.vector_store %arg11[%c0_164, %c0_165], %200 {strides = array<i32>} : memref<16x128xf32, #tpu.memory_space<vmem>>, vector<16x128xf32>,
    %c0_166 = arith.constant 0 : index
    %c4 = arith.constant 4 : index
    %c0_167 = arith.constant 0 : index
    %202 = vector.load %arg1[%c0_166, %c4, %c0_167] : memref<16x8x512xf32, #tpu.memory_space<vmem>>, vector<16x1x128xf32>
    %203 = vector.shape_cast %202 : vector<16x1x128xf32> to vector<16x128xf32>
    %204 = arith.truncf %203 : vector<16x128xf32> to vector<16x128xbf16>
    %c0_168 = arith.constant 0 : index
    %c0_169 = arith.constant 0 : index
    %205 = vector.load %arg2[%c0_168, %c0_169] : memref<128x128xbf16, #tpu.memory_space<vmem>>, vector<128x128xbf16>
    %cst_170 = arith.constant dense<0.000000e+00> : vector<16x128xf32>
    %206 = tpu.matmul %204, %205, %cst_170 {dimension_numbers = #tpu.dot_dimension_numbers<[1], [0], [0], [1], [0, 0, 1, 1], [], []>} : vector<16x128xbf16>, vector<128x128xbf16>, vector<16x128xf32> -> vector<16x128xf32>
    %c0_171 = arith.constant 0 : index
    %c0_172 = arith.constant 0 : index
    %207 = vector.load %arg3[%c0_171, %c0_172] : memref<1x128xf32, #tpu.memory_space<vmem>>, vector<1x128xf32>
    %208 = vector.broadcast %207 : vector<1x128xf32> to vector<16x128xf32>
    %209 = arith.addf %206, %208 : vector<16x128xf32>
    %cst_173 = arith.constant 0.000000e+00 : f32
    %210 = vector.broadcast %cst_173 : f32 to vector<16x128xf32>
    %211 = arith.maximumf %209, %210 : vector<16x128xf32>
    %212 = arith.truncf %211 : vector<16x128xf32> to vector<16x128xbf16>
    %c0_174 = arith.constant 0 : index
    %c4_175 = arith.constant 4 : index
    %c128_176 = arith.constant 128 : index
    %213 = vector.load %arg1[%c0_174, %c4_175, %c128_176] : memref<16x8x512xf32, #tpu.memory_space<vmem>>, vector<16x1x128xf32>
    %214 = vector.shape_cast %213 : vector<16x1x128xf32> to vector<16x128xf32>
    %215 = arith.truncf %214 : vector<16x128xf32> to vector<16x128xbf16>
    %c0_177 = arith.constant 0 : index
    %c0_178 = arith.constant 0 : index
    %216 = vector.load %arg2[%c0_177, %c0_178] : memref<128x128xbf16, #tpu.memory_space<vmem>>, vector<128x128xbf16>
    %cst_179 = arith.constant dense<0.000000e+00> : vector<16x128xf32>
    %217 = tpu.matmul %215, %216, %cst_179 {dimension_numbers = #tpu.dot_dimension_numbers<[1], [0], [0], [1], [0, 0, 1, 1], [], []>} : vector<16x128xbf16>, vector<128x128xbf16>, vector<16x128xf32> -> vector<16x128xf32>
    %c0_180 = arith.constant 0 : index
    %c0_181 = arith.constant 0 : index
    %218 = vector.load %arg3[%c0_180, %c0_181] : memref<1x128xf32, #tpu.memory_space<vmem>>, vector<1x128xf32>
    %219 = vector.broadcast %218 : vector<1x128xf32> to vector<16x128xf32>
    %220 = arith.addf %217, %219 : vector<16x128xf32>
    %cst_182 = arith.constant 0.000000e+00 : f32
    %221 = vector.broadcast %cst_182 : f32 to vector<16x128xf32>
    %222 = arith.maximumf %220, %221 : vector<16x128xf32>
    %223 = arith.truncf %222 : vector<16x128xf32> to vector<16x128xbf16>
    %c0_183 = arith.constant 0 : index
    %c4_184 = arith.constant 4 : index
    %c256_185 = arith.constant 256 : index
    %224 = vector.load %arg1[%c0_183, %c4_184, %c256_185] : memref<16x8x512xf32, #tpu.memory_space<vmem>>, vector<16x1x128xf32>
    %225 = vector.shape_cast %224 : vector<16x1x128xf32> to vector<16x128xf32>
    %226 = arith.truncf %225 : vector<16x128xf32> to vector<16x128xbf16>
    %c0_186 = arith.constant 0 : index
    %c0_187 = arith.constant 0 : index
    %227 = vector.load %arg2[%c0_186, %c0_187] : memref<128x128xbf16, #tpu.memory_space<vmem>>, vector<128x128xbf16>
    %cst_188 = arith.constant dense<0.000000e+00> : vector<16x128xf32>
    %228 = tpu.matmul %226, %227, %cst_188 {dimension_numbers = #tpu.dot_dimension_numbers<[1], [0], [0], [1], [0, 0, 1, 1], [], []>} : vector<16x128xbf16>, vector<128x128xbf16>, vector<16x128xf32> -> vector<16x128xf32>
    %c0_189 = arith.constant 0 : index
    %c0_190 = arith.constant 0 : index
    %229 = vector.load %arg3[%c0_189, %c0_190] : memref<1x128xf32, #tpu.memory_space<vmem>>, vector<1x128xf32>
    %230 = vector.broadcast %229 : vector<1x128xf32> to vector<16x128xf32>
    %231 = arith.addf %228, %230 : vector<16x128xf32>
    %cst_191 = arith.constant 0.000000e+00 : f32
    %232 = vector.broadcast %cst_191 : f32 to vector<16x128xf32>
    %233 = arith.maximumf %231, %232 : vector<16x128xf32>
    %234 = arith.truncf %233 : vector<16x128xf32> to vector<16x128xbf16>
    %c0_192 = arith.constant 0 : index
    %c4_193 = arith.constant 4 : index
    %c384_194 = arith.constant 384 : index
    %235 = vector.load %arg1[%c0_192, %c4_193, %c384_194] : memref<16x8x512xf32, #tpu.memory_space<vmem>>, vector<16x1x128xf32>
    %236 = vector.shape_cast %235 : vector<16x1x128xf32> to vector<16x128xf32>
    %237 = arith.truncf %236 : vector<16x128xf32> to vector<16x128xbf16>
    %c0_195 = arith.constant 0 : index
    %c0_196 = arith.constant 0 : index
    %238 = vector.load %arg2[%c0_195, %c0_196] : memref<128x128xbf16, #tpu.memory_space<vmem>>, vector<128x128xbf16>
    %cst_197 = arith.constant dense<0.000000e+00> : vector<16x128xf32>
    %239 = tpu.matmul %237, %238, %cst_197 {dimension_numbers = #tpu.dot_dimension_numbers<[1], [0], [0], [1], [0, 0, 1, 1], [], []>} : vector<16x128xbf16>, vector<128x128xbf16>, vector<16x128xf32> -> vector<16x128xf32>
    %c0_198 = arith.constant 0 : index
    %c0_199 = arith.constant 0 : index
    %240 = vector.load %arg3[%c0_198, %c0_199] : memref<1x128xf32, #tpu.memory_space<vmem>>, vector<1x128xf32>
    %241 = vector.broadcast %240 : vector<1x128xf32> to vector<16x128xf32>
    %242 = arith.addf %239, %241 : vector<16x128xf32>
    %cst_200 = arith.constant 0.000000e+00 : f32
    %243 = vector.broadcast %cst_200 : f32 to vector<16x128xf32>
    %244 = arith.maximumf %242, %243 : vector<16x128xf32>
    %245 = arith.truncf %244 : vector<16x128xf32> to vector<16x128xbf16>
    %246 = tpu.concatenate %212, %223, %234, %245 in 1 : vector<16x128xbf16>, vector<16x128xbf16>, vector<16x128xbf16>, vector<16x128xbf16> -> vector<16x512xbf16>
    %c4_201 = arith.constant 4 : index
    %c0_202 = arith.constant 0 : index
    %c0_203 = arith.constant 0 : index
    %247 = vector.load %arg4[%c4_201, %c0_202, %c0_203] : memref<8x512x128xbf16, #tpu.memory_space<vmem>>, vector<1x512x128xbf16>
    %248 = vector.shape_cast %247 : vector<1x512x128xbf16> to vector<512x128xbf16>
    %cst_204 = arith.constant dense<0.000000e+00> : vector<16x128xf32>
    %249 = tpu.matmul %246, %248, %cst_204 {dimension_numbers = #tpu.dot_dimension_numbers<[1], [0], [0], [1], [0, 0, 1, 1], [], []>} : vector<16x512xbf16>, vector<512x128xbf16>, vector<16x128xf32> -> vector<16x128xf32>
    %c0_205 = arith.constant 0 : index
    %c0_206 = arith.constant 0 : index
    %250 = vector.load %arg11[%c0_205, %c0_206] : memref<16x128xf32, #tpu.memory_space<vmem>>, vector<16x128xf32>
    %251 = arith.addf %250, %249 : vector<16x128xf32>
    %c0_207 = arith.constant 0 : index
    %c0_208 = arith.constant 0 : index
    %252 = vector.load %arg11[%c0_207, %c0_208] : memref<16x128xf32, #tpu.memory_space<vmem>>, vector<16x128xf32>
    tpu.vector_store %arg11[%c0_207, %c0_208], %251 {strides = array<i32>} : memref<16x128xf32, #tpu.memory_space<vmem>>, vector<16x128xf32>,
    %c0_209 = arith.constant 0 : index
    %c5 = arith.constant 5 : index
    %c0_210 = arith.constant 0 : index
    %253 = vector.load %arg1[%c0_209, %c5, %c0_210] : memref<16x8x512xf32, #tpu.memory_space<vmem>>, vector<16x1x128xf32>
    %254 = vector.shape_cast %253 : vector<16x1x128xf32> to vector<16x128xf32>
    %255 = arith.truncf %254 : vector<16x128xf32> to vector<16x128xbf16>
    %c0_211 = arith.constant 0 : index
    %c0_212 = arith.constant 0 : index
    %256 = vector.load %arg2[%c0_211, %c0_212] : memref<128x128xbf16, #tpu.memory_space<vmem>>, vector<128x128xbf16>
    %cst_213 = arith.constant dense<0.000000e+00> : vector<16x128xf32>
    %257 = tpu.matmul %255, %256, %cst_213 {dimension_numbers = #tpu.dot_dimension_numbers<[1], [0], [0], [1], [0, 0, 1, 1], [], []>} : vector<16x128xbf16>, vector<128x128xbf16>, vector<16x128xf32> -> vector<16x128xf32>
    %c0_214 = arith.constant 0 : index
    %c0_215 = arith.constant 0 : index
    %258 = vector.load %arg3[%c0_214, %c0_215] : memref<1x128xf32, #tpu.memory_space<vmem>>, vector<1x128xf32>
    %259 = vector.broadcast %258 : vector<1x128xf32> to vector<16x128xf32>
    %260 = arith.addf %257, %259 : vector<16x128xf32>
    %cst_216 = arith.constant 0.000000e+00 : f32
    %261 = vector.broadcast %cst_216 : f32 to vector<16x128xf32>
    %262 = arith.maximumf %260, %261 : vector<16x128xf32>
    %263 = arith.truncf %262 : vector<16x128xf32> to vector<16x128xbf16>
    %c0_217 = arith.constant 0 : index
    %c5_218 = arith.constant 5 : index
    %c128_219 = arith.constant 128 : index
    %264 = vector.load %arg1[%c0_217, %c5_218, %c128_219] : memref<16x8x512xf32, #tpu.memory_space<vmem>>, vector<16x1x128xf32>
    %265 = vector.shape_cast %264 : vector<16x1x128xf32> to vector<16x128xf32>
    %266 = arith.truncf %265 : vector<16x128xf32> to vector<16x128xbf16>
    %c0_220 = arith.constant 0 : index
    %c0_221 = arith.constant 0 : index
    %267 = vector.load %arg2[%c0_220, %c0_221] : memref<128x128xbf16, #tpu.memory_space<vmem>>, vector<128x128xbf16>
    %cst_222 = arith.constant dense<0.000000e+00> : vector<16x128xf32>
    %268 = tpu.matmul %266, %267, %cst_222 {dimension_numbers = #tpu.dot_dimension_numbers<[1], [0], [0], [1], [0, 0, 1, 1], [], []>} : vector<16x128xbf16>, vector<128x128xbf16>, vector<16x128xf32> -> vector<16x128xf32>
    %c0_223 = arith.constant 0 : index
    %c0_224 = arith.constant 0 : index
    %269 = vector.load %arg3[%c0_223, %c0_224] : memref<1x128xf32, #tpu.memory_space<vmem>>, vector<1x128xf32>
    %270 = vector.broadcast %269 : vector<1x128xf32> to vector<16x128xf32>
    %271 = arith.addf %268, %270 : vector<16x128xf32>
    %cst_225 = arith.constant 0.000000e+00 : f32
    %272 = vector.broadcast %cst_225 : f32 to vector<16x128xf32>
    %273 = arith.maximumf %271, %272 : vector<16x128xf32>
    %274 = arith.truncf %273 : vector<16x128xf32> to vector<16x128xbf16>
    %c0_226 = arith.constant 0 : index
    %c5_227 = arith.constant 5 : index
    %c256_228 = arith.constant 256 : index
    %275 = vector.load %arg1[%c0_226, %c5_227, %c256_228] : memref<16x8x512xf32, #tpu.memory_space<vmem>>, vector<16x1x128xf32>
    %276 = vector.shape_cast %275 : vector<16x1x128xf32> to vector<16x128xf32>
    %277 = arith.truncf %276 : vector<16x128xf32> to vector<16x128xbf16>
    %c0_229 = arith.constant 0 : index
    %c0_230 = arith.constant 0 : index
    %278 = vector.load %arg2[%c0_229, %c0_230] : memref<128x128xbf16, #tpu.memory_space<vmem>>, vector<128x128xbf16>
    %cst_231 = arith.constant dense<0.000000e+00> : vector<16x128xf32>
    %279 = tpu.matmul %277, %278, %cst_231 {dimension_numbers = #tpu.dot_dimension_numbers<[1], [0], [0], [1], [0, 0, 1, 1], [], []>} : vector<16x128xbf16>, vector<128x128xbf16>, vector<16x128xf32> -> vector<16x128xf32>
    %c0_232 = arith.constant 0 : index
    %c0_233 = arith.constant 0 : index
    %280 = vector.load %arg3[%c0_232, %c0_233] : memref<1x128xf32, #tpu.memory_space<vmem>>, vector<1x128xf32>
    %281 = vector.broadcast %280 : vector<1x128xf32> to vector<16x128xf32>
    %282 = arith.addf %279, %281 : vector<16x128xf32>
    %cst_234 = arith.constant 0.000000e+00 : f32
    %283 = vector.broadcast %cst_234 : f32 to vector<16x128xf32>
    %284 = arith.maximumf %282, %283 : vector<16x128xf32>
    %285 = arith.truncf %284 : vector<16x128xf32> to vector<16x128xbf16>
    %c0_235 = arith.constant 0 : index
    %c5_236 = arith.constant 5 : index
    %c384_237 = arith.constant 384 : index
    %286 = vector.load %arg1[%c0_235, %c5_236, %c384_237] : memref<16x8x512xf32, #tpu.memory_space<vmem>>, vector<16x1x128xf32>
    %287 = vector.shape_cast %286 : vector<16x1x128xf32> to vector<16x128xf32>
    %288 = arith.truncf %287 : vector<16x128xf32> to vector<16x128xbf16>
    %c0_238 = arith.constant 0 : index
    %c0_239 = arith.constant 0 : index
    %289 = vector.load %arg2[%c0_238, %c0_239] : memref<128x128xbf16, #tpu.memory_space<vmem>>, vector<128x128xbf16>
    %cst_240 = arith.constant dense<0.000000e+00> : vector<16x128xf32>
    %290 = tpu.matmul %288, %289, %cst_240 {dimension_numbers = #tpu.dot_dimension_numbers<[1], [0], [0], [1], [0, 0, 1, 1], [], []>} : vector<16x128xbf16>, vector<128x128xbf16>, vector<16x128xf32> -> vector<16x128xf32>
    %c0_241 = arith.constant 0 : index
    %c0_242 = arith.constant 0 : index
    %291 = vector.load %arg3[%c0_241, %c0_242] : memref<1x128xf32, #tpu.memory_space<vmem>>, vector<1x128xf32>
    %292 = vector.broadcast %291 : vector<1x128xf32> to vector<16x128xf32>
    %293 = arith.addf %290, %292 : vector<16x128xf32>
    %cst_243 = arith.constant 0.000000e+00 : f32
    %294 = vector.broadcast %cst_243 : f32 to vector<16x128xf32>
    %295 = arith.maximumf %293, %294 : vector<16x128xf32>
    %296 = arith.truncf %295 : vector<16x128xf32> to vector<16x128xbf16>
    %297 = tpu.concatenate %263, %274, %285, %296 in 1 : vector<16x128xbf16>, vector<16x128xbf16>, vector<16x128xbf16>, vector<16x128xbf16> -> vector<16x512xbf16>
    %c5_244 = arith.constant 5 : index
    %c0_245 = arith.constant 0 : index
    %c0_246 = arith.constant 0 : index
    %298 = vector.load %arg4[%c5_244, %c0_245, %c0_246] : memref<8x512x128xbf16, #tpu.memory_space<vmem>>, vector<1x512x128xbf16>
    %299 = vector.shape_cast %298 : vector<1x512x128xbf16> to vector<512x128xbf16>
    %cst_247 = arith.constant dense<0.000000e+00> : vector<16x128xf32>
    %300 = tpu.matmul %297, %299, %cst_247 {dimension_numbers = #tpu.dot_dimension_numbers<[1], [0], [0], [1], [0, 0, 1, 1], [], []>} : vector<16x512xbf16>, vector<512x128xbf16>, vector<16x128xf32> -> vector<16x128xf32>
    %c0_248 = arith.constant 0 : index
    %c0_249 = arith.constant 0 : index
    %301 = vector.load %arg11[%c0_248, %c0_249] : memref<16x128xf32, #tpu.memory_space<vmem>>, vector<16x128xf32>
    %302 = arith.addf %301, %300 : vector<16x128xf32>
    %c0_250 = arith.constant 0 : index
    %c0_251 = arith.constant 0 : index
    %303 = vector.load %arg11[%c0_250, %c0_251] : memref<16x128xf32, #tpu.memory_space<vmem>>, vector<16x128xf32>
    tpu.vector_store %arg11[%c0_250, %c0_251], %302 {strides = array<i32>} : memref<16x128xf32, #tpu.memory_space<vmem>>, vector<16x128xf32>,
    %c0_252 = arith.constant 0 : index
    %c6 = arith.constant 6 : index
    %c0_253 = arith.constant 0 : index
    %304 = vector.load %arg1[%c0_252, %c6, %c0_253] : memref<16x8x512xf32, #tpu.memory_space<vmem>>, vector<16x1x128xf32>
    %305 = vector.shape_cast %304 : vector<16x1x128xf32> to vector<16x128xf32>
    %306 = arith.truncf %305 : vector<16x128xf32> to vector<16x128xbf16>
    %c0_254 = arith.constant 0 : index
    %c0_255 = arith.constant 0 : index
    %307 = vector.load %arg2[%c0_254, %c0_255] : memref<128x128xbf16, #tpu.memory_space<vmem>>, vector<128x128xbf16>
    %cst_256 = arith.constant dense<0.000000e+00> : vector<16x128xf32>
    %308 = tpu.matmul %306, %307, %cst_256 {dimension_numbers = #tpu.dot_dimension_numbers<[1], [0], [0], [1], [0, 0, 1, 1], [], []>} : vector<16x128xbf16>, vector<128x128xbf16>, vector<16x128xf32> -> vector<16x128xf32>
    %c0_257 = arith.constant 0 : index
    %c0_258 = arith.constant 0 : index
    %309 = vector.load %arg3[%c0_257, %c0_258] : memref<1x128xf32, #tpu.memory_space<vmem>>, vector<1x128xf32>
    %310 = vector.broadcast %309 : vector<1x128xf32> to vector<16x128xf32>
    %311 = arith.addf %308, %310 : vector<16x128xf32>
    %cst_259 = arith.constant 0.000000e+00 : f32
    %312 = vector.broadcast %cst_259 : f32 to vector<16x128xf32>
    %313 = arith.maximumf %311, %312 : vector<16x128xf32>
    %314 = arith.truncf %313 : vector<16x128xf32> to vector<16x128xbf16>
    %c0_260 = arith.constant 0 : index
    %c6_261 = arith.constant 6 : index
    %c128_262 = arith.constant 128 : index
    %315 = vector.load %arg1[%c0_260, %c6_261, %c128_262] : memref<16x8x512xf32, #tpu.memory_space<vmem>>, vector<16x1x128xf32>
    %316 = vector.shape_cast %315 : vector<16x1x128xf32> to vector<16x128xf32>
    %317 = arith.truncf %316 : vector<16x128xf32> to vector<16x128xbf16>
    %c0_263 = arith.constant 0 : index
    %c0_264 = arith.constant 0 : index
    %318 = vector.load %arg2[%c0_263, %c0_264] : memref<128x128xbf16, #tpu.memory_space<vmem>>, vector<128x128xbf16>
    %cst_265 = arith.constant dense<0.000000e+00> : vector<16x128xf32>
    %319 = tpu.matmul %317, %318, %cst_265 {dimension_numbers = #tpu.dot_dimension_numbers<[1], [0], [0], [1], [0, 0, 1, 1], [], []>} : vector<16x128xbf16>, vector<128x128xbf16>, vector<16x128xf32> -> vector<16x128xf32>
    %c0_266 = arith.constant 0 : index
    %c0_267 = arith.constant 0 : index
    %320 = vector.load %arg3[%c0_266, %c0_267] : memref<1x128xf32, #tpu.memory_space<vmem>>, vector<1x128xf32>
    %321 = vector.broadcast %320 : vector<1x128xf32> to vector<16x128xf32>
    %322 = arith.addf %319, %321 : vector<16x128xf32>
    %cst_268 = arith.constant 0.000000e+00 : f32
    %323 = vector.broadcast %cst_268 : f32 to vector<16x128xf32>
    %324 = arith.maximumf %322, %323 : vector<16x128xf32>
    %325 = arith.truncf %324 : vector<16x128xf32> to vector<16x128xbf16>
    %c0_269 = arith.constant 0 : index
    %c6_270 = arith.constant 6 : index
    %c256_271 = arith.constant 256 : index
    %326 = vector.load %arg1[%c0_269, %c6_270, %c256_271] : memref<16x8x512xf32, #tpu.memory_space<vmem>>, vector<16x1x128xf32>
    %327 = vector.shape_cast %326 : vector<16x1x128xf32> to vector<16x128xf32>
    %328 = arith.truncf %327 : vector<16x128xf32> to vector<16x128xbf16>
    %c0_272 = arith.constant 0 : index
    %c0_273 = arith.constant 0 : index
    %329 = vector.load %arg2[%c0_272, %c0_273] : memref<128x128xbf16, #tpu.memory_space<vmem>>, vector<128x128xbf16>
    %cst_274 = arith.constant dense<0.000000e+00> : vector<16x128xf32>
    %330 = tpu.matmul %328, %329, %cst_274 {dimension_numbers = #tpu.dot_dimension_numbers<[1], [0], [0], [1], [0, 0, 1, 1], [], []>} : vector<16x128xbf16>, vector<128x128xbf16>, vector<16x128xf32> -> vector<16x128xf32>
    %c0_275 = arith.constant 0 : index
    %c0_276 = arith.constant 0 : index
    %331 = vector.load %arg3[%c0_275, %c0_276] : memref<1x128xf32, #tpu.memory_space<vmem>>, vector<1x128xf32>
    %332 = vector.broadcast %331 : vector<1x128xf32> to vector<16x128xf32>
    %333 = arith.addf %330, %332 : vector<16x128xf32>
    %cst_277 = arith.constant 0.000000e+00 : f32
    %334 = vector.broadcast %cst_277 : f32 to vector<16x128xf32>
    %335 = arith.maximumf %333, %334 : vector<16x128xf32>
    %336 = arith.truncf %335 : vector<16x128xf32> to vector<16x128xbf16>
    %c0_278 = arith.constant 0 : index
    %c6_279 = arith.constant 6 : index
    %c384_280 = arith.constant 384 : index
    %337 = vector.load %arg1[%c0_278, %c6_279, %c384_280] : memref<16x8x512xf32, #tpu.memory_space<vmem>>, vector<16x1x128xf32>
    %338 = vector.shape_cast %337 : vector<16x1x128xf32> to vector<16x128xf32>
    %339 = arith.truncf %338 : vector<16x128xf32> to vector<16x128xbf16>
    %c0_281 = arith.constant 0 : index
    %c0_282 = arith.constant 0 : index
    %340 = vector.load %arg2[%c0_281, %c0_282] : memref<128x128xbf16, #tpu.memory_space<vmem>>, vector<128x128xbf16>
    %cst_283 = arith.constant dense<0.000000e+00> : vector<16x128xf32>
    %341 = tpu.matmul %339, %340, %cst_283 {dimension_numbers = #tpu.dot_dimension_numbers<[1], [0], [0], [1], [0, 0, 1, 1], [], []>} : vector<16x128xbf16>, vector<128x128xbf16>, vector<16x128xf32> -> vector<16x128xf32>
    %c0_284 = arith.constant 0 : index
    %c0_285 = arith.constant 0 : index
    %342 = vector.load %arg3[%c0_284, %c0_285] : memref<1x128xf32, #tpu.memory_space<vmem>>, vector<1x128xf32>
    %343 = vector.broadcast %342 : vector<1x128xf32> to vector<16x128xf32>
    %344 = arith.addf %341, %343 : vector<16x128xf32>
    %cst_286 = arith.constant 0.000000e+00 : f32
    %345 = vector.broadcast %cst_286 : f32 to vector<16x128xf32>
    %346 = arith.maximumf %344, %345 : vector<16x128xf32>
    %347 = arith.truncf %346 : vector<16x128xf32> to vector<16x128xbf16>
    %348 = tpu.concatenate %314, %325, %336, %347 in 1 : vector<16x128xbf16>, vector<16x128xbf16>, vector<16x128xbf16>, vector<16x128xbf16> -> vector<16x512xbf16>
    %c6_287 = arith.constant 6 : index
    %c0_288 = arith.constant 0 : index
    %c0_289 = arith.constant 0 : index
    %349 = vector.load %arg4[%c6_287, %c0_288, %c0_289] : memref<8x512x128xbf16, #tpu.memory_space<vmem>>, vector<1x512x128xbf16>
    %350 = vector.shape_cast %349 : vector<1x512x128xbf16> to vector<512x128xbf16>
    %cst_290 = arith.constant dense<0.000000e+00> : vector<16x128xf32>
    %351 = tpu.matmul %348, %350, %cst_290 {dimension_numbers = #tpu.dot_dimension_numbers<[1], [0], [0], [1], [0, 0, 1, 1], [], []>} : vector<16x512xbf16>, vector<512x128xbf16>, vector<16x128xf32> -> vector<16x128xf32>
    %c0_291 = arith.constant 0 : index
    %c0_292 = arith.constant 0 : index
    %352 = vector.load %arg11[%c0_291, %c0_292] : memref<16x128xf32, #tpu.memory_space<vmem>>, vector<16x128xf32>
    %353 = arith.addf %352, %351 : vector<16x128xf32>
    %c0_293 = arith.constant 0 : index
    %c0_294 = arith.constant 0 : index
    %354 = vector.load %arg11[%c0_293, %c0_294] : memref<16x128xf32, #tpu.memory_space<vmem>>, vector<16x128xf32>
    tpu.vector_store %arg11[%c0_293, %c0_294], %353 {strides = array<i32>} : memref<16x128xf32, #tpu.memory_space<vmem>>, vector<16x128xf32>,
    %c0_295 = arith.constant 0 : index
    %c7 = arith.constant 7 : index
    %c0_296 = arith.constant 0 : index
    %355 = vector.load %arg1[%c0_295, %c7, %c0_296] : memref<16x8x512xf32, #tpu.memory_space<vmem>>, vector<16x1x128xf32>
    %356 = vector.shape_cast %355 : vector<16x1x128xf32> to vector<16x128xf32>
    %357 = arith.truncf %356 : vector<16x128xf32> to vector<16x128xbf16>
    %c0_297 = arith.constant 0 : index
    %c0_298 = arith.constant 0 : index
    %358 = vector.load %arg2[%c0_297, %c0_298] : memref<128x128xbf16, #tpu.memory_space<vmem>>, vector<128x128xbf16>
    %cst_299 = arith.constant dense<0.000000e+00> : vector<16x128xf32>
    %359 = tpu.matmul %357, %358, %cst_299 {dimension_numbers = #tpu.dot_dimension_numbers<[1], [0], [0], [1], [0, 0, 1, 1], [], []>} : vector<16x128xbf16>, vector<128x128xbf16>, vector<16x128xf32> -> vector<16x128xf32>
    %c0_300 = arith.constant 0 : index
    %c0_301 = arith.constant 0 : index
    %360 = vector.load %arg3[%c0_300, %c0_301] : memref<1x128xf32, #tpu.memory_space<vmem>>, vector<1x128xf32>
    %361 = vector.broadcast %360 : vector<1x128xf32> to vector<16x128xf32>
    %362 = arith.addf %359, %361 : vector<16x128xf32>
    %cst_302 = arith.constant 0.000000e+00 : f32
    %363 = vector.broadcast %cst_302 : f32 to vector<16x128xf32>
    %364 = arith.maximumf %362, %363 : vector<16x128xf32>
    %365 = arith.truncf %364 : vector<16x128xf32> to vector<16x128xbf16>
    %c0_303 = arith.constant 0 : index
    %c7_304 = arith.constant 7 : index
    %c128_305 = arith.constant 128 : index
    %366 = vector.load %arg1[%c0_303, %c7_304, %c128_305] : memref<16x8x512xf32, #tpu.memory_space<vmem>>, vector<16x1x128xf32>
    %367 = vector.shape_cast %366 : vector<16x1x128xf32> to vector<16x128xf32>
    %368 = arith.truncf %367 : vector<16x128xf32> to vector<16x128xbf16>
    %c0_306 = arith.constant 0 : index
    %c0_307 = arith.constant 0 : index
    %369 = vector.load %arg2[%c0_306, %c0_307] : memref<128x128xbf16, #tpu.memory_space<vmem>>, vector<128x128xbf16>
    %cst_308 = arith.constant dense<0.000000e+00> : vector<16x128xf32>
    %370 = tpu.matmul %368, %369, %cst_308 {dimension_numbers = #tpu.dot_dimension_numbers<[1], [0], [0], [1], [0, 0, 1, 1], [], []>} : vector<16x128xbf16>, vector<128x128xbf16>, vector<16x128xf32> -> vector<16x128xf32>
    %c0_309 = arith.constant 0 : index
    %c0_310 = arith.constant 0 : index
    %371 = vector.load %arg3[%c0_309, %c0_310] : memref<1x128xf32, #tpu.memory_space<vmem>>, vector<1x128xf32>
    %372 = vector.broadcast %371 : vector<1x128xf32> to vector<16x128xf32>
    %373 = arith.addf %370, %372 : vector<16x128xf32>
    %cst_311 = arith.constant 0.000000e+00 : f32
    %374 = vector.broadcast %cst_311 : f32 to vector<16x128xf32>
    %375 = arith.maximumf %373, %374 : vector<16x128xf32>
    %376 = arith.truncf %375 : vector<16x128xf32> to vector<16x128xbf16>
    %c0_312 = arith.constant 0 : index
    %c7_313 = arith.constant 7 : index
    %c256_314 = arith.constant 256 : index
    %377 = vector.load %arg1[%c0_312, %c7_313, %c256_314] : memref<16x8x512xf32, #tpu.memory_space<vmem>>, vector<16x1x128xf32>
    %378 = vector.shape_cast %377 : vector<16x1x128xf32> to vector<16x128xf32>
    %379 = arith.truncf %378 : vector<16x128xf32> to vector<16x128xbf16>
    %c0_315 = arith.constant 0 : index
    %c0_316 = arith.constant 0 : index
    %380 = vector.load %arg2[%c0_315, %c0_316] : memref<128x128xbf16, #tpu.memory_space<vmem>>, vector<128x128xbf16>
    %cst_317 = arith.constant dense<0.000000e+00> : vector<16x128xf32>
    %381 = tpu.matmul %379, %380, %cst_317 {dimension_numbers = #tpu.dot_dimension_numbers<[1], [0], [0], [1], [0, 0, 1, 1], [], []>} : vector<16x128xbf16>, vector<128x128xbf16>, vector<16x128xf32> -> vector<16x128xf32>
    %c0_318 = arith.constant 0 : index
    %c0_319 = arith.constant 0 : index
    %382 = vector.load %arg3[%c0_318, %c0_319] : memref<1x128xf32, #tpu.memory_space<vmem>>, vector<1x128xf32>
    %383 = vector.broadcast %382 : vector<1x128xf32> to vector<16x128xf32>
    %384 = arith.addf %381, %383 : vector<16x128xf32>
    %cst_320 = arith.constant 0.000000e+00 : f32
    %385 = vector.broadcast %cst_320 : f32 to vector<16x128xf32>
    %386 = arith.maximumf %384, %385 : vector<16x128xf32>
    %387 = arith.truncf %386 : vector<16x128xf32> to vector<16x128xbf16>
    %c0_321 = arith.constant 0 : index
    %c7_322 = arith.constant 7 : index
    %c384_323 = arith.constant 384 : index
    %388 = vector.load %arg1[%c0_321, %c7_322, %c384_323] : memref<16x8x512xf32, #tpu.memory_space<vmem>>, vector<16x1x128xf32>
    %389 = vector.shape_cast %388 : vector<16x1x128xf32> to vector<16x128xf32>
    %390 = arith.truncf %389 : vector<16x128xf32> to vector<16x128xbf16>
    %c0_324 = arith.constant 0 : index
    %c0_325 = arith.constant 0 : index
    %391 = vector.load %arg2[%c0_324, %c0_325] : memref<128x128xbf16, #tpu.memory_space<vmem>>, vector<128x128xbf16>
    %cst_326 = arith.constant dense<0.000000e+00> : vector<16x128xf32>
    %392 = tpu.matmul %390, %391, %cst_326 {dimension_numbers = #tpu.dot_dimension_numbers<[1], [0], [0], [1], [0, 0, 1, 1], [], []>} : vector<16x128xbf16>, vector<128x128xbf16>, vector<16x128xf32> -> vector<16x128xf32>
    %c0_327 = arith.constant 0 : index
    %c0_328 = arith.constant 0 : index
    %393 = vector.load %arg3[%c0_327, %c0_328] : memref<1x128xf32, #tpu.memory_space<vmem>>, vector<1x128xf32>
    %394 = vector.broadcast %393 : vector<1x128xf32> to vector<16x128xf32>
    %395 = arith.addf %392, %394 : vector<16x128xf32>
    %cst_329 = arith.constant 0.000000e+00 : f32
    %396 = vector.broadcast %cst_329 : f32 to vector<16x128xf32>
    %397 = arith.maximumf %395, %396 : vector<16x128xf32>
    %398 = arith.truncf %397 : vector<16x128xf32> to vector<16x128xbf16>
    %399 = tpu.concatenate %365, %376, %387, %398 in 1 : vector<16x128xbf16>, vector<16x128xbf16>, vector<16x128xbf16>, vector<16x128xbf16> -> vector<16x512xbf16>
    %c7_330 = arith.constant 7 : index
    %c0_331 = arith.constant 0 : index
    %c0_332 = arith.constant 0 : index
    %400 = vector.load %arg4[%c7_330, %c0_331, %c0_332] : memref<8x512x128xbf16, #tpu.memory_space<vmem>>, vector<1x512x128xbf16>
    %401 = vector.shape_cast %400 : vector<1x512x128xbf16> to vector<512x128xbf16>
    %cst_333 = arith.constant dense<0.000000e+00> : vector<16x128xf32>
    %402 = tpu.matmul %399, %401, %cst_333 {dimension_numbers = #tpu.dot_dimension_numbers<[1], [0], [0], [1], [0, 0, 1, 1], [], []>} : vector<16x512xbf16>, vector<512x128xbf16>, vector<16x128xf32> -> vector<16x128xf32>
    %c0_334 = arith.constant 0 : index
    %c0_335 = arith.constant 0 : index
    %403 = vector.load %arg11[%c0_334, %c0_335] : memref<16x128xf32, #tpu.memory_space<vmem>>, vector<16x128xf32>
    %404 = arith.addf %403, %402 : vector<16x128xf32>
    %c0_336 = arith.constant 0 : index
    %c0_337 = arith.constant 0 : index
    %405 = vector.load %arg11[%c0_336, %c0_337] : memref<16x128xf32, #tpu.memory_space<vmem>>, vector<16x128xf32>
    tpu.vector_store %arg11[%c0_336, %c0_337], %404 {strides = array<i32>} : memref<16x128xf32, #tpu.memory_space<vmem>>, vector<16x128xf32>,
    %c0_338 = arith.constant 0 : index
    %c0_339 = arith.constant 0 : index
    %406 = vector.load %arg11[%c0_338, %c0_339] : memref<16x128xf32, #tpu.memory_space<vmem>>, vector<16x128xf32>
    %c0_340 = arith.constant 0 : index
    %c0_341 = arith.constant 0 : index
    %407 = vector.load %arg5[%c0_340, %c0_341] : memref<1x128xf32, #tpu.memory_space<vmem>>, vector<1x128xf32>
    %408 = vector.broadcast %407 : vector<1x128xf32> to vector<16x128xf32>
    %409 = arith.addf %406, %408 : vector<16x128xf32>
    %cst_342 = arith.constant 0.000000e+00 : f32
    %410 = vector.broadcast %cst_342 : f32 to vector<16x128xf32>
    %411 = arith.maximumf %409, %410 : vector<16x128xf32>
    %412 = arith.truncf %411 : vector<16x128xf32> to vector<16x128xbf16>
    %c0_343 = arith.constant 0 : index
    %c0_344 = arith.constant 0 : index
    %413 = vector.load %arg6[%c0_343, %c0_344] : memref<128x96xbf16, #tpu.memory_space<vmem>>, vector<128x96xbf16>
    %cst_345 = arith.constant dense<0.000000e+00> : vector<16x96xf32>
    %414 = tpu.matmul %412, %413, %cst_345 {dimension_numbers = #tpu.dot_dimension_numbers<[1], [0], [0], [1], [0, 0, 1, 1], [], []>} : vector<16x128xbf16>, vector<128x96xbf16>, vector<16x96xf32> -> vector<16x96xf32>
    %c0_346 = arith.constant 0 : index
    %c0_347 = arith.constant 0 : index
    %415 = vector.load %arg7[%c0_346, %c0_347] : memref<1x96xf32, #tpu.memory_space<vmem>>, vector<1x96xf32>
    %416 = vector.broadcast %415 : vector<1x96xf32> to vector<16x96xf32>
    %417 = arith.addf %414, %416 : vector<16x96xf32>
    %cst_348 = arith.constant 0.000000e+00 : f32
    %418 = vector.broadcast %cst_348 : f32 to vector<16x96xf32>
    %419 = arith.maximumf %417, %418 : vector<16x96xf32>
    %420 = arith.truncf %419 : vector<16x96xf32> to vector<16x96xbf16>
    %c0_349 = arith.constant 0 : index
    %c0_350 = arith.constant 0 : index
    %421 = vector.load %arg8[%c0_349, %c0_350] : memref<96x64xbf16, #tpu.memory_space<vmem>>, vector<96x64xbf16>
    %cst_351 = arith.constant dense<0.000000e+00> : vector<16x64xf32>
    %422 = tpu.matmul %420, %421, %cst_351 {dimension_numbers = #tpu.dot_dimension_numbers<[1], [0], [0], [1], [0, 0, 1, 1], [], []>} : vector<16x96xbf16>, vector<96x64xbf16>, vector<16x64xf32> -> vector<16x64xf32>
    %c0_352 = arith.constant 0 : index
    %c0_353 = arith.constant 0 : index
    %423 = vector.load %arg9[%c0_352, %c0_353] : memref<1x64xf32, #tpu.memory_space<vmem>>, vector<1x64xf32>
    %424 = vector.broadcast %423 : vector<1x64xf32> to vector<16x64xf32>
    %425 = arith.addf %422, %424 : vector<16x64xf32>
    %cst_354 = arith.constant 0.000000e+00 : f32
    %426 = vector.broadcast %cst_354 : f32 to vector<16x64xf32>
    %427 = arith.maximumf %425, %426 : vector<16x64xf32>
    %c0_355 = arith.constant 0 : index
    %c0_356 = arith.constant 0 : index
    %428 = vector.load %arg10[%c0_355, %c0_356] : memref<16x64xf32, #tpu.memory_space<vmem>>, vector<16x64xf32>
    tpu.vector_store %arg10[%c0_355, %c0_356], %427 {strides = array<i32>} : memref<16x64xf32, #tpu.memory_space<vmem>>, vector<16x64xf32>,
    return
  }
  func.func @transform_0(%arg0: i32) -> (i32, i32, i32) {
    %c0_i32 = arith.constant 0 : i32
    %c0_i32_0 = arith.constant 0 : i32
    %c0_i32_1 = arith.constant 0 : i32
    return %arg0, %c0_i32, %c0_i32_0 : i32, i32, i32
  }
  func.func @transform_1(%arg0: i32) -> (i32, i32) {
    %c0_i32 = arith.constant 0 : i32
    %c0_i32_0 = arith.constant 0 : i32
    %c0_i32_1 = arith.constant 0 : i32
    return %c0_i32, %c0_i32_0 : i32, i32
  }
  func.func @transform_2(%arg0: i32) -> (i32, i32) {
    %c0_i32 = arith.constant 0 : i32
    %c0_i32_0 = arith.constant 0 : i32
    %c0_i32_1 = arith.constant 0 : i32
    return %c0_i32, %c0_i32_0 : i32, i32
  }
  func.func @transform_3(%arg0: i32) -> (i32, i32, i32) {
    %c0_i32 = arith.constant 0 : i32
    %c0_i32_0 = arith.constant 0 : i32
    %c0_i32_1 = arith.constant 0 : i32
    %c0_i32_2 = arith.constant 0 : i32
    return %c0_i32, %c0_i32_0, %c0_i32_1 : i32, i32, i32
  }
  func.func @transform_4(%arg0: i32) -> (i32, i32) {
    %c0_i32 = arith.constant 0 : i32
    %c0_i32_0 = arith.constant 0 : i32
    %c0_i32_1 = arith.constant 0 : i32
    return %c0_i32, %c0_i32_0 : i32, i32
  }
  func.func @transform_5(%arg0: i32) -> (i32, i32) {
    %c0_i32 = arith.constant 0 : i32
    %c0_i32_0 = arith.constant 0 : i32
    %c0_i32_1 = arith.constant 0 : i32
    return %c0_i32, %c0_i32_0 : i32, i32
  }
  func.func @transform_6(%arg0: i32) -> (i32, i32) {
    %c0_i32 = arith.constant 0 : i32
    %c0_i32_0 = arith.constant 0 : i32
    %c0_i32_1 = arith.constant 0 : i32
    return %c0_i32, %c0_i32_0 : i32, i32
  }
  func.func @transform_7(%arg0: i32) -> (i32, i32) {
    %c0_i32 = arith.constant 0 : i32
    %c0_i32_0 = arith.constant 0 : i32
    %c0_i32_1 = arith.constant 0 : i32
    return %c0_i32, %c0_i32_0 : i32, i32
  }
  func.func @transform_8(%arg0: i32) -> (i32, i32) {
    %c0_i32 = arith.constant 0 : i32
    %c0_i32_0 = arith.constant 0 : i32
    %c0_i32_1 = arith.constant 0 : i32
    return %c0_i32, %c0_i32_0 : i32, i32
  }
  func.func @transform_9(%arg0: i32) -> (i32, i32) {
    %c0_i32 = arith.constant 0 : i32
    %c0_i32_0 = arith.constant 0 : i32
    return %arg0, %c0_i32 : i32, i32
  }
}

</mosaic_0001>

<bundles_post_ra>
// kernel: tpu_custom_call.1
= control target key start
LH: loop header
LB: loop body
LE: loop exit
PB: predicated region body
PF: predicated region fallthrough
CT: control target
= control target key end

     0   :  { %s12647_s0 = inlined_call_operand.hbm [shape: f32[24,8,512], index: 0, kind: input, shape index: {}]   ;;  %s12648_s1 = inlined_call_operand.vmem [shape: bf16[128,128], index: 1, kind: input, shape index: {}]   ;;  %s12649_s2 = inlined_call_operand.vmem [shape: f32[1,128], index: 2, kind: input, shape index: {}]   ;;  %s12650_s3 = inlined_call_operand.hbm [shape: bf16[8,512,128], index: 3, kind: input, shape index: {}]   ;;  %s12651_s4 = inlined_call_operand.vmem [shape: f32[1,128], index: 4, kind: input, shape index: {}]   ;;  %s12652_s5 = inlined_call_operand.vmem [shape: bf16[128,96], index: 5, kind: input, shape index: {}]   ;;  %s12653_s6 = inlined_call_operand.vmem [shape: f32[1,96], index: 6, kind: input, shape index: {}]   ;;  %s12654_s7 = inlined_call_operand.vmem [shape: bf16[96,64], index: 7, kind: input, shape index: {}]   ;;  %s12655_s8 = inlined_call_operand.vmem [shape: f32[1,64], index: 8, kind: input, shape index: {}]   ;;  %s12656_s9 = inlined_call_operand.hbm [shape: f32[24,64], index: 9, kind: output, shape index: {}]  }
   0x1   :  { %12661 = sst [smem:[#allocation14_spill]] %s12650_s3 }
   0x2   :  { %14 = vsyncpa [#allocation4], 0 }
   0x3   :  { %16 = vsyncpa [#allocation4 + $0x1], 0 }
   0x4   :  { %17 = vsyncpa [#allocation7], 0 }
   0x5   :  { %18 = vsyncpa [#allocation5], 0 }
   0x6   :  { %20 = vsyncpa [#allocation5 + $0x1], 0  ;;  %s10310_s30 = smov 0   ;;  %s10312_s10 = smov 0  }
   0x7   :  { %s10314_s11 = smov 0   ;;  %s10316_s12 = smov 0  }
   0x8 LB: > { %12662 = sst [smem:[#allocation12_spill]] %s10243_s11  ;;  %s10331_s13 = sadd.s32 4294967295, %s10247_s12   ;;  %s10247_s12 = sphi %s10316_s12, %s12682_s12   ;;  %s10243_s11 = sphi %s10314_s11, %s12679_s11   ;;  %s10239_s10 = sphi %s10312_s10, %s12681_s10   ;;  %s10235_s30 = sphi %s10310_s30, %s12680_s30  }
   0x9   : > { %s8021_s14 = sadd.s32 4294967294, %s10247_s12   ;;  %s10335_s15 = sadd.s32 1, %s10247_s12  }
   0xa   : > { %s33_s16 = sadd.s32 1, %s10243_s11  ;;  %s30_s17 = ssub.s32 %s10247_s12, %s10335_s15 }
   0xb   : > { %p40_p0 = scmp.ne.s32.totalorder %s10243_s11, %s10239_s10  ;;  %p31_p1 = scmp.eq.s32.totalorder %s30_s17, 0 }
   0xc   : > { %p41_p2 = scmp.eq.s32.totalorder %s10247_s12, 0  ;;  %p46_p3 = scmp.ne.s32.totalorder %s10239_s10, %s10235_s30 }
   0xd   : > { %p12657_p4 = scmp.eq.s32.totalorder %s10331_s13, 0  ;;  %p238_p7 = scmp.eq.s32.totalorder %s10331_s13, 1 }
   0xe   : > { %s10347_s18 = scalar_select %p31_p1, %s10243_s11, %s33_s16  }
   0xf   : > { %p10349_p5 = por %p41_p2, %p40_p0  ;;  %p10355_p6 = por %p12657_p4, %p46_p3 }
  0x10   : > { %12663 = sst [smem:[#allocation13_spill]] %s10347_s18  ;;  %p244_p8 = scmp.eq.s32.totalorder %s8021_s14, 1 }
  0x11   : > { %s12664_s19 = scalar_select %p10349_p5, 1, 0 }
  0x12   : > { %s12665_s20 = scalar_select %p10355_p6, 1, 0 }
  0x13   : > { %p8022_p9 = scmp.ge.s32.totalorder %s10247_s12, 1  ;;  %p251_p10 = scmp.lt.s32.totalorder %s10247_s12, 3 }
  0x14   : > { %p10362_p11 = por %p238_p7, %p40_p0  ;;  %p10366_p12 = por %p244_p8, %p46_p3 }
  0x15   : > { %p10370_p13 = pnand %p8022_p9, %p251_p10  ;;  %s10249_s24 = smov [#allocation6]  }
  0x16   : > { %s12666_s21 = scalar_select %p10362_p11, 1, 0 }
  0x17   : > { %s12667_s22 = scalar_select %p10366_p12, 1, 0 }
  0x18   : > { %s12668_s23 = scalar_select %p10370_p13, 1, 0 }
  0x19   : > { %p9735_p1 = pneg %p10370_p13  ;;  %s269_s25 = sshll.u32 %s10249_s24, 4  ;;  %s270_s25 = int_to_ptr.vmem [resolvable:$true] %s269_s25 }
  0x1a   : > { %s12670_s3 = sld [smem:[#allocation14_spill]] }
  0x1b   : > { %p10378_p2 = pnand %p9735_p1, %p12657_p4 }
  0x1d   : > { %p10123_p3 = pneg %p10378_p2 }
  0x20   : > { %s10121_s29 = scalar_lea.hbm %s12670_s3, 32768 }
  0x21   : > { %p10122_p0 = scmp.ne.s32.totalorder %s12670_s3, %s10121_s29  ;;  %p10128_p9 = scmp.lt.u32.totalorder %s10121_s29, %s12670_s3 }
  0x23   : > { %p10124_p7 = pnand %p10123_p3, %p10122_p0 }
  0x25   : > { %p10125_p8 = pneg %p10124_p7 }
  0x27   : > { %p10130_p10 = pnand %p10128_p9, %p10125_p8 }
  0x29   : > { %10133 = shalt.err (!%p10130_p10)
}
  0x2a   : > { %s10134_s18 = scalar_lea.vmem %s270_s25, 32768  ;;  %p10142_p11 = scmp.lt.s32.totalorder %s270_s25, %s270_s25 }
  0x2b   : > { %p10135_p1 = scmp.ne.s32.totalorder %s270_s25, %s10134_s18  ;;  %p10143_p6 = scmp.lt.s32.totalorder %s10134_s18, %s10134_s18 }
  0x2d   : > { %p10137_p4 = pnand %p10135_p1, %p10123_p3  ;;  %p10144_p13 = por %p10143_p6, %p10142_p11 }
  0x2f   : > { %p10138_p12 = pneg %p10137_p4 }
  0x31   : > { %p10145_p5 = pnand %p10144_p13, %p10138_p12 }
  0x33   : > { %10148 = shalt.err (!%p10145_p5)
}
  0x34   : > { %s10250_s27 = smov 64   ;;  %s10251_s28 = smov 4  }
  0x35   : > { %9738 = dma.hbm_to_vmem [thread:$0]  (!%p10378_p2), %s12670_s3, 32768, %s270_s25, [#allocation7], %s10250_s27, %s10250_s27, %s10251_s28  }
  0x36   : > { %p8024_p0 = scmp.ge.s32.totalorder %s10247_s12, 2 }
  0x37   : > { %p12671_p4 = scmp.ne.s32.totalorder (!%p8024_p0), %s12664_s19, 0 }
  0x38   : > { %294 = sbr.rel (%p8024_p0) target bundleno = 98 (0x62), region = 48 }
  0x3f   : > { %297 = sbr.rel (!%p12671_p4) target bundleno = 98 (0x62), region = 52  ;;  %s298_s18 = sand.u32 (%p12671_p4), 1, %s10243_s11  }
  0x40   : > { %s8026_s29 = sshll.u32 (%p12671_p4), %s10247_s12, 4  ;;  %s8025_s17 = sshll.u32 (%p12671_p4), %s298_s18, 9 }
  0x41   : > { %s304_s24 = ssub.s32 (%p12671_p4), 24, %s8026_s29  ;;  %s10408_s27 = scalar_lea.sflag (%p12671_p4), [#allocation4], %s298_s18 }
  0x42   : > { %p305_p5 = scmp.lt.s32.totalorder (%p12671_p4), %s304_s24, 16  ;;  %s302_s28 = scalar_lea.vmem (%p12671_p4), [#allocation3], %s8025_s17 }
  0x46   : > { %s12684_s24 = smov (!%p305_p5, %s304_s24), 16 }
  0x47   : > { %s10405_s26 = sshll.u32 %s12684_s24, 9 }
  0x48   : > { %s310_s25 = ssub.s32 8192, %s10405_s26 }
  0x49   : > { %311 = vsyncadd %s10408_s27, %s310_s25  ;;  %p8029_p6 = scmp.ne.s32.totalorder %s10405_s26, 0  ;;  %s8395_s19 = sshll.u32 %s10247_s12, 13 }
  0x4a   : > { %s10416_s29 = scalar_lea.hbm %s12647_s0, %s8395_s19  ;;  %s317_s18 = sshll.u32 %s302_s28, 4  ;;  %s10418_s18 = int_to_ptr.vmem [resolvable:$true] %s317_s18 }
  0x4b   : > { %s10149_s17 = scalar_lea.hbm %s10416_s29, %s10405_s26  ;;  %s10153_s3 = scalar_lea.hbm %s12647_s0, 12288 }
  0x4c   : > { %p10150_p11 = scmp.ne.s32.totalorder %s10416_s29, %s10149_s17  ;;  %p10154_p2 = scmp.lt.u32.totalorder %s10416_s29, %s12647_s0 }
  0x4d   : > { %p10155_p3 = scmp.lt.u32.totalorder %s10153_s3, %s10149_s17  ;;  %p10157_p8 = scmp.lt.u32.totalorder %s10149_s17, %s10416_s29 }
  0x4e   : > { %p10151_p12 = pnand %p10150_p11, %p8029_p6 }
  0x4f   : > { %p10156_p7 = por %p10155_p3, %p10154_p2 }
  0x50   : > { %p10152_p13 = pneg %p10151_p12 }
  0x51   : > { %p10158_p9 = por %p10157_p8, %p10156_p7 }
  0x53   : > { %p10159_p10 = pnand %p10158_p9, %p10152_p13 }
  0x55   : > { %10162 = shalt.err (!%p10159_p10)
}
  0x56   : > { %s10163_s28 = scalar_lea.vmem %s10418_s18, %s10405_s26  ;;  %s10252_s19 = smov [#allocation3]  }
  0x57   : > { %p10164_p1 = scmp.ne.s32.totalorder %s10418_s18, %s10163_s28  ;;  %s10167_s16 = sshll.u32 %s10252_s19, 4  ;;  %s10168_s16 = int_to_ptr.vmem [resolvable:$false] %s10167_s16 }
  0x58   : > { %s10169_s11 = scalar_lea.vmem %s10168_s16, 16384  ;;  %p10170_p11 = scmp.lt.s32.totalorder %s10418_s18, %s10168_s16 }
  0x59   : > { %p10165_p4 = pnand %p10164_p1, %p8029_p6  ;;  %p10171_p12 = scmp.lt.s32.totalorder %s10169_s11, %s10163_s28 }
  0x5b   : > { %p10166_p5 = pneg %p10165_p4  ;;  %p10172_p2 = por %p10171_p12, %p10170_p11 }
  0x5d   : > { %p10173_p3 = pnand %p10172_p2, %p10166_p5 }
  0x5f   : > { %10176 = shalt.err (!%p10173_p3)
}
  0x60   : > { %s10253_s3 = smov 512   ;;  %s10254_s17 = smov 32  }
  0x61   : > { %323 = dma.hbm_to_vmem [thread:$0]  (%p8029_p6), %s10416_s29, %s10405_s26, %s10418_s18, %s10408_s27, %s10253_s3, %s10253_s3, %s10254_s17  }
  0x62 PF: > { %p12672_p13 = scmp.ne.s32.totalorder %s12668_s23, 0 }
  0x63   : > { %s10448_s24 = sand.u32 (!%p12672_p13), 1, %s10239_s10   ;;  %p12673_p7 = scmp.ne.s32.totalorder (!%p12672_p13), %s12665_s20, 0 }
  0x64   : > { %329 = sbr.rel (%p12672_p13) target bundleno = 3088 (0xc10), region = 56  ;;  %s8035_s25 = sshll.u32 (!%p12672_p13), %s10448_s24, 9 }
  0x65   : > { %s332_s14 = scalar_lea.sflag (!%p12672_p13), [#allocation4], %s10448_s24  ;;  %s10452_s28 = scalar_lea.vmem (!%p12672_p13), [#allocation3], %s8035_s25 }
  0x6b   : > { %10222 = dma.done.wait (%p12673_p7), %s332_s14, 8192  }
  0x6c   : > { %10224 = vsyncadd (%p12673_p7), %s332_s14, 4294959104  ;;  %p12674_p6 = scmp.eq.s32.totalorder %s10331_s13, 0 }
  0x6e   : > { %10226 = dma.done.wait (%p12674_p6), [#allocation7], 32768   ;;  %p12675_p8 = pmov %p12674_p6 }
  0x6f   : > { %v10255_v0 = vmov 0.0   ;;  %vm10256_vm0 = vmmov 0   ;;  %v10471_v1 = vld [vmem:[%s12648_s1] sm:$0xff]   ;;  %v10478_v2 = vld [vmem:[%s12648_s1 + $0x8] sm:$0xff]   ;;  %v10487_v3 = vld [vmem:[%s12648_s1 + $0x10] sm:$0xff]   ;;  %vm473_vm1 = vcmask 1041409  }
  0x70   : > { %10228 = vsyncadd (%p12675_p8), [#allocation7], 4294934528  ;;  %9053 = vmatprep.subr.bf16.mxu0 %v10255_v0  ;;  %9073 = vmatprep.subr.bf16.mxu1 %v10255_v0  ;;  %vm475_vm2 = vcmask 1042434   ;;  %v10494_v4 = vld [vmem:[%s12648_s1 + $0x18] sm:$0xff]   ;;  %v386_v5 = vld [vmem:[%s10452_s28] ss:$0 sm:$0xff] }
  0x71   : > { %9069 = vmatprep.mubr.msk.bf16.mxu0 %vm10256_vm0, %v10255_v0  ;;  %9089 = vmatprep.mubr.msk.bf16.mxu1 %vm10256_vm0, %v10255_v0  ;;  %v387_v6 = vld [vmem:[%s10452_s28 + $0x20] ss:$0 sm:$0xff]  ;;  %vm477_vm3 = vcmask 1043459   ;;  %v402_v11 = vpack.c.bf16 %v386_v5, %v386_v5  ;;  %vm479_vm4 = vcmask 1044484   ;;  %vm481_vm5 = vcmask 1045509   ;;  %v10537_v52 = vld [vmem:[%s12648_s1 + $0x28] sm:$0xff]  }
  0x72   : > { %9054 = vmatpush3.bf16.msra.mxu0 %v10471_v1  ;;  %9074 = vmatpush3.bf16.msra.mxu1 %v10471_v1  ;;  %v388_v7 = vld [vmem:[%s10452_s28 + $0x40] ss:$0 sm:$0xff]  ;;  %v403_v12 = vpack.c.bf16 %v387_v6, %v387_v6  ;;  %vm483_vm6 = vcmask 1046534   ;;  %v588_v51 = vld [vmem:[%s10452_s28 + $0x8] ss:$0 sm:$0xff]  ;;  %vm485_vm7 = vcmask 1047559  }
  0x73   : > { %9055 = vmatprep.subr.bf16.mxu0 %v10255_v0  ;;  %9075 = vmatprep.subr.bf16.mxu1 %v10255_v0  ;;  %v389_v8 = vld [vmem:[%s10452_s28 + $0x60] ss:$0 sm:$0xff]  ;;  %v404_v16 = vpack.c.bf16 %v388_v7, %v388_v7  ;;  %v457_v32 = vunpack.c.l.b16 %v402_v11  ;;  %v589_v57 = vld [vmem:[%s10452_s28 + $0x28] ss:$0 sm:$0xff]  ;;  %vm7868_vm8 = vcmask 785408   ;;  %s8037_s19 = sshll.u32 %s10448_s24, 4 }
  0x74   : > { %v390_v9 = vld [vmem:[%s10452_s28 + $0x80] ss:$0 sm:$0xff]  ;;  %v405_v20 = vpack.c.bf16 %v389_v8, %v389_v8  ;;  %v458_v33 = vunpack.c.l.b16 %v403_v12  ;;  %v590_v58 = vld [vmem:[%s10452_s28 + $0x48] ss:$0 sm:$0xff]  ;;  %vm7915_vm9 = vcmask 523264   ;;  %s373_s16 = scalar_lea.vmem [#allocation8], %s8037_s19 }
  0x75   : > { %v391_v10 = vld [vmem:[%s10452_s28 + $0xa0] ss:$0 sm:$0xff]  ;;  %v406_v21 = vpack.c.bf16 %v390_v9, %v390_v9  ;;  %v459_v37 = vunpack.c.l.b16 %v404_v16  ;;  %v591_v62 = vld [vmem:[%s10452_s28 + $0x68] ss:$0 sm:$0xff]  ;;  %v605_v16 = vpack.c.bf16 %v589_v57, %v589_v57  ;;  %s7919_s11 = scalar_lea.sflag [#allocation5], %s10448_s24  ;;  %p12676_p9 = scmp.ne.s32.totalorder %s12666_s21, 0 }
  0x76   : > { %9056 = vmatpush3.bf16.msra.mxu0 %v10478_v2  ;;  %9076 = vmatpush3.bf16.msra.mxu1 %v10478_v2  ;;  %v392_v13 = vld [vmem:[%s10452_s28 + $0xc0] ss:$0 sm:$0xff]  ;;  %v407_v26 = vpack.c.bf16 %v391_v10, %v391_v10  ;;  %v460_v40 = vunpack.c.l.b16 %v405_v20  ;;  %v474_v49 = vsel %vm473_vm1, %v458_v33, %v457_v32  ;;  %v592_v63 = vld [vmem:[%s10452_s28 + $0x88] ss:$0 sm:$0xff]  ;;  %v604_v10 = vpack.c.bf16 %v588_v51, %v588_v51  ;;  %s8385_s3 = sshll.u32 (%p12676_p9), %s10331_s13, 1 }
  0x77   : > { %9057 = vmatprep.subr.bf16.mxu0 %v10255_v0  ;;  %9077 = vmatprep.subr.bf16.mxu1 %v10255_v0  ;;  %v10506_v14 = vld [vmem:[%s10452_s28 + $0xe0] ss:$0 sm:$0xff]  ;;  %v408_v35 = vpack.c.bf16 %v392_v13, %v392_v13  ;;  %v461_v43 = vunpack.c.l.b16 %v406_v21  ;;  %v476_v55 = vsel %vm475_vm2, %v459_v37, %v474_v49  ;;  %v593_v8 = vld [vmem:[%s10452_s28 + $0xa8] ss:$0 sm:$0xff]  ;;  %s7927_s17 = ssub.s32 (%p12676_p9), 3, %s8385_s3 }
  0x78   : > { %v394_v15 = vld [vmem:[%s10452_s28 + $0x100] ss:$0 sm:$0xff]  ;;  %v409_v36 = vpack.c.bf16 %v10506_v14, %v10506_v14  ;;  %v462_v47 = vunpack.c.l.b16 %v407_v26  ;;  %v478_v60 = vsel %vm477_vm3, %v460_v40, %v476_v55  ;;  %v594_v9 = vld [vmem:[%s10452_s28 + $0xc8] ss:$0 sm:$0xff]  ;;  %v637_v40 = vunpack.c.l.b16 %v605_v16  ;;  %v712_v55 = vld [vmem:[%s10452_s28 + $0x10] ss:$0 sm:$0xff] }
  0x79   : > { %v395_v17 = vld [vmem:[%s10452_s28 + $0x120] ss:$0 sm:$0xff]  ;;  %v410_v22 = vpack.c.bf16 %v394_v15, %v394_v15  ;;  %v463_v54 = vunpack.c.l.b16 %v408_v35  ;;  %v480_v6 = vsel %vm479_vm4, %v461_v43, %v478_v60  ;;  %v596_v13 = vld [vmem:[%s10452_s28 + $0x108] ss:$0 sm:$0xff]  ;;  %v713_v60 = vld [vmem:[%s10452_s28 + $0x30] ss:$0 sm:$0xff] }
  0x7a   : > { %9058 = vmatpush3.bf16.msra.mxu0 %v10487_v3  ;;  %9078 = vmatpush3.bf16.msra.mxu1 %v10487_v3  ;;  %v396_v18 = vld [vmem:[%s10452_s28 + $0x140] ss:$0 sm:$0xff]  ;;  %v411_v27 = vpack.c.bf16 %v395_v17, %v395_v17  ;;  %v464_v5 = vunpack.c.l.b16 %v409_v36  ;;  %v482_v11 = vsel %vm481_vm5, %v462_v47, %v480_v6  ;;  %v597_v14 = vld [vmem:[%s10452_s28 + $0x128] ss:$0 sm:$0xff]  ;;  %v606_v17 = vpack.c.bf16 %v590_v58, %v590_v58  ;;  %v714_v6 = vld [vmem:[%s10452_s28 + $0x50] ss:$0 sm:$0xff] }
  0x7b   : > { %9059 = vmatprep.subr.bf16.mxu0 %v10255_v0  ;;  %9079 = vmatprep.subr.bf16.mxu1 %v10255_v0  ;;  %v397_v19 = vld [vmem:[%s10452_s28 + $0x160] ss:$0 sm:$0xff]  ;;  %v412_v28 = vpack.c.bf16 %v396_v18, %v396_v18  ;;  %v465_v41 = vunpack.c.l.b16 %v410_v22  ;;  %v598_v15 = vld [vmem:[%s10452_s28 + $0x148] ss:$0 sm:$0xff]  ;;  %v10563_v18 = vld [vmem:[%s12648_s1 + $0x30] sm:$0xff]   ;;  %v484_v20 = vsel %vm483_vm6, %v463_v54, %v482_v11  ;;  %v612_v32 = vpack.c.bf16 %v596_v13, %v596_v13  ;;  %p7928_p10 = scmp.lt.s32.totalorder (%p12676_p9), %s7927_s17, 2 }
  0x7c   : > { %v398_v23 = vld [vmem:[%s10452_s28 + $0x180] ss:$0 sm:$0xff]  ;;  %v413_v29 = vpack.c.bf16 %v397_v19, %v397_v19  ;;  %v466_v42 = vunpack.c.l.b16 %v411_v27  ;;  %v599_v21 = vld [vmem:[%s10452_s28 + $0x168] ss:$0 sm:$0xff]  ;;  %v613_v33 = vpack.c.bf16 %v597_v14, %v597_v14  ;;  %v614_v35 = vpack.c.bf16 %v598_v15, %v598_v15  ;;  %v721_v16 = vld [vmem:[%s10452_s28 + $0x130] ss:$0 sm:$0xff] }
  0x7d   : > { %v399_v24 = vld [vmem:[%s10452_s28 + $0x1a0] ss:$0 sm:$0xff]  ;;  %v414_v30 = vpack.c.bf16 %v398_v23, %v398_v23  ;;  %v467_v44 = vunpack.c.l.b16 %v412_v28  ;;  %v600_v22 = vld [vmem:[%s10452_s28 + $0x188] ss:$0 sm:$0xff]  ;;  %v607_v23 = vpack.c.bf16 %v591_v62, %v591_v62  ;;  %v609_v28 = vpack.c.bf16 %v593_v8, %v593_v8 }
  0x7e   : > { %v400_v25 = vld [vmem:[%s10452_s28 + $0x1c0] ss:$0 sm:$0xff]  ;;  %v415_v31 = vpack.c.bf16 %v399_v24, %v399_v24  ;;  %9060 = vmatpush3.bf16.msra.mxu0 %v10494_v4  ;;  %9080 = vmatpush3.bf16.msra.mxu1 %v10494_v4  ;;  %v468_v45 = vunpack.c.l.b16 %v413_v29  ;;  %v487_v50 = vsel %vm473_vm1, %v466_v42, %v465_v41  ;;  %v608_v24 = vpack.c.bf16 %v592_v63, %v592_v63  ;;  %v595_v26 = vld [vmem:[%s10452_s28 + $0xe8] ss:$0 sm:$0xff]  ;;  %v10581_v41 = vld [vmem:[%s12648_s1 + $0x38] sm:$0xff]  }
  0x7f   : > { %v10522_v34 = vld [vmem:[%s12648_s1 + $0x20] sm:$0xff]   ;;  %9061 = vmatprep.subr.bf16.mxu0 %v10255_v0  ;;  %9081 = vmatprep.subr.bf16.mxu1 %v10255_v0  ;;  %v416_v39 = vpack.c.bf16 %v400_v25, %v400_v25  ;;  %v469_v46 = vunpack.c.l.b16 %v414_v30  ;;  %v488_v56 = vsel %vm475_vm2, %v467_v44, %v487_v50  ;;  %v601_v27 = vld [vmem:[%s10452_s28 + $0x1a8] ss:$0 sm:$0xff]  ;;  %v610_v29 = vpack.c.bf16 %v594_v9, %v594_v9 }
  0x80   : > { %v401_v38 = vld [vmem:[%s10452_s28 + $0x1e0] ss:$0 sm:$0xff]  ;;  %v470_v48 = vunpack.c.l.b16 %v415_v31  ;;  %v489_v61 = vsel %vm477_vm3, %v468_v45, %v488_v56  ;;  %v602_v30 = vld [vmem:[%s10452_s28 + $0x1c8] ss:$0 sm:$0xff]  ;;  %v636_v36 = vunpack.c.l.b16 %v604_v10  ;;  %v486_v37 = vsel %vm485_vm7, %v464_v5, %v484_v20  ;;  %v722_v20 = vld [vmem:[%s10452_s28 + $0x150] ss:$0 sm:$0xff] }
  0x81   : > { %v417_v53 = vpack.c.bf16 %v401_v38, %v401_v38  ;;  %v471_v59 = vunpack.c.l.b16 %v416_v39  ;;  %v490_v7 = vsel %vm479_vm4, %v469_v46, %v489_v61  ;;  %v603_v31 = vld [vmem:[%s10452_s28 + $0x1e8] ss:$0 sm:$0xff]  ;;  %v615_v38 = vpack.c.bf16 %v599_v21, %v599_v21 }
  0x82   : > { %9062 = vmatpush3.bf16.msra.mxu0 %v10522_v34  ;;  %9082 = vmatpush3.bf16.msra.mxu1 %v10522_v34  ;;  %v491_v12 = vsel %vm481_vm5, %v470_v48, %v490_v7  ;;  %v616_v39 = vpack.c.bf16 %v600_v22, %v600_v22  ;;  %v611_v43 = vpack.c.bf16 %v595_v26, %v595_v26  ;;  %v638_v45 = vunpack.c.l.b16 %v606_v17  ;;  %v715_v7 = vld [vmem:[%s10452_s28 + $0x70] ss:$0 sm:$0xff] }
  0x83   : > { %9063 = vmatprep.subr.bf16.mxu0 %v10255_v0  ;;  %9083 = vmatprep.subr.bf16.mxu1 %v10255_v0  ;;  %v472_v19 = vunpack.c.l.b16 %v417_v53  ;;  %v492_v25 = vsel %vm483_vm6, %v471_v59, %v491_v12  ;;  %v617_v44 = vpack.c.bf16 %v601_v27, %v601_v27  ;;  %v618_v46 = vpack.c.bf16 %v602_v30, %v602_v30  ;;  %v720_v12 = vld [vmem:[%s10452_s28 + $0x110] ss:$0 sm:$0xff] }
  0x84   : > { %v619_v47 = vpack.c.bf16 %v603_v31, %v603_v31  ;;  %v639_v48 = vunpack.c.l.b16 %v607_v23  ;;  %v644_v49 = vunpack.c.l.b16 %v612_v32  ;;  %v640_v50 = vunpack.c.l.b16 %v608_v24  ;;  %v723_v24 = vld [vmem:[%s10452_s28 + $0x170] ss:$0 sm:$0xff] }
  0x85   : > { %v493_v42 = vsel %vm485_vm7, %v472_v19, %v492_v25  ;;  %v645_v51 = vunpack.c.l.b16 %v613_v33  ;;  %v646_v53 = vunpack.c.l.b16 %v614_v35  ;;  %v647_v54 = vunpack.c.l.b16 %v615_v38  ;;  %v717_v32 = vld [vmem:[%s10452_s28 + $0xb0] ss:$0 sm:$0xff] }
  0x86   : > { %9064 = vmatpush3.bf16.msra.mxu0 %v10537_v52  ;;  %9084 = vmatpush3.bf16.msra.mxu1 %v10537_v52  ;;  %v494_v56 = vpack.c.b16 %v493_v42, %v486_v37  ;;  %v641_v57 = vunpack.c.l.b16 %v609_v28  ;;  %v648_v58 = vunpack.c.l.b16 %v616_v39  ;;  %v652_v59 = vsel %vm473_vm1, %v637_v40, %v636_v36  ;;  %v716_v28 = vld [vmem:[%s10452_s28 + $0x90] ss:$0 sm:$0xff] }
  0x87   : > { %9065 = vmatprep.subr.bf16.mxu0 %v10255_v0  ;;  %9085 = vmatprep.subr.bf16.mxu1 %v10255_v0  ;;  %v642_v61 = vunpack.c.l.b16 %v610_v29  ;;  %v649_v62 = vunpack.c.l.b16 %v617_v44  ;;  %v653_v63 = vsel %vm475_vm2, %v638_v45, %v652_v59  ;;  %v659_v5 = vsel %vm473_vm1, %v645_v51, %v644_v49  ;;  %v718_v33 = vld [vmem:[%s10452_s28 + $0xd0] ss:$0 sm:$0xff] }
  0x88   : > { %v643_v8 = vunpack.c.l.b16 %v611_v43  ;;  %v650_v9 = vunpack.c.l.b16 %v618_v46  ;;  %v654_v10 = vsel %vm477_vm3, %v639_v48, %v653_v63  ;;  %v660_v11 = vsel %vm475_vm2, %v646_v53, %v659_v5  ;;  %v724_v35 = vld [vmem:[%s10452_s28 + $0x190] ss:$0 sm:$0xff] }
  0x89   : > { %v651_v13 = vunpack.c.l.b16 %v619_v47  ;;  %v655_v14 = vsel %vm479_vm4, %v640_v50, %v654_v10  ;;  %v661_v15 = vsel %vm477_vm3, %v647_v54, %v660_v11  ;;  %v728_v21 = vpack.c.bf16 %v712_v55, %v712_v55  ;;  %v719_v40 = vld [vmem:[%s10452_s28 + $0xf0] ss:$0 sm:$0xff] }
  0x8a   : > { %9066 = vmatpush3.bf16.msra.mxu0 %v10563_v18  ;;  %9086 = vmatpush3.bf16.msra.mxu1 %v10563_v18  ;;  %v656_v17 = vsel %vm481_vm5, %v641_v57, %v655_v14  ;;  %v662_v19 = vsel %vm479_vm4, %v648_v58, %v661_v15  ;;  %v729_v25 = vpack.c.bf16 %v713_v60, %v713_v60  ;;  %v725_v43 = vld [vmem:[%s10452_s28 + $0x1b0] ss:$0 sm:$0xff]  ;;  %v837_v60 = vld [vmem:[%s10452_s28 + $0x38] ss:$0 sm:$0xff] }
  0x8b   : > { %9067 = vmatprep.subr.bf16.mxu0 %v10255_v0  ;;  %9087 = vmatprep.subr.bf16.mxu1 %v10255_v0  ;;  %v657_v22 = vsel %vm483_vm6, %v642_v61, %v656_v17  ;;  %v663_v23 = vsel %vm481_vm5, %v649_v62, %v662_v19  ;;  %v730_v29 = vpack.c.bf16 %v714_v6, %v714_v6  ;;  %v760_v44 = vunpack.c.l.b16 %v728_v21  ;;  %v10625_v46 = vld [vmem:[%s10452_s28 + $0x1d0] ss:$0 sm:$0xff]  ;;  %v839_v6 = vld [vmem:[%s10452_s28 + $0x78] ss:$0 sm:$0xff] }
  0x8c   : > { %v658_v26 = vsel %vm485_vm7, %v643_v8, %v657_v22  ;;  %v664_v27 = vsel %vm483_vm6, %v650_v9, %v663_v23  ;;  %v731_v30 = vpack.c.bf16 %v715_v7, %v715_v7  ;;  %v736_v36 = vpack.c.bf16 %v720_v12, %v720_v12  ;;  %v10628_v47 = vld [vmem:[%s10452_s28 + $0x1f0] ss:$0 sm:$0xff]  ;;  %v840_v7 = vld [vmem:[%s10452_s28 + $0x98] ss:$0 sm:$0xff] }
  0x8d   : > { %v665_v31 = vsel %vm485_vm7, %v651_v13, %v664_v27  ;;  %v737_v37 = vpack.c.bf16 %v721_v16, %v721_v16  ;;  %v738_v38 = vpack.c.bf16 %v722_v20, %v722_v20  ;;  %v739_v42 = vpack.c.bf16 %v723_v24, %v723_v24  ;;  %v844_v8 = vld [vmem:[%s10452_s28 + $0x118] ss:$0 sm:$0xff] }
  0x8e   : > { %9068 = vmatpush3.bf16.msra.mxu0 %v10581_v41  ;;  %9088 = vmatpush3.bf16.msra.mxu1 %v10581_v41  ;;  %v666_v39 = vpack.c.b16 %v665_v31, %v658_v26  ;;  %v761_v45 = vunpack.c.l.b16 %v729_v25  ;;  %v732_v48 = vpack.c.bf16 %v716_v28, %v716_v28  ;;  %v740_v49 = vpack.c.bf16 %v724_v35, %v724_v35  ;;  %v845_v12 = vld [vmem:[%s10452_s28 + $0x138] ss:$0 sm:$0xff] }
  0x8f   : > { %9093 = vmatprep.subr.bf16.mxu0 %v10255_v0  ;;  %9113 = vmatprep.subr.bf16.mxu1 %v10255_v0  ;;  %v762_v50 = vunpack.c.l.b16 %v730_v29  ;;  %v763_v51 = vunpack.c.l.b16 %v731_v30  ;;  %v768_v53 = vunpack.c.l.b16 %v736_v36  ;;  %v769_v54 = vunpack.c.l.b16 %v737_v37  ;;  %v846_v13 = vld [vmem:[%s10452_s28 + $0x158] ss:$0 sm:$0xff] }
  0x90   : > { %v770_v55 = vunpack.c.l.b16 %v738_v38  ;;  %v733_v57 = vpack.c.bf16 %v717_v32, %v717_v32  ;;  %v734_v58 = vpack.c.bf16 %v718_v33, %v718_v33  ;;  %v771_v59 = vunpack.c.l.b16 %v739_v42  ;;  %v847_v14 = vld [vmem:[%s10452_s28 + $0x178] ss:$0 sm:$0xff] }
  0x91   : > { %9070 = vmatmul.mubr.bf16.vlgmr.msra.gmra.mrb[0].mxu0 %v494_v56  ;;  %9090 = vmatmul.mubr.bf16.vlgmr.msra.gmra.mrb[0].mxu1 %v666_v39  ;;  %v836_v56 = vld [vmem:[%s10452_s28 + $0x18] ss:$0 sm:$0xff]  ;;  %v735_v61 = vpack.c.bf16 %v719_v40, %v719_v40  ;;  %v741_v62 = vpack.c.bf16 %v725_v43, %v725_v43  ;;  %v776_v63 = vsel %vm473_vm1, %v761_v45, %v760_v44  ;;  %v764_v9 = vunpack.c.l.b16 %v732_v48 }
  0x92   : > { %9094 = vmatpush3.bf16.msra.mxu0 %v10471_v1  ;;  %9109 = vmatprep.mubr.msk.bf16.mxu0 %vm10256_vm0, %v10255_v0  ;;  %v783_v5 = vsel %vm473_vm1, %v769_v54, %v768_v53  ;;  %v777_v10 = vsel %vm475_vm2, %v762_v50, %v776_v63  ;;  %v742_v15 = vpack.c.bf16 %v10625_v46, %v10625_v46  ;;  %v772_v17 = vunpack.c.l.b16 %v740_v49  ;;  %v848_v20 = vld [vmem:[%s10452_s28 + $0x198] ss:$0 sm:$0xff] }
  0x93   : > { %9095 = vmatprep.subr.bf16.mxu0 %v10255_v0  ;;  %9114 = vmatpush3.bf16.msra.mxu1 %v10471_v1  ;;  %v838_v1 = vld [vmem:[%s10452_s28 + $0x58] ss:$0 sm:$0xff]  ;;  %v784_v11 = vsel %vm475_vm2, %v770_v55, %v783_v5  ;;  %v743_v16 = vpack.c.bf16 %v10628_v47, %v10628_v47  ;;  %v778_v19 = vsel %vm477_vm3, %v763_v51, %v777_v10  ;;  %v765_v21 = vunpack.c.l.b16 %v733_v57 }
  0x94   : > { %9129 = vmatprep.mubr.msk.bf16.mxu1 %vm10256_vm0, %v10255_v0  ;;  %9115 = vmatprep.subr.bf16.mxu1 %v10255_v0  ;;  %v766_v22 = vunpack.c.l.b16 %v734_v58  ;;  %v785_v23 = vsel %vm477_vm3, %v771_v59, %v784_v11  ;;  %v841_v24 = vld [vmem:[%s10452_s28 + $0xb8] ss:$0 sm:$0xff]  ;;  %v852_v25 = vpack.c.bf16 %v836_v56, %v836_v56  ;;  %v10661_v26 = vunpack.c.l.b16 %v735_v61 }
  0x95   : > { %v773_v27 = vunpack.c.l.b16 %v741_v62  ;;  %v853_v28 = vpack.c.bf16 %v837_v60, %v837_v60  ;;  %v854_v29 = vpack.c.bf16 %v838_v1, %v838_v1  ;;  %v779_v30 = vsel %vm479_vm4, %v764_v9, %v778_v19  ;;  %v842_v36 = vld [vmem:[%s10452_s28 + $0xd8] ss:$0 sm:$0xff]  ;;  %v9795_v19 = vld [vmem:[#allocation6 + $0x40] sm:$0xff]  }
  0x96   : > { %9096 = vmatpush3.bf16.msra.mxu0 %v10478_v2  ;;  %v855_v31 = vpack.c.bf16 %v839_v6, %v839_v6  ;;  %v856_v32 = vpack.c.bf16 %v840_v7, %v840_v7  ;;  %v860_v33 = vpack.c.bf16 %v844_v8, %v844_v8  ;;  %v786_v35 = vsel %vm479_vm4, %v772_v17, %v785_v23  ;;  %v850_v37 = vld [vmem:[%s10452_s28 + $0x1d8] ss:$0 sm:$0xff] }
  0x97   : > { %9097 = vmatprep.subr.bf16.mxu0 %v10255_v0  ;;  %9116 = vmatpush3.bf16.msra.mxu1 %v10478_v2  ;;  %v849_v2 = vld [vmem:[%s10452_s28 + $0x1b8] ss:$0 sm:$0xff]  ;;  %v861_v38 = vpack.c.bf16 %v845_v12, %v845_v12  ;;  %v862_v39 = vpack.c.bf16 %v846_v13, %v846_v13  ;;  %v863_v40 = vpack.c.bf16 %v847_v14, %v847_v14  ;;  %v774_v42 = vunpack.c.l.b16 %v742_v15 }
  0x98   : > { %9117 = vmatprep.subr.bf16.mxu1 %v10255_v0  ;;  %v775_v43 = vunpack.c.l.b16 %v743_v16  ;;  %v864_v44 = vpack.c.bf16 %v848_v20, %v848_v20  ;;  %v884_v45 = vunpack.c.l.b16 %v852_v25  ;;  %v857_v46 = vpack.c.bf16 %v841_v24, %v841_v24  ;;  %v843_v51 = vld [vmem:[%s10452_s28 + $0xf8] ss:$0 sm:$0xff] }
  0x99   : > { %v865_v47 = vpack.c.bf16 %v849_v2, %v849_v2  ;;  %v886_v48 = vunpack.c.l.b16 %v854_v29  ;;  %v780_v49 = vsel %vm481_vm5, %v765_v21, %v779_v30  ;;  %v787_v50 = vsel %vm481_vm5, %v773_v27, %v786_v35  ;;  %v851_v53 = vld [vmem:[%s10452_s28 + $0x1f8] ss:$0 sm:$0xff]  ;;  %v9796_v2 = vld [vmem:[#allocation6] sm:$0xff]   ;;  %v9798_v30 = vld [vmem:[#allocation6 + $0x8] sm:$0xff]  }
  0x9a   : > { %9098 = vmatpush3.bf16.msra.mxu0 %v10487_v3  ;;  %v887_v54 = vunpack.c.l.b16 %v855_v31  ;;  %v892_v55 = vunpack.c.l.b16 %v860_v33  ;;  %v888_v56 = vunpack.c.l.b16 %v856_v32  ;;  %v893_v57 = vunpack.c.l.b16 %v861_v38  ;;  %v9799_v31 = vld [vmem:[#allocation6 + $0x50] sm:$0xff]   ;;  %v9801_v35 = vld [vmem:[#allocation6 + $0x58] sm:$0xff]   ;;  %v9805_v38 = vld [vmem:[#allocation6 + $0x68] sm:$0xff]  }
  0x9b   : > { %9099 = vmatprep.subr.bf16.mxu0 %v10255_v0  ;;  %9118 = vmatpush3.bf16.msra.mxu1 %v10487_v3  ;;  %v885_v3 = vunpack.c.l.b16 %v853_v28  ;;  %v894_v58 = vunpack.c.l.b16 %v862_v39  ;;  %v895_v59 = vunpack.c.l.b16 %v863_v40  ;;  %v858_v60 = vpack.c.bf16 %v842_v36, %v842_v36  ;;  %v9797_v28 = vld [vmem:[#allocation6 + $0x48] sm:$0xff]   ;;  %v9800_v33 = vld [vmem:[#allocation6 + $0x10] sm:$0xff]   ;;  %v9803_v36 = vld [vmem:[#allocation6 + $0x60] sm:$0xff]  }
  0x9c   : > { %9119 = vmatprep.subr.bf16.mxu1 %v10255_v0  ;;  %v866_v1 = vpack.c.bf16 %v850_v37, %v850_v37  ;;  %v896_v61 = vunpack.c.l.b16 %v864_v44  ;;  %v889_v63 = vunpack.c.l.b16 %v857_v46  ;;  %v897_v5 = vunpack.c.l.b16 %v865_v47  ;;  %v9804_v37 = vld [vmem:[#allocation6 + $0x20] sm:$0xff]   ;;  %v9806_v39 = vld [vmem:[#allocation6 + $0x28] sm:$0xff]   ;;  %v9807_v40 = vld [vmem:[#allocation6 + $0x70] sm:$0xff]  }
  0x9d   : > { %v900_v62 = vsel %vm473_vm1, %v885_v3, %v884_v45  ;;  %v907_v7 = vsel %vm473_vm1, %v893_v57, %v892_v55  ;;  %v788_v8 = vsel %vm483_vm6, %v774_v42, %v787_v50  ;;  %v859_v11 = vpack.c.bf16 %v843_v51, %v843_v51  ;;  %v9808_v42 = vld [vmem:[#allocation6 + $0x30] sm:$0xff]   ;;  %v9811_v44 = vld [vmem:[#allocation6 + $0xc0] sm:$0xff]   ;;  %v9813_v46 = vld [vmem:[#allocation6 + $0xc8] sm:$0xff]  }
  0x9e   : > { %9100 = vmatpush3.bf16.msra.mxu0 %v10494_v4  ;;  %v901_v6 = vsel %vm475_vm2, %v886_v48, %v900_v62  ;;  %v908_v10 = vsel %vm475_vm2, %v894_v58, %v907_v7  ;;  %v867_v12 = vpack.c.bf16 %v851_v53, %v851_v53  ;;  %v890_v15 = vunpack.c.l.b16 %v858_v60  ;;  %v9812_v45 = vld [vmem:[#allocation6 + $0x80] sm:$0xff]   ;;  %v9814_v47 = vld [vmem:[#allocation6 + $0x88] sm:$0xff]   ;;  %v9815_v3 = vld [vmem:[#allocation6 + $0xd0] sm:$0xff]  }
  0x9f   : > { %9101 = vmatprep.subr.bf16.mxu0 %v10255_v0  ;;  %9120 = vmatpush3.bf16.msra.mxu1 %v10494_v4  ;;  %v781_v4 = vsel %vm483_vm6, %v766_v22, %v780_v49  ;;  %v902_v9 = vsel %vm477_vm3, %v887_v54, %v901_v6  ;;  %v909_v14 = vsel %vm477_vm3, %v895_v59, %v908_v10  ;;  %v898_v16 = vunpack.c.l.b16 %v866_v1  ;;  %v9816_v48 = vld [vmem:[#allocation6 + $0x90] sm:$0xff]   ;;  %v9817_v49 = vld [vmem:[#allocation6 + $0xd8] sm:$0xff]   ;;  %v9819_v51 = vld [vmem:[#allocation6 + $0xe0] sm:$0xff]  }
  0xa0   : > { %9121 = vmatprep.subr.bf16.mxu1 %v10255_v0  ;;  %v903_v13 = vsel %vm479_vm4, %v888_v56, %v902_v9  ;;  %v910_v17 = vsel %vm479_vm4, %v896_v61, %v909_v14  ;;  %v782_v20 = vsel %vm485_vm7, %v10661_v26, %v781_v4  ;;  %v891_v23 = vunpack.c.l.b16 %v859_v11  ;;  %v9818_v50 = vld [vmem:[#allocation6 + $0x98] sm:$0xff]   ;;  %v9820_v53 = vld [vmem:[#allocation6 + $0xa0] sm:$0xff]   ;;  %v9821_v54 = vld [vmem:[#allocation6 + $0xe8] sm:$0xff]  }
  0xa1   : > { %v904_v21 = vsel %vm481_vm5, %v889_v63, %v903_v13  ;;  %v911_v22 = vsel %vm481_vm5, %v897_v5, %v910_v17  ;;  %v899_v24 = vunpack.c.l.b16 %v867_v12  ;;  %v9822_v55 = vld [vmem:[#allocation6 + $0xa8] sm:$0xff]   ;;  %v9823_v56 = vld [vmem:[#allocation6 + $0xf0] sm:$0xff]   ;;  %v9825_v58 = vld [vmem:[#allocation6 + $0xf8] sm:$0xff]  }
  0xa2   : > { %9102 = vmatpush3.bf16.msra.mxu0 %v10522_v34  ;;  %v905_v27 = vsel %vm483_vm6, %v890_v15, %v904_v21  ;;  %v912_v26 = vsel %vm483_vm6, %v898_v16, %v911_v22  ;;  %v9824_v57 = vld [vmem:[#allocation6 + $0xb0] sm:$0xff]   ;;  %v9826_v59 = vld [vmem:[#allocation6 + $0xb8] sm:$0xff]   ;;  %v10714_v60 = vld [vmem:[%s12649_s2] ss:$0 sm:$0xff] }
  0xa3   : > { %9103 = vmatprep.subr.bf16.mxu0 %v10255_v0  ;;  %9122 = vmatpush3.bf16.msra.mxu1 %v10522_v34  ;;  %v789_v34 = vsel %vm485_vm7, %v775_v43, %v788_v8  ;;  %v906_v29 = vsel %vm485_vm7, %v891_v23, %v905_v27  ;;  %v9810_v43 = vld [vmem:[#allocation6 + $0x38] sm:$0xff]   ;;  %v1300_v16 = vld [vmem:[%s10452_s28 + $0x1] ss:$0 sm:$0xff] }
  0xa4   : > { %9123 = vmatprep.subr.bf16.mxu1 %v10255_v0  ;;  %v790_v25 = vpack.c.b16 %v789_v34, %v782_v20  ;;  %v1301_v17 = vld [vmem:[%s10452_s28 + $0x21] ss:$0 sm:$0xff] }
  0xa5   : > { %v1309_v20 = vld [vmem:[%s10452_s28 + $0x121] ss:$0 sm:$0xff]  ;;  %v1317_v27 = vpack.c.bf16 %v1301_v17, %v1301_v17 }
  0xa6   : > { %9104 = vmatpush3.bf16.msra.mxu0 %v10537_v52  ;;  %v10727_v21 = vld [vmem:[%s12648_s1] sm:$0xff]  }
  0xa7   : > { %9105 = vmatprep.subr.bf16.mxu0 %v10255_v0  ;;  %9124 = vmatpush3.bf16.msra.mxu1 %v10537_v52  ;;  %v913_v52 = vsel %vm485_vm7, %v899_v24, %v912_v26  ;;  %v1302_v23 = vld [vmem:[%s10452_s28 + $0x41] ss:$0 sm:$0xff] }
  0xa8   : > { %9125 = vmatprep.subr.bf16.mxu1 %v10255_v0  ;;  %v914_v32 = vpack.c.b16 %v913_v52, %v906_v29  ;;  %v1310_v24 = vld [vmem:[%s10452_s28 + $0x141] ss:$0 sm:$0xff] }
  0xa9   : > { %v1303_v29 = vld [vmem:[%s10452_s28 + $0x61] ss:$0 sm:$0xff] }
  0xaa   : > { %9106 = vmatpush3.bf16.msra.mxu0 %v10563_v18  ;;  %v1311_v52 = vld [vmem:[%s10452_s28 + $0x161] ss:$0 sm:$0xff] }
  0xab   : > { %9107 = vmatprep.subr.bf16.mxu0 %v10255_v0  ;;  %9126 = vmatpush3.bf16.msra.mxu1 %v10563_v18  ;;  %v9802_v18 = vld [vmem:[#allocation6 + $0x18] sm:$0xff]  }
  0xac   : > { %9127 = vmatprep.subr.bf16.mxu1 %v10255_v0 }
  0xae   : > { %9108 = vmatpush3.bf16.msra.mxu0 %v10581_v41 }
  0xaf   : > { %8433 = vmatprep.subr.bf16.mxu0 %v9795_v19  ;;  %9128 = vmatpush3.bf16.msra.mxu1 %v10581_v41  ;;  %v9809_v41 = vld [vmem:[#allocation6 + $0x78] sm:$0xff]   ;;  %v1308_v19 = vld [vmem:[%s10452_s28 + $0x101] ss:$0 sm:$0xff] }
  0xb0   : > { %8455 = vmatprep.subr.bf16.mxu1 %v9811_v44  ;;  %v1324_v26 = vpack.c.bf16 %v1308_v19, %v1308_v19 }
  0xb1   : > { %9110 = vmatmul.mubr.bf16.vlgmr.msra.gmra.mrb[4].mxu0 %v790_v25  ;;  %v1316_v25 = vpack.c.bf16 %v1300_v16, %v1300_v16 }
  0xb2   : > { %8434 = vmatpush3.bf16.msra.mxu0 %v9796_v2  ;;  %9130 = vmatmul.mubr.bf16.vlgmr.msra.gmra.mrb[4].mxu1 %v914_v32  ;;  %v10734_v2 = vld [vmem:[%s12648_s1 + $0x8] sm:$0xff]   ;;  %v10745_v32 = vld [vmem:[%s12648_s1 + $0x10] sm:$0xff]  }
  0xb3   : > { %8435 = vmatprep.subr.bf16.mxu0 %v9797_v28  ;;  %8456 = vmatpush3.bf16.msra.mxu1 %v9812_v45  ;;  %v1325_v28 = vpack.c.bf16 %v1309_v20, %v1309_v20  ;;  %v10756_v45 = vld [vmem:[%s12648_s1 + $0x18] sm:$0xff]  }
  0xb4   : > { %8457 = vmatprep.subr.bf16.mxu1 %v9813_v46 }
  0xb6   : > { %8436 = vmatpush3.bf16.msra.mxu0 %v9798_v30  ;;  %v1318_v30 = vpack.c.bf16 %v1302_v23, %v1302_v23 }
  0xb7   : > { %8437 = vmatprep.subr.bf16.mxu0 %v9799_v31  ;;  %8458 = vmatpush3.bf16.msra.mxu1 %v9814_v47  ;;  %v1326_v31 = vpack.c.bf16 %v1310_v24, %v1310_v24 }
  0xb8   : > { %8459 = vmatprep.subr.bf16.mxu1 %v9815_v3 }
  0xb9   : > { %v1381_v44 = vunpack.c.l.b16 %v1326_v31 }
  0xba   : > { %8438 = vmatpush3.bf16.msra.mxu0 %v9800_v33  ;;  %v1304_v33 = vld [vmem:[%s10452_s28 + $0x81] ss:$0 sm:$0xff] }
  0xbb   : > { %8439 = vmatprep.subr.bf16.mxu0 %v9801_v35  ;;  %8460 = vmatpush3.bf16.msra.mxu1 %v9816_v48  ;;  %v1312_v35 = vld [vmem:[%s10452_s28 + $0x181] ss:$0 sm:$0xff]  ;;  %v1320_v3 = vpack.c.bf16 %v1304_v33, %v1304_v33 }
  0xbc   : > { %8461 = vmatprep.subr.bf16.mxu1 %v9817_v49  ;;  %v1328_v48 = vpack.c.bf16 %v1312_v35, %v1312_v35  ;;  %v1306_v49 = vld [vmem:[%s10452_s28 + $0xc1] ss:$0 sm:$0xff] }
  0xbe   : > { %8440 = vmatpush3.bf16.msra.mxu0 %v9802_v18  ;;  %v1371_v18 = vunpack.c.l.b16 %v1316_v25 }
  0xbf   : > { %8441 = vmatprep.subr.bf16.mxu0 %v9803_v36  ;;  %8462 = vmatpush3.bf16.msra.mxu1 %v9818_v50  ;;  %v1372_v36 = vunpack.c.l.b16 %v1317_v27  ;;  %v1314_v50 = vld [vmem:[%s10452_s28 + $0x1c1] ss:$0 sm:$0xff] }
  0xc0   : > { %8463 = vmatprep.subr.bf16.mxu1 %v9819_v51 }
  0xc1   : > { %v1387_v46 = vsel %vm473_vm1, %v1372_v36, %v1371_v18 }
  0xc2   : > { %8442 = vmatpush3.bf16.msra.mxu0 %v9804_v37  ;;  %v1379_v37 = vunpack.c.l.b16 %v1324_v26  ;;  %v10794_v26 = vld [vmem:[%s12648_s1 + $0x30] sm:$0xff]  }
  0xc3   : > { %8443 = vmatprep.subr.bf16.mxu0 %v9805_v38  ;;  %8464 = vmatpush3.bf16.msra.mxu1 %v9820_v53  ;;  %v1380_v38 = vunpack.c.l.b16 %v1325_v28 }
  0xc4   : > { %8465 = vmatprep.subr.bf16.mxu1 %v9821_v54 }
  0xc5   : > { %v1394_v47 = vsel %vm473_vm1, %v1380_v38, %v1379_v37 }
  0xc6   : > { %8444 = vmatpush3.bf16.msra.mxu0 %v9806_v39  ;;  %v1319_v39 = vpack.c.bf16 %v1303_v29, %v1303_v29 }
  0xc7   : > { %8445 = vmatprep.subr.bf16.mxu0 %v9807_v40  ;;  %8466 = vmatpush3.bf16.msra.mxu1 %v9822_v55  ;;  %v1327_v40 = vpack.c.bf16 %v1311_v52, %v1311_v52  ;;  %v1395_v55 = vsel %vm475_vm2, %v1381_v44, %v1394_v47 }
  0xc8   : > { %8467 = vmatprep.subr.bf16.mxu1 %v9823_v56  ;;  %v1374_v51 = vunpack.c.l.b16 %v1319_v39  ;;  %v10769_v56 = vld [vmem:[%s12648_s1 + $0x20] sm:$0xff]   ;;  %v10805_v39 = vld [vmem:[%s12648_s1 + $0x38] sm:$0xff]  }
  0xc9   : > { %v1382_v53 = vunpack.c.l.b16 %v1327_v40 }
  0xca   : > { %8446 = vmatpush3.bf16.msra.mxu0 %v9808_v42  ;;  %v1305_v42 = vld [vmem:[%s10452_s28 + $0xa1] ss:$0 sm:$0xff] }
  0xcb   : > { %8447 = vmatprep.subr.bf16.mxu0 %v9809_v41  ;;  %8468 = vmatpush3.bf16.msra.mxu1 %v9824_v57  ;;  %v1313_v41 = vld [vmem:[%s10452_s28 + $0x1a1] ss:$0 sm:$0xff]  ;;  %v1321_v57 = vpack.c.bf16 %v1305_v42, %v1305_v42 }
  0xcc   : > { %8469 = vmatprep.subr.bf16.mxu1 %v9825_v58  ;;  %v1329_v58 = vpack.c.bf16 %v1313_v41, %v1313_v41  ;;  %v1495_v41 = vld [vmem:[%s10452_s28 + $0x9] ss:$0 sm:$0xff] }
  0xce   : > { %8448 = vmatpush3.bf16.msra.mxu0 %v9810_v43  ;;  %v1373_v43 = vunpack.c.l.b16 %v1318_v30 }
  0xcf   : > { %9133 = vmatprep.subr.bf16.mxu0 %v10255_v0  ;;  %8470 = vmatpush3.bf16.msra.mxu1 %v9826_v59  ;;  %v1307_v59 = vld [vmem:[%s10452_s28 + $0xe1] ss:$0 sm:$0xff] }
  0xd0   : > { %9153 = vmatprep.subr.bf16.mxu1 %v10255_v0  ;;  %v1388_v54 = vsel %vm475_vm2, %v1373_v43, %v1387_v46  ;;  %v1496_v43 = vld [vmem:[%s10452_s28 + $0x29] ss:$0 sm:$0xff] }
 0x164   : > { %v578_v1 = vpop.f32.mrb[0].mxu0  ;;  %v702_v8 = vpop.f32.mrb[0].mxu1 }
 0x165   : > { %v579_v61 = vadd.f32 %v10714_v60, %v578_v1  ;;  %v9071_v62 = vpop.f32.mrb[1].mxu0  ;;  %v703_v9 = vadd.f32 %v10714_v60, %v702_v8  ;;  %v9091_v10 = vpop.f32.mrb[1].mxu1  ;;  %v1315_v1 = vld [vmem:[%s10452_s28 + $0x1e1] ss:$0 sm:$0xff]  ;;  %v1384_v8 = vunpack.c.l.b16 %v1329_v58  ;;  %v1505_v58 = vld [vmem:[%s10452_s28 + $0x149] ss:$0 sm:$0xff] }
 0x166   : > { %v581_v63 = vpop.f32.mrb[2].mxu0  ;;  %v705_v12 = vpop.f32.mrb[2].mxu1  ;;  %v1383_v62 = vunpack.c.l.b16 %v1328_v48  ;;  %v1331_v16 = vpack.c.bf16 %v1315_v1, %v1315_v1  ;;  %v1619_v48 = vld [vmem:[%s10452_s28 + $0x11] ss:$0 sm:$0xff] }
 0x167   : > { %v585_v5 = vmax.f32 %v579_v61, 0.0  ;;  %v582_v6 = vadd.f32 %v10714_v60, %v581_v63  ;;  %v9072_v7 = vpop.f32.mrb[3].mxu0  ;;  %v709_v13 = vmax.f32 %v703_v9, 0.0  ;;  %v706_v14 = vadd.f32 %v10714_v60, %v705_v12  ;;  %v9092_v15 = vpop.f32.mrb[3].mxu1 }
 0x168   : > { %v1375_v61 = vunpack.c.l.b16 %v1320_v3  ;;  %v1389_v63 = vsel %vm477_vm3, %v1374_v51, %v1388_v54  ;;  %v1330_v7 = vpack.c.bf16 %v1314_v50, %v1314_v50  ;;  %v1323_v15 = vpack.c.bf16 %v1307_v59, %v1307_v59  ;;  %v1504_v3 = vld [vmem:[%s10452_s28 + $0x129] ss:$0 sm:$0xff]  ;;  %v1620_v50 = vld [vmem:[%s10452_s28 + $0x31] ss:$0 sm:$0xff] }
 0x169   : > { %v586_v4 = vmax.f32 %v582_v6, 0.0  ;;  %v710_v34 = vmax.f32 %v706_v14, 0.0  ;;  %v1322_v6 = vpack.c.bf16 %v1306_v49, %v1306_v49  ;;  %v10784_v14 = vld [vmem:[%s12648_s1 + $0x28] sm:$0xff]   ;;  %v1386_v29 = vunpack.c.l.b16 %v1331_v16  ;;  %v1627_v51 = vld [vmem:[%s10452_s28 + $0x111] ss:$0 sm:$0xff] }
 0x16a   : > { %v1390_v10 = vsel %vm479_vm4, %v1375_v61, %v1389_v63  ;;  %v1385_v20 = vunpack.c.l.b16 %v1330_v7  ;;  %v1378_v28 = vunpack.c.l.b16 %v1323_v15  ;;  %v1511_v54 = vpack.c.bf16 %v1495_v41, %v1495_v41  ;;  %v1629_v63 = vld [vmem:[%s10452_s28 + $0x151] ss:$0 sm:$0xff] }
 0x16b   : > { %v587_v11 = vpack.c.bf16 %v586_v4, %v585_v5  ;;  %v711_v22 = vpack.c.bf16 %v710_v34, %v709_v13  ;;  %v1396_v5 = vsel %vm477_vm3, %v1382_v53, %v1395_v55  ;;  %v1376_v4 = vunpack.c.l.b16 %v1321_v57  ;;  %v1628_v53 = vld [vmem:[%s10452_s28 + $0x131] ss:$0 sm:$0xff]  ;;  %v1497_v57 = vld [vmem:[%s10452_s28 + $0x49] ss:$0 sm:$0xff] }
 0x16c   : > { %v1377_v19 = vunpack.c.l.b16 %v1322_v6  ;;  %v1512_v55 = vpack.c.bf16 %v1496_v43, %v1496_v43  ;;  %v1520_v1 = vpack.c.bf16 %v1504_v3, %v1504_v3  ;;  %v1635_v61 = vpack.c.bf16 %v1619_v48, %v1619_v48  ;;  %v1501_v43 = vld [vmem:[%s10452_s28 + $0xc9] ss:$0 sm:$0xff] }
 0x16d   : > { %1248 = vmatprep.mubr.bf16.mxu0 %v711_v22  ;;  %v1391_v24 = vsel %vm481_vm5, %v1376_v4, %v1390_v10  ;;  %v1643_v6 = vpack.c.bf16 %v1627_v51, %v1627_v51  ;;  %v1644_v7 = vpack.c.bf16 %v1628_v53, %v1628_v53  ;;  %v1498_v4 = vld [vmem:[%s10452_s28 + $0x69] ss:$0 sm:$0xff]  ;;  %v1513_v10 = vpack.c.bf16 %v1497_v57, %v1497_v57  ;;  %v1632_v51 = vld [vmem:[%s10452_s28 + $0x1b1] ss:$0 sm:$0xff] }
 0x16e   : > { %1249 = vmatmul.mubr.bf16.vlgmr.msra.gmra.mrb[8].mxu0 %v587_v11  ;;  %v1397_v11 = vsel %vm479_vm4, %v1383_v62, %v1396_v5  ;;  %v1392_v30 = vsel %vm483_vm6, %v1377_v19, %v1391_v24  ;;  %v1621_v62 = vld [vmem:[%s10452_s28 + $0x51] ss:$0 sm:$0xff]  ;;  %v1636_v5 = vpack.c.bf16 %v1620_v50, %v1620_v50  ;;  %v1552_v16 = vunpack.c.l.b16 %v1520_v1  ;;  %v1509_v1 = vld [vmem:[%s10452_s28 + $0x1c9] ss:$0 sm:$0xff] }
 0x16f   : > { %9134 = vmatpush3.bf16.msra.mxu0 %v10727_v21  ;;  %9149 = vmatprep.mubr.msk.bf16.mxu0 %vm10256_vm0, %v10255_v0  ;;  %v1398_v25 = vsel %vm481_vm5, %v1384_v8, %v1397_v11  ;;  %v1393_v40 = vsel %vm485_vm7, %v1378_v28, %v1392_v30  ;;  %v10831_v8 = vld [vmem:[%s10452_s28 + $0x89] ss:$0 sm:$0xff]  ;;  %v1521_v11 = vpack.c.bf16 %v1505_v58, %v1505_v58  ;;  %v1630_v19 = vld [vmem:[%s10452_s28 + $0x171] ss:$0 sm:$0xff]  ;;  %v1675_v24 = vunpack.c.l.b16 %v1643_v6 }
 0x170   : > { %9135 = vmatprep.subr.bf16.mxu0 %v10255_v0  ;;  %v1399_v31 = vsel %vm483_vm6, %v1385_v20, %v1398_v25  ;;  %v1637_v20 = vpack.c.bf16 %v1621_v62, %v1621_v62  ;;  %v1676_v25 = vunpack.c.l.b16 %v1644_v7  ;;  %v1507_v28 = vld [vmem:[%s10452_s28 + $0x189] ss:$0 sm:$0xff]  ;;  %v1624_v50 = vld [vmem:[%s10452_s28 + $0xb1] ss:$0 sm:$0xff] }
 0x171   : > { %v1400_v42 = vsel %vm485_vm7, %v1386_v29, %v1399_v31  ;;  %v1514_v29 = vpack.c.bf16 %v1498_v4, %v1498_v4  ;;  %v1545_v31 = vunpack.c.l.b16 %v1513_v10  ;;  %v1625_v4 = vld [vmem:[%s10452_s28 + $0xd1] ss:$0 sm:$0xff]  ;;  %v1648_v10 = vpack.c.bf16 %v1632_v51, %v1632_v51 }
 0x172   : > { %v1401_v47 = vpack.c.b16 %v1400_v42, %v1393_v40  ;;  %v1669_v42 = vunpack.c.l.b16 %v1637_v20  ;;  %v1690_v3 = vsel %vm473_vm1, %v1676_v25, %v1675_v24  ;;  %v1626_v24 = vld [vmem:[%s10452_s28 + $0xf1] ss:$0 sm:$0xff] }
 0x173   : > { %9136 = vmatpush3.bf16.msra.mxu0 %v10734_v2  ;;  %v1546_v48 = vunpack.c.l.b16 %v1514_v29  ;;  %v1634_v25 = vld [vmem:[%s10452_s28 + $0x1f1] ss:$0 sm:$0xff] }
 0x174   : > { %9137 = vmatprep.subr.bf16.mxu0 %v10255_v0 }
 0x177   : > { %9138 = vmatpush3.bf16.msra.mxu0 %v10745_v32 }
 0x178   : > { %9139 = vmatprep.subr.bf16.mxu0 %v10255_v0 }
 0x17b   : > { %9140 = vmatpush3.bf16.msra.mxu0 %v10756_v45 }
 0x17c   : > { %9141 = vmatprep.subr.bf16.mxu0 %v10255_v0 }
 0x17f   : > { %9142 = vmatpush3.bf16.msra.mxu0 %v10769_v56 }
 0x180   : > { %9143 = vmatprep.subr.bf16.mxu0 %v10255_v0 }
 0x183   : > { %9144 = vmatpush3.bf16.msra.mxu0 %v10784_v14 }
 0x184   : > { %v826_v9 = vpop.f32.mrb[4].mxu0  ;;  %9145 = vmatprep.subr.bf16.mxu0 %v10255_v0 }
 0x185   : > { %v827_v12 = vadd.f32 %v10714_v60, %v826_v9  ;;  %v9111_v13 = vpop.f32.mrb[5].mxu0  ;;  %v950_v52 = vpop.f32.mrb[4].mxu1  ;;  %v1506_v9 = vld [vmem:[%s10452_s28 + $0x169] ss:$0 sm:$0xff] }
 0x186   : > { %v829_v17 = vpop.f32.mrb[6].mxu0  ;;  %v951_v33 = vadd.f32 %v10714_v60, %v950_v52  ;;  %v9131_v35 = vpop.f32.mrb[5].mxu1  ;;  %v1544_v13 = vunpack.c.l.b16 %v1512_v55  ;;  %v1515_v52 = vpack.c.bf16 %v10831_v8, %v10831_v8  ;;  %v1522_v30 = vpack.c.bf16 %v1506_v9, %v1506_v9  ;;  %v1633_v8 = vld [vmem:[%s10452_s28 + $0x1d1] ss:$0 sm:$0xff] }
 0x187   : > { %v833_v34 = vmax.f32 %v827_v12, 0.0  ;;  %v830_v22 = vadd.f32 %v10714_v60, %v829_v17  ;;  %v9112_v23 = vpop.f32.mrb[7].mxu0  ;;  %v953_v36 = vpop.f32.mrb[6].mxu1  ;;  %9146 = vmatpush3.bf16.msra.mxu0 %v10794_v26  ;;  %v1543_v12 = vunpack.c.l.b16 %v1511_v54  ;;  %v1622_v17 = vld [vmem:[%s10452_s28 + $0x71] ss:$0 sm:$0xff]  ;;  %v1640_v9 = vpack.c.bf16 %v1624_v50, %v1624_v50 }
 0x188   : > { %v954_v37 = vadd.f32 %v10714_v60, %v953_v36  ;;  %v9132_v38 = vpop.f32.mrb[7].mxu1  ;;  %9147 = vmatprep.subr.bf16.mxu0 %v10255_v0  ;;  %v1503_v60 = vld [vmem:[%s10452_s28 + $0x109] ss:$0 sm:$0xff]  ;;  %v957_v44 = vmax.f32 %v951_v33, 0.0  ;;  %v1668_v23 = vunpack.c.l.b16 %v1636_v5  ;;  %v1553_v33 = vunpack.c.l.b16 %v1521_v11  ;;  %v1623_v35 = vld [vmem:[%s10452_s28 + $0x91] ss:$0 sm:$0xff] }
 0x189   : > { %v834_v27 = vmax.f32 %v830_v22, 0.0  ;;  %v1519_v59 = vpack.c.bf16 %v1503_v60, %v1503_v60  ;;  %v1667_v22 = vunpack.c.l.b16 %v1635_v61  ;;  %v1638_v36 = vpack.c.bf16 %v1622_v17, %v1622_v17  ;;  %v1508_v60 = vld [vmem:[%s10452_s28 + $0x1a9] ss:$0 sm:$0xff] }
 0x18a   : > { %v958_v46 = vmax.f32 %v954_v37, 0.0  ;;  %v1646_v37 = vpack.c.bf16 %v1630_v19, %v1630_v19  ;;  %v1559_v38 = vsel %vm473_vm1, %v1544_v13, %v1543_v12  ;;  %v1639_v53 = vpack.c.bf16 %v1623_v35, %v1623_v35  ;;  %v1510_v17 = vld [vmem:[%s10452_s28 + $0x1e9] ss:$0 sm:$0xff] }
 0x18b   : > { %v835_v18 = vpack.c.bf16 %v834_v27, %v833_v34  ;;  %9148 = vmatpush3.bf16.msra.mxu0 %v10805_v39  ;;  %v1551_v15 = vunpack.c.l.b16 %v1519_v59  ;;  %v1645_v34 = vpack.c.bf16 %v1629_v63, %v1629_v63  ;;  %v1500_v27 = vld [vmem:[%s10452_s28 + $0xa9] ss:$0 sm:$0xff]  ;;  %v1560_v55 = vsel %vm475_vm2, %v1545_v31, %v1559_v38 }
 0x18c   : > { %v959_v49 = vpack.c.bf16 %v958_v46, %v957_v44  ;;  %9173 = vmatprep.subr.bf16.mxu0 %v10255_v0  ;;  %v1516_v44 = vpack.c.bf16 %v1500_v27, %v1500_v27  ;;  %v1523_v46 = vpack.c.bf16 %v1507_v28, %v1507_v28  ;;  %v1670_v58 = vunpack.c.l.b16 %v1638_v36 }
 0x18d   : > { %v1566_v40 = vsel %vm473_vm1, %v1552_v16, %v1551_v15  ;;  %v1677_v41 = vunpack.c.l.b16 %v1645_v34  ;;  %v1678_v59 = vunpack.c.l.b16 %v1646_v37  ;;  %v1517_v61 = vpack.c.bf16 %v1501_v43, %v1501_v43  ;;  %v1502_v16 = vld [vmem:[%s10452_s28 + $0xe9] ss:$0 sm:$0xff] }
 0x18e   : > { %1289 = vmatprep.mubr.bf16.mxu1 %v959_v49  ;;  %9150 = vmatmul.mubr.bf16.vlgmr.msra.gmra.mrb[12].mxu0 %v1401_v47  ;;  %v1683_v47 = vsel %vm473_vm1, %v1668_v23, %v1667_v22  ;;  %v1554_v49 = vunpack.c.l.b16 %v1522_v30  ;;  %v1567_v57 = vsel %vm475_vm2, %v1553_v33, %v1566_v40  ;;  %v1524_v62 = vpack.c.bf16 %v1508_v60, %v1508_v60 }
 0x18f   : > { %1290 = vmatmul.mubr.bf16.vlgmr.msra.gmra.mrb[8].mxu1 %v835_v18  ;;  %9174 = vmatpush3.bf16.msra.mxu0 %v10727_v21  ;;  %v1631_v18 = vld [vmem:[%s10452_s28 + $0x191] ss:$0 sm:$0xff]  ;;  %v1684_v63 = vsel %vm475_vm2, %v1669_v42, %v1683_v47  ;;  %v1691_v5 = vsel %vm475_vm2, %v1677_v41, %v1690_v3  ;;  %v1547_v6 = vunpack.c.l.b16 %v1515_v52  ;;  %v1555_v7 = vunpack.c.l.b16 %v1523_v46 }
 0x190   : > { %9154 = vmatpush3.bf16.msra.mxu1 %v10727_v21  ;;  %9169 = vmatprep.mubr.msk.bf16.mxu1 %vm10256_vm0, %v10255_v0  ;;  %v1647_v54 = vpack.c.bf16 %v1631_v18, %v1631_v18  ;;  %v1561_v11 = vsel %vm477_vm3, %v1546_v48, %v1560_v55  ;;  %v1568_v12 = vsel %vm477_vm3, %v1554_v49, %v1567_v57  ;;  %v1671_v13 = vunpack.c.l.b16 %v1639_v53 }
 0x191   : > { %9155 = vmatprep.subr.bf16.mxu1 %v10255_v0  ;;  %9175 = vmatprep.subr.bf16.mxu0 %v10255_v0  ;;  %v1525_v19 = vpack.c.bf16 %v1509_v1, %v1509_v1  ;;  %v1685_v20 = vsel %vm477_vm3, %v1670_v58, %v1684_v63  ;;  %v1692_v34 = vsel %vm477_vm3, %v1678_v59, %v1691_v5  ;;  %v1548_v22 = vunpack.c.l.b16 %v1516_v44  ;;  %v1744_v63 = vld [vmem:[%s10452_s28 + $0x39] ss:$0 sm:$0xff] }
 0x192   : > { %9189 = vmatprep.mubr.msk.bf16.mxu0 %vm10256_vm0, %v10255_v0  ;;  %v1679_v15 = vunpack.c.l.b16 %v1647_v54  ;;  %v1556_v23 = vunpack.c.l.b16 %v1524_v62  ;;  %v1641_v27 = vpack.c.bf16 %v1625_v4, %v1625_v4  ;;  %v1649_v28 = vpack.c.bf16 %v1633_v8, %v1633_v8  ;;  %v1751_v5 = vld [vmem:[%s10452_s28 + $0x119] ss:$0 sm:$0xff] }
 0x193   : > { %9176 = vmatpush3.bf16.msra.mxu0 %v10734_v2  ;;  %v1562_v29 = vsel %vm479_vm4, %v1547_v6, %v1561_v11  ;;  %v1569_v52 = vsel %vm479_vm4, %v1555_v7, %v1568_v12  ;;  %v1672_v30 = vunpack.c.l.b16 %v1640_v9  ;;  %v1680_v31 = vunpack.c.l.b16 %v1648_v10  ;;  %v1752_v6 = vld [vmem:[%s10452_s28 + $0x139] ss:$0 sm:$0xff] }
 0x194   : > { %9156 = vmatpush3.bf16.msra.mxu1 %v10734_v2  ;;  %9177 = vmatprep.subr.bf16.mxu0 %v10255_v0  ;;  %v1518_v33 = vpack.c.bf16 %v1502_v16, %v1502_v16  ;;  %v1526_v35 = vpack.c.bf16 %v1510_v17, %v1510_v17  ;;  %v1686_v18 = vsel %vm479_vm4, %v1671_v13, %v1685_v20  ;;  %v1549_v37 = vunpack.c.l.b16 %v1517_v61  ;;  %v1743_v61 = vld [vmem:[%s10452_s28 + $0x19] ss:$0 sm:$0xff] }
 0x195   : > { %9157 = vmatprep.subr.bf16.mxu1 %v10255_v0  ;;  %v1693_v36 = vsel %vm479_vm4, %v1679_v15, %v1692_v34  ;;  %v1557_v38 = vunpack.c.l.b16 %v1525_v19  ;;  %v1642_v40 = vpack.c.bf16 %v1626_v24, %v1626_v24  ;;  %v1650_v42 = vpack.c.bf16 %v1634_v25, %v1634_v25  ;;  %v1745_v4 = vld [vmem:[%s10452_s28 + $0x59] ss:$0 sm:$0xff] }
 0x196   : > { %v1563_v41 = vsel %vm481_vm5, %v1548_v22, %v1562_v29  ;;  %v1570_v43 = vsel %vm481_vm5, %v1556_v23, %v1569_v52  ;;  %v1673_v60 = vunpack.c.l.b16 %v1641_v27  ;;  %v1681_v44 = vunpack.c.l.b16 %v1649_v28  ;;  %v1753_v8 = vld [vmem:[%s10452_s28 + $0x159] ss:$0 sm:$0xff] }
 0x197   : > { %9178 = vmatpush3.bf16.msra.mxu0 %v10745_v32  ;;  %v1687_v46 = vsel %vm481_vm5, %v1672_v30, %v1686_v18  ;;  %v1694_v47 = vsel %vm481_vm5, %v1680_v31, %v1693_v36  ;;  %v1550_v3 = vunpack.c.l.b16 %v1518_v33  ;;  %v1558_v48 = vunpack.c.l.b16 %v1526_v35  ;;  %v1746_v13 = vld [vmem:[%s10452_s28 + $0x79] ss:$0 sm:$0xff] }
 0x198   : > { %9158 = vmatpush3.bf16.msra.mxu1 %v10745_v32  ;;  %9179 = vmatprep.subr.bf16.mxu0 %v10255_v0  ;;  %v1564_v49 = vsel %vm483_vm6, %v1549_v37, %v1563_v41  ;;  %v1571_v50 = vsel %vm483_vm6, %v1557_v38, %v1570_v43  ;;  %v1674_v51 = vunpack.c.l.b16 %v1642_v40  ;;  %v1682_v53 = vunpack.c.l.b16 %v1650_v42  ;;  %v1754_v15 = vld [vmem:[%s10452_s28 + $0x179] ss:$0 sm:$0xff] }
 0x199   : > { %9159 = vmatprep.subr.bf16.mxu1 %v10255_v0  ;;  %v1688_v54 = vsel %vm483_vm6, %v1673_v60, %v1687_v46  ;;  %v1695_v55 = vsel %vm483_vm6, %v1681_v44, %v1694_v47  ;;  %v1565_v57 = vsel %vm485_vm7, %v1550_v3, %v1564_v49  ;;  %v1572_v58 = vsel %vm485_vm7, %v1558_v48, %v1571_v50  ;;  %v1747_v23 = vld [vmem:[%s10452_s28 + $0x99] ss:$0 sm:$0xff] }
 0x19a   : > { %v1689_v59 = vsel %vm485_vm7, %v1674_v51, %v1688_v54  ;;  %v1696_v1 = vsel %vm485_vm7, %v1682_v53, %v1695_v55  ;;  %v1573_v62 = vpack.c.b16 %v1572_v58, %v1565_v57  ;;  %v1759_v9 = vpack.c.bf16 %v1743_v61, %v1743_v61  ;;  %v1748_v30 = vld [vmem:[%s10452_s28 + $0xb9] ss:$0 sm:$0xff] }
 0x19b   : > { %9180 = vmatpush3.bf16.msra.mxu0 %v10756_v45  ;;  %v1697_v7 = vpack.c.b16 %v1696_v1, %v1689_v59  ;;  %v1760_v10 = vpack.c.bf16 %v1744_v63, %v1744_v63  ;;  %v1767_v11 = vpack.c.bf16 %v1751_v5, %v1751_v5  ;;  %v1768_v12 = vpack.c.bf16 %v1752_v6, %v1752_v6  ;;  %v1756_v31 = vld [vmem:[%s10452_s28 + $0x1b9] ss:$0 sm:$0xff] }
 0x19c   : > { %9160 = vmatpush3.bf16.msra.mxu1 %v10756_v45  ;;  %9181 = vmatprep.subr.bf16.mxu0 %v10255_v0  ;;  %v1761_v16 = vpack.c.bf16 %v1745_v4, %v1745_v4  ;;  %v1769_v17 = vpack.c.bf16 %v1753_v8, %v1753_v8  ;;  %v1791_v19 = vunpack.c.l.b16 %v1759_v9  ;;  %v1762_v24 = vpack.c.bf16 %v1746_v13, %v1746_v13  ;;  %v1749_v38 = vld [vmem:[%s10452_s28 + $0xd9] ss:$0 sm:$0xff]  ;;  %v9837_v4 = vld [vmem:[#allocation6 + $0x148] sm:$0xff]   ;;  %v9839_v9 = vld [vmem:[#allocation6 + $0x150] sm:$0xff]  }
 0x19d   : > { %9161 = vmatprep.subr.bf16.mxu1 %v10255_v0  ;;  %v1792_v20 = vunpack.c.l.b16 %v1760_v10  ;;  %v1799_v34 = vunpack.c.l.b16 %v1767_v11  ;;  %v1800_v22 = vunpack.c.l.b16 %v1768_v12  ;;  %v1770_v25 = vpack.c.bf16 %v1754_v15, %v1754_v15  ;;  %v1757_v40 = vld [vmem:[%s10452_s28 + $0x1d9] ss:$0 sm:$0xff]  ;;  %v9838_v8 = vld [vmem:[#allocation6 + $0x108] sm:$0xff]   ;;  %v9843_v12 = vld [vmem:[#allocation6 + $0x160] sm:$0xff]  }
 0x19e   : > { %v1793_v27 = vunpack.c.l.b16 %v1761_v16  ;;  %v1801_v28 = vunpack.c.l.b16 %v1769_v17  ;;  %v1763_v33 = vpack.c.bf16 %v1747_v23, %v1747_v23  ;;  %v1764_v42 = vpack.c.bf16 %v1748_v30, %v1748_v30  ;;  %v1750_v46 = vld [vmem:[%s10452_s28 + $0xf9] ss:$0 sm:$0xff]  ;;  %v9844_v13 = vld [vmem:[#allocation6 + $0x120] sm:$0xff]   ;;  %v9846_v15 = vld [vmem:[#allocation6 + $0x128] sm:$0xff]  }
 0x19f   : > { %9182 = vmatpush3.bf16.msra.mxu0 %v10769_v56  ;;  %v1807_v29 = vsel %vm473_vm1, %v1792_v20, %v1791_v19  ;;  %v1814_v52 = vsel %vm473_vm1, %v1800_v22, %v1799_v34  ;;  %v1802_v18 = vunpack.c.l.b16 %v1770_v25  ;;  %v1772_v41 = vpack.c.bf16 %v1756_v31, %v1756_v31  ;;  %v1758_v47 = vld [vmem:[%s10452_s28 + $0x1f9] ss:$0 sm:$0xff]  ;;  %v9847_v16 = vld [vmem:[#allocation6 + $0x170] sm:$0xff]   ;;  %v9851_v34 = vld [vmem:[#allocation6 + $0x1c0] sm:$0xff]  }
 0x1a0   : > { %9162 = vmatpush3.bf16.msra.mxu1 %v10769_v56  ;;  %9183 = vmatprep.subr.bf16.mxu0 %v10255_v0  ;;  %v1808_v36 = vsel %vm475_vm2, %v1793_v27, %v1807_v29  ;;  %v1815_v37 = vsel %vm475_vm2, %v1801_v28, %v1814_v52  ;;  %v1795_v43 = vunpack.c.l.b16 %v1763_v33  ;;  %v1765_v3 = vpack.c.bf16 %v1749_v38, %v1749_v38  ;;  %v9841_v10 = vld [vmem:[#allocation6 + $0x158] sm:$0xff]   ;;  %v9848_v17 = vld [vmem:[#allocation6 + $0x130] sm:$0xff]   ;;  %v9852_v22 = vld [vmem:[#allocation6 + $0x180] sm:$0xff]  }
 0x1a1   : > { %9163 = vmatprep.subr.bf16.mxu1 %v10255_v0  ;;  %v1816_v44 = vsel %vm477_vm3, %v1802_v18, %v1815_v37  ;;  %v1773_v48 = vpack.c.bf16 %v1757_v40, %v1757_v40  ;;  %v1796_v49 = vunpack.c.l.b16 %v1764_v42  ;;  %v1804_v50 = vunpack.c.l.b16 %v1772_v41  ;;  %v9842_v11 = vld [vmem:[#allocation6 + $0x118] sm:$0xff]   ;;  %v9853_v23 = vld [vmem:[#allocation6 + $0x1c8] sm:$0xff]   ;;  %v9856_v25 = vld [vmem:[#allocation6 + $0x190] sm:$0xff]  }
 0x1a2   : > { %v1766_v54 = vpack.c.bf16 %v1750_v46, %v1750_v46  ;;  %v1797_v55 = vunpack.c.l.b16 %v1765_v3  ;;  %v9849_v19 = vld [vmem:[#allocation6 + $0x178] sm:$0xff]   ;;  %v9859_v29 = vld [vmem:[#allocation6 + $0x1e0] sm:$0xff]   ;;  %v9861_v30 = vld [vmem:[#allocation6 + $0x1e8] sm:$0xff]  }
 0x1a3   : > { %9184 = vmatpush3.bf16.msra.mxu0 %v10784_v14  ;;  %v1805_v57 = vunpack.c.l.b16 %v1773_v48  ;;  %v9850_v20 = vld [vmem:[#allocation6 + $0x138] sm:$0xff]   ;;  %v9860_v52 = vld [vmem:[#allocation6 + $0x1a0] sm:$0xff]   ;;  %v9862_v31 = vld [vmem:[#allocation6 + $0x1a8] sm:$0xff]  }
 0x1a4   : > { %9164 = vmatpush3.bf16.msra.mxu1 %v10784_v14  ;;  %9185 = vmatprep.subr.bf16.mxu0 %v10255_v0  ;;  %v1798_v1 = vunpack.c.l.b16 %v1766_v54  ;;  %v9857_v27 = vld [vmem:[#allocation6 + $0x1d8] sm:$0xff]   ;;  %v9863_v33 = vld [vmem:[#allocation6 + $0x1f0] sm:$0xff]  }
 0x1a5   : > { %9165 = vmatprep.subr.bf16.mxu1 %v10255_v0  ;;  %v9858_v28 = vld [vmem:[#allocation6 + $0x198] sm:$0xff]  }
 0x1a6   : > { %v9866_v18 = vld [vmem:[#allocation6 + $0x1b8] sm:$0xff]  }
 0x1a7   : > { %9186 = vmatpush3.bf16.msra.mxu0 %v10794_v26 }
 0x1a8   : > { %9166 = vmatpush3.bf16.msra.mxu1 %v10794_v26  ;;  %9187 = vmatprep.subr.bf16.mxu0 %v10255_v0 }
 0x1a9   : > { %9167 = vmatprep.subr.bf16.mxu1 %v10255_v0 }
 0x1ab   : > { %9188 = vmatpush3.bf16.msra.mxu0 %v10805_v39 }
 0x1ac   : > { %9168 = vmatpush3.bf16.msra.mxu1 %v10805_v39 }
 0x1ad   : > { %9193 = vmatprep.subr.bf16.mxu1 %v10255_v0 }
 0x1ae   : > { %9190 = vmatmul.mubr.bf16.vlgmr.msra.gmra.mrb[16].mxu0 %v1697_v7  ;;  %v9836_v7 = vld [vmem:[#allocation6 + $0x100] sm:$0xff]  }
 0x1af   : > { %9170 = vmatmul.mubr.bf16.vlgmr.msra.gmra.mrb[12].mxu1 %v1573_v62 }
 0x1b0   : > { %9194 = vmatpush3.bf16.msra.mxu1 %v10727_v21  ;;  %9209 = vmatprep.mubr.msk.bf16.mxu1 %vm10256_vm0, %v10255_v0  ;;  %v1755_v21 = vld [vmem:[%s10452_s28 + $0x199] ss:$0 sm:$0xff] }
 0x1b1   : > { %9195 = vmatprep.subr.bf16.mxu1 %v10255_v0  ;;  %v1771_v35 = vpack.c.bf16 %v1755_v21, %v1755_v21  ;;  %v9854_v21 = vld [vmem:[#allocation6 + $0x188] sm:$0xff]  }
 0x1b3   : > { %v1803_v60 = vunpack.c.l.b16 %v1771_v35  ;;  %v9864_v35 = vld [vmem:[#allocation6 + $0x1b0] sm:$0xff]  }
 0x1b4   : > { %9196 = vmatpush3.bf16.msra.mxu1 %v10734_v2  ;;  %v1794_v2 = vunpack.c.l.b16 %v1762_v24  ;;  %v9855_v24 = vld [vmem:[#allocation6 + $0x1d0] sm:$0xff]  }
 0x1b5   : > { %9197 = vmatprep.subr.bf16.mxu1 %v10255_v0  ;;  %v1817_v53 = vsel %vm479_vm4, %v1803_v60, %v1816_v44 }
 0x1b6   : > { %v1818_v59 = vsel %vm481_vm5, %v1804_v50, %v1817_v53 }
 0x1b8   : > { %9198 = vmatpush3.bf16.msra.mxu1 %v10745_v32  ;;  %v1809_v32 = vsel %vm477_vm3, %v1794_v2, %v1808_v36  ;;  %v9865_v2 = vld [vmem:[#allocation6 + $0x1f8] sm:$0xff]  }
 0x1b9   : > { %9199 = vmatprep.subr.bf16.mxu1 %v10255_v0  ;;  %v1810_v51 = vsel %vm479_vm4, %v1795_v43, %v1809_v32  ;;  %v10963_v43 = vld [vmem:[%s12649_s2] ss:$0 sm:$0xff] }
 0x1ba   : > { %v1811_v58 = vsel %vm481_vm5, %v1796_v49, %v1810_v51 }
 0x1bb   : > { %v1812_v62 = vsel %vm483_vm6, %v1797_v55, %v1811_v58 }
 0x1bc   : > { %9200 = vmatpush3.bf16.msra.mxu1 %v10756_v45  ;;  %v1774_v45 = vpack.c.bf16 %v1758_v47, %v1758_v47  ;;  %v1813_v63 = vsel %vm485_vm7, %v1798_v1, %v1812_v62 }
 0x1bd   : > { %9201 = vmatprep.subr.bf16.mxu1 %v10255_v0 }
 0x1be   : > { %v1806_v61 = vunpack.c.l.b16 %v1774_v45 }
 0x1c0   : > { %9202 = vmatpush3.bf16.msra.mxu1 %v10769_v56  ;;  %v1819_v56 = vsel %vm483_vm6, %v1805_v57, %v1818_v59 }
 0x1c1   : > { %9203 = vmatprep.subr.bf16.mxu1 %v10255_v0  ;;  %v1820_v5 = vsel %vm485_vm7, %v1806_v61, %v1819_v56 }
 0x1c2   : > { %v1821_v6 = vpack.c.b16 %v1820_v5, %v1813_v63 }
 0x1c4   : > { %9204 = vmatpush3.bf16.msra.mxu1 %v10784_v14  ;;  %v9835_v14 = vld [vmem:[#allocation6 + $0x140] sm:$0xff]  }
 0x1c5   : > { %9205 = vmatprep.subr.bf16.mxu1 %v10255_v0  ;;  %8513 = vmatprep.subr.bf16.mxu0 %v9835_v14 }
 0x1c6   : > { %8514 = vmatpush3.bf16.msra.mxu0 %v9836_v7 }
 0x1c7   : > { %8515 = vmatprep.subr.bf16.mxu0 %v9837_v4 }
 0x1c8   : > { %9206 = vmatpush3.bf16.msra.mxu1 %v10794_v26  ;;  %v9840_v26 = vld [vmem:[#allocation6 + $0x110] sm:$0xff]  }
 0x1c9   : > { %9207 = vmatprep.subr.bf16.mxu1 %v10255_v0 }
 0x1ca   : > { %8516 = vmatpush3.bf16.msra.mxu0 %v9838_v8 }
 0x1cb   : > { %8517 = vmatprep.subr.bf16.mxu0 %v9839_v9 }
 0x1cc   : > { %9208 = vmatpush3.bf16.msra.mxu1 %v10805_v39  ;;  %v9845_v39 = vld [vmem:[#allocation6 + $0x168] sm:$0xff]  }
 0x1cd   : > { %8535 = vmatprep.subr.bf16.mxu1 %v9851_v34  ;;  %v2214_v34 = vld [vmem:[%s10452_s28 + $0x42] ss:$0 sm:$0xff] }
 0x1ce   : > { %8518 = vmatpush3.bf16.msra.mxu0 %v9840_v26 }
 0x1cf   : > { %9210 = vmatmul.mubr.bf16.vlgmr.msra.gmra.mrb[16].mxu1 %v1821_v6  ;;  %8519 = vmatprep.subr.bf16.mxu0 %v9841_v10 }
 0x1d0   : > { %8536 = vmatpush3.bf16.msra.mxu1 %v9852_v22  ;;  %v2222_v22 = vld [vmem:[%s10452_s28 + $0x142] ss:$0 sm:$0xff] }
 0x1d1   : > { %8537 = vmatprep.subr.bf16.mxu1 %v9853_v23 }
 0x1d2   : > { %8520 = vmatpush3.bf16.msra.mxu0 %v9842_v11 }
 0x1d3   : > { %8521 = vmatprep.subr.bf16.mxu0 %v9843_v12  ;;  %v2212_v12 = vld [vmem:[%s10452_s28 + $0x2] ss:$0 sm:$0xff] }
 0x1d4   : > { %8538 = vmatpush3.bf16.msra.mxu1 %v9854_v21  ;;  %v2228_v23 = vpack.c.bf16 %v2212_v12, %v2212_v12 }
 0x1d5   : > { %8539 = vmatprep.subr.bf16.mxu1 %v9855_v24 }
 0x1d6   : > { %8522 = vmatpush3.bf16.msra.mxu0 %v9844_v13  ;;  %v2213_v13 = vld [vmem:[%s10452_s28 + $0x22] ss:$0 sm:$0xff] }
 0x1d7   : > { %8523 = vmatprep.subr.bf16.mxu0 %v9845_v39  ;;  %v2229_v21 = vpack.c.bf16 %v2213_v13, %v2213_v13 }
 0x1d8   : > { %8540 = vmatpush3.bf16.msra.mxu1 %v9856_v25 }
 0x1d9   : > { %8541 = vmatprep.subr.bf16.mxu1 %v9857_v27  ;;  %v10992_v27 = vld [vmem:[%s12648_s1 + $0x8] sm:$0xff]  }
 0x1da   : > { %8524 = vmatpush3.bf16.msra.mxu0 %v9846_v15  ;;  %v2220_v15 = vld [vmem:[%s10452_s28 + $0x102] ss:$0 sm:$0xff] }
 0x1db   : > { %8525 = vmatprep.subr.bf16.mxu0 %v9847_v16  ;;  %v2221_v16 = vld [vmem:[%s10452_s28 + $0x122] ss:$0 sm:$0xff]  ;;  %v2236_v24 = vpack.c.bf16 %v2220_v15, %v2220_v15 }
 0x1dc   : > { %8542 = vmatpush3.bf16.msra.mxu1 %v9858_v28  ;;  %v2237_v25 = vpack.c.bf16 %v2221_v16, %v2221_v16  ;;  %v2215_v28 = vld [vmem:[%s10452_s28 + $0x62] ss:$0 sm:$0xff] }
 0x1dd   : > { %8543 = vmatprep.subr.bf16.mxu1 %v9859_v29  ;;  %v2223_v29 = vld [vmem:[%s10452_s28 + $0x162] ss:$0 sm:$0xff] }
 0x1de   : > { %8526 = vmatpush3.bf16.msra.mxu0 %v9848_v17 }
 0x1df   : > { %8527 = vmatprep.subr.bf16.mxu0 %v9849_v19  ;;  %v10982_v19 = vld [vmem:[%s12648_s1] sm:$0xff]  }
 0x1e0   : > { %8544 = vmatpush3.bf16.msra.mxu1 %v9860_v52  ;;  %v2230_v52 = vpack.c.bf16 %v2214_v34, %v2214_v34 }
 0x1e1   : > { %8545 = vmatprep.subr.bf16.mxu1 %v9861_v30  ;;  %v2238_v30 = vpack.c.bf16 %v2222_v22, %v2222_v22 }
 0x1e2   : > { %8528 = vmatpush3.bf16.msra.mxu0 %v9850_v20 }
 0x1e3   : > { %9213 = vmatprep.subr.bf16.mxu0 %v10255_v0 }
 0x1e4   : > { %8546 = vmatpush3.bf16.msra.mxu1 %v9862_v31  ;;  %v2283_v31 = vunpack.c.l.b16 %v2228_v23 }
 0x1e5   : > { %8547 = vmatprep.subr.bf16.mxu1 %v9863_v33  ;;  %v2284_v33 = vunpack.c.l.b16 %v2229_v21 }
 0x1e8   : > { %8548 = vmatpush3.bf16.msra.mxu1 %v9864_v35  ;;  %v2291_v35 = vunpack.c.l.b16 %v2236_v24 }
 0x1e9   : > { %8549 = vmatprep.subr.bf16.mxu1 %v9865_v2  ;;  %v2292_v2 = vunpack.c.l.b16 %v2237_v25 }
 0x1ec   : > { %8550 = vmatpush3.bf16.msra.mxu1 %v9866_v18  ;;  %v11003_v18 = vld [vmem:[%s12648_s1 + $0x10] sm:$0xff]  }
 0x1ed   : > { %9233 = vmatprep.subr.bf16.mxu1 %v10255_v0 }
 0x241   : > { %v8449_v36 = vpop.f32.mrb[8].mxu0 }
 0x242   : > { %v8450_v37 = vpop.f32.mrb[9].mxu0 }
 0x243   : > { %v8451_v38 = vadd.f32 %v8450_v37, %v8449_v36  ;;  %v8452_v40 = vpop.f32.mrb[10].mxu0  ;;  %v2216_v36 = vld [vmem:[%s10452_s28 + $0x82] ss:$0 sm:$0xff] }
 0x244   : > { %v8453_v42 = vpop.f32.mrb[11].mxu0  ;;  %v2224_v37 = vld [vmem:[%s10452_s28 + $0x182] ss:$0 sm:$0xff] }
 0x245   : > { %v8454_v41 = vadd.f32 %v8453_v42, %v8452_v40  ;;  %v2239_v40 = vpack.c.bf16 %v2223_v29, %v2223_v29  ;;  %v2285_v42 = vunpack.c.l.b16 %v2230_v52 }
 0x261   : > { %v1485_v32 = vpop.f32.mrb[12].mxu0 }
 0x262   : > { %v8471_v60 = vpop.f32.mrb[8].mxu1  ;;  %v1486_v46 = vadd.f32 %v10963_v43, %v1485_v32  ;;  %v9151_v47 = vpop.f32.mrb[13].mxu0  ;;  %v2306_v32 = vsel %vm473_vm1, %v2292_v2, %v2291_v35 }
 0x263   : > { %v8472_v44 = vpop.f32.mrb[9].mxu1  ;;  %v1488_v49 = vpop.f32.mrb[14].mxu0  ;;  %v2232_v47 = vpack.c.bf16 %v2216_v36, %v2216_v36 }
 0x264   : > { %v8473_v3 = vadd.f32 %v8472_v44, %v8471_v60  ;;  %v8474_v48 = vpop.f32.mrb[10].mxu1  ;;  %v1492_v51 = vmax.f32 %v1486_v46, 0.0  ;;  %v1489_v53 = vadd.f32 %v10963_v43, %v1488_v49  ;;  %v9152_v54 = vpop.f32.mrb[15].mxu0  ;;  %v2299_v60 = vsel %vm473_vm1, %v2284_v33, %v2283_v31  ;;  %v2217_v44 = vld [vmem:[%s10452_s28 + $0xa2] ss:$0 sm:$0xff]  ;;  %v11060_v31 = vld [vmem:[%s12648_s1 + $0x38] sm:$0xff]  }
 0x265   : > { %v8475_v50 = vpop.f32.mrb[11].mxu1  ;;  %v2225_v46 = vld [vmem:[%s10452_s28 + $0x1a2] ss:$0 sm:$0xff] }
 0x266   : > { %v10967_v45 = vadd.f32 %v8473_v3, %v8451_v38  ;;  %v8476_v55 = vadd.f32 %v8475_v50, %v8474_v48  ;;  %v1493_v57 = vmax.f32 %v1489_v53, 0.0  ;;  %v2231_v38 = vpack.c.bf16 %v2215_v28, %v2215_v28  ;;  %v11016_v48 = vld [vmem:[%s12648_s1 + $0x18] sm:$0xff]   ;;  %v2218_v54 = vld [vmem:[%s10452_s28 + $0xc2] ss:$0 sm:$0xff] }
 0x267   : > { %v2240_v3 = vpack.c.bf16 %v2224_v37, %v2224_v37  ;;  %v2294_v50 = vunpack.c.l.b16 %v2239_v40  ;;  %v2408_v37 = vld [vmem:[%s10452_s28 + $0x2a] ss:$0 sm:$0xff] }
 0x268   : > { %v10969_v58 = vadd.f32 %v8476_v55, %v8454_v41  ;;  %v1494_v59 = vpack.c.bf16 %v1493_v57, %v1492_v51  ;;  %v2293_v41 = vunpack.c.l.b16 %v2238_v30  ;;  %v2286_v49 = vunpack.c.l.b16 %v2231_v38  ;;  %v2226_v55 = vld [vmem:[%s10452_s28 + $0x1c2] ss:$0 sm:$0xff]  ;;  %v2415_v40 = vld [vmem:[%s10452_s28 + $0x10a] ss:$0 sm:$0xff] }
 0x269   : > { %v2300_v51 = vsel %vm475_vm2, %v2285_v42, %v2299_v60  ;;  %v2233_v57 = vpack.c.bf16 %v2217_v44, %v2217_v44  ;;  %v2416_v42 = vld [vmem:[%s10452_s28 + $0x12a] ss:$0 sm:$0xff]  ;;  %v2539_v44 = vld [vmem:[%s10452_s28 + $0x112] ss:$0 sm:$0xff] }
 0x26a   : > { %v2307_v53 = vsel %vm475_vm2, %v2293_v41, %v2306_v32  ;;  %v2531_v41 = vld [vmem:[%s10452_s28 + $0x12] ss:$0 sm:$0xff] }
 0x26b   : > { %v2532_v32 = vld [vmem:[%s10452_s28 + $0x32] ss:$0 sm:$0xff] }
 0x281   : > { %v1733_v56 = vpop.f32.mrb[16].mxu0 }
 0x282   : > { %v1609_v1 = vpop.f32.mrb[12].mxu1  ;;  %v1734_v5 = vadd.f32 %v10963_v43, %v1733_v56  ;;  %v9191_v6 = vpop.f32.mrb[17].mxu0  ;;  %v2301_v56 = vsel %vm477_vm3, %v2286_v49, %v2300_v51  ;;  %v2409_v49 = vld [vmem:[%s10452_s28 + $0x4a] ss:$0 sm:$0xff]  ;;  %v2431_v51 = vpack.c.bf16 %v2415_v40, %v2415_v40 }
 0x283   : > { %v1610_v61 = vadd.f32 %v10963_v43, %v1609_v1  ;;  %v9171_v62 = vpop.f32.mrb[13].mxu1  ;;  %v1736_v8 = vpop.f32.mrb[18].mxu0  ;;  %v2287_v1 = vunpack.c.l.b16 %v2232_v47  ;;  %v2227_v6 = vld [vmem:[%s10452_s28 + $0x1e2] ss:$0 sm:$0xff] }
 0x284   : > { %v1612_v63 = vpop.f32.mrb[14].mxu1  ;;  %v1740_v9 = vmax.f32 %v1734_v5, 0.0  ;;  %v1737_v26 = vadd.f32 %v10963_v43, %v1736_v8  ;;  %v9192_v10 = vpop.f32.mrb[19].mxu0  ;;  %v11027_v62 = vld [vmem:[%s12648_s1 + $0x20] sm:$0xff]   ;;  %v2243_v12 = vpack.c.bf16 %v2227_v6, %v2227_v6 }
 0x285   : > { %v1616_v14 = vmax.f32 %v1610_v61, 0.0  ;;  %v1613_v7 = vadd.f32 %v10963_v43, %v1612_v63  ;;  %v9172_v4 = vpop.f32.mrb[15].mxu1  ;;  %v2295_v61 = vunpack.c.l.b16 %v2240_v3  ;;  %v2308_v63 = vsel %vm477_vm3, %v2294_v50, %v2307_v53  ;;  %v2219_v5 = vld [vmem:[%s10452_s28 + $0xe2] ss:$0 sm:$0xff]  ;;  %v11040_v10 = vld [vmem:[%s12648_s1 + $0x28] sm:$0xff]  }
 0x286   : > { %v1741_v39 = vmax.f32 %v1737_v26, 0.0  ;;  %v2288_v4 = vunpack.c.l.b16 %v2233_v57  ;;  %v2298_v22 = vunpack.c.l.b16 %v2243_v12  ;;  %v2424_v3 = vpack.c.bf16 %v2408_v37, %v2408_v37  ;;  %v2417_v50 = vld [vmem:[%s10452_s28 + $0x14a] ss:$0 sm:$0xff]  ;;  %v2541_v57 = vld [vmem:[%s10452_s28 + $0x152] ss:$0 sm:$0xff] }
 0x287   : > { %v1617_v11 = vmax.f32 %v1613_v7, 0.0  ;;  %v2242_v7 = vpack.c.bf16 %v2226_v55, %v2226_v55  ;;  %v2309_v26 = vsel %vm479_vm4, %v2295_v61, %v2308_v63  ;;  %v2432_v53 = vpack.c.bf16 %v2416_v42, %v2416_v42  ;;  %v2533_v55 = vld [vmem:[%s10452_s28 + $0x52] ss:$0 sm:$0xff]  ;;  %v11087_v63 = vld [vmem:[%s10452_s28 + $0x8a] ss:$0 sm:$0xff] }
 0x288   : > { %v10984_v20 = vpack.c.bf16 %v1741_v39, %v1740_v9  ;;  %v2302_v9 = vsel %vm479_vm4, %v2287_v1, %v2301_v56  ;;  %v2555_v1 = vpack.c.bf16 %v2539_v44, %v2539_v44  ;;  %v2410_v56 = vld [vmem:[%s10452_s28 + $0x6a] ss:$0 sm:$0xff]  ;;  %v2433_v6 = vpack.c.bf16 %v2417_v50, %v2417_v50 }
 0x289   : > { %v1618_v17 = vpack.c.bf16 %v1617_v11, %v1616_v14  ;;  %v2234_v14 = vpack.c.bf16 %v2218_v54, %v2218_v54  ;;  %v2235_v11 = vpack.c.bf16 %v2219_v5, %v2219_v5  ;;  %v2297_v39 = vunpack.c.l.b16 %v2242_v7  ;;  %v2413_v37 = vld [vmem:[%s10452_s28 + $0xca] ss:$0 sm:$0xff] }
 0x28a   : > { %v2303_v15 = vsel %vm481_vm5, %v2288_v4, %v2302_v9  ;;  %v2547_v54 = vpack.c.bf16 %v2531_v41, %v2531_v41  ;;  %v2425_v5 = vpack.c.bf16 %v2409_v49, %v2409_v49  ;;  %v2456_v7 = vunpack.c.l.b16 %v2424_v3  ;;  %v2534_v9 = vld [vmem:[%s10452_s28 + $0x72] ss:$0 sm:$0xff] }
 0x28b   : > { %2156 = vmatprep.mubr.bf16.mxu0 %v1618_v17  ;;  %v2289_v13 = vunpack.c.l.b16 %v2234_v14  ;;  %v11049_v17 = vld [vmem:[%s12648_s1 + $0x30] sm:$0xff]   ;;  %v2290_v34 = vunpack.c.l.b16 %v2235_v11  ;;  %v2463_v4 = vunpack.c.l.b16 %v2431_v51  ;;  %v2549_v11 = vpack.c.bf16 %v2533_v55, %v2533_v55  ;;  %v2421_v55 = vld [vmem:[%s10452_s28 + $0x1ca] ss:$0 sm:$0xff] }
 0x28c   : > { %2157 = vmatmul.mubr.bf16.vlgmr.msra.gmra.mrb[20].mxu0 %v1494_v59  ;;  %v2241_v59 = vpack.c.bf16 %v2225_v46, %v2225_v46  ;;  %v2540_v46 = vld [vmem:[%s10452_s28 + $0x132] ss:$0 sm:$0xff]  ;;  %v2557_v12 = vpack.c.bf16 %v2541_v57, %v2541_v57  ;;  %v2429_v57 = vpack.c.bf16 %v2413_v37, %v2413_v37 }
 0x28d   : > { %9214 = vmatpush3.bf16.msra.mxu0 %v10982_v19  ;;  %9229 = vmatprep.mubr.msk.bf16.mxu0 %vm10256_vm0, %v10255_v0  ;;  %v2304_v21 = vsel %vm483_vm6, %v2289_v13, %v2303_v15  ;;  %v2556_v61 = vpack.c.bf16 %v2540_v46, %v2540_v46  ;;  %v2579_v13 = vunpack.c.l.b16 %v2547_v54  ;;  %v2587_v15 = vunpack.c.l.b16 %v2555_v1  ;;  %v2536_v46 = vld [vmem:[%s10452_s28 + $0xb2] ss:$0 sm:$0xff] }
 0x28e   : > { %9215 = vmatprep.subr.bf16.mxu0 %v10255_v0  ;;  %v2296_v8 = vunpack.c.l.b16 %v2241_v59  ;;  %v2305_v33 = vsel %vm485_vm7, %v2290_v34, %v2304_v21  ;;  %v2548_v59 = vpack.c.bf16 %v2532_v32, %v2532_v32  ;;  %v2412_v34 = vld [vmem:[%s10452_s28 + $0xaa] ss:$0 sm:$0xff]  ;;  %v2427_v21 = vpack.c.bf16 %v11087_v63, %v11087_v63 }
 0x28f   : > { %v2428_v40 = vpack.c.bf16 %v2412_v34, %v2412_v34  ;;  %v2538_v34 = vld [vmem:[%s10452_s28 + $0xf2] ss:$0 sm:$0xff] }
 0x290   : > { %v2310_v16 = vsel %vm481_vm5, %v2296_v8, %v2309_v26  ;;  %v2464_v8 = vunpack.c.l.b16 %v2432_v53  ;;  %v2542_v26 = vld [vmem:[%s10452_s28 + $0x172] ss:$0 sm:$0xff] }
 0x291   : > { %9216 = vmatpush3.bf16.msra.mxu0 %v10992_v27  ;;  %v2311_v24 = vsel %vm483_vm6, %v2297_v39, %v2310_v16  ;;  %v2580_v39 = vunpack.c.l.b16 %v2548_v59  ;;  %v2588_v16 = vunpack.c.l.b16 %v2556_v61 }
 0x292   : > { %9217 = vmatprep.subr.bf16.mxu0 %v10255_v0  ;;  %v2312_v35 = vsel %vm485_vm7, %v2298_v22, %v2311_v24  ;;  %v2419_v22 = vld [vmem:[%s10452_s28 + $0x18a] ss:$0 sm:$0xff] }
 0x293   : > { %v2313_v38 = vpack.c.b16 %v2312_v35, %v2305_v33  ;;  %v2558_v33 = vpack.c.bf16 %v2542_v26, %v2542_v26  ;;  %v2435_v42 = vpack.c.bf16 %v2419_v22, %v2419_v22  ;;  %v2595_v41 = vsel %vm473_vm1, %v2580_v39, %v2579_v13  ;;  %v2414_v26 = vld [vmem:[%s10452_s28 + $0xea] ss:$0 sm:$0xff]  ;;  %v2546_v22 = vld [vmem:[%s10452_s28 + $0x1f2] ss:$0 sm:$0xff] }
 0x294   : > { %v2562_v37 = vpack.c.bf16 %v2546_v22, %v2546_v22  ;;  %v2659_v22 = vld [vmem:[%s10452_s28 + $0x9a] ss:$0 sm:$0xff] }
 0x295   : > { %9218 = vmatpush3.bf16.msra.mxu0 %v11003_v18  ;;  %v2590_v54 = vunpack.c.l.b16 %v2558_v33  ;;  %v2467_v63 = vunpack.c.l.b16 %v2435_v42 }
 0x296   : > { %9219 = vmatprep.subr.bf16.mxu0 %v10255_v0 }
 0x299   : > { %9220 = vmatpush3.bf16.msra.mxu0 %v11016_v48 }
 0x29a   : > { %9221 = vmatprep.subr.bf16.mxu0 %v10255_v0 }
 0x29d   : > { %9222 = vmatpush3.bf16.msra.mxu0 %v11027_v62 }
 0x29e   : > { %9223 = vmatprep.subr.bf16.mxu0 %v10255_v0 }
 0x2a1   : > { %9224 = vmatpush3.bf16.msra.mxu0 %v11040_v10 }
 0x2a2   : > { %v1857_v23 = vpop.f32.mrb[16].mxu1  ;;  %9225 = vmatprep.subr.bf16.mxu0 %v10255_v0 }
 0x2a3   : > { %v1858_v25 = vadd.f32 %v10963_v43, %v1857_v23  ;;  %v9211_v28 = vpop.f32.mrb[17].mxu1  ;;  %v2426_v23 = vpack.c.bf16 %v2410_v56, %v2410_v56  ;;  %v2459_v56 = vunpack.c.l.b16 %v2427_v21 }
 0x2a4   : > { %v1860_v29 = vpop.f32.mrb[18].mxu1  ;;  %v2465_v28 = vunpack.c.l.b16 %v2433_v6  ;;  %v2552_v6 = vpack.c.bf16 %v2536_v46, %v2536_v46 }
 0x2a5   : > { %v1861_v52 = vadd.f32 %v10963_v43, %v1860_v29  ;;  %v9212_v30 = vpop.f32.mrb[19].mxu1  ;;  %9226 = vmatpush3.bf16.msra.mxu0 %v11049_v17  ;;  %v1864_v2 = vmax.f32 %v1858_v25, 0.0  ;;  %v2407_v43 = vld [vmem:[%s10452_s28 + $0xa] ss:$0 sm:$0xff]  ;;  %v2457_v25 = vunpack.c.l.b16 %v2425_v5  ;;  %v2535_v29 = vld [vmem:[%s10452_s28 + $0x92] ss:$0 sm:$0xff]  ;;  %v2458_v32 = vunpack.c.l.b16 %v2426_v23 }
 0x2a6   : > { %9227 = vmatprep.subr.bf16.mxu0 %v10255_v0  ;;  %v2423_v47 = vpack.c.bf16 %v2407_v43, %v2407_v43  ;;  %v2550_v30 = vpack.c.bf16 %v2534_v9, %v2534_v9  ;;  %v2589_v43 = vunpack.c.l.b16 %v2557_v12  ;;  %v2551_v3 = vpack.c.bf16 %v2535_v29, %v2535_v29  ;;  %v2545_v5 = vld [vmem:[%s10452_s28 + $0x1d2] ss:$0 sm:$0xff] }
 0x2a7   : > { %v1865_v36 = vmax.f32 %v1861_v52, 0.0  ;;  %v2543_v52 = vld [vmem:[%s10452_s28 + $0x192] ss:$0 sm:$0xff]  ;;  %v2437_v12 = vpack.c.bf16 %v2421_v55, %v2421_v55  ;;  %v2561_v21 = vpack.c.bf16 %v2545_v5, %v2545_v5 }
 0x2a8   : > { %v2455_v14 = vunpack.c.l.b16 %v2423_v47  ;;  %v2544_v47 = vld [vmem:[%s10452_s28 + $0x1b2] ss:$0 sm:$0xff]  ;;  %v2559_v49 = vpack.c.bf16 %v2543_v52, %v2543_v52  ;;  %v2582_v53 = vunpack.c.l.b16 %v2550_v30  ;;  %v2430_v52 = vpack.c.bf16 %v2414_v26, %v2414_v26  ;;  %v2658_v26 = vld [vmem:[%s10452_s28 + $0x7a] ss:$0 sm:$0xff] }
 0x2a9   : > { %v1866_v60 = vpack.c.bf16 %v1865_v36, %v1864_v2  ;;  %9228 = vmatpush3.bf16.msra.mxu0 %v11060_v31  ;;  %v2478_v2 = vsel %vm473_vm1, %v2464_v8, %v2463_v4  ;;  %v2581_v36 = vunpack.c.l.b16 %v2549_v11  ;;  %v2583_v8 = vunpack.c.l.b16 %v2551_v3  ;;  %v2422_v11 = vld [vmem:[%s10452_s28 + $0x1ea] ss:$0 sm:$0xff] }
 0x2aa   : > { %9253 = vmatprep.subr.bf16.mxu0 %v10255_v0  ;;  %v2471_v35 = vsel %vm473_vm1, %v2456_v7, %v2455_v14  ;;  %v2479_v51 = vsel %vm475_vm2, %v2465_v28, %v2478_v2  ;;  %v2560_v14 = vpack.c.bf16 %v2544_v47, %v2544_v47  ;;  %v2591_v9 = vunpack.c.l.b16 %v2559_v49 }
 0x2ab   : > { %2197 = vmatprep.mubr.bf16.mxu1 %v1866_v60  ;;  %v2602_v60 = vsel %vm473_vm1, %v2588_v16, %v2587_v15  ;;  %v2472_v50 = vsel %vm475_vm2, %v2457_v25, %v2471_v35  ;;  %v2596_v1 = vsel %vm475_vm2, %v2581_v36, %v2595_v41  ;;  %v2460_v15 = vunpack.c.l.b16 %v2428_v40 }
 0x2ac   : > { %2198 = vmatmul.mubr.bf16.vlgmr.msra.gmra.mrb[20].mxu1 %v10984_v20  ;;  %9230 = vmatmul.mubr.bf16.vlgmr.msra.gmra.mrb[24].mxu0 %v2313_v38  ;;  %v2418_v20 = vld [vmem:[%s10452_s28 + $0x16a] ss:$0 sm:$0xff]  ;;  %v2603_v61 = vsel %vm475_vm2, %v2589_v43, %v2602_v60  ;;  %v2473_v7 = vsel %vm477_vm3, %v2458_v32, %v2472_v50  ;;  %v2597_v13 = vsel %vm477_vm3, %v2582_v53, %v2596_v1  ;;  %v2584_v28 = vunpack.c.l.b16 %v2552_v6  ;;  %v2655_v1 = vld [vmem:[%s10452_s28 + $0x1a] ss:$0 sm:$0xff] }
 0x2ad   : > { %9234 = vmatpush3.bf16.msra.mxu1 %v10982_v19  ;;  %9249 = vmatprep.mubr.msk.bf16.mxu1 %vm10256_vm0, %v10255_v0  ;;  %v2434_v24 = vpack.c.bf16 %v2418_v20, %v2418_v20  ;;  %v2420_v38 = vld [vmem:[%s10452_s28 + $0x1aa] ss:$0 sm:$0xff]  ;;  %v2537_v20 = vld [vmem:[%s10452_s28 + $0xd2] ss:$0 sm:$0xff]  ;;  %v2604_v39 = vsel %vm477_vm3, %v2590_v54, %v2603_v61  ;;  %v2592_v29 = vunpack.c.l.b16 %v2560_v14  ;;  %v2438_v30 = vpack.c.bf16 %v2422_v11, %v2422_v11  ;;  %v2657_v6 = vld [vmem:[%s10452_s28 + $0x5a] ss:$0 sm:$0xff] }
 0x2ae   : > { %9235 = vmatprep.subr.bf16.mxu1 %v10255_v0  ;;  %9254 = vmatpush3.bf16.msra.mxu0 %v10982_v19  ;;  %v2436_v59 = vpack.c.bf16 %v2420_v38, %v2420_v38  ;;  %v2553_v23 = vpack.c.bf16 %v2537_v20, %v2537_v20  ;;  %v2598_v33 = vsel %vm479_vm4, %v2583_v8, %v2597_v13  ;;  %v2461_v2 = vunpack.c.l.b16 %v2429_v57  ;;  %v2664_v20 = vld [vmem:[%s10452_s28 + $0x13a] ss:$0 sm:$0xff] }
 0x2af   : > { %9255 = vmatprep.subr.bf16.mxu0 %v10255_v0  ;;  %9269 = vmatprep.mubr.msk.bf16.mxu0 %vm10256_vm0, %v10255_v0  ;;  %v2466_v44 = vunpack.c.l.b16 %v2434_v24  ;;  %v2474_v24 = vsel %vm479_vm4, %v2459_v56, %v2473_v7  ;;  %v2605_v35 = vsel %vm479_vm4, %v2591_v9, %v2604_v39  ;;  %v2469_v36 = vunpack.c.l.b16 %v2437_v12  ;;  %v2656_v56 = vld [vmem:[%s10452_s28 + $0x3a] ss:$0 sm:$0xff] }
 0x2b0   : > { %v2468_v16 = vunpack.c.l.b16 %v2436_v59  ;;  %v2554_v43 = vpack.c.bf16 %v2538_v34, %v2538_v34  ;;  %v2475_v38 = vsel %vm481_vm5, %v2460_v15, %v2474_v24  ;;  %v2585_v42 = vunpack.c.l.b16 %v2553_v23  ;;  %v2665_v14 = vld [vmem:[%s10452_s28 + $0x15a] ss:$0 sm:$0xff] }
 0x2b1   : > { %9236 = vmatpush3.bf16.msra.mxu1 %v10992_v27  ;;  %v2480_v4 = vsel %vm477_vm3, %v2466_v44, %v2479_v51  ;;  %v2593_v41 = vunpack.c.l.b16 %v2561_v21  ;;  %v2599_v60 = vsel %vm481_vm5, %v2584_v28, %v2598_v33  ;;  %v2606_v32 = vsel %vm481_vm5, %v2592_v29, %v2605_v35  ;;  %v2666_v11 = vld [vmem:[%s10452_s28 + $0x17a] ss:$0 sm:$0xff] }
 0x2b2   : > { %9237 = vmatprep.subr.bf16.mxu1 %v10255_v0  ;;  %9256 = vmatpush3.bf16.msra.mxu0 %v10992_v27  ;;  %v2481_v25 = vsel %vm479_vm4, %v2467_v63, %v2480_v4  ;;  %v2462_v44 = vunpack.c.l.b16 %v2430_v52  ;;  %v2470_v46 = vunpack.c.l.b16 %v2438_v30  ;;  %v2476_v47 = vsel %vm483_vm6, %v2461_v2, %v2475_v38  ;;  %v2663_v63 = vld [vmem:[%s10452_s28 + $0x11a] ss:$0 sm:$0xff] }
 0x2b3   : > { %9257 = vmatprep.subr.bf16.mxu0 %v10255_v0  ;;  %v2482_v40 = vsel %vm481_vm5, %v2468_v16, %v2481_v25  ;;  %v2586_v49 = vunpack.c.l.b16 %v2554_v43  ;;  %v2594_v50 = vunpack.c.l.b16 %v2562_v37  ;;  %v2600_v51 = vsel %vm483_vm6, %v2585_v42, %v2599_v60  ;;  %v2660_v52 = vld [vmem:[%s10452_s28 + $0xba] ss:$0 sm:$0xff] }
 0x2b4   : > { %v2483_v3 = vsel %vm483_vm6, %v2469_v36, %v2482_v40  ;;  %v2607_v53 = vsel %vm483_vm6, %v2593_v41, %v2606_v32  ;;  %v2477_v54 = vsel %vm485_vm7, %v2462_v44, %v2476_v47  ;;  %v2671_v7 = vpack.c.bf16 %v2655_v1, %v2655_v1  ;;  %v2668_v30 = vld [vmem:[%s10452_s28 + $0x1ba] ss:$0 sm:$0xff] }
 0x2b5   : > { %9238 = vmatpush3.bf16.msra.mxu1 %v11003_v18  ;;  %v2484_v55 = vsel %vm485_vm7, %v2470_v46, %v2483_v3  ;;  %v2601_v57 = vsel %vm485_vm7, %v2586_v49, %v2600_v51  ;;  %v2608_v59 = vsel %vm485_vm7, %v2594_v50, %v2607_v53  ;;  %v2672_v4 = vpack.c.bf16 %v2656_v56, %v2656_v56  ;;  %v2661_v37 = vld [vmem:[%s10452_s28 + $0xda] ss:$0 sm:$0xff] }
 0x2b6   : > { %9239 = vmatprep.subr.bf16.mxu1 %v10255_v0  ;;  %9258 = vmatpush3.bf16.msra.mxu0 %v11003_v18  ;;  %v2485_v61 = vpack.c.b16 %v2484_v55, %v2477_v54  ;;  %v2609_v5 = vpack.c.b16 %v2608_v59, %v2601_v57  ;;  %v2679_v8 = vpack.c.bf16 %v2663_v63, %v2663_v63  ;;  %v2703_v39 = vunpack.c.l.b16 %v2671_v7  ;;  %v2669_v38 = vld [vmem:[%s10452_s28 + $0x1da] ss:$0 sm:$0xff]  ;;  %v9877_v7 = vld [vmem:[#allocation6 + $0x248] sm:$0xff]  }
 0x2b7   : > { %9259 = vmatprep.subr.bf16.mxu0 %v10255_v0  ;;  %v2680_v9 = vpack.c.bf16 %v2664_v20, %v2664_v20  ;;  %v2673_v12 = vpack.c.bf16 %v2657_v6, %v2657_v6  ;;  %v2681_v13 = vpack.c.bf16 %v2665_v14, %v2665_v14  ;;  %v2704_v15 = vunpack.c.l.b16 %v2672_v4  ;;  %v2662_v44 = vld [vmem:[%s10452_s28 + $0xfa] ss:$0 sm:$0xff]  ;;  %v9876_v14 = vld [vmem:[#allocation6 + $0x200] sm:$0xff]   ;;  %v9878_v4 = vld [vmem:[#allocation6 + $0x208] sm:$0xff]  }
 0x2b8   : > { %v2711_v16 = vunpack.c.l.b16 %v2679_v8  ;;  %v2674_v23 = vpack.c.bf16 %v2658_v26, %v2658_v26  ;;  %v2682_v21 = vpack.c.bf16 %v2666_v11, %v2666_v11  ;;  %v2675_v33 = vpack.c.bf16 %v2659_v22, %v2659_v22  ;;  %v2670_v46 = vld [vmem:[%s10452_s28 + $0x1fa] ss:$0 sm:$0xff]  ;;  %v9879_v8 = vld [vmem:[#allocation6 + $0x250] sm:$0xff]   ;;  %v9883_v11 = vld [vmem:[#allocation6 + $0x260] sm:$0xff]  }
 0x2b9   : > { %9240 = vmatpush3.bf16.msra.mxu1 %v11016_v48  ;;  %v2712_v34 = vunpack.c.l.b16 %v2680_v9  ;;  %v2705_v24 = vunpack.c.l.b16 %v2673_v12  ;;  %v2713_v25 = vunpack.c.l.b16 %v2681_v13  ;;  %v2719_v28 = vsel %vm473_vm1, %v2704_v15, %v2703_v39  ;;  %v9881_v9 = vld [vmem:[#allocation6 + $0x258] sm:$0xff]   ;;  %v9884_v12 = vld [vmem:[#allocation6 + $0x220] sm:$0xff]   ;;  %v9886_v13 = vld [vmem:[#allocation6 + $0x228] sm:$0xff]  }
 0x2ba   : > { %9241 = vmatprep.subr.bf16.mxu1 %v10255_v0  ;;  %9260 = vmatpush3.bf16.msra.mxu0 %v11016_v48  ;;  %v2714_v2 = vunpack.c.l.b16 %v2682_v21  ;;  %v2676_v40 = vpack.c.bf16 %v2660_v52, %v2660_v52  ;;  %v2684_v42 = vpack.c.bf16 %v2668_v30, %v2668_v30  ;;  %v2707_v41 = vunpack.c.l.b16 %v2675_v33  ;;  %v9882_v26 = vld [vmem:[#allocation6 + $0x218] sm:$0xff]   ;;  %v9887_v39 = vld [vmem:[#allocation6 + $0x270] sm:$0xff]   ;;  %v9891_v22 = vld [vmem:[#allocation6 + $0x2c0] sm:$0xff]  }
 0x2bb   : > { %9261 = vmatprep.subr.bf16.mxu0 %v10255_v0  ;;  %v2726_v29 = vsel %vm473_vm1, %v2712_v34, %v2711_v16  ;;  %v2720_v36 = vsel %vm475_vm2, %v2705_v24, %v2719_v28  ;;  %v2677_v47 = vpack.c.bf16 %v2661_v37, %v2661_v37  ;;  %v2685_v3 = vpack.c.bf16 %v2669_v38, %v2669_v38  ;;  %v9888_v15 = vld [vmem:[#allocation6 + $0x230] sm:$0xff]   ;;  %v9889_v16 = vld [vmem:[#allocation6 + $0x278] sm:$0xff]   ;;  %v9894_v21 = vld [vmem:[#allocation6 + $0x288] sm:$0xff]  }
 0x2bc   : > { %v2727_v43 = vsel %vm475_vm2, %v2713_v25, %v2726_v29  ;;  %v2708_v49 = vunpack.c.l.b16 %v2676_v40  ;;  %v2716_v50 = vunpack.c.l.b16 %v2684_v42  ;;  %v2678_v54 = vpack.c.bf16 %v2662_v44, %v2662_v44  ;;  %v9890_v34 = vld [vmem:[#allocation6 + $0x238] sm:$0xff]   ;;  %v9895_v24 = vld [vmem:[#allocation6 + $0x2d0] sm:$0xff]   ;;  %v9899_v52 = vld [vmem:[#allocation6 + $0x2e0] sm:$0xff]  }
 0x2bd   : > { %9242 = vmatpush3.bf16.msra.mxu1 %v11027_v62  ;;  %v2728_v32 = vsel %vm477_vm3, %v2714_v2, %v2727_v43  ;;  %v2709_v55 = vunpack.c.l.b16 %v2677_v47  ;;  %v2717_v57 = vunpack.c.l.b16 %v2685_v3  ;;  %v9896_v25 = vld [vmem:[#allocation6 + $0x290] sm:$0xff]   ;;  %v9897_v28 = vld [vmem:[#allocation6 + $0x2d8] sm:$0xff]   ;;  %v9900_v30 = vld [vmem:[#allocation6 + $0x2a0] sm:$0xff]  }
 0x2be   : > { %9243 = vmatprep.subr.bf16.mxu1 %v10255_v0  ;;  %9262 = vmatpush3.bf16.msra.mxu0 %v11027_v62  ;;  %v9898_v29 = vld [vmem:[#allocation6 + $0x298] sm:$0xff]   ;;  %v9901_v33 = vld [vmem:[#allocation6 + $0x2e8] sm:$0xff]   ;;  %v9904_v2 = vld [vmem:[#allocation6 + $0x2b0] sm:$0xff]  }
 0x2bf   : > { %9263 = vmatprep.subr.bf16.mxu0 %v10255_v0  ;;  %v9906_v43 = vld [vmem:[#allocation6 + $0x2b8] sm:$0xff]  }
 0x2c1   : > { %9244 = vmatpush3.bf16.msra.mxu1 %v11040_v10 }
 0x2c2   : > { %9245 = vmatprep.subr.bf16.mxu1 %v10255_v0  ;;  %9264 = vmatpush3.bf16.msra.mxu0 %v11040_v10 }
 0x2c3   : > { %9265 = vmatprep.subr.bf16.mxu0 %v10255_v0 }
 0x2c5   : > { %9246 = vmatpush3.bf16.msra.mxu1 %v11049_v17 }
 0x2c6   : > { %9247 = vmatprep.subr.bf16.mxu1 %v10255_v0  ;;  %9266 = vmatpush3.bf16.msra.mxu0 %v11049_v17 }
 0x2c7   : > { %9267 = vmatprep.subr.bf16.mxu0 %v10255_v0 }
 0x2c9   : > { %9248 = vmatpush3.bf16.msra.mxu1 %v11060_v31 }
 0x2ca   : > { %9273 = vmatprep.subr.bf16.mxu1 %v10255_v0  ;;  %9268 = vmatpush3.bf16.msra.mxu0 %v11060_v31 }
 0x2cc   : > { %9250 = vmatmul.mubr.bf16.vlgmr.msra.gmra.mrb[24].mxu1 %v2485_v61  ;;  %v2710_v61 = vunpack.c.l.b16 %v2678_v54 }
 0x2cd   : > { %9274 = vmatpush3.bf16.msra.mxu1 %v10982_v19  ;;  %9270 = vmatmul.mubr.bf16.vlgmr.msra.gmra.mrb[28].mxu0 %v2609_v5  ;;  %v2667_v19 = vld [vmem:[%s10452_s28 + $0x19a] ss:$0 sm:$0xff] }
 0x2ce   : > { %9275 = vmatprep.subr.bf16.mxu1 %v10255_v0  ;;  %9289 = vmatprep.mubr.msk.bf16.mxu1 %vm10256_vm0, %v10255_v0  ;;  %v2683_v35 = vpack.c.bf16 %v2667_v19, %v2667_v19  ;;  %v9892_v19 = vld [vmem:[#allocation6 + $0x280] sm:$0xff]  }
 0x2d0   : > { %v2715_v60 = vunpack.c.l.b16 %v2683_v35  ;;  %v9902_v35 = vld [vmem:[#allocation6 + $0x2a8] sm:$0xff]  }
 0x2d1   : > { %9276 = vmatpush3.bf16.msra.mxu1 %v10992_v27  ;;  %v2706_v27 = vunpack.c.l.b16 %v2674_v23  ;;  %v9893_v23 = vld [vmem:[#allocation6 + $0x2c8] sm:$0xff]  }
 0x2d2   : > { %9277 = vmatprep.subr.bf16.mxu1 %v10255_v0  ;;  %v2729_v53 = vsel %vm479_vm4, %v2715_v60, %v2728_v32 }
 0x2d3   : > { %v2730_v1 = vsel %vm481_vm5, %v2716_v50, %v2729_v53 }
 0x2d5   : > { %9278 = vmatpush3.bf16.msra.mxu1 %v11003_v18  ;;  %v2721_v18 = vsel %vm477_vm3, %v2706_v27, %v2720_v36  ;;  %v9903_v27 = vld [vmem:[#allocation6 + $0x2f0] sm:$0xff]   ;;  %v9905_v36 = vld [vmem:[#allocation6 + $0x2f8] sm:$0xff]  }
 0x2d6   : > { %9279 = vmatprep.subr.bf16.mxu1 %v10255_v0  ;;  %v2722_v51 = vsel %vm479_vm4, %v2707_v41, %v2721_v18  ;;  %v11219_v18 = vld [vmem:[%s12649_s2] ss:$0 sm:$0xff] }
 0x2d7   : > { %v2723_v59 = vsel %vm481_vm5, %v2708_v49, %v2722_v51 }
 0x2d8   : > { %v2724_v63 = vsel %vm483_vm6, %v2709_v55, %v2723_v59 }
 0x2d9   : > { %9280 = vmatpush3.bf16.msra.mxu1 %v11016_v48  ;;  %v2686_v48 = vpack.c.bf16 %v2670_v46, %v2670_v46  ;;  %v2725_v20 = vsel %vm485_vm7, %v2710_v61, %v2724_v63 }
 0x2da   : > { %9281 = vmatprep.subr.bf16.mxu1 %v10255_v0 }
 0x2db   : > { %v2718_v56 = vunpack.c.l.b16 %v2686_v48 }
 0x2dd   : > { %9282 = vmatpush3.bf16.msra.mxu1 %v11027_v62  ;;  %v2731_v62 = vsel %vm483_vm6, %v2717_v57, %v2730_v1 }
 0x2de   : > { %9283 = vmatprep.subr.bf16.mxu1 %v10255_v0  ;;  %v2732_v5 = vsel %vm485_vm7, %v2718_v56, %v2731_v62 }
 0x2df   : > { %v2733_v6 = vpack.c.b16 %v2732_v5, %v2725_v20 }
 0x2e1   : > { %9284 = vmatpush3.bf16.msra.mxu1 %v11040_v10  ;;  %v9875_v10 = vld [vmem:[#allocation6 + $0x240] sm:$0xff]  }
 0x2e2   : > { %9285 = vmatprep.subr.bf16.mxu1 %v10255_v0  ;;  %8593 = vmatprep.subr.bf16.mxu0 %v9875_v10 }
 0x2e3   : > { %8594 = vmatpush3.bf16.msra.mxu0 %v9876_v14 }
 0x2e4   : > { %8595 = vmatprep.subr.bf16.mxu0 %v9877_v7 }
 0x2e5   : > { %9286 = vmatpush3.bf16.msra.mxu1 %v11049_v17  ;;  %v9880_v17 = vld [vmem:[#allocation6 + $0x210] sm:$0xff]  }
 0x2e6   : > { %9287 = vmatprep.subr.bf16.mxu1 %v10255_v0 }
 0x2e7   : > { %8596 = vmatpush3.bf16.msra.mxu0 %v9878_v4 }
 0x2e8   : > { %8597 = vmatprep.subr.bf16.mxu0 %v9879_v8 }
 0x2e9   : > { %9288 = vmatpush3.bf16.msra.mxu1 %v11060_v31  ;;  %v9885_v31 = vld [vmem:[#allocation6 + $0x268] sm:$0xff]  }
 0x2ea   : > { %8615 = vmatprep.subr.bf16.mxu1 %v9891_v22  ;;  %v11240_v22 = vld [vmem:[%s12648_s1] sm:$0xff]  }
 0x2eb   : > { %8598 = vmatpush3.bf16.msra.mxu0 %v9880_v17 }
 0x2ec   : > { %9290 = vmatmul.mubr.bf16.vlgmr.msra.gmra.mrb[28].mxu1 %v2733_v6  ;;  %8599 = vmatprep.subr.bf16.mxu0 %v9881_v9 }
 0x2ed   : > { %8616 = vmatpush3.bf16.msra.mxu1 %v9892_v19 }
 0x2ee   : > { %8617 = vmatprep.subr.bf16.mxu1 %v9893_v23  ;;  %v3126_v23 = vld [vmem:[%s10452_s28 + $0x43] ss:$0 sm:$0xff] }
 0x2ef   : > { %8600 = vmatpush3.bf16.msra.mxu0 %v9882_v26 }
 0x2f0   : > { %8601 = vmatprep.subr.bf16.mxu0 %v9883_v11 }
 0x2f1   : > { %8618 = vmatpush3.bf16.msra.mxu1 %v9894_v21  ;;  %v3134_v21 = vld [vmem:[%s10452_s28 + $0x143] ss:$0 sm:$0xff] }
 0x2f2   : > { %8619 = vmatprep.subr.bf16.mxu1 %v9895_v24 }
 0x2f3   : > { %8602 = vmatpush3.bf16.msra.mxu0 %v9884_v12 }
 0x2f4   : > { %8603 = vmatprep.subr.bf16.mxu0 %v9885_v31  ;;  %v3124_v31 = vld [vmem:[%s10452_s28 + $0x3] ss:$0 sm:$0xff] }
 0x2f5   : > { %8620 = vmatpush3.bf16.msra.mxu1 %v9896_v25  ;;  %v3140_v24 = vpack.c.bf16 %v3124_v31, %v3124_v31 }
 0x2f6   : > { %8621 = vmatprep.subr.bf16.mxu1 %v9897_v28 }
 0x2f7   : > { %8604 = vmatpush3.bf16.msra.mxu0 %v9886_v13  ;;  %v3125_v13 = vld [vmem:[%s10452_s28 + $0x23] ss:$0 sm:$0xff] }
 0x2f8   : > { %8605 = vmatprep.subr.bf16.mxu0 %v9887_v39  ;;  %v3141_v25 = vpack.c.bf16 %v3125_v13, %v3125_v13 }
 0x2f9   : > { %8622 = vmatpush3.bf16.msra.mxu1 %v9898_v29 }
 0x2fa   : > { %8623 = vmatprep.subr.bf16.mxu1 %v9899_v52  ;;  %v11250_v52 = vld [vmem:[%s12648_s1 + $0x8] sm:$0xff]  }
 0x2fb   : > { %8606 = vmatpush3.bf16.msra.mxu0 %v9888_v15  ;;  %v3132_v15 = vld [vmem:[%s10452_s28 + $0x103] ss:$0 sm:$0xff] }
 0x2fc   : > { %8607 = vmatprep.subr.bf16.mxu0 %v9889_v16  ;;  %v3133_v16 = vld [vmem:[%s10452_s28 + $0x123] ss:$0 sm:$0xff]  ;;  %v3148_v28 = vpack.c.bf16 %v3132_v15, %v3132_v15 }
 0x2fd   : > { %8624 = vmatpush3.bf16.msra.mxu1 %v9900_v30  ;;  %v3149_v29 = vpack.c.bf16 %v3133_v16, %v3133_v16  ;;  %v3127_v30 = vld [vmem:[%s10452_s28 + $0x63] ss:$0 sm:$0xff] }
 0x2fe   : > { %8625 = vmatprep.subr.bf16.mxu1 %v9901_v33  ;;  %v3135_v33 = vld [vmem:[%s10452_s28 + $0x163] ss:$0 sm:$0xff] }
 0x2ff   : > { %8608 = vmatpush3.bf16.msra.mxu0 %v9890_v34 }
 0x300   : > { %9293 = vmatprep.subr.bf16.mxu0 %v10255_v0 }
 0x301   : > { %8626 = vmatpush3.bf16.msra.mxu1 %v9902_v35  ;;  %v3142_v35 = vpack.c.bf16 %v3126_v23, %v3126_v23 }
 0x302   : > { %8627 = vmatprep.subr.bf16.mxu1 %v9903_v27  ;;  %v3150_v27 = vpack.c.bf16 %v3134_v21, %v3134_v21 }
 0x305   : > { %8628 = vmatpush3.bf16.msra.mxu1 %v9904_v2  ;;  %v3195_v2 = vunpack.c.l.b16 %v3140_v24 }
 0x306   : > { %8629 = vmatprep.subr.bf16.mxu1 %v9905_v36  ;;  %v3196_v36 = vunpack.c.l.b16 %v3141_v25 }
 0x309   : > { %8630 = vmatpush3.bf16.msra.mxu1 %v9906_v43  ;;  %v3203_v43 = vunpack.c.l.b16 %v3148_v28 }
 0x30a   : > { %9313 = vmatprep.subr.bf16.mxu1 %v10255_v0 }
 0x35f   : > { %v8529_v37 = vpop.f32.mrb[20].mxu0 }
 0x360   : > { %v8530_v38 = vpop.f32.mrb[21].mxu0 }
 0x361   : > { %v8531_v40 = vadd.f32 %v8530_v38, %v8529_v37  ;;  %v8532_v42 = vpop.f32.mrb[22].mxu0  ;;  %v3204_v37 = vunpack.c.l.b16 %v3149_v29  ;;  %v11261_v38 = vld [vmem:[%s12648_s1 + $0x10] sm:$0xff]  }
 0x362   : > { %v8533_v41 = vpop.f32.mrb[23].mxu0 }
 0x363   : > { %v8534_v60 = vadd.f32 %v8533_v41, %v8532_v42  ;;  %v3136_v42 = vld [vmem:[%s10452_s28 + $0x183] ss:$0 sm:$0xff]  ;;  %v3143_v41 = vpack.c.bf16 %v3127_v30, %v3127_v30 }
 0x37f   : > { %v8551_v32 = vpop.f32.mrb[20].mxu1  ;;  %v2397_v44 = vpop.f32.mrb[24].mxu0 }
 0x380   : > { %v8552_v46 = vpop.f32.mrb[21].mxu1  ;;  %v2398_v47 = vadd.f32 %v11219_v18, %v2397_v44  ;;  %v9231_v3 = vpop.f32.mrb[25].mxu0  ;;  %v3205_v44 = vunpack.c.l.b16 %v3150_v27 }
 0x381   : > { %v8553_v49 = vadd.f32 %v8552_v46, %v8551_v32  ;;  %v8554_v50 = vpop.f32.mrb[22].mxu1  ;;  %v2400_v51 = vpop.f32.mrb[26].mxu0  ;;  %v3197_v32 = vunpack.c.l.b16 %v3142_v35  ;;  %v3211_v46 = vsel %vm473_vm1, %v3196_v36, %v3195_v2  ;;  %v3129_v3 = vld [vmem:[%s10452_s28 + $0xa3] ss:$0 sm:$0xff]  ;;  %v11318_v2 = vld [vmem:[%s12648_s1 + $0x38] sm:$0xff]  }
 0x382   : > { %v8555_v53 = vpop.f32.mrb[23].mxu1  ;;  %v2404_v54 = vmax.f32 %v2398_v47, 0.0  ;;  %v2401_v48 = vadd.f32 %v11219_v18, %v2400_v51  ;;  %v9232_v55 = vpop.f32.mrb[27].mxu0  ;;  %v3218_v47 = vsel %vm473_vm1, %v3204_v37, %v3203_v43  ;;  %v3152_v51 = vpack.c.bf16 %v3136_v42, %v3136_v42  ;;  %v3320_v42 = vld [vmem:[%s10452_s28 + $0x2b] ss:$0 sm:$0xff] }
 0x383   : > { %v2200_v57 = vadd.f32 %v8553_v49, %v8531_v40  ;;  %v8556_v59 = vadd.f32 %v8555_v53, %v8554_v50  ;;  %v3128_v40 = vld [vmem:[%s10452_s28 + $0x83] ss:$0 sm:$0xff]  ;;  %v11274_v53 = vld [vmem:[%s12648_s1 + $0x18] sm:$0xff]   ;;  %v3212_v55 = vsel %vm475_vm2, %v3197_v32, %v3211_v46  ;;  %v3328_v32 = vld [vmem:[%s10452_s28 + $0x12b] ss:$0 sm:$0xff] }
 0x384   : > { %v2405_v1 = vmax.f32 %v2401_v48, 0.0  ;;  %v3137_v49 = vld [vmem:[%s10452_s28 + $0x1a3] ss:$0 sm:$0xff]  ;;  %v3144_v50 = vpack.c.bf16 %v3128_v40, %v3128_v40 }
 0x385   : > { %v11224_v61 = vadd.f32 %v2200_v57, %v10967_v45  ;;  %v2203_v56 = vadd.f32 %v8556_v59, %v8534_v60  ;;  %v3151_v60 = vpack.c.bf16 %v3135_v33, %v3135_v33  ;;  %v3219_v57 = vsel %vm475_vm2, %v3205_v44, %v3218_v47  ;;  %v3130_v59 = vld [vmem:[%s10452_s28 + $0xc3] ss:$0 sm:$0xff]  ;;  %v3443_v44 = vld [vmem:[%s10452_s28 + $0x13] ss:$0 sm:$0xff] }
 0x386   : > { %v2406_v63 = vpack.c.bf16 %v2405_v1, %v2404_v54  ;;  %v3198_v54 = vunpack.c.l.b16 %v3143_v41  ;;  %v3138_v1 = vld [vmem:[%s10452_s28 + $0x1c3] ss:$0 sm:$0xff]  ;;  %v3444_v47 = vld [vmem:[%s10452_s28 + $0x33] ss:$0 sm:$0xff] }
 0x387   : > { %v11227_v62 = vadd.f32 %v2203_v56, %v10969_v58  ;;  %v3206_v48 = vunpack.c.l.b16 %v3151_v60  ;;  %v3145_v56 = vpack.c.bf16 %v3129_v3, %v3129_v3  ;;  %v3327_v60 = vld [vmem:[%s10452_s28 + $0x10b] ss:$0 sm:$0xff]  ;;  %v3451_v3 = vld [vmem:[%s10452_s28 + $0x113] ss:$0 sm:$0xff] }
 0x39f   : > { %v2521_v20 = vpop.f32.mrb[24].mxu1 }
 0x3a0   : > { %v2522_v5 = vadd.f32 %v11219_v18, %v2521_v20  ;;  %v9251_v6 = vpop.f32.mrb[25].mxu1  ;;  %v2645_v10 = vpop.f32.mrb[28].mxu0  ;;  %v3199_v20 = vunpack.c.l.b16 %v3144_v50 }
 0x3a1   : > { %v2524_v14 = vpop.f32.mrb[26].mxu1  ;;  %v2646_v7 = vadd.f32 %v11219_v18, %v2645_v10  ;;  %v9271_v4 = vpop.f32.mrb[29].mxu0  ;;  %v11285_v6 = vld [vmem:[%s12648_s1 + $0x20] sm:$0xff]   ;;  %v3213_v10 = vsel %vm477_vm3, %v3198_v54, %v3212_v55  ;;  %v3321_v54 = vld [vmem:[%s10452_s28 + $0x4b] ss:$0 sm:$0xff]  ;;  %v3343_v55 = vpack.c.bf16 %v3327_v60, %v3327_v60 }
 0x3a2   : > { %v2528_v45 = vmax.f32 %v2522_v5, 0.0  ;;  %v2525_v8 = vadd.f32 %v11219_v18, %v2524_v14  ;;  %v9252_v17 = vpop.f32.mrb[27].mxu1  ;;  %v2648_v58 = vpop.f32.mrb[30].mxu0  ;;  %v3207_v5 = vunpack.c.l.b16 %v3152_v51  ;;  %v3220_v14 = vsel %vm477_vm3, %v3206_v48, %v3219_v57  ;;  %v3139_v4 = vld [vmem:[%s10452_s28 + $0x1e3] ss:$0 sm:$0xff] }
 0x3a3   : > { %v2652_v9 = vmax.f32 %v2646_v7, 0.0  ;;  %v2649_v26 = vadd.f32 %v11219_v18, %v2648_v58  ;;  %v9272_v11 = vpop.f32.mrb[31].mxu0  ;;  %v3131_v7 = vld [vmem:[%s10452_s28 + $0xe3] ss:$0 sm:$0xff]  ;;  %v3200_v17 = vunpack.c.l.b16 %v3145_v56  ;;  %v3155_v31 = vpack.c.bf16 %v3139_v4, %v3139_v4  ;;  %v3329_v48 = vld [vmem:[%s10452_s28 + $0x14b] ss:$0 sm:$0xff] }
 0x3a4   : > { %v2529_v12 = vmax.f32 %v2525_v8, 0.0  ;;  %v3154_v8 = vpack.c.bf16 %v3138_v1, %v3138_v1  ;;  %v11298_v11 = vld [vmem:[%s12648_s1 + $0x28] sm:$0xff]   ;;  %v3336_v51 = vpack.c.bf16 %v3320_v42, %v3320_v42  ;;  %v3344_v57 = vpack.c.bf16 %v3328_v32, %v3328_v32  ;;  %v3445_v1 = vld [vmem:[%s10452_s28 + $0x53] ss:$0 sm:$0xff] }
 0x3a5   : > { %v2653_v39 = vmax.f32 %v2649_v26, 0.0  ;;  %v3221_v26 = vsel %vm479_vm4, %v3207_v5, %v3220_v14  ;;  %v3210_v21 = vunpack.c.l.b16 %v3155_v31  ;;  %v3453_v56 = vld [vmem:[%s10452_s28 + $0x153] ss:$0 sm:$0xff]  ;;  %v11345_v14 = vld [vmem:[%s10452_s28 + $0x8b] ss:$0 sm:$0xff]  ;;  %v3345_v4 = vpack.c.bf16 %v3329_v48, %v3329_v48 }
 0x3a6   : > { %v2530_v34 = vpack.c.bf16 %v2529_v12, %v2528_v45  ;;  %v3146_v45 = vpack.c.bf16 %v3130_v59, %v3130_v59  ;;  %v3147_v12 = vpack.c.bf16 %v3131_v7, %v3131_v7  ;;  %v3459_v59 = vpack.c.bf16 %v3443_v44, %v3443_v44  ;;  %v3325_v42 = vld [vmem:[%s10452_s28 + $0xcb] ss:$0 sm:$0xff] }
 0x3a7   : > { %v11242_v19 = vpack.c.bf16 %v2653_v39, %v2652_v9  ;;  %v3214_v9 = vsel %vm479_vm4, %v3199_v20, %v3213_v10  ;;  %v3209_v39 = vunpack.c.l.b16 %v3154_v8  ;;  %v3467_v20 = vpack.c.bf16 %v3451_v3, %v3451_v3  ;;  %v3322_v10 = vld [vmem:[%s10452_s28 + $0x6b] ss:$0 sm:$0xff] }
 0x3a8   : > { %3068 = vmatprep.mubr.bf16.mxu0 %v2530_v34  ;;  %v3201_v13 = vunpack.c.l.b16 %v3146_v45  ;;  %v3215_v15 = vsel %vm481_vm5, %v3200_v17, %v3214_v9  ;;  %v11307_v34 = vld [vmem:[%s12648_s1 + $0x30] sm:$0xff]   ;;  %v3202_v23 = vunpack.c.l.b16 %v3147_v12  ;;  %v3337_v7 = vpack.c.bf16 %v3321_v54, %v3321_v54 }
 0x3a9   : > { %3069 = vmatmul.mubr.bf16.vlgmr.msra.gmra.mrb[32].mxu0 %v2406_v63  ;;  %v3153_v63 = vpack.c.bf16 %v3137_v49, %v3137_v49  ;;  %v3452_v49 = vld [vmem:[%s10452_s28 + $0x133] ss:$0 sm:$0xff]  ;;  %v3368_v8 = vunpack.c.l.b16 %v3336_v51  ;;  %v3375_v17 = vunpack.c.l.b16 %v3343_v55  ;;  %v3461_v12 = vpack.c.bf16 %v3445_v1, %v3445_v1  ;;  %v3333_v1 = vld [vmem:[%s10452_s28 + $0x1cb] ss:$0 sm:$0xff] }
 0x3aa   : > { %9294 = vmatpush3.bf16.msra.mxu0 %v11240_v22  ;;  %9309 = vmatprep.mubr.msk.bf16.mxu0 %vm10256_vm0, %v10255_v0  ;;  %v3216_v25 = vsel %vm483_vm6, %v3201_v13, %v3215_v15  ;;  %v3468_v5 = vpack.c.bf16 %v3452_v49, %v3452_v49  ;;  %v3446_v9 = vld [vmem:[%s10452_s28 + $0x73] ss:$0 sm:$0xff]  ;;  %v3469_v31 = vpack.c.bf16 %v3453_v56, %v3453_v56  ;;  %v3491_v13 = vunpack.c.l.b16 %v3459_v59 }
 0x3ab   : > { %9295 = vmatprep.subr.bf16.mxu0 %v10255_v0  ;;  %v3208_v58 = vunpack.c.l.b16 %v3153_v63  ;;  %v3217_v36 = vsel %vm485_vm7, %v3202_v23, %v3216_v25  ;;  %v3460_v63 = vpack.c.bf16 %v3444_v47, %v3444_v47  ;;  %v3499_v15 = vunpack.c.l.b16 %v3467_v20  ;;  %v3324_v23 = vld [vmem:[%s10452_s28 + $0xab] ss:$0 sm:$0xff]  ;;  %v3448_v49 = vld [vmem:[%s10452_s28 + $0xb3] ss:$0 sm:$0xff] }
 0x3ac   : > { %v3339_v25 = vpack.c.bf16 %v11345_v14, %v11345_v14  ;;  %v3340_v60 = vpack.c.bf16 %v3324_v23, %v3324_v23  ;;  %v3341_v56 = vpack.c.bf16 %v3325_v42, %v3325_v42  ;;  %v3450_v23 = vld [vmem:[%s10452_s28 + $0xf3] ss:$0 sm:$0xff] }
 0x3ad   : > { %v3222_v16 = vsel %vm481_vm5, %v3208_v58, %v3221_v26  ;;  %v3376_v58 = vunpack.c.l.b16 %v3344_v57  ;;  %v3454_v26 = vld [vmem:[%s10452_s28 + $0x173] ss:$0 sm:$0xff] }
 0x3ae   : > { %9296 = vmatpush3.bf16.msra.mxu0 %v11250_v52  ;;  %v3223_v28 = vsel %vm483_vm6, %v3209_v39, %v3222_v16  ;;  %v3492_v39 = vunpack.c.l.b16 %v3460_v63  ;;  %v3500_v16 = vunpack.c.l.b16 %v3468_v5 }
 0x3af   : > { %9297 = vmatprep.subr.bf16.mxu0 %v10255_v0  ;;  %v3224_v43 = vsel %vm485_vm7, %v3210_v21, %v3223_v28  ;;  %v3331_v21 = vld [vmem:[%s10452_s28 + $0x18b] ss:$0 sm:$0xff] }
 0x3b0   : > { %v3225_v41 = vpack.c.b16 %v3224_v43, %v3217_v36  ;;  %v3470_v36 = vpack.c.bf16 %v3454_v26, %v3454_v26  ;;  %v3347_v32 = vpack.c.bf16 %v3331_v21, %v3331_v21  ;;  %v3507_v44 = vsel %vm473_vm1, %v3492_v39, %v3491_v13  ;;  %v3326_v26 = vld [vmem:[%s10452_s28 + $0xeb] ss:$0 sm:$0xff]  ;;  %v3458_v21 = vld [vmem:[%s10452_s28 + $0x1f3] ss:$0 sm:$0xff] }
 0x3b1   : > { %v3474_v42 = vpack.c.bf16 %v3458_v21, %v3458_v21  ;;  %v3571_v21 = vld [vmem:[%s10452_s28 + $0x9b] ss:$0 sm:$0xff] }
 0x3b2   : > { %9298 = vmatpush3.bf16.msra.mxu0 %v11261_v38  ;;  %v3502_v59 = vunpack.c.l.b16 %v3470_v36  ;;  %v3379_v14 = vunpack.c.l.b16 %v3347_v32 }
 0x3b3   : > { %9299 = vmatprep.subr.bf16.mxu0 %v10255_v0 }
 0x3b6   : > { %9300 = vmatpush3.bf16.msra.mxu0 %v11274_v53 }
 0x3b7   : > { %9301 = vmatprep.subr.bf16.mxu0 %v10255_v0 }
 0x3ba   : > { %9302 = vmatpush3.bf16.msra.mxu0 %v11285_v6 }
 0x3bb   : > { %9303 = vmatprep.subr.bf16.mxu0 %v10255_v0 }
 0x3be   : > { %9304 = vmatpush3.bf16.msra.mxu0 %v11298_v11 }
 0x3bf   : > { %v2769_v24 = vpop.f32.mrb[28].mxu1  ;;  %9305 = vmatprep.subr.bf16.mxu0 %v10255_v0 }
 0x3c0   : > { %v2770_v29 = vadd.f32 %v11219_v18, %v2769_v24  ;;  %v9291_v30 = vpop.f32.mrb[29].mxu1  ;;  %v3338_v24 = vpack.c.bf16 %v3322_v10, %v3322_v10  ;;  %v3371_v10 = vunpack.c.l.b16 %v3339_v25 }
 0x3c1   : > { %v2772_v33 = vpop.f32.mrb[30].mxu1  ;;  %v3377_v30 = vunpack.c.l.b16 %v3345_v4  ;;  %v3464_v4 = vpack.c.bf16 %v3448_v49, %v3448_v49 }
 0x3c2   : > { %v2773_v35 = vadd.f32 %v11219_v18, %v2772_v33  ;;  %v9292_v27 = vpop.f32.mrb[31].mxu1  ;;  %9306 = vmatpush3.bf16.msra.mxu0 %v11307_v34  ;;  %v2776_v37 = vmax.f32 %v2770_v29, 0.0  ;;  %v3319_v18 = vld [vmem:[%s10452_s28 + $0xb] ss:$0 sm:$0xff]  ;;  %v3369_v29 = vunpack.c.l.b16 %v3337_v7  ;;  %v3447_v33 = vld [vmem:[%s10452_s28 + $0x93] ss:$0 sm:$0xff]  ;;  %v3370_v47 = vunpack.c.l.b16 %v3338_v24 }
 0x3c3   : > { %9307 = vmatprep.subr.bf16.mxu0 %v10255_v0  ;;  %v3335_v50 = vpack.c.bf16 %v3319_v18, %v3319_v18  ;;  %v3462_v27 = vpack.c.bf16 %v3446_v9, %v3446_v9  ;;  %v3501_v18 = vunpack.c.l.b16 %v3469_v31  ;;  %v3463_v51 = vpack.c.bf16 %v3447_v33, %v3447_v33  ;;  %v3457_v7 = vld [vmem:[%s10452_s28 + $0x1d3] ss:$0 sm:$0xff] }
 0x3c4   : > { %v2777_v40 = vmax.f32 %v2773_v35, 0.0  ;;  %v3455_v35 = vld [vmem:[%s10452_s28 + $0x193] ss:$0 sm:$0xff]  ;;  %v3349_v31 = vpack.c.bf16 %v3333_v1, %v3333_v1  ;;  %v3473_v25 = vpack.c.bf16 %v3457_v7, %v3457_v7 }
 0x3c5   : > { %v3367_v45 = vunpack.c.l.b16 %v3335_v50  ;;  %v3456_v50 = vld [vmem:[%s10452_s28 + $0x1b3] ss:$0 sm:$0xff]  ;;  %v3471_v54 = vpack.c.bf16 %v3455_v35, %v3455_v35  ;;  %v3494_v57 = vunpack.c.l.b16 %v3462_v27  ;;  %v3342_v35 = vpack.c.bf16 %v3326_v26, %v3326_v26  ;;  %v3570_v26 = vld [vmem:[%s10452_s28 + $0x7b] ss:$0 sm:$0xff] }
 0x3c6   : > { %v2778_v46 = vpack.c.bf16 %v2777_v40, %v2776_v37  ;;  %9308 = vmatpush3.bf16.msra.mxu0 %v11318_v2  ;;  %v3390_v37 = vsel %vm473_vm1, %v3376_v58, %v3375_v17  ;;  %v3493_v40 = vunpack.c.l.b16 %v3461_v12  ;;  %v3495_v58 = vunpack.c.l.b16 %v3463_v51  ;;  %v3334_v12 = vld [vmem:[%s10452_s28 + $0x1eb] ss:$0 sm:$0xff] }
 0x3c7   : > { %9333 = vmatprep.subr.bf16.mxu0 %v10255_v0  ;;  %v3383_v43 = vsel %vm473_vm1, %v3368_v8, %v3367_v45  ;;  %v3391_v55 = vsel %vm475_vm2, %v3377_v30, %v3390_v37  ;;  %v3472_v45 = vpack.c.bf16 %v3456_v50, %v3456_v50  ;;  %v3503_v9 = vunpack.c.l.b16 %v3471_v54 }
 0x3c8   : > { %3109 = vmatprep.mubr.bf16.mxu1 %v2778_v46  ;;  %v3514_v46 = vsel %vm473_vm1, %v3500_v16, %v3499_v15  ;;  %v3384_v48 = vsel %vm475_vm2, %v3369_v29, %v3383_v43  ;;  %v3508_v20 = vsel %vm475_vm2, %v3493_v40, %v3507_v44  ;;  %v3372_v15 = vunpack.c.l.b16 %v3340_v60 }
 0x3c9   : > { %3110 = vmatmul.mubr.bf16.vlgmr.msra.gmra.mrb[32].mxu1 %v11242_v19  ;;  %9310 = vmatmul.mubr.bf16.vlgmr.msra.gmra.mrb[36].mxu0 %v3225_v41  ;;  %v3330_v19 = vld [vmem:[%s10452_s28 + $0x16b] ss:$0 sm:$0xff]  ;;  %v3515_v5 = vsel %vm475_vm2, %v3501_v18, %v3514_v46  ;;  %v3385_v8 = vsel %vm477_vm3, %v3370_v47, %v3384_v48  ;;  %v3509_v13 = vsel %vm477_vm3, %v3494_v57, %v3508_v20  ;;  %v3496_v30 = vunpack.c.l.b16 %v3464_v4  ;;  %v3567_v20 = vld [vmem:[%s10452_s28 + $0x1b] ss:$0 sm:$0xff] }
 0x3ca   : > { %9314 = vmatpush3.bf16.msra.mxu1 %v11240_v22  ;;  %9329 = vmatprep.mubr.msk.bf16.mxu1 %vm10256_vm0, %v10255_v0  ;;  %v3346_v28 = vpack.c.bf16 %v3330_v19, %v3330_v19  ;;  %v3332_v41 = vld [vmem:[%s10452_s28 + $0x1ab] ss:$0 sm:$0xff]  ;;  %v3449_v19 = vld [vmem:[%s10452_s28 + $0xd3] ss:$0 sm:$0xff]  ;;  %v3516_v39 = vsel %vm477_vm3, %v3502_v59, %v3515_v5  ;;  %v3504_v33 = vunpack.c.l.b16 %v3472_v45  ;;  %v3350_v27 = vpack.c.bf16 %v3334_v12, %v3334_v12  ;;  %v3569_v4 = vld [vmem:[%s10452_s28 + $0x5b] ss:$0 sm:$0xff] }
 0x3cb   : > { %9315 = vmatprep.subr.bf16.mxu1 %v10255_v0  ;;  %9334 = vmatpush3.bf16.msra.mxu0 %v11240_v22  ;;  %v3348_v63 = vpack.c.bf16 %v3332_v41, %v3332_v41  ;;  %v3465_v24 = vpack.c.bf16 %v3449_v19, %v3449_v19  ;;  %v3510_v36 = vsel %vm479_vm4, %v3495_v58, %v3509_v13  ;;  %v3373_v37 = vunpack.c.l.b16 %v3341_v56  ;;  %v3576_v19 = vld [vmem:[%s10452_s28 + $0x13b] ss:$0 sm:$0xff] }
 0x3cc   : > { %9335 = vmatprep.subr.bf16.mxu0 %v10255_v0  ;;  %9349 = vmatprep.mubr.msk.bf16.mxu0 %vm10256_vm0, %v10255_v0  ;;  %v3378_v3 = vunpack.c.l.b16 %v3346_v28  ;;  %v3386_v28 = vsel %vm479_vm4, %v3371_v10, %v3385_v8  ;;  %v3517_v43 = vsel %vm479_vm4, %v3503_v9, %v3516_v39  ;;  %v3381_v40 = vunpack.c.l.b16 %v3349_v31  ;;  %v3568_v10 = vld [vmem:[%s10452_s28 + $0x3b] ss:$0 sm:$0xff] }
 0x3cd   : > { %v3380_v16 = vunpack.c.l.b16 %v3348_v63  ;;  %v3466_v18 = vpack.c.bf16 %v3450_v23, %v3450_v23  ;;  %v3387_v41 = vsel %vm481_vm5, %v3372_v15, %v3386_v28  ;;  %v3497_v32 = vunpack.c.l.b16 %v3465_v24  ;;  %v3577_v45 = vld [vmem:[%s10452_s28 + $0x15b] ss:$0 sm:$0xff] }
 0x3ce   : > { %9316 = vmatpush3.bf16.msra.mxu1 %v11250_v52  ;;  %v3392_v17 = vsel %vm477_vm3, %v3378_v3, %v3391_v55  ;;  %v3505_v44 = vunpack.c.l.b16 %v3473_v25  ;;  %v3511_v46 = vsel %vm481_vm5, %v3496_v30, %v3510_v36  ;;  %v3518_v47 = vsel %vm481_vm5, %v3504_v33, %v3517_v43  ;;  %v3578_v12 = vld [vmem:[%s10452_s28 + $0x17b] ss:$0 sm:$0xff] }
 0x3cf   : > { %9317 = vmatprep.subr.bf16.mxu1 %v10255_v0  ;;  %9336 = vmatpush3.bf16.msra.mxu0 %v11250_v52  ;;  %v3393_v29 = vsel %vm479_vm4, %v3379_v14, %v3392_v17  ;;  %v3374_v3 = vunpack.c.l.b16 %v3342_v35  ;;  %v3382_v49 = vunpack.c.l.b16 %v3350_v27  ;;  %v3388_v50 = vsel %vm483_vm6, %v3373_v37, %v3387_v41  ;;  %v3575_v14 = vld [vmem:[%s10452_s28 + $0x11b] ss:$0 sm:$0xff] }
 0x3d0   : > { %9337 = vmatprep.subr.bf16.mxu0 %v10255_v0  ;;  %v3394_v60 = vsel %vm481_vm5, %v3380_v16, %v3393_v29  ;;  %v3498_v54 = vunpack.c.l.b16 %v3466_v18  ;;  %v3506_v48 = vunpack.c.l.b16 %v3474_v42  ;;  %v3512_v55 = vsel %vm483_vm6, %v3497_v32, %v3511_v46  ;;  %v3572_v35 = vld [vmem:[%s10452_s28 + $0xbb] ss:$0 sm:$0xff] }
 0x3d1   : > { %v3395_v51 = vsel %vm483_vm6, %v3381_v40, %v3394_v60  ;;  %v3519_v57 = vsel %vm483_vm6, %v3505_v44, %v3518_v47  ;;  %v3389_v59 = vsel %vm485_vm7, %v3374_v3, %v3388_v50  ;;  %v3583_v8 = vpack.c.bf16 %v3567_v20, %v3567_v20  ;;  %v3580_v27 = vld [vmem:[%s10452_s28 + $0x1bb] ss:$0 sm:$0xff] }
 0x3d2   : > { %9318 = vmatpush3.bf16.msra.mxu1 %v11261_v38  ;;  %v3396_v1 = vsel %vm485_vm7, %v3382_v49, %v3395_v51  ;;  %v3513_v56 = vsel %vm485_vm7, %v3498_v54, %v3512_v55  ;;  %v3520_v63 = vsel %vm485_vm7, %v3506_v48, %v3519_v57  ;;  %v3584_v17 = vpack.c.bf16 %v3568_v10, %v3568_v10  ;;  %v3573_v42 = vld [vmem:[%s10452_s28 + $0xdb] ss:$0 sm:$0xff] }
 0x3d3   : > { %9319 = vmatprep.subr.bf16.mxu1 %v10255_v0  ;;  %9338 = vmatpush3.bf16.msra.mxu0 %v11261_v38  ;;  %v3397_v5 = vpack.c.b16 %v3396_v1, %v3389_v59  ;;  %v3521_v7 = vpack.c.b16 %v3520_v63, %v3513_v56  ;;  %v3591_v58 = vpack.c.bf16 %v3575_v14, %v3575_v14  ;;  %v3615_v39 = vunpack.c.l.b16 %v3583_v8  ;;  %v3581_v41 = vld [vmem:[%s10452_s28 + $0x1db] ss:$0 sm:$0xff]  ;;  %v9917_v8 = vld [vmem:[#allocation6 + $0x348] sm:$0xff]  }
 0x3d4   : > { %9339 = vmatprep.subr.bf16.mxu0 %v10255_v0  ;;  %v3592_v9 = vpack.c.bf16 %v3576_v19, %v3576_v19  ;;  %v3585_v31 = vpack.c.bf16 %v3569_v4, %v3569_v4  ;;  %v3593_v13 = vpack.c.bf16 %v3577_v45, %v3577_v45  ;;  %v3616_v15 = vunpack.c.l.b16 %v3584_v17  ;;  %v3574_v3 = vld [vmem:[%s10452_s28 + $0xfb] ss:$0 sm:$0xff]  ;;  %v9916_v45 = vld [vmem:[#allocation6 + $0x300] sm:$0xff]   ;;  %v9918_v17 = vld [vmem:[#allocation6 + $0x308] sm:$0xff]  }
 0x3d5   : > { %v3623_v16 = vunpack.c.l.b16 %v3591_v58  ;;  %v3586_v24 = vpack.c.bf16 %v3570_v26, %v3570_v26  ;;  %v3594_v25 = vpack.c.bf16 %v3578_v12, %v3578_v12  ;;  %v3587_v36 = vpack.c.bf16 %v3571_v21, %v3571_v21  ;;  %v3582_v49 = vld [vmem:[%s10452_s28 + $0x1fb] ss:$0 sm:$0xff]  ;;  %v9919_v58 = vld [vmem:[#allocation6 + $0x350] sm:$0xff]   ;;  %v9923_v12 = vld [vmem:[#allocation6 + $0x360] sm:$0xff]  }
 0x3d6   : > { %9320 = vmatpush3.bf16.msra.mxu1 %v11274_v53  ;;  %v3624_v23 = vunpack.c.l.b16 %v3592_v9  ;;  %v3617_v28 = vunpack.c.l.b16 %v3585_v31  ;;  %v3625_v29 = vunpack.c.l.b16 %v3593_v13  ;;  %v3631_v30 = vsel %vm473_vm1, %v3616_v15, %v3615_v39  ;;  %v9921_v9 = vld [vmem:[#allocation6 + $0x358] sm:$0xff]   ;;  %v9924_v31 = vld [vmem:[#allocation6 + $0x320] sm:$0xff]   ;;  %v9926_v13 = vld [vmem:[#allocation6 + $0x328] sm:$0xff]  }
 0x3d7   : > { %9321 = vmatprep.subr.bf16.mxu1 %v10255_v0  ;;  %9340 = vmatpush3.bf16.msra.mxu0 %v11274_v53  ;;  %v3626_v37 = vunpack.c.l.b16 %v3594_v25  ;;  %v3588_v60 = vpack.c.bf16 %v3572_v35, %v3572_v35  ;;  %v3596_v32 = vpack.c.bf16 %v3580_v27, %v3580_v27  ;;  %v3619_v44 = vunpack.c.l.b16 %v3587_v36  ;;  %v9922_v26 = vld [vmem:[#allocation6 + $0x318] sm:$0xff]   ;;  %v9927_v39 = vld [vmem:[#allocation6 + $0x370] sm:$0xff]   ;;  %v9931_v21 = vld [vmem:[#allocation6 + $0x3c0] sm:$0xff]  }
 0x3d8   : > { %9341 = vmatprep.subr.bf16.mxu0 %v10255_v0  ;;  %v3638_v33 = vsel %vm473_vm1, %v3624_v23, %v3623_v16  ;;  %v3632_v40 = vsel %vm475_vm2, %v3617_v28, %v3631_v30  ;;  %v3589_v50 = vpack.c.bf16 %v3573_v42, %v3573_v42  ;;  %v3597_v51 = vpack.c.bf16 %v3581_v41, %v3581_v41  ;;  %v9928_v15 = vld [vmem:[#allocation6 + $0x330] sm:$0xff]   ;;  %v9929_v16 = vld [vmem:[#allocation6 + $0x378] sm:$0xff]   ;;  %v9934_v25 = vld [vmem:[#allocation6 + $0x388] sm:$0xff]  }
 0x3d9   : > { %v3639_v18 = vsel %vm475_vm2, %v3625_v29, %v3638_v33  ;;  %v3620_v54 = vunpack.c.l.b16 %v3588_v60  ;;  %v3628_v48 = vunpack.c.l.b16 %v3596_v32  ;;  %v3590_v59 = vpack.c.bf16 %v3574_v3, %v3574_v3  ;;  %v9930_v23 = vld [vmem:[#allocation6 + $0x338] sm:$0xff]   ;;  %v9935_v28 = vld [vmem:[#allocation6 + $0x3d0] sm:$0xff]   ;;  %v9939_v35 = vld [vmem:[#allocation6 + $0x3e0] sm:$0xff]  }
 0x3da   : > { %9322 = vmatpush3.bf16.msra.mxu1 %v11285_v6  ;;  %v3640_v47 = vsel %vm477_vm3, %v3626_v37, %v3639_v18  ;;  %v3621_v1 = vunpack.c.l.b16 %v3589_v50  ;;  %v3629_v56 = vunpack.c.l.b16 %v3597_v51  ;;  %v9936_v29 = vld [vmem:[#allocation6 + $0x390] sm:$0xff]   ;;  %v9937_v30 = vld [vmem:[#allocation6 + $0x3d8] sm:$0xff]   ;;  %v9940_v27 = vld [vmem:[#allocation6 + $0x3a0] sm:$0xff]  }
 0x3db   : > { %9323 = vmatprep.subr.bf16.mxu1 %v10255_v0  ;;  %9342 = vmatpush3.bf16.msra.mxu0 %v11285_v6  ;;  %v9938_v33 = vld [vmem:[#allocation6 + $0x398] sm:$0xff]   ;;  %v9941_v36 = vld [vmem:[#allocation6 + $0x3e8] sm:$0xff]   ;;  %v9944_v37 = vld [vmem:[#allocation6 + $0x3b0] sm:$0xff]  }
 0x3dc   : > { %9343 = vmatprep.subr.bf16.mxu0 %v10255_v0  ;;  %v9946_v18 = vld [vmem:[#allocation6 + $0x3b8] sm:$0xff]  }
 0x3de   : > { %9324 = vmatpush3.bf16.msra.mxu1 %v11298_v11 }
 0x3df   : > { %9325 = vmatprep.subr.bf16.mxu1 %v10255_v0  ;;  %9344 = vmatpush3.bf16.msra.mxu0 %v11298_v11 }
 0x3e0   : > { %9345 = vmatprep.subr.bf16.mxu0 %v10255_v0 }
 0x3e2   : > { %9326 = vmatpush3.bf16.msra.mxu1 %v11307_v34 }
 0x3e3   : > { %9327 = vmatprep.subr.bf16.mxu1 %v10255_v0  ;;  %9346 = vmatpush3.bf16.msra.mxu0 %v11307_v34 }
 0x3e4   : > { %9347 = vmatprep.subr.bf16.mxu0 %v10255_v0 }
 0x3e6   : > { %9328 = vmatpush3.bf16.msra.mxu1 %v11318_v2 }
 0x3e7   : > { %9353 = vmatprep.subr.bf16.mxu1 %v10255_v0  ;;  %9348 = vmatpush3.bf16.msra.mxu0 %v11318_v2 }
 0x3e9   : > { %9330 = vmatmul.mubr.bf16.vlgmr.msra.gmra.mrb[36].mxu1 %v3397_v5  ;;  %v3622_v5 = vunpack.c.l.b16 %v3590_v59 }
 0x3ea   : > { %9354 = vmatpush3.bf16.msra.mxu1 %v11240_v22  ;;  %9350 = vmatmul.mubr.bf16.vlgmr.msra.gmra.mrb[40].mxu0 %v3521_v7  ;;  %v3579_v22 = vld [vmem:[%s10452_s28 + $0x19b] ss:$0 sm:$0xff] }
 0x3eb   : > { %9355 = vmatprep.subr.bf16.mxu1 %v10255_v0  ;;  %9369 = vmatprep.mubr.msk.bf16.mxu1 %vm10256_vm0, %v10255_v0  ;;  %v3595_v43 = vpack.c.bf16 %v3579_v22, %v3579_v22  ;;  %v9932_v22 = vld [vmem:[#allocation6 + $0x380] sm:$0xff]  }
 0x3ed   : > { %v3627_v46 = vunpack.c.l.b16 %v3595_v43  ;;  %v9942_v43 = vld [vmem:[#allocation6 + $0x3a8] sm:$0xff]  }
 0x3ee   : > { %9356 = vmatpush3.bf16.msra.mxu1 %v11250_v52  ;;  %v3618_v52 = vunpack.c.l.b16 %v3586_v24  ;;  %v9933_v24 = vld [vmem:[#allocation6 + $0x3c8] sm:$0xff]  }
 0x3ef   : > { %9357 = vmatprep.subr.bf16.mxu1 %v10255_v0  ;;  %v3641_v57 = vsel %vm479_vm4, %v3627_v46, %v3640_v47 }
 0x3f0   : > { %v3642_v20 = vsel %vm481_vm5, %v3628_v48, %v3641_v57 }
 0x3f2   : > { %9358 = vmatpush3.bf16.msra.mxu1 %v11261_v38  ;;  %v3633_v38 = vsel %vm477_vm3, %v3618_v52, %v3632_v40  ;;  %v9943_v52 = vld [vmem:[#allocation6 + $0x3f0] sm:$0xff]   ;;  %v9945_v40 = vld [vmem:[#allocation6 + $0x3f8] sm:$0xff]  }
 0x3f3   : > { %9359 = vmatprep.subr.bf16.mxu1 %v10255_v0  ;;  %v3634_v55 = vsel %vm479_vm4, %v3619_v44, %v3633_v38  ;;  %v11477_v38 = vld [vmem:[%s12649_s2] ss:$0 sm:$0xff] }
 0x3f4   : > { %v3635_v63 = vsel %vm481_vm5, %v3620_v54, %v3634_v55 }
 0x3f5   : > { %v3636_v14 = vsel %vm483_vm6, %v3621_v1, %v3635_v63 }
 0x3f6   : > { %9360 = vmatpush3.bf16.msra.mxu1 %v11274_v53  ;;  %v3598_v53 = vpack.c.bf16 %v3582_v49, %v3582_v49  ;;  %v3637_v19 = vsel %vm485_vm7, %v3622_v5, %v3636_v14 }
 0x3f7   : > { %9361 = vmatprep.subr.bf16.mxu1 %v10255_v0 }
 0x3f8   : > { %v3630_v10 = vunpack.c.l.b16 %v3598_v53 }
 0x3fa   : > { %9362 = vmatpush3.bf16.msra.mxu1 %v11285_v6  ;;  %v3643_v6 = vsel %vm483_vm6, %v3629_v56, %v3642_v20 }
 0x3fb   : > { %9363 = vmatprep.subr.bf16.mxu1 %v10255_v0  ;;  %v3644_v7 = vsel %vm485_vm7, %v3630_v10, %v3643_v6 }
 0x3fc   : > { %v3645_v4 = vpack.c.b16 %v3644_v7, %v3637_v19 }
 0x3fe   : > { %9364 = vmatpush3.bf16.msra.mxu1 %v11298_v11  ;;  %v9915_v11 = vld [vmem:[#allocation6 + $0x340] sm:$0xff]  }
 0x3ff   : > { %9365 = vmatprep.subr.bf16.mxu1 %v10255_v0  ;;  %8673 = vmatprep.subr.bf16.mxu0 %v9915_v11 }
 0x400   : > { %8674 = vmatpush3.bf16.msra.mxu0 %v9916_v45 }
 0x401   : > { %8675 = vmatprep.subr.bf16.mxu0 %v9917_v8 }
 0x402   : > { %9366 = vmatpush3.bf16.msra.mxu1 %v11307_v34  ;;  %v9920_v34 = vld [vmem:[#allocation6 + $0x310] sm:$0xff]  }
 0x403   : > { %9367 = vmatprep.subr.bf16.mxu1 %v10255_v0 }
 0x404   : > { %8676 = vmatpush3.bf16.msra.mxu0 %v9918_v17 }
 0x405   : > { %8677 = vmatprep.subr.bf16.mxu0 %v9919_v58 }
 0x406   : > { %9368 = vmatpush3.bf16.msra.mxu1 %v11318_v2  ;;  %v9925_v2 = vld [vmem:[#allocation6 + $0x368] sm:$0xff]  }
 0x407   : > { %8695 = vmatprep.subr.bf16.mxu1 %v9931_v21  ;;  %v11498_v21 = vld [vmem:[%s12648_s1] sm:$0xff]  }
 0x408   : > { %8678 = vmatpush3.bf16.msra.mxu0 %v9920_v34 }
 0x409   : > { %9370 = vmatmul.mubr.bf16.vlgmr.msra.gmra.mrb[40].mxu1 %v3645_v4  ;;  %8679 = vmatprep.subr.bf16.mxu0 %v9921_v9 }
 0x40a   : > { %8696 = vmatpush3.bf16.msra.mxu1 %v9932_v22 }
 0x40b   : > { %8697 = vmatprep.subr.bf16.mxu1 %v9933_v24  ;;  %v4038_v24 = vld [vmem:[%s10452_s28 + $0x44] ss:$0 sm:$0xff] }
 0x40c   : > { %8680 = vmatpush3.bf16.msra.mxu0 %v9922_v26 }
 0x40d   : > { %8681 = vmatprep.subr.bf16.mxu0 %v9923_v12 }
 0x40e   : > { %8698 = vmatpush3.bf16.msra.mxu1 %v9934_v25  ;;  %v4046_v25 = vld [vmem:[%s10452_s28 + $0x144] ss:$0 sm:$0xff] }
 0x40f   : > { %8699 = vmatprep.subr.bf16.mxu1 %v9935_v28 }
 0x410   : > { %8682 = vmatpush3.bf16.msra.mxu0 %v9924_v31 }
 0x411   : > { %8683 = vmatprep.subr.bf16.mxu0 %v9925_v2  ;;  %v4036_v2 = vld [vmem:[%s10452_s28 + $0x4] ss:$0 sm:$0xff] }
 0x412   : > { %8700 = vmatpush3.bf16.msra.mxu1 %v9936_v29  ;;  %v4052_v28 = vpack.c.bf16 %v4036_v2, %v4036_v2 }
 0x413   : > { %8701 = vmatprep.subr.bf16.mxu1 %v9937_v30 }
 0x414   : > { %8684 = vmatpush3.bf16.msra.mxu0 %v9926_v13  ;;  %v4037_v13 = vld [vmem:[%s10452_s28 + $0x24] ss:$0 sm:$0xff] }
 0x415   : > { %8685 = vmatprep.subr.bf16.mxu0 %v9927_v39  ;;  %v4053_v29 = vpack.c.bf16 %v4037_v13, %v4037_v13 }
 0x416   : > { %8702 = vmatpush3.bf16.msra.mxu1 %v9938_v33 }
 0x417   : > { %8703 = vmatprep.subr.bf16.mxu1 %v9939_v35  ;;  %v11508_v35 = vld [vmem:[%s12648_s1 + $0x8] sm:$0xff]  }
 0x418   : > { %8686 = vmatpush3.bf16.msra.mxu0 %v9928_v15  ;;  %v4044_v15 = vld [vmem:[%s10452_s28 + $0x104] ss:$0 sm:$0xff] }
 0x419   : > { %8687 = vmatprep.subr.bf16.mxu0 %v9929_v16  ;;  %v4045_v16 = vld [vmem:[%s10452_s28 + $0x124] ss:$0 sm:$0xff]  ;;  %v4060_v30 = vpack.c.bf16 %v4044_v15, %v4044_v15 }
 0x41a   : > { %8704 = vmatpush3.bf16.msra.mxu1 %v9940_v27  ;;  %v4061_v33 = vpack.c.bf16 %v4045_v16, %v4045_v16  ;;  %v4039_v27 = vld [vmem:[%s10452_s28 + $0x64] ss:$0 sm:$0xff] }
 0x41b   : > { %8705 = vmatprep.subr.bf16.mxu1 %v9941_v36  ;;  %v4047_v36 = vld [vmem:[%s10452_s28 + $0x164] ss:$0 sm:$0xff] }
 0x41c   : > { %8688 = vmatpush3.bf16.msra.mxu0 %v9930_v23 }
 0x41d   : > { %9373 = vmatprep.subr.bf16.mxu0 %v10255_v0 }
 0x41e   : > { %8706 = vmatpush3.bf16.msra.mxu1 %v9942_v43  ;;  %v4054_v43 = vpack.c.bf16 %v4038_v24, %v4038_v24 }
 0x41f   : > { %8707 = vmatprep.subr.bf16.mxu1 %v9943_v52  ;;  %v4062_v52 = vpack.c.bf16 %v4046_v25, %v4046_v25 }
 0x422   : > { %8708 = vmatpush3.bf16.msra.mxu1 %v9944_v37  ;;  %v4107_v37 = vunpack.c.l.b16 %v4052_v28 }
 0x423   : > { %8709 = vmatprep.subr.bf16.mxu1 %v9945_v40  ;;  %v4108_v40 = vunpack.c.l.b16 %v4053_v29 }
 0x426   : > { %8710 = vmatpush3.bf16.msra.mxu1 %v9946_v18  ;;  %v4115_v18 = vunpack.c.l.b16 %v4060_v30 }
 0x427   : > { %9393 = vmatprep.subr.bf16.mxu1 %v10255_v0 }
 0x47c   : > { %v8609_v42 = vpop.f32.mrb[32].mxu0 }
 0x47d   : > { %v8610_v41 = vpop.f32.mrb[33].mxu0 }
 0x47e   : > { %v8611_v60 = vadd.f32 %v8610_v41, %v8609_v42  ;;  %v8612_v32 = vpop.f32.mrb[34].mxu0  ;;  %v4116_v42 = vunpack.c.l.b16 %v4061_v33  ;;  %v11519_v41 = vld [vmem:[%s12648_s1 + $0x10] sm:$0xff]  }
 0x47f   : > { %v8613_v44 = vpop.f32.mrb[35].mxu0 }
 0x480   : > { %v8614_v46 = vadd.f32 %v8613_v44, %v8612_v32  ;;  %v4048_v32 = vld [vmem:[%s10452_s28 + $0x184] ss:$0 sm:$0xff]  ;;  %v4055_v44 = vpack.c.bf16 %v4039_v27, %v4039_v27 }
 0x49c   : > { %v8631_v47 = vpop.f32.mrb[32].mxu1  ;;  %v3309_v3 = vpop.f32.mrb[36].mxu0 }
 0x49d   : > { %v8632_v49 = vpop.f32.mrb[33].mxu1  ;;  %v3310_v50 = vadd.f32 %v11477_v38, %v3309_v3  ;;  %v9311_v51 = vpop.f32.mrb[37].mxu0  ;;  %v4117_v3 = vunpack.c.l.b16 %v4062_v52 }
 0x49e   : > { %v8633_v54 = vadd.f32 %v8632_v49, %v8631_v47  ;;  %v8634_v48 = vpop.f32.mrb[34].mxu1  ;;  %v3312_v55 = vpop.f32.mrb[38].mxu0  ;;  %v4109_v47 = vunpack.c.l.b16 %v4054_v43  ;;  %v4123_v49 = vsel %vm473_vm1, %v4108_v40, %v4107_v37  ;;  %v4041_v51 = vld [vmem:[%s10452_s28 + $0xa4] ss:$0 sm:$0xff]  ;;  %v11576_v37 = vld [vmem:[%s12648_s1 + $0x38] sm:$0xff]  }
 0x49f   : > { %v8635_v57 = vpop.f32.mrb[35].mxu1  ;;  %v3316_v59 = vmax.f32 %v3310_v50, 0.0  ;;  %v3313_v53 = vadd.f32 %v11477_v38, %v3312_v55  ;;  %v9312_v1 = vpop.f32.mrb[39].mxu0  ;;  %v4130_v50 = vsel %vm473_vm1, %v4116_v42, %v4115_v18  ;;  %v4064_v55 = vpack.c.bf16 %v4048_v32, %v4048_v32  ;;  %v4232_v32 = vld [vmem:[%s10452_s28 + $0x2c] ss:$0 sm:$0xff] }
 0x4a0   : > { %v3112_v56 = vadd.f32 %v8633_v54, %v8611_v60  ;;  %v8636_v63 = vadd.f32 %v8635_v57, %v8634_v48  ;;  %v4040_v60 = vld [vmem:[%s10452_s28 + $0x84] ss:$0 sm:$0xff]  ;;  %v11532_v57 = vld [vmem:[%s12648_s1 + $0x18] sm:$0xff]   ;;  %v4124_v1 = vsel %vm475_vm2, %v4109_v47, %v4123_v49  ;;  %v4240_v47 = vld [vmem:[%s10452_s28 + $0x12c] ss:$0 sm:$0xff] }
 0x4a1   : > { %v3317_v20 = vmax.f32 %v3313_v53, 0.0  ;;  %v4049_v54 = vld [vmem:[%s10452_s28 + $0x1a4] ss:$0 sm:$0xff]  ;;  %v4056_v48 = vpack.c.bf16 %v4040_v60, %v4040_v60 }
 0x4a2   : > { %v11482_v5 = vadd.f32 %v3112_v56, %v11224_v61  ;;  %v3115_v10 = vadd.f32 %v8636_v63, %v8614_v46  ;;  %v4063_v46 = vpack.c.bf16 %v4047_v36, %v4047_v36  ;;  %v4131_v56 = vsel %vm475_vm2, %v4117_v3, %v4130_v50  ;;  %v4042_v63 = vld [vmem:[%s10452_s28 + $0xc4] ss:$0 sm:$0xff]  ;;  %v4355_v3 = vld [vmem:[%s10452_s28 + $0x14] ss:$0 sm:$0xff] }
 0x4a3   : > { %v3318_v14 = vpack.c.bf16 %v3317_v20, %v3316_v59  ;;  %v4110_v59 = vunpack.c.l.b16 %v4055_v44  ;;  %v4050_v20 = vld [vmem:[%s10452_s28 + $0x1c4] ss:$0 sm:$0xff]  ;;  %v4356_v50 = vld [vmem:[%s10452_s28 + $0x34] ss:$0 sm:$0xff] }
 0x4a4   : > { %v11485_v6 = vadd.f32 %v3115_v10, %v11227_v62  ;;  %v4118_v53 = vunpack.c.l.b16 %v4063_v46  ;;  %v4057_v10 = vpack.c.bf16 %v4041_v51, %v4041_v51  ;;  %v4239_v46 = vld [vmem:[%s10452_s28 + $0x10c] ss:$0 sm:$0xff]  ;;  %v4363_v51 = vld [vmem:[%s10452_s28 + $0x114] ss:$0 sm:$0xff] }
 0x4bc   : > { %v3433_v19 = vpop.f32.mrb[36].mxu1 }
 0x4bd   : > { %v3434_v7 = vadd.f32 %v11477_v38, %v3433_v19  ;;  %v9331_v4 = vpop.f32.mrb[37].mxu1  ;;  %v3557_v11 = vpop.f32.mrb[40].mxu0  ;;  %v4111_v19 = vunpack.c.l.b16 %v4056_v48 }
 0x4be   : > { %v3436_v45 = vpop.f32.mrb[38].mxu1  ;;  %v3558_v8 = vadd.f32 %v11477_v38, %v3557_v11  ;;  %v9351_v17 = vpop.f32.mrb[41].mxu0  ;;  %v11543_v4 = vld [vmem:[%s12648_s1 + $0x20] sm:$0xff]   ;;  %v4125_v11 = vsel %vm477_vm3, %v4110_v59, %v4124_v1  ;;  %v4233_v59 = vld [vmem:[%s10452_s28 + $0x4c] ss:$0 sm:$0xff]  ;;  %v4255_v1 = vpack.c.bf16 %v4239_v46, %v4239_v46 }
 0x4bf   : > { %v3440_v61 = vmax.f32 %v3434_v7, 0.0  ;;  %v3437_v58 = vadd.f32 %v11477_v38, %v3436_v45  ;;  %v9332_v34 = vpop.f32.mrb[39].mxu1  ;;  %v3560_v62 = vpop.f32.mrb[42].mxu0  ;;  %v4119_v7 = vunpack.c.l.b16 %v4064_v55  ;;  %v4132_v45 = vsel %vm477_vm3, %v4118_v53, %v4131_v56  ;;  %v4051_v17 = vld [vmem:[%s10452_s28 + $0x1e4] ss:$0 sm:$0xff] }
 0x4c0   : > { %v3564_v9 = vmax.f32 %v3558_v8, 0.0  ;;  %v3561_v26 = vadd.f32 %v11477_v38, %v3560_v62  ;;  %v9352_v12 = vpop.f32.mrb[43].mxu0  ;;  %v4043_v8 = vld [vmem:[%s10452_s28 + $0xe4] ss:$0 sm:$0xff]  ;;  %v4112_v34 = vunpack.c.l.b16 %v4057_v10  ;;  %v4067_v2 = vpack.c.bf16 %v4051_v17, %v4051_v17  ;;  %v4241_v53 = vld [vmem:[%s10452_s28 + $0x14c] ss:$0 sm:$0xff] }
 0x4c1   : > { %v3441_v31 = vmax.f32 %v3437_v58, 0.0  ;;  %v4066_v58 = vpack.c.bf16 %v4050_v20, %v4050_v20  ;;  %v11556_v12 = vld [vmem:[%s12648_s1 + $0x28] sm:$0xff]   ;;  %v4248_v55 = vpack.c.bf16 %v4232_v32, %v4232_v32  ;;  %v4256_v56 = vpack.c.bf16 %v4240_v47, %v4240_v47  ;;  %v4357_v20 = vld [vmem:[%s10452_s28 + $0x54] ss:$0 sm:$0xff] }
 0x4c2   : > { %v3565_v39 = vmax.f32 %v3561_v26, 0.0  ;;  %v4133_v26 = vsel %vm479_vm4, %v4119_v7, %v4132_v45  ;;  %v4122_v25 = vunpack.c.l.b16 %v4067_v2  ;;  %v4365_v10 = vld [vmem:[%s10452_s28 + $0x154] ss:$0 sm:$0xff]  ;;  %v11603_v45 = vld [vmem:[%s10452_s28 + $0x8c] ss:$0 sm:$0xff]  ;;  %v4257_v17 = vpack.c.bf16 %v4241_v53, %v4241_v53 }
 0x4c3   : > { %v3442_v23 = vpack.c.bf16 %v3441_v31, %v3440_v61  ;;  %v4058_v61 = vpack.c.bf16 %v4042_v63, %v4042_v63  ;;  %v4059_v31 = vpack.c.bf16 %v4043_v8, %v4043_v8  ;;  %v4371_v63 = vpack.c.bf16 %v4355_v3, %v4355_v3  ;;  %v4237_v32 = vld [vmem:[%s10452_s28 + $0xcc] ss:$0 sm:$0xff] }
 0x4c4   : > { %v11500_v22 = vpack.c.bf16 %v3565_v39, %v3564_v9  ;;  %v4126_v9 = vsel %vm479_vm4, %v4111_v19, %v4125_v11  ;;  %v4121_v39 = vunpack.c.l.b16 %v4066_v58  ;;  %v4379_v19 = vpack.c.bf16 %v4363_v51, %v4363_v51  ;;  %v4234_v11 = vld [vmem:[%s10452_s28 + $0x6c] ss:$0 sm:$0xff] }
 0x4c5   : > { %3980 = vmatprep.mubr.bf16.mxu0 %v3442_v23  ;;  %v4113_v13 = vunpack.c.l.b16 %v4058_v61  ;;  %v4127_v15 = vsel %vm481_vm5, %v4112_v34, %v4126_v9  ;;  %v11565_v23 = vld [vmem:[%s12648_s1 + $0x30] sm:$0xff]   ;;  %v4114_v24 = vunpack.c.l.b16 %v4059_v31  ;;  %v4249_v8 = vpack.c.bf16 %v4233_v59, %v4233_v59 }
 0x4c6   : > { %3981 = vmatmul.mubr.bf16.vlgmr.msra.gmra.mrb[44].mxu0 %v3318_v14  ;;  %v4065_v14 = vpack.c.bf16 %v4049_v54, %v4049_v54  ;;  %v4364_v54 = vld [vmem:[%s10452_s28 + $0x134] ss:$0 sm:$0xff]  ;;  %v4280_v58 = vunpack.c.l.b16 %v4248_v55  ;;  %v4287_v34 = vunpack.c.l.b16 %v4255_v1  ;;  %v4373_v31 = vpack.c.bf16 %v4357_v20, %v4357_v20  ;;  %v4245_v20 = vld [vmem:[%s10452_s28 + $0x1cc] ss:$0 sm:$0xff] }
 0x4c7   : > { %9374 = vmatpush3.bf16.msra.mxu0 %v11498_v21  ;;  %9389 = vmatprep.mubr.msk.bf16.mxu0 %vm10256_vm0, %v10255_v0  ;;  %v4128_v29 = vsel %vm483_vm6, %v4113_v13, %v4127_v15  ;;  %v4380_v7 = vpack.c.bf16 %v4364_v54, %v4364_v54  ;;  %v4358_v9 = vld [vmem:[%s10452_s28 + $0x74] ss:$0 sm:$0xff]  ;;  %v4381_v2 = vpack.c.bf16 %v4365_v10, %v4365_v10  ;;  %v4403_v13 = vunpack.c.l.b16 %v4371_v63 }
 0x4c8   : > { %9375 = vmatprep.subr.bf16.mxu0 %v10255_v0  ;;  %v4120_v62 = vunpack.c.l.b16 %v4065_v14  ;;  %v4129_v40 = vsel %vm485_vm7, %v4114_v24, %v4128_v29  ;;  %v4372_v14 = vpack.c.bf16 %v4356_v50, %v4356_v50  ;;  %v4411_v15 = vunpack.c.l.b16 %v4379_v19  ;;  %v4236_v24 = vld [vmem:[%s10452_s28 + $0xac] ss:$0 sm:$0xff]  ;;  %v4360_v54 = vld [vmem:[%s10452_s28 + $0xb4] ss:$0 sm:$0xff] }
 0x4c9   : > { %v4251_v29 = vpack.c.bf16 %v11603_v45, %v11603_v45  ;;  %v4252_v46 = vpack.c.bf16 %v4236_v24, %v4236_v24  ;;  %v4253_v10 = vpack.c.bf16 %v4237_v32, %v4237_v32  ;;  %v4362_v24 = vld [vmem:[%s10452_s28 + $0xf4] ss:$0 sm:$0xff] }
 0x4ca   : > { %v4134_v16 = vsel %vm481_vm5, %v4120_v62, %v4133_v26  ;;  %v4288_v62 = vunpack.c.l.b16 %v4256_v56  ;;  %v4366_v26 = vld [vmem:[%s10452_s28 + $0x174] ss:$0 sm:$0xff] }
 0x4cb   : > { %9376 = vmatpush3.bf16.msra.mxu0 %v11508_v35  ;;  %v4135_v30 = vsel %vm483_vm6, %v4121_v39, %v4134_v16  ;;  %v4404_v39 = vunpack.c.l.b16 %v4372_v14  ;;  %v4412_v16 = vunpack.c.l.b16 %v4380_v7 }
 0x4cc   : > { %9377 = vmatprep.subr.bf16.mxu0 %v10255_v0  ;;  %v4136_v18 = vsel %vm485_vm7, %v4122_v25, %v4135_v30  ;;  %v4243_v25 = vld [vmem:[%s10452_s28 + $0x18c] ss:$0 sm:$0xff] }
 0x4cd   : > { %v4137_v44 = vpack.c.b16 %v4136_v18, %v4129_v40  ;;  %v4382_v40 = vpack.c.bf16 %v4366_v26, %v4366_v26  ;;  %v4259_v47 = vpack.c.bf16 %v4243_v25, %v4243_v25  ;;  %v4419_v3 = vsel %vm473_vm1, %v4404_v39, %v4403_v13  ;;  %v4238_v26 = vld [vmem:[%s10452_s28 + $0xec] ss:$0 sm:$0xff]  ;;  %v4370_v25 = vld [vmem:[%s10452_s28 + $0x1f4] ss:$0 sm:$0xff] }
 0x4ce   : > { %v4386_v32 = vpack.c.bf16 %v4370_v25, %v4370_v25  ;;  %v4483_v25 = vld [vmem:[%s10452_s28 + $0x9c] ss:$0 sm:$0xff] }
 0x4cf   : > { %9378 = vmatpush3.bf16.msra.mxu0 %v11519_v41  ;;  %v4414_v63 = vunpack.c.l.b16 %v4382_v40  ;;  %v4291_v45 = vunpack.c.l.b16 %v4259_v47 }
 0x4d0   : > { %9379 = vmatprep.subr.bf16.mxu0 %v10255_v0 }
 0x4d3   : > { %9380 = vmatpush3.bf16.msra.mxu0 %v11532_v57 }
 0x4d4   : > { %9381 = vmatprep.subr.bf16.mxu0 %v10255_v0 }
 0x4d7   : > { %9382 = vmatpush3.bf16.msra.mxu0 %v11543_v4 }
 0x4d8   : > { %9383 = vmatprep.subr.bf16.mxu0 %v10255_v0 }
 0x4db   : > { %9384 = vmatpush3.bf16.msra.mxu0 %v11556_v12 }
 0x4dc   : > { %v3681_v28 = vpop.f32.mrb[40].mxu1  ;;  %9385 = vmatprep.subr.bf16.mxu0 %v10255_v0 }
 0x4dd   : > { %v3682_v33 = vadd.f32 %v11477_v38, %v3681_v28  ;;  %v9371_v27 = vpop.f32.mrb[41].mxu1  ;;  %v4250_v28 = vpack.c.bf16 %v4234_v11, %v4234_v11  ;;  %v4283_v11 = vunpack.c.l.b16 %v4251_v29 }
 0x4de   : > { %v3684_v36 = vpop.f32.mrb[42].mxu1  ;;  %v4289_v27 = vunpack.c.l.b16 %v4257_v17  ;;  %v4376_v17 = vpack.c.bf16 %v4360_v54, %v4360_v54 }
 0x4df   : > { %v3685_v43 = vadd.f32 %v11477_v38, %v3684_v36  ;;  %v9372_v52 = vpop.f32.mrb[43].mxu1  ;;  %9386 = vmatpush3.bf16.msra.mxu0 %v11565_v23  ;;  %v3688_v42 = vmax.f32 %v3682_v33, 0.0  ;;  %v4231_v38 = vld [vmem:[%s10452_s28 + $0xc] ss:$0 sm:$0xff]  ;;  %v4281_v33 = vunpack.c.l.b16 %v4249_v8  ;;  %v4359_v36 = vld [vmem:[%s10452_s28 + $0x94] ss:$0 sm:$0xff]  ;;  %v4282_v50 = vunpack.c.l.b16 %v4250_v28 }
 0x4e0   : > { %9387 = vmatprep.subr.bf16.mxu0 %v10255_v0  ;;  %v4247_v48 = vpack.c.bf16 %v4231_v38, %v4231_v38  ;;  %v4374_v52 = vpack.c.bf16 %v4358_v9, %v4358_v9  ;;  %v4413_v38 = vunpack.c.l.b16 %v4381_v2  ;;  %v4375_v55 = vpack.c.bf16 %v4359_v36, %v4359_v36  ;;  %v4369_v8 = vld [vmem:[%s10452_s28 + $0x1d4] ss:$0 sm:$0xff] }
 0x4e1   : > { %v3689_v60 = vmax.f32 %v3685_v43, 0.0  ;;  %v4367_v43 = vld [vmem:[%s10452_s28 + $0x194] ss:$0 sm:$0xff]  ;;  %v4261_v2 = vpack.c.bf16 %v4245_v20, %v4245_v20  ;;  %v4385_v29 = vpack.c.bf16 %v4369_v8, %v4369_v8 }
 0x4e2   : > { %v4279_v61 = vunpack.c.l.b16 %v4247_v48  ;;  %v4368_v48 = vld [vmem:[%s10452_s28 + $0x1b4] ss:$0 sm:$0xff]  ;;  %v4383_v59 = vpack.c.bf16 %v4367_v43, %v4367_v43  ;;  %v4406_v56 = vunpack.c.l.b16 %v4374_v52  ;;  %v4254_v43 = vpack.c.bf16 %v4238_v26, %v4238_v26  ;;  %v4482_v26 = vld [vmem:[%s10452_s28 + $0x7c] ss:$0 sm:$0xff] }
 0x4e3   : > { %v3690_v49 = vpack.c.bf16 %v3689_v60, %v3688_v42  ;;  %9388 = vmatpush3.bf16.msra.mxu0 %v11576_v37  ;;  %v4302_v42 = vsel %vm473_vm1, %v4288_v62, %v4287_v34  ;;  %v4405_v60 = vunpack.c.l.b16 %v4373_v31  ;;  %v4407_v62 = vunpack.c.l.b16 %v4375_v55  ;;  %v4246_v31 = vld [vmem:[%s10452_s28 + $0x1ec] ss:$0 sm:$0xff] }
 0x4e4   : > { %9413 = vmatprep.subr.bf16.mxu0 %v10255_v0  ;;  %v4295_v18 = vsel %vm473_vm1, %v4280_v58, %v4279_v61  ;;  %v4303_v1 = vsel %vm475_vm2, %v4289_v27, %v4302_v42  ;;  %v4384_v61 = vpack.c.bf16 %v4368_v48, %v4368_v48  ;;  %v4415_v9 = vunpack.c.l.b16 %v4383_v59 }
 0x4e5   : > { %4021 = vmatprep.mubr.bf16.mxu1 %v3690_v49  ;;  %v4426_v49 = vsel %vm473_vm1, %v4412_v16, %v4411_v15  ;;  %v4296_v53 = vsel %vm475_vm2, %v4281_v33, %v4295_v18  ;;  %v4420_v19 = vsel %vm475_vm2, %v4405_v60, %v4419_v3  ;;  %v4284_v15 = vunpack.c.l.b16 %v4252_v46 }
 0x4e6   : > { %4022 = vmatmul.mubr.bf16.vlgmr.msra.gmra.mrb[44].mxu1 %v11500_v22  ;;  %9390 = vmatmul.mubr.bf16.vlgmr.msra.gmra.mrb[48].mxu0 %v4137_v44  ;;  %v4242_v22 = vld [vmem:[%s10452_s28 + $0x16c] ss:$0 sm:$0xff]  ;;  %v4427_v7 = vsel %vm475_vm2, %v4413_v38, %v4426_v49  ;;  %v4297_v58 = vsel %vm477_vm3, %v4282_v50, %v4296_v53  ;;  %v4421_v13 = vsel %vm477_vm3, %v4406_v56, %v4420_v19  ;;  %v4408_v27 = vunpack.c.l.b16 %v4376_v17  ;;  %v4479_v19 = vld [vmem:[%s10452_s28 + $0x1c] ss:$0 sm:$0xff] }
 0x4e7   : > { %9394 = vmatpush3.bf16.msra.mxu1 %v11498_v21  ;;  %9409 = vmatprep.mubr.msk.bf16.mxu1 %vm10256_vm0, %v10255_v0  ;;  %v4258_v30 = vpack.c.bf16 %v4242_v22, %v4242_v22  ;;  %v4244_v44 = vld [vmem:[%s10452_s28 + $0x1ac] ss:$0 sm:$0xff]  ;;  %v4361_v22 = vld [vmem:[%s10452_s28 + $0xd4] ss:$0 sm:$0xff]  ;;  %v4428_v39 = vsel %vm477_vm3, %v4414_v63, %v4427_v7  ;;  %v4416_v36 = vunpack.c.l.b16 %v4384_v61  ;;  %v4262_v52 = vpack.c.bf16 %v4246_v31, %v4246_v31  ;;  %v4481_v17 = vld [vmem:[%s10452_s28 + $0x5c] ss:$0 sm:$0xff] }
 0x4e8   : > { %9395 = vmatprep.subr.bf16.mxu1 %v10255_v0  ;;  %9414 = vmatpush3.bf16.msra.mxu0 %v11498_v21  ;;  %v4260_v14 = vpack.c.bf16 %v4244_v44, %v4244_v44  ;;  %v4377_v28 = vpack.c.bf16 %v4361_v22, %v4361_v22  ;;  %v4422_v40 = vsel %vm479_vm4, %v4407_v62, %v4421_v13  ;;  %v4285_v42 = vunpack.c.l.b16 %v4253_v10  ;;  %v4488_v22 = vld [vmem:[%s10452_s28 + $0x13c] ss:$0 sm:$0xff] }
 0x4e9   : > { %9415 = vmatprep.subr.bf16.mxu0 %v10255_v0  ;;  %9429 = vmatprep.mubr.msk.bf16.mxu0 %vm10256_vm0, %v10255_v0  ;;  %v4290_v51 = vunpack.c.l.b16 %v4258_v30  ;;  %v4298_v30 = vsel %vm479_vm4, %v4283_v11, %v4297_v58  ;;  %v4429_v18 = vsel %vm479_vm4, %v4415_v9, %v4428_v39  ;;  %v4293_v60 = vunpack.c.l.b16 %v4261_v2  ;;  %v4480_v11 = vld [vmem:[%s10452_s28 + $0x3c] ss:$0 sm:$0xff] }
 0x4ea   : > { %v4292_v16 = vunpack.c.l.b16 %v4260_v14  ;;  %v4378_v38 = vpack.c.bf16 %v4362_v24, %v4362_v24  ;;  %v4299_v44 = vsel %vm481_vm5, %v4284_v15, %v4298_v30  ;;  %v4409_v47 = vunpack.c.l.b16 %v4377_v28  ;;  %v4489_v61 = vld [vmem:[%s10452_s28 + $0x15c] ss:$0 sm:$0xff] }
 0x4eb   : > { %9396 = vmatpush3.bf16.msra.mxu1 %v11508_v35  ;;  %v4304_v34 = vsel %vm477_vm3, %v4290_v51, %v4303_v1  ;;  %v4417_v3 = vunpack.c.l.b16 %v4385_v29  ;;  %v4423_v49 = vsel %vm481_vm5, %v4408_v27, %v4422_v40  ;;  %v4430_v50 = vsel %vm481_vm5, %v4416_v36, %v4429_v18  ;;  %v4490_v31 = vld [vmem:[%s10452_s28 + $0x17c] ss:$0 sm:$0xff] }
 0x4ec   : > { %9397 = vmatprep.subr.bf16.mxu1 %v10255_v0  ;;  %9416 = vmatpush3.bf16.msra.mxu0 %v11508_v35  ;;  %v4305_v33 = vsel %vm479_vm4, %v4291_v45, %v4304_v34  ;;  %v4286_v51 = vunpack.c.l.b16 %v4254_v43  ;;  %v4294_v54 = vunpack.c.l.b16 %v4262_v52  ;;  %v4300_v48 = vsel %vm483_vm6, %v4285_v42, %v4299_v44  ;;  %v4487_v45 = vld [vmem:[%s10452_s28 + $0x11c] ss:$0 sm:$0xff] }
 0x4ed   : > { %9417 = vmatprep.subr.bf16.mxu0 %v10255_v0  ;;  %v4306_v46 = vsel %vm481_vm5, %v4292_v16, %v4305_v33  ;;  %v4410_v59 = vunpack.c.l.b16 %v4378_v38  ;;  %v4418_v53 = vunpack.c.l.b16 %v4386_v32  ;;  %v4424_v1 = vsel %vm483_vm6, %v4409_v47, %v4423_v49  ;;  %v4484_v43 = vld [vmem:[%s10452_s28 + $0xbc] ss:$0 sm:$0xff] }
 0x4ee   : > { %v4307_v55 = vsel %vm483_vm6, %v4293_v60, %v4306_v46  ;;  %v4431_v56 = vsel %vm483_vm6, %v4417_v3, %v4430_v50  ;;  %v4301_v63 = vsel %vm485_vm7, %v4286_v51, %v4300_v48  ;;  %v4495_v58 = vpack.c.bf16 %v4479_v19, %v4479_v19  ;;  %v4492_v52 = vld [vmem:[%s10452_s28 + $0x1bc] ss:$0 sm:$0xff] }
 0x4ef   : > { %9398 = vmatpush3.bf16.msra.mxu1 %v11519_v41  ;;  %v4308_v20 = vsel %vm485_vm7, %v4294_v54, %v4307_v55  ;;  %v4425_v10 = vsel %vm485_vm7, %v4410_v59, %v4424_v1  ;;  %v4432_v14 = vsel %vm485_vm7, %v4418_v53, %v4431_v56  ;;  %v4496_v34 = vpack.c.bf16 %v4480_v11, %v4480_v11  ;;  %v4485_v32 = vld [vmem:[%s10452_s28 + $0xdc] ss:$0 sm:$0xff] }
 0x4f0   : > { %9399 = vmatprep.subr.bf16.mxu1 %v10255_v0  ;;  %9418 = vmatpush3.bf16.msra.mxu0 %v11519_v41  ;;  %v4309_v7 = vpack.c.b16 %v4308_v20, %v4301_v63  ;;  %v4433_v8 = vpack.c.b16 %v4432_v14, %v4425_v10  ;;  %v4503_v62 = vpack.c.bf16 %v4487_v45, %v4487_v45  ;;  %v4527_v39 = vunpack.c.l.b16 %v4495_v58  ;;  %v4493_v44 = vld [vmem:[%s10452_s28 + $0x1dc] ss:$0 sm:$0xff]  ;;  %v9957_v58 = vld [vmem:[#allocation6 + $0x448] sm:$0xff]  }
 0x4f1   : > { %9419 = vmatprep.subr.bf16.mxu0 %v10255_v0  ;;  %v4504_v9 = vpack.c.bf16 %v4488_v22, %v4488_v22  ;;  %v4497_v2 = vpack.c.bf16 %v4481_v17, %v4481_v17  ;;  %v4505_v13 = vpack.c.bf16 %v4489_v61, %v4489_v61  ;;  %v4528_v15 = vunpack.c.l.b16 %v4496_v34  ;;  %v4486_v51 = vld [vmem:[%s10452_s28 + $0xfc] ss:$0 sm:$0xff]  ;;  %v9956_v61 = vld [vmem:[#allocation6 + $0x400] sm:$0xff]   ;;  %v9958_v34 = vld [vmem:[#allocation6 + $0x408] sm:$0xff]  }
 0x4f2   : > { %v4535_v16 = vunpack.c.l.b16 %v4503_v62  ;;  %v4498_v28 = vpack.c.bf16 %v4482_v26, %v4482_v26  ;;  %v4506_v29 = vpack.c.bf16 %v4490_v31, %v4490_v31  ;;  %v4499_v40 = vpack.c.bf16 %v4483_v25, %v4483_v25  ;;  %v4494_v54 = vld [vmem:[%s10452_s28 + $0x1fc] ss:$0 sm:$0xff]  ;;  %v9959_v62 = vld [vmem:[#allocation6 + $0x450] sm:$0xff]   ;;  %v9963_v31 = vld [vmem:[#allocation6 + $0x460] sm:$0xff]  }
 0x4f3   : > { %9400 = vmatpush3.bf16.msra.mxu1 %v11532_v57  ;;  %v4536_v24 = vunpack.c.l.b16 %v4504_v9  ;;  %v4529_v30 = vunpack.c.l.b16 %v4497_v2  ;;  %v4537_v33 = vunpack.c.l.b16 %v4505_v13  ;;  %v4543_v27 = vsel %vm473_vm1, %v4528_v15, %v4527_v39  ;;  %v9961_v9 = vld [vmem:[#allocation6 + $0x458] sm:$0xff]   ;;  %v9964_v2 = vld [vmem:[#allocation6 + $0x420] sm:$0xff]   ;;  %v9966_v13 = vld [vmem:[#allocation6 + $0x428] sm:$0xff]  }
 0x4f4   : > { %9401 = vmatprep.subr.bf16.mxu1 %v10255_v0  ;;  %9420 = vmatpush3.bf16.msra.mxu0 %v11532_v57  ;;  %v4538_v42 = vunpack.c.l.b16 %v4506_v29  ;;  %v4500_v46 = vpack.c.bf16 %v4484_v43, %v4484_v43  ;;  %v4508_v47 = vpack.c.bf16 %v4492_v52, %v4492_v52  ;;  %v4531_v3 = vunpack.c.l.b16 %v4499_v40  ;;  %v9962_v26 = vld [vmem:[#allocation6 + $0x418] sm:$0xff]   ;;  %v9967_v39 = vld [vmem:[#allocation6 + $0x470] sm:$0xff]   ;;  %v9971_v25 = vld [vmem:[#allocation6 + $0x4c0] sm:$0xff]  }
 0x4f5   : > { %9421 = vmatprep.subr.bf16.mxu0 %v10255_v0  ;;  %v4550_v36 = vsel %vm473_vm1, %v4536_v24, %v4535_v16  ;;  %v4544_v60 = vsel %vm475_vm2, %v4529_v30, %v4543_v27  ;;  %v4501_v48 = vpack.c.bf16 %v4485_v32, %v4485_v32  ;;  %v4509_v55 = vpack.c.bf16 %v4493_v44, %v4493_v44  ;;  %v9968_v15 = vld [vmem:[#allocation6 + $0x430] sm:$0xff]   ;;  %v9969_v16 = vld [vmem:[#allocation6 + $0x478] sm:$0xff]   ;;  %v9974_v29 = vld [vmem:[#allocation6 + $0x488] sm:$0xff]  }
 0x4f6   : > { %v4551_v38 = vsel %vm475_vm2, %v4537_v33, %v4550_v36  ;;  %v4532_v59 = vunpack.c.l.b16 %v4500_v46  ;;  %v4540_v53 = vunpack.c.l.b16 %v4508_v47  ;;  %v4502_v63 = vpack.c.bf16 %v4486_v51, %v4486_v51  ;;  %v9970_v24 = vld [vmem:[#allocation6 + $0x438] sm:$0xff]   ;;  %v9975_v30 = vld [vmem:[#allocation6 + $0x4d0] sm:$0xff]   ;;  %v9979_v43 = vld [vmem:[#allocation6 + $0x4e0] sm:$0xff]  }
 0x4f7   : > { %9402 = vmatpush3.bf16.msra.mxu1 %v11543_v4  ;;  %v4552_v50 = vsel %vm477_vm3, %v4538_v42, %v4551_v38  ;;  %v4533_v20 = vunpack.c.l.b16 %v4501_v48  ;;  %v4541_v10 = vunpack.c.l.b16 %v4509_v55  ;;  %v9976_v33 = vld [vmem:[#allocation6 + $0x490] sm:$0xff]   ;;  %v9977_v27 = vld [vmem:[#allocation6 + $0x4d8] sm:$0xff]   ;;  %v9980_v52 = vld [vmem:[#allocation6 + $0x4a0] sm:$0xff]  }
 0x4f8   : > { %9403 = vmatprep.subr.bf16.mxu1 %v10255_v0  ;;  %9422 = vmatpush3.bf16.msra.mxu0 %v11543_v4  ;;  %v9978_v36 = vld [vmem:[#allocation6 + $0x498] sm:$0xff]   ;;  %v9981_v40 = vld [vmem:[#allocation6 + $0x4e8] sm:$0xff]   ;;  %v9984_v42 = vld [vmem:[#allocation6 + $0x4b0] sm:$0xff]  }
 0x4f9   : > { %9423 = vmatprep.subr.bf16.mxu0 %v10255_v0  ;;  %v9986_v38 = vld [vmem:[#allocation6 + $0x4b8] sm:$0xff]  }
 0x4fb   : > { %9404 = vmatpush3.bf16.msra.mxu1 %v11556_v12 }
 0x4fc   : > { %9405 = vmatprep.subr.bf16.mxu1 %v10255_v0  ;;  %9424 = vmatpush3.bf16.msra.mxu0 %v11556_v12 }
 0x4fd   : > { %9425 = vmatprep.subr.bf16.mxu0 %v10255_v0 }
 0x4ff   : > { %9406 = vmatpush3.bf16.msra.mxu1 %v11565_v23 }
 0x500   : > { %9407 = vmatprep.subr.bf16.mxu1 %v10255_v0  ;;  %9426 = vmatpush3.bf16.msra.mxu0 %v11565_v23 }
 0x501   : > { %9427 = vmatprep.subr.bf16.mxu0 %v10255_v0 }
 0x503   : > { %9408 = vmatpush3.bf16.msra.mxu1 %v11576_v37 }
 0x504   : > { %9433 = vmatprep.subr.bf16.mxu1 %v10255_v0  ;;  %9428 = vmatpush3.bf16.msra.mxu0 %v11576_v37 }
 0x506   : > { %9410 = vmatmul.mubr.bf16.vlgmr.msra.gmra.mrb[48].mxu1 %v4309_v7  ;;  %v4534_v7 = vunpack.c.l.b16 %v4502_v63 }
 0x507   : > { %9434 = vmatpush3.bf16.msra.mxu1 %v11498_v21  ;;  %9430 = vmatmul.mubr.bf16.vlgmr.msra.gmra.mrb[52].mxu0 %v4433_v8  ;;  %v4491_v21 = vld [vmem:[%s10452_s28 + $0x19c] ss:$0 sm:$0xff] }
 0x508   : > { %9435 = vmatprep.subr.bf16.mxu1 %v10255_v0  ;;  %9449 = vmatprep.mubr.msk.bf16.mxu1 %vm10256_vm0, %v10255_v0  ;;  %v4507_v18 = vpack.c.bf16 %v4491_v21, %v4491_v21  ;;  %v9972_v21 = vld [vmem:[#allocation6 + $0x480] sm:$0xff]  }
 0x50a   : > { %v4539_v49 = vunpack.c.l.b16 %v4507_v18  ;;  %v9982_v18 = vld [vmem:[#allocation6 + $0x4a8] sm:$0xff]  }
 0x50b   : > { %9436 = vmatpush3.bf16.msra.mxu1 %v11508_v35  ;;  %v4530_v35 = vunpack.c.l.b16 %v4498_v28  ;;  %v9973_v28 = vld [vmem:[#allocation6 + $0x4c8] sm:$0xff]  }
 0x50c   : > { %9437 = vmatprep.subr.bf16.mxu1 %v10255_v0  ;;  %v4553_v56 = vsel %vm479_vm4, %v4539_v49, %v4552_v50 }
 0x50d   : > { %v4554_v19 = vsel %vm481_vm5, %v4540_v53, %v4553_v56 }
 0x50f   : > { %9438 = vmatpush3.bf16.msra.mxu1 %v11519_v41  ;;  %v4545_v41 = vsel %vm477_vm3, %v4530_v35, %v4544_v60  ;;  %v9983_v35 = vld [vmem:[#allocation6 + $0x4f0] sm:$0xff]   ;;  %v9985_v60 = vld [vmem:[#allocation6 + $0x4f8] sm:$0xff]  }
 0x510   : > { %9439 = vmatprep.subr.bf16.mxu1 %v10255_v0  ;;  %v4546_v1 = vsel %vm479_vm4, %v4531_v3, %v4545_v41  ;;  %v11735_v41 = vld [vmem:[%s12649_s2] ss:$0 sm:$0xff] }
 0x511   : > { %v4547_v14 = vsel %vm481_vm5, %v4532_v59, %v4546_v1 }
 0x512   : > { %v4548_v45 = vsel %vm483_vm6, %v4533_v20, %v4547_v14 }
 0x513   : > { %9440 = vmatpush3.bf16.msra.mxu1 %v11532_v57  ;;  %v4510_v57 = vpack.c.bf16 %v4494_v54, %v4494_v54  ;;  %v4549_v22 = vsel %vm485_vm7, %v4534_v7, %v4548_v45 }
 0x514   : > { %9441 = vmatprep.subr.bf16.mxu1 %v10255_v0 }
 0x515   : > { %v4542_v11 = vunpack.c.l.b16 %v4510_v57 }
 0x517   : > { %9442 = vmatpush3.bf16.msra.mxu1 %v11543_v4  ;;  %v4555_v4 = vsel %vm483_vm6, %v4541_v10, %v4554_v19 }
 0x518   : > { %9443 = vmatprep.subr.bf16.mxu1 %v10255_v0  ;;  %v4556_v8 = vsel %vm485_vm7, %v4542_v11, %v4555_v4 }
 0x519   : > { %v4557_v17 = vpack.c.b16 %v4556_v8, %v4549_v22 }
 0x51b   : > { %9444 = vmatpush3.bf16.msra.mxu1 %v11556_v12  ;;  %v9955_v12 = vld [vmem:[#allocation6 + $0x440] sm:$0xff]  }
 0x51c   : > { %9445 = vmatprep.subr.bf16.mxu1 %v10255_v0  ;;  %8753 = vmatprep.subr.bf16.mxu0 %v9955_v12 }
 0x51d   : > { %8754 = vmatpush3.bf16.msra.mxu0 %v9956_v61 }
 0x51e   : > { %8755 = vmatprep.subr.bf16.mxu0 %v9957_v58 }
 0x51f   : > { %9446 = vmatpush3.bf16.msra.mxu1 %v11565_v23  ;;  %v9960_v23 = vld [vmem:[#allocation6 + $0x410] sm:$0xff]  }
 0x520   : > { %9447 = vmatprep.subr.bf16.mxu1 %v10255_v0 }
 0x521   : > { %8756 = vmatpush3.bf16.msra.mxu0 %v9958_v34 }
 0x522   : > { %8757 = vmatprep.subr.bf16.mxu0 %v9959_v62 }
 0x523   : > { %9448 = vmatpush3.bf16.msra.mxu1 %v11576_v37  ;;  %v9965_v37 = vld [vmem:[#allocation6 + $0x468] sm:$0xff]  }
 0x524   : > { %8775 = vmatprep.subr.bf16.mxu1 %v9971_v25  ;;  %v11756_v25 = vld [vmem:[%s12648_s1] sm:$0xff]  }
 0x525   : > { %8758 = vmatpush3.bf16.msra.mxu0 %v9960_v23 }
 0x526   : > { %9450 = vmatmul.mubr.bf16.vlgmr.msra.gmra.mrb[52].mxu1 %v4557_v17  ;;  %8759 = vmatprep.subr.bf16.mxu0 %v9961_v9 }
 0x527   : > { %8776 = vmatpush3.bf16.msra.mxu1 %v9972_v21 }
 0x528   : > { %8777 = vmatprep.subr.bf16.mxu1 %v9973_v28  ;;  %v4950_v28 = vld [vmem:[%s10452_s28 + $0x45] ss:$0 sm:$0xff] }
 0x529   : > { %8760 = vmatpush3.bf16.msra.mxu0 %v9962_v26 }
 0x52a   : > { %8761 = vmatprep.subr.bf16.mxu0 %v9963_v31 }
 0x52b   : > { %8778 = vmatpush3.bf16.msra.mxu1 %v9974_v29  ;;  %v4958_v29 = vld [vmem:[%s10452_s28 + $0x145] ss:$0 sm:$0xff] }
 0x52c   : > { %8779 = vmatprep.subr.bf16.mxu1 %v9975_v30 }
 0x52d   : > { %8762 = vmatpush3.bf16.msra.mxu0 %v9964_v2 }
 0x52e   : > { %8763 = vmatprep.subr.bf16.mxu0 %v9965_v37  ;;  %v4948_v37 = vld [vmem:[%s10452_s28 + $0x5] ss:$0 sm:$0xff] }
 0x52f   : > { %8780 = vmatpush3.bf16.msra.mxu1 %v9976_v33  ;;  %v4964_v30 = vpack.c.bf16 %v4948_v37, %v4948_v37 }
 0x530   : > { %8781 = vmatprep.subr.bf16.mxu1 %v9977_v27 }
 0x531   : > { %8764 = vmatpush3.bf16.msra.mxu0 %v9966_v13  ;;  %v4949_v13 = vld [vmem:[%s10452_s28 + $0x25] ss:$0 sm:$0xff] }
 0x532   : > { %8765 = vmatprep.subr.bf16.mxu0 %v9967_v39  ;;  %v4965_v33 = vpack.c.bf16 %v4949_v13, %v4949_v13 }
 0x533   : > { %8782 = vmatpush3.bf16.msra.mxu1 %v9978_v36 }
 0x534   : > { %8783 = vmatprep.subr.bf16.mxu1 %v9979_v43  ;;  %v11766_v43 = vld [vmem:[%s12648_s1 + $0x8] sm:$0xff]  }
 0x535   : > { %8766 = vmatpush3.bf16.msra.mxu0 %v9968_v15  ;;  %v4956_v15 = vld [vmem:[%s10452_s28 + $0x105] ss:$0 sm:$0xff] }
 0x536   : > { %8767 = vmatprep.subr.bf16.mxu0 %v9969_v16  ;;  %v4957_v16 = vld [vmem:[%s10452_s28 + $0x125] ss:$0 sm:$0xff]  ;;  %v4972_v27 = vpack.c.bf16 %v4956_v15, %v4956_v15 }
 0x537   : > { %8784 = vmatpush3.bf16.msra.mxu1 %v9980_v52  ;;  %v4973_v36 = vpack.c.bf16 %v4957_v16, %v4957_v16  ;;  %v4951_v52 = vld [vmem:[%s10452_s28 + $0x65] ss:$0 sm:$0xff] }
 0x538   : > { %8785 = vmatprep.subr.bf16.mxu1 %v9981_v40  ;;  %v4959_v40 = vld [vmem:[%s10452_s28 + $0x165] ss:$0 sm:$0xff] }
 0x539   : > { %8768 = vmatpush3.bf16.msra.mxu0 %v9970_v24 }
 0x53a   : > { %9453 = vmatprep.subr.bf16.mxu0 %v10255_v0 }
 0x53b   : > { %8786 = vmatpush3.bf16.msra.mxu1 %v9982_v18  ;;  %v4966_v18 = vpack.c.bf16 %v4950_v28, %v4950_v28 }
 0x53c   : > { %8787 = vmatprep.subr.bf16.mxu1 %v9983_v35  ;;  %v4974_v35 = vpack.c.bf16 %v4958_v29, %v4958_v29 }
 0x53f   : > { %8788 = vmatpush3.bf16.msra.mxu1 %v9984_v42  ;;  %v5019_v42 = vunpack.c.l.b16 %v4964_v30 }
 0x540   : > { %8789 = vmatprep.subr.bf16.mxu1 %v9985_v60  ;;  %v5020_v60 = vunpack.c.l.b16 %v4965_v33 }
 0x543   : > { %8790 = vmatpush3.bf16.msra.mxu1 %v9986_v38  ;;  %v5027_v38 = vunpack.c.l.b16 %v4972_v27 }
 0x544   : > { %9473 = vmatprep.subr.bf16.mxu1 %v10255_v0 }
 0x599   : > { %v8689_v32 = vpop.f32.mrb[44].mxu0 }
 0x59a   : > { %v8690_v44 = vpop.f32.mrb[45].mxu0 }
 0x59b   : > { %v8691_v46 = vadd.f32 %v8690_v44, %v8689_v32  ;;  %v8692_v47 = vpop.f32.mrb[46].mxu0  ;;  %v5028_v32 = vunpack.c.l.b16 %v4973_v36  ;;  %v11777_v44 = vld [vmem:[%s12648_s1 + $0x10] sm:$0xff]  }
 0x59c   : > { %v8693_v3 = vpop.f32.mrb[47].mxu0 }
 0x59d   : > { %v8694_v49 = vadd.f32 %v8693_v3, %v8692_v47  ;;  %v4960_v47 = vld [vmem:[%s10452_s28 + $0x185] ss:$0 sm:$0xff]  ;;  %v4967_v3 = vpack.c.bf16 %v4951_v52, %v4951_v52 }
 0x5b9   : > { %v8711_v50 = vpop.f32.mrb[44].mxu1  ;;  %v4221_v51 = vpop.f32.mrb[48].mxu0 }
 0x5ba   : > { %v8712_v54 = vpop.f32.mrb[45].mxu1  ;;  %v4222_v48 = vadd.f32 %v11735_v41, %v4221_v51  ;;  %v9391_v55 = vpop.f32.mrb[49].mxu0  ;;  %v5029_v51 = vunpack.c.l.b16 %v4974_v35 }
 0x5bb   : > { %v8713_v59 = vadd.f32 %v8712_v54, %v8711_v50  ;;  %v8714_v53 = vpop.f32.mrb[46].mxu1  ;;  %v4224_v1 = vpop.f32.mrb[50].mxu0  ;;  %v5021_v50 = vunpack.c.l.b16 %v4966_v18  ;;  %v5035_v54 = vsel %vm473_vm1, %v5020_v60, %v5019_v42  ;;  %v4953_v55 = vld [vmem:[%s10452_s28 + $0xa5] ss:$0 sm:$0xff]  ;;  %v11834_v42 = vld [vmem:[%s12648_s1 + $0x38] sm:$0xff]  }
 0x5bc   : > { %v8715_v56 = vpop.f32.mrb[47].mxu1  ;;  %v4228_v63 = vmax.f32 %v4222_v48, 0.0  ;;  %v4225_v57 = vadd.f32 %v11735_v41, %v4224_v1  ;;  %v9392_v20 = vpop.f32.mrb[51].mxu0  ;;  %v5042_v48 = vsel %vm473_vm1, %v5028_v32, %v5027_v38  ;;  %v4976_v1 = vpack.c.bf16 %v4960_v47, %v4960_v47  ;;  %v5144_v47 = vld [vmem:[%s10452_s28 + $0x2d] ss:$0 sm:$0xff] }
 0x5bd   : > { %v4024_v10 = vadd.f32 %v8713_v59, %v8691_v46  ;;  %v8716_v14 = vadd.f32 %v8715_v56, %v8714_v53  ;;  %v4952_v46 = vld [vmem:[%s10452_s28 + $0x85] ss:$0 sm:$0xff]  ;;  %v11790_v56 = vld [vmem:[%s12648_s1 + $0x18] sm:$0xff]   ;;  %v5036_v20 = vsel %vm475_vm2, %v5021_v50, %v5035_v54  ;;  %v5152_v50 = vld [vmem:[%s10452_s28 + $0x12d] ss:$0 sm:$0xff] }
 0x5be   : > { %v4229_v19 = vmax.f32 %v4225_v57, 0.0  ;;  %v4961_v59 = vld [vmem:[%s10452_s28 + $0x1a5] ss:$0 sm:$0xff]  ;;  %v4968_v53 = vpack.c.bf16 %v4952_v46, %v4952_v46 }
 0x5bf   : > { %v11740_v7 = vadd.f32 %v4024_v10, %v11482_v5  ;;  %v4027_v11 = vadd.f32 %v8716_v14, %v8694_v49  ;;  %v4975_v49 = vpack.c.bf16 %v4959_v40, %v4959_v40  ;;  %v5043_v10 = vsel %vm475_vm2, %v5029_v51, %v5042_v48  ;;  %v4954_v14 = vld [vmem:[%s10452_s28 + $0xc5] ss:$0 sm:$0xff]  ;;  %v5267_v51 = vld [vmem:[%s10452_s28 + $0x15] ss:$0 sm:$0xff] }
 0x5c0   : > { %v4230_v45 = vpack.c.bf16 %v4229_v19, %v4228_v63  ;;  %v5022_v63 = vunpack.c.l.b16 %v4967_v3  ;;  %v4962_v19 = vld [vmem:[%s10452_s28 + $0x1c5] ss:$0 sm:$0xff]  ;;  %v5268_v48 = vld [vmem:[%s10452_s28 + $0x35] ss:$0 sm:$0xff] }
 0x5c1   : > { %v11743_v4 = vadd.f32 %v4027_v11, %v11485_v6  ;;  %v5030_v57 = vunpack.c.l.b16 %v4975_v49  ;;  %v4969_v11 = vpack.c.bf16 %v4953_v55, %v4953_v55  ;;  %v5151_v49 = vld [vmem:[%s10452_s28 + $0x10d] ss:$0 sm:$0xff]  ;;  %v5275_v55 = vld [vmem:[%s10452_s28 + $0x115] ss:$0 sm:$0xff] }
 0x5d9   : > { %v4345_v22 = vpop.f32.mrb[48].mxu1 }
 0x5da   : > { %v4346_v8 = vadd.f32 %v11735_v41, %v4345_v22  ;;  %v9411_v17 = vpop.f32.mrb[49].mxu1  ;;  %v4469_v12 = vpop.f32.mrb[52].mxu0  ;;  %v5023_v22 = vunpack.c.l.b16 %v4968_v53 }
 0x5db   : > { %v4348_v61 = vpop.f32.mrb[50].mxu1  ;;  %v4470_v58 = vadd.f32 %v11735_v41, %v4469_v12  ;;  %v9431_v34 = vpop.f32.mrb[53].mxu0  ;;  %v11801_v17 = vld [vmem:[%s12648_s1 + $0x20] sm:$0xff]   ;;  %v5037_v12 = vsel %vm477_vm3, %v5022_v63, %v5036_v20  ;;  %v5145_v63 = vld [vmem:[%s10452_s28 + $0x4d] ss:$0 sm:$0xff]  ;;  %v5167_v20 = vpack.c.bf16 %v5151_v49, %v5151_v49 }
 0x5dc   : > { %v4352_v5 = vmax.f32 %v4346_v8, 0.0  ;;  %v4349_v62 = vadd.f32 %v11735_v41, %v4348_v61  ;;  %v9412_v23 = vpop.f32.mrb[51].mxu1  ;;  %v4472_v6 = vpop.f32.mrb[54].mxu0  ;;  %v5031_v8 = vunpack.c.l.b16 %v4976_v1  ;;  %v5044_v61 = vsel %vm477_vm3, %v5030_v57, %v5043_v10  ;;  %v4963_v34 = vld [vmem:[%s10452_s28 + $0x1e5] ss:$0 sm:$0xff] }
 0x5dd   : > { %v4476_v9 = vmax.f32 %v4470_v58, 0.0  ;;  %v4473_v26 = vadd.f32 %v11735_v41, %v4472_v6  ;;  %v9432_v31 = vpop.f32.mrb[55].mxu0  ;;  %v4955_v58 = vld [vmem:[%s10452_s28 + $0xe5] ss:$0 sm:$0xff]  ;;  %v5024_v23 = vunpack.c.l.b16 %v4969_v11  ;;  %v4979_v37 = vpack.c.bf16 %v4963_v34, %v4963_v34  ;;  %v5153_v57 = vld [vmem:[%s10452_s28 + $0x14d] ss:$0 sm:$0xff] }
 0x5de   : > { %v4353_v2 = vmax.f32 %v4349_v62, 0.0  ;;  %v4978_v62 = vpack.c.bf16 %v4962_v19, %v4962_v19  ;;  %v11814_v31 = vld [vmem:[%s12648_s1 + $0x28] sm:$0xff]   ;;  %v5160_v1 = vpack.c.bf16 %v5144_v47, %v5144_v47  ;;  %v5168_v10 = vpack.c.bf16 %v5152_v50, %v5152_v50  ;;  %v5269_v19 = vld [vmem:[%s10452_s28 + $0x55] ss:$0 sm:$0xff] }
 0x5df   : > { %v4477_v39 = vmax.f32 %v4473_v26, 0.0  ;;  %v5045_v26 = vsel %vm479_vm4, %v5031_v8, %v5044_v61  ;;  %v5034_v29 = vunpack.c.l.b16 %v4979_v37  ;;  %v5277_v11 = vld [vmem:[%s10452_s28 + $0x155] ss:$0 sm:$0xff]  ;;  %v11861_v61 = vld [vmem:[%s10452_s28 + $0x8d] ss:$0 sm:$0xff]  ;;  %v5169_v34 = vpack.c.bf16 %v5153_v57, %v5153_v57 }
 0x5e0   : > { %v4354_v24 = vpack.c.bf16 %v4353_v2, %v4352_v5  ;;  %v4970_v5 = vpack.c.bf16 %v4954_v14, %v4954_v14  ;;  %v4971_v2 = vpack.c.bf16 %v4955_v58, %v4955_v58  ;;  %v5283_v14 = vpack.c.bf16 %v5267_v51, %v5267_v51  ;;  %v5149_v47 = vld [vmem:[%s10452_s28 + $0xcd] ss:$0 sm:$0xff] }
 0x5e1   : > { %v11758_v21 = vpack.c.bf16 %v4477_v39, %v4476_v9  ;;  %v5038_v9 = vsel %vm479_vm4, %v5023_v22, %v5037_v12  ;;  %v5033_v39 = vunpack.c.l.b16 %v4978_v62  ;;  %v5291_v22 = vpack.c.bf16 %v5275_v55, %v5275_v55  ;;  %v5146_v12 = vld [vmem:[%s10452_s28 + $0x6d] ss:$0 sm:$0xff] }
 0x5e2   : > { %4892 = vmatprep.mubr.bf16.mxu0 %v4354_v24  ;;  %v5025_v13 = vunpack.c.l.b16 %v4970_v5  ;;  %v5039_v15 = vsel %vm481_vm5, %v5024_v23, %v5038_v9  ;;  %v11823_v24 = vld [vmem:[%s12648_s1 + $0x30] sm:$0xff]   ;;  %v5026_v28 = vunpack.c.l.b16 %v4971_v2  ;;  %v5161_v58 = vpack.c.bf16 %v5145_v63, %v5145_v63 }
 0x5e3   : > { %4893 = vmatmul.mubr.bf16.vlgmr.msra.gmra.mrb[56].mxu0 %v4230_v45  ;;  %v4977_v45 = vpack.c.bf16 %v4961_v59, %v4961_v59  ;;  %v5276_v59 = vld [vmem:[%s10452_s28 + $0x135] ss:$0 sm:$0xff]  ;;  %v5192_v62 = vunpack.c.l.b16 %v5160_v1  ;;  %v5199_v23 = vunpack.c.l.b16 %v5167_v20  ;;  %v5285_v2 = vpack.c.bf16 %v5269_v19, %v5269_v19  ;;  %v5157_v19 = vld [vmem:[%s10452_s28 + $0x1cd] ss:$0 sm:$0xff] }
 0x5e4   : > { %9454 = vmatpush3.bf16.msra.mxu0 %v11756_v25  ;;  %9469 = vmatprep.mubr.msk.bf16.mxu0 %vm10256_vm0, %v10255_v0  ;;  %v5040_v33 = vsel %vm483_vm6, %v5025_v13, %v5039_v15  ;;  %v5292_v8 = vpack.c.bf16 %v5276_v59, %v5276_v59  ;;  %v5270_v9 = vld [vmem:[%s10452_s28 + $0x75] ss:$0 sm:$0xff]  ;;  %v5293_v37 = vpack.c.bf16 %v5277_v11, %v5277_v11  ;;  %v5315_v13 = vunpack.c.l.b16 %v5283_v14 }
 0x5e5   : > { %9455 = vmatprep.subr.bf16.mxu0 %v10255_v0  ;;  %v5032_v6 = vunpack.c.l.b16 %v4977_v45  ;;  %v5041_v60 = vsel %vm485_vm7, %v5026_v28, %v5040_v33  ;;  %v5284_v45 = vpack.c.bf16 %v5268_v48, %v5268_v48  ;;  %v5323_v15 = vunpack.c.l.b16 %v5291_v22  ;;  %v5148_v28 = vld [vmem:[%s10452_s28 + $0xad] ss:$0 sm:$0xff]  ;;  %v5272_v59 = vld [vmem:[%s10452_s28 + $0xb5] ss:$0 sm:$0xff] }
 0x5e6   : > { %v5163_v33 = vpack.c.bf16 %v11861_v61, %v11861_v61  ;;  %v5164_v49 = vpack.c.bf16 %v5148_v28, %v5148_v28  ;;  %v5165_v11 = vpack.c.bf16 %v5149_v47, %v5149_v47  ;;  %v5274_v28 = vld [vmem:[%s10452_s28 + $0xf5] ss:$0 sm:$0xff] }
 0x5e7   : > { %v5046_v16 = vsel %vm481_vm5, %v5032_v6, %v5045_v26  ;;  %v5200_v6 = vunpack.c.l.b16 %v5168_v10  ;;  %v5278_v26 = vld [vmem:[%s10452_s28 + $0x175] ss:$0 sm:$0xff] }
 0x5e8   : > { %9456 = vmatpush3.bf16.msra.mxu0 %v11766_v43  ;;  %v5047_v27 = vsel %vm483_vm6, %v5033_v39, %v5046_v16  ;;  %v5316_v39 = vunpack.c.l.b16 %v5284_v45  ;;  %v5324_v16 = vunpack.c.l.b16 %v5292_v8 }
 0x5e9   : > { %9457 = vmatprep.subr.bf16.mxu0 %v10255_v0  ;;  %v5048_v38 = vsel %vm485_vm7, %v5034_v29, %v5047_v27  ;;  %v5155_v29 = vld [vmem:[%s10452_s28 + $0x18d] ss:$0 sm:$0xff] }
 0x5ea   : > { %v5049_v3 = vpack.c.b16 %v5048_v38, %v5041_v60  ;;  %v5294_v60 = vpack.c.bf16 %v5278_v26, %v5278_v26  ;;  %v5171_v50 = vpack.c.bf16 %v5155_v29, %v5155_v29  ;;  %v5331_v51 = vsel %vm473_vm1, %v5316_v39, %v5315_v13  ;;  %v5150_v26 = vld [vmem:[%s10452_s28 + $0xed] ss:$0 sm:$0xff]  ;;  %v5282_v29 = vld [vmem:[%s10452_s28 + $0x1f5] ss:$0 sm:$0xff] }
 0x5eb   : > { %v5298_v47 = vpack.c.bf16 %v5282_v29, %v5282_v29  ;;  %v5395_v29 = vld [vmem:[%s10452_s28 + $0x9d] ss:$0 sm:$0xff] }
 0x5ec   : > { %9458 = vmatpush3.bf16.msra.mxu0 %v11777_v44  ;;  %v5326_v14 = vunpack.c.l.b16 %v5294_v60  ;;  %v5203_v61 = vunpack.c.l.b16 %v5171_v50 }
 0x5ed   : > { %9459 = vmatprep.subr.bf16.mxu0 %v10255_v0 }
 0x5f0   : > { %9460 = vmatpush3.bf16.msra.mxu0 %v11790_v56 }
 0x5f1   : > { %9461 = vmatprep.subr.bf16.mxu0 %v10255_v0 }
 0x5f4   : > { %9462 = vmatpush3.bf16.msra.mxu0 %v11801_v17 }
 0x5f5   : > { %9463 = vmatprep.subr.bf16.mxu0 %v10255_v0 }
 0x5f8   : > { %9464 = vmatpush3.bf16.msra.mxu0 %v11814_v31 }
 0x5f9   : > { %v4593_v30 = vpop.f32.mrb[52].mxu1  ;;  %9465 = vmatprep.subr.bf16.mxu0 %v10255_v0 }
 0x5fa   : > { %v4594_v36 = vadd.f32 %v11735_v41, %v4593_v30  ;;  %v9451_v52 = vpop.f32.mrb[53].mxu1  ;;  %v5162_v30 = vpack.c.bf16 %v5146_v12, %v5146_v12  ;;  %v5195_v12 = vunpack.c.l.b16 %v5163_v33 }
 0x5fb   : > { %v4596_v40 = vpop.f32.mrb[54].mxu1  ;;  %v5201_v52 = vunpack.c.l.b16 %v5169_v34  ;;  %v5288_v34 = vpack.c.bf16 %v5272_v59, %v5272_v59 }
 0x5fc   : > { %v4597_v18 = vadd.f32 %v11735_v41, %v4596_v40  ;;  %v9452_v35 = vpop.f32.mrb[55].mxu1  ;;  %9466 = vmatpush3.bf16.msra.mxu0 %v11823_v24  ;;  %v4600_v32 = vmax.f32 %v4594_v36, 0.0  ;;  %v5143_v41 = vld [vmem:[%s10452_s28 + $0xd] ss:$0 sm:$0xff]  ;;  %v5193_v36 = vunpack.c.l.b16 %v5161_v58  ;;  %v5271_v40 = vld [vmem:[%s10452_s28 + $0x95] ss:$0 sm:$0xff]  ;;  %v5194_v48 = vunpack.c.l.b16 %v5162_v30 }
 0x5fd   : > { %9467 = vmatprep.subr.bf16.mxu0 %v10255_v0  ;;  %v5159_v53 = vpack.c.bf16 %v5143_v41, %v5143_v41  ;;  %v5286_v35 = vpack.c.bf16 %v5270_v9, %v5270_v9  ;;  %v5325_v41 = vunpack.c.l.b16 %v5293_v37  ;;  %v5287_v1 = vpack.c.bf16 %v5271_v40, %v5271_v40  ;;  %v5281_v58 = vld [vmem:[%s10452_s28 + $0x1d5] ss:$0 sm:$0xff] }
 0x5fe   : > { %v4601_v46 = vmax.f32 %v4597_v18, 0.0  ;;  %v5279_v18 = vld [vmem:[%s10452_s28 + $0x195] ss:$0 sm:$0xff]  ;;  %v5173_v37 = vpack.c.bf16 %v5157_v19, %v5157_v19  ;;  %v5297_v33 = vpack.c.bf16 %v5281_v58, %v5281_v58 }
 0x5ff   : > { %v5191_v5 = vunpack.c.l.b16 %v5159_v53  ;;  %v5280_v53 = vld [vmem:[%s10452_s28 + $0x1b5] ss:$0 sm:$0xff]  ;;  %v5295_v63 = vpack.c.bf16 %v5279_v18, %v5279_v18  ;;  %v5318_v10 = vunpack.c.l.b16 %v5286_v35  ;;  %v5166_v18 = vpack.c.bf16 %v5150_v26, %v5150_v26  ;;  %v5394_v26 = vld [vmem:[%s10452_s28 + $0x7d] ss:$0 sm:$0xff] }
 0x600   : > { %v4602_v54 = vpack.c.bf16 %v4601_v46, %v4600_v32  ;;  %9468 = vmatpush3.bf16.msra.mxu0 %v11834_v42  ;;  %v5214_v32 = vsel %vm473_vm1, %v5200_v6, %v5199_v23  ;;  %v5317_v46 = vunpack.c.l.b16 %v5285_v2  ;;  %v5319_v6 = vunpack.c.l.b16 %v5287_v1  ;;  %v5158_v2 = vld [vmem:[%s10452_s28 + $0x1ed] ss:$0 sm:$0xff] }
 0x601   : > { %9493 = vmatprep.subr.bf16.mxu0 %v10255_v0  ;;  %v5207_v38 = vsel %vm473_vm1, %v5192_v62, %v5191_v5  ;;  %v5215_v20 = vsel %vm475_vm2, %v5201_v52, %v5214_v32  ;;  %v5296_v5 = vpack.c.bf16 %v5280_v53, %v5280_v53  ;;  %v5327_v9 = vunpack.c.l.b16 %v5295_v63 }
 0x602   : > { %4933 = vmatprep.mubr.bf16.mxu1 %v4602_v54  ;;  %v5338_v54 = vsel %vm473_vm1, %v5324_v16, %v5323_v15  ;;  %v5208_v57 = vsel %vm475_vm2, %v5193_v36, %v5207_v38  ;;  %v5332_v22 = vsel %vm475_vm2, %v5317_v46, %v5331_v51  ;;  %v5196_v15 = vunpack.c.l.b16 %v5164_v49 }
 0x603   : > { %4934 = vmatmul.mubr.bf16.vlgmr.msra.gmra.mrb[56].mxu1 %v11758_v21  ;;  %9470 = vmatmul.mubr.bf16.vlgmr.msra.gmra.mrb[60].mxu0 %v5049_v3  ;;  %v5154_v21 = vld [vmem:[%s10452_s28 + $0x16d] ss:$0 sm:$0xff]  ;;  %v5339_v8 = vsel %vm475_vm2, %v5325_v41, %v5338_v54  ;;  %v5209_v62 = vsel %vm477_vm3, %v5194_v48, %v5208_v57  ;;  %v5333_v13 = vsel %vm477_vm3, %v5318_v10, %v5332_v22  ;;  %v5320_v52 = vunpack.c.l.b16 %v5288_v34  ;;  %v5391_v22 = vld [vmem:[%s10452_s28 + $0x1d] ss:$0 sm:$0xff] }
 0x604   : > { %9474 = vmatpush3.bf16.msra.mxu1 %v11756_v25  ;;  %9489 = vmatprep.mubr.msk.bf16.mxu1 %vm10256_vm0, %v10255_v0  ;;  %v5170_v27 = vpack.c.bf16 %v5154_v21, %v5154_v21  ;;  %v5156_v3 = vld [vmem:[%s10452_s28 + $0x1ad] ss:$0 sm:$0xff]  ;;  %v5273_v21 = vld [vmem:[%s10452_s28 + $0xd5] ss:$0 sm:$0xff]  ;;  %v5340_v39 = vsel %vm477_vm3, %v5326_v14, %v5339_v8  ;;  %v5328_v40 = vunpack.c.l.b16 %v5296_v5  ;;  %v5174_v35 = vpack.c.bf16 %v5158_v2, %v5158_v2  ;;  %v5393_v34 = vld [vmem:[%s10452_s28 + $0x5d] ss:$0 sm:$0xff] }
 0x605   : > { %9475 = vmatprep.subr.bf16.mxu1 %v10255_v0  ;;  %9494 = vmatpush3.bf16.msra.mxu0 %v11756_v25  ;;  %v5172_v45 = vpack.c.bf16 %v5156_v3, %v5156_v3  ;;  %v5289_v30 = vpack.c.bf16 %v5273_v21, %v5273_v21  ;;  %v5334_v60 = vsel %vm479_vm4, %v5319_v6, %v5333_v13  ;;  %v5197_v32 = vunpack.c.l.b16 %v5165_v11  ;;  %v5400_v21 = vld [vmem:[%s10452_s28 + $0x13d] ss:$0 sm:$0xff] }
 0x606   : > { %9495 = vmatprep.subr.bf16.mxu0 %v10255_v0  ;;  %9509 = vmatprep.mubr.msk.bf16.mxu0 %vm10256_vm0, %v10255_v0  ;;  %v5202_v55 = vunpack.c.l.b16 %v5170_v27  ;;  %v5210_v27 = vsel %vm479_vm4, %v5195_v12, %v5209_v62  ;;  %v5341_v38 = vsel %vm479_vm4, %v5327_v9, %v5340_v39  ;;  %v5205_v46 = vunpack.c.l.b16 %v5173_v37  ;;  %v5392_v12 = vld [vmem:[%s10452_s28 + $0x3d] ss:$0 sm:$0xff] }
 0x607   : > { %v5204_v16 = vunpack.c.l.b16 %v5172_v45  ;;  %v5290_v41 = vpack.c.bf16 %v5274_v28, %v5274_v28  ;;  %v5211_v3 = vsel %vm481_vm5, %v5196_v15, %v5210_v27  ;;  %v5321_v50 = vunpack.c.l.b16 %v5289_v30  ;;  %v5401_v5 = vld [vmem:[%s10452_s28 + $0x15d] ss:$0 sm:$0xff] }
 0x608   : > { %9476 = vmatpush3.bf16.msra.mxu1 %v11766_v43  ;;  %v5216_v23 = vsel %vm477_vm3, %v5202_v55, %v5215_v20  ;;  %v5329_v51 = vunpack.c.l.b16 %v5297_v33  ;;  %v5335_v54 = vsel %vm481_vm5, %v5320_v52, %v5334_v60  ;;  %v5342_v48 = vsel %vm481_vm5, %v5328_v40, %v5341_v38  ;;  %v5402_v2 = vld [vmem:[%s10452_s28 + $0x17d] ss:$0 sm:$0xff] }
 0x609   : > { %9477 = vmatprep.subr.bf16.mxu1 %v10255_v0  ;;  %9496 = vmatpush3.bf16.msra.mxu0 %v11766_v43  ;;  %v5217_v36 = vsel %vm479_vm4, %v5203_v61, %v5216_v23  ;;  %v5198_v55 = vunpack.c.l.b16 %v5166_v18  ;;  %v5206_v59 = vunpack.c.l.b16 %v5174_v35  ;;  %v5212_v53 = vsel %vm483_vm6, %v5197_v32, %v5211_v3  ;;  %v5399_v61 = vld [vmem:[%s10452_s28 + $0x11d] ss:$0 sm:$0xff] }
 0x60a   : > { %9497 = vmatprep.subr.bf16.mxu0 %v10255_v0  ;;  %v5218_v49 = vsel %vm481_vm5, %v5204_v16, %v5217_v36  ;;  %v5322_v63 = vunpack.c.l.b16 %v5290_v41  ;;  %v5330_v57 = vunpack.c.l.b16 %v5298_v47  ;;  %v5336_v20 = vsel %vm483_vm6, %v5321_v50, %v5335_v54  ;;  %v5396_v18 = vld [vmem:[%s10452_s28 + $0xbd] ss:$0 sm:$0xff] }
 0x60b   : > { %v5219_v1 = vsel %vm483_vm6, %v5205_v46, %v5218_v49  ;;  %v5343_v10 = vsel %vm483_vm6, %v5329_v51, %v5342_v48  ;;  %v5213_v14 = vsel %vm485_vm7, %v5198_v55, %v5212_v53  ;;  %v5407_v62 = vpack.c.bf16 %v5391_v22, %v5391_v22  ;;  %v5404_v35 = vld [vmem:[%s10452_s28 + $0x1bd] ss:$0 sm:$0xff] }
 0x60c   : > { %9478 = vmatpush3.bf16.msra.mxu1 %v11777_v44  ;;  %v5220_v19 = vsel %vm485_vm7, %v5206_v59, %v5219_v1  ;;  %v5337_v11 = vsel %vm485_vm7, %v5322_v63, %v5336_v20  ;;  %v5344_v45 = vsel %vm485_vm7, %v5330_v57, %v5343_v10  ;;  %v5408_v23 = vpack.c.bf16 %v5392_v12, %v5392_v12  ;;  %v5397_v47 = vld [vmem:[%s10452_s28 + $0xdd] ss:$0 sm:$0xff] }
 0x60d   : > { %9479 = vmatprep.subr.bf16.mxu1 %v10255_v0  ;;  %9498 = vmatpush3.bf16.msra.mxu0 %v11777_v44  ;;  %v5221_v8 = vpack.c.b16 %v5220_v19, %v5213_v14  ;;  %v5345_v58 = vpack.c.b16 %v5344_v45, %v5337_v11  ;;  %v5415_v6 = vpack.c.bf16 %v5399_v61, %v5399_v61  ;;  %v5439_v39 = vunpack.c.l.b16 %v5407_v62  ;;  %v5405_v3 = vld [vmem:[%s10452_s28 + $0x1dd] ss:$0 sm:$0xff]  ;;  %v9997_v62 = vld [vmem:[#allocation6 + $0x548] sm:$0xff]  }
 0x60e   : > { %9499 = vmatprep.subr.bf16.mxu0 %v10255_v0  ;;  %v5416_v9 = vpack.c.bf16 %v5400_v21, %v5400_v21  ;;  %v5409_v37 = vpack.c.bf16 %v5393_v34, %v5393_v34  ;;  %v5417_v13 = vpack.c.bf16 %v5401_v5, %v5401_v5  ;;  %v5440_v15 = vunpack.c.l.b16 %v5408_v23  ;;  %v5398_v55 = vld [vmem:[%s10452_s28 + $0xfd] ss:$0 sm:$0xff]  ;;  %v9996_v5 = vld [vmem:[#allocation6 + $0x500] sm:$0xff]   ;;  %v9998_v23 = vld [vmem:[#allocation6 + $0x508] sm:$0xff]  }
 0x60f   : > { %v5447_v16 = vunpack.c.l.b16 %v5415_v6  ;;  %v5410_v30 = vpack.c.bf16 %v5394_v26, %v5394_v26  ;;  %v5418_v33 = vpack.c.bf16 %v5402_v2, %v5402_v2  ;;  %v5411_v60 = vpack.c.bf16 %v5395_v29, %v5395_v29  ;;  %v5406_v59 = vld [vmem:[%s10452_s28 + $0x1fd] ss:$0 sm:$0xff]  ;;  %v9999_v6 = vld [vmem:[#allocation6 + $0x550] sm:$0xff]   ;;  %v10003_v2 = vld [vmem:[#allocation6 + $0x560] sm:$0xff]  }
 0x610   : > { %9480 = vmatpush3.bf16.msra.mxu1 %v11790_v56  ;;  %v5448_v28 = vunpack.c.l.b16 %v5416_v9  ;;  %v5441_v27 = vunpack.c.l.b16 %v5409_v37  ;;  %v5449_v36 = vunpack.c.l.b16 %v5417_v13  ;;  %v5455_v52 = vsel %vm473_vm1, %v5440_v15, %v5439_v39  ;;  %v10001_v9 = vld [vmem:[#allocation6 + $0x558] sm:$0xff]   ;;  %v10004_v37 = vld [vmem:[#allocation6 + $0x520] sm:$0xff]   ;;  %v10006_v13 = vld [vmem:[#allocation6 + $0x528] sm:$0xff]  }
 0x611   : > { %9481 = vmatprep.subr.bf16.mxu1 %v10255_v0  ;;  %9500 = vmatpush3.bf16.msra.mxu0 %v11790_v56  ;;  %v5450_v32 = vunpack.c.l.b16 %v5418_v33  ;;  %v5412_v49 = vpack.c.bf16 %v5396_v18, %v5396_v18  ;;  %v5420_v50 = vpack.c.bf16 %v5404_v35, %v5404_v35  ;;  %v5443_v51 = vunpack.c.l.b16 %v5411_v60  ;;  %v10002_v26 = vld [vmem:[#allocation6 + $0x518] sm:$0xff]   ;;  %v10007_v39 = vld [vmem:[#allocation6 + $0x570] sm:$0xff]   ;;  %v10011_v29 = vld [vmem:[#allocation6 + $0x5c0] sm:$0xff]  }
 0x612   : > { %9501 = vmatprep.subr.bf16.mxu0 %v10255_v0  ;;  %v5462_v40 = vsel %vm473_vm1, %v5448_v28, %v5447_v16  ;;  %v5456_v46 = vsel %vm475_vm2, %v5441_v27, %v5455_v52  ;;  %v5413_v53 = vpack.c.bf16 %v5397_v47, %v5397_v47  ;;  %v5421_v1 = vpack.c.bf16 %v5405_v3, %v5405_v3  ;;  %v10008_v15 = vld [vmem:[#allocation6 + $0x530] sm:$0xff]   ;;  %v10009_v16 = vld [vmem:[#allocation6 + $0x578] sm:$0xff]   ;;  %v10014_v33 = vld [vmem:[#allocation6 + $0x588] sm:$0xff]  }
 0x613   : > { %v5463_v41 = vsel %vm475_vm2, %v5449_v36, %v5462_v40  ;;  %v5444_v63 = vunpack.c.l.b16 %v5412_v49  ;;  %v5452_v57 = vunpack.c.l.b16 %v5420_v50  ;;  %v5414_v14 = vpack.c.bf16 %v5398_v55, %v5398_v55  ;;  %v10010_v28 = vld [vmem:[#allocation6 + $0x538] sm:$0xff]   ;;  %v10015_v27 = vld [vmem:[#allocation6 + $0x5d0] sm:$0xff]   ;;  %v10019_v18 = vld [vmem:[#allocation6 + $0x5e0] sm:$0xff]  }
 0x614   : > { %9482 = vmatpush3.bf16.msra.mxu1 %v11801_v17  ;;  %v5464_v48 = vsel %vm477_vm3, %v5450_v32, %v5463_v41  ;;  %v5445_v19 = vunpack.c.l.b16 %v5413_v53  ;;  %v5453_v11 = vunpack.c.l.b16 %v5421_v1  ;;  %v10016_v36 = vld [vmem:[#allocation6 + $0x590] sm:$0xff]   ;;  %v10017_v52 = vld [vmem:[#allocation6 + $0x5d8] sm:$0xff]   ;;  %v10020_v35 = vld [vmem:[#allocation6 + $0x5a0] sm:$0xff]  }
 0x615   : > { %9483 = vmatprep.subr.bf16.mxu1 %v10255_v0  ;;  %9502 = vmatpush3.bf16.msra.mxu0 %v11801_v17  ;;  %v10018_v40 = vld [vmem:[#allocation6 + $0x598] sm:$0xff]   ;;  %v10021_v60 = vld [vmem:[#allocation6 + $0x5e8] sm:$0xff]   ;;  %v10024_v32 = vld [vmem:[#allocation6 + $0x5b0] sm:$0xff]  }
 0x616   : > { %9503 = vmatprep.subr.bf16.mxu0 %v10255_v0  ;;  %v10026_v41 = vld [vmem:[#allocation6 + $0x5b8] sm:$0xff]  }
 0x618   : > { %9484 = vmatpush3.bf16.msra.mxu1 %v11814_v31 }
 0x619   : > { %9485 = vmatprep.subr.bf16.mxu1 %v10255_v0  ;;  %9504 = vmatpush3.bf16.msra.mxu0 %v11814_v31 }
 0x61a   : > { %9505 = vmatprep.subr.bf16.mxu0 %v10255_v0 }
 0x61c   : > { %9486 = vmatpush3.bf16.msra.mxu1 %v11823_v24 }
 0x61d   : > { %9487 = vmatprep.subr.bf16.mxu1 %v10255_v0  ;;  %9506 = vmatpush3.bf16.msra.mxu0 %v11823_v24 }
 0x61e   : > { %9507 = vmatprep.subr.bf16.mxu0 %v10255_v0 }
 0x620   : > { %9488 = vmatpush3.bf16.msra.mxu1 %v11834_v42 }
 0x621   : > { %9513 = vmatprep.subr.bf16.mxu1 %v10255_v0  ;;  %9508 = vmatpush3.bf16.msra.mxu0 %v11834_v42 }
 0x623   : > { %9490 = vmatmul.mubr.bf16.vlgmr.msra.gmra.mrb[60].mxu1 %v5221_v8  ;;  %v5446_v8 = vunpack.c.l.b16 %v5414_v14 }
 0x624   : > { %9514 = vmatpush3.bf16.msra.mxu1 %v11756_v25  ;;  %9510 = vmatmul.mubr.bf16.vlgmr.msra.gmra.mrb[64].mxu0 %v5345_v58  ;;  %v5403_v25 = vld [vmem:[%s10452_s28 + $0x19d] ss:$0 sm:$0xff] }
 0x625   : > { %9515 = vmatprep.subr.bf16.mxu1 %v10255_v0  ;;  %9529 = vmatprep.mubr.msk.bf16.mxu1 %vm10256_vm0, %v10255_v0  ;;  %v5419_v38 = vpack.c.bf16 %v5403_v25, %v5403_v25  ;;  %v10012_v25 = vld [vmem:[#allocation6 + $0x580] sm:$0xff]  }
 0x627   : > { %v5451_v54 = vunpack.c.l.b16 %v5419_v38  ;;  %v10022_v38 = vld [vmem:[#allocation6 + $0x5a8] sm:$0xff]  }
 0x628   : > { %9516 = vmatpush3.bf16.msra.mxu1 %v11766_v43  ;;  %v5442_v43 = vunpack.c.l.b16 %v5410_v30  ;;  %v10013_v30 = vld [vmem:[#allocation6 + $0x5c8] sm:$0xff]  }
 0x629   : > { %9517 = vmatprep.subr.bf16.mxu1 %v10255_v0  ;;  %v5465_v10 = vsel %vm479_vm4, %v5451_v54, %v5464_v48 }
 0x62a   : > { %v5466_v22 = vsel %vm481_vm5, %v5452_v57, %v5465_v10 }
 0x62c   : > { %9518 = vmatpush3.bf16.msra.mxu1 %v11777_v44  ;;  %v5457_v44 = vsel %vm477_vm3, %v5442_v43, %v5456_v46  ;;  %v10023_v43 = vld [vmem:[#allocation6 + $0x5f0] sm:$0xff]   ;;  %v10025_v46 = vld [vmem:[#allocation6 + $0x5f8] sm:$0xff]  }
 0x62d   : > { %9519 = vmatprep.subr.bf16.mxu1 %v10255_v0  ;;  %v5458_v20 = vsel %vm479_vm4, %v5443_v51, %v5457_v44  ;;  %v11993_v44 = vld [vmem:[%s12649_s2] ss:$0 sm:$0xff] }
 0x62e   : > { %v5459_v45 = vsel %vm481_vm5, %v5444_v63, %v5458_v20 }
 0x62f   : > { %v5460_v61 = vsel %vm483_vm6, %v5445_v19, %v5459_v45 }
 0x630   : > { %9520 = vmatpush3.bf16.msra.mxu1 %v11790_v56  ;;  %v5422_v56 = vpack.c.bf16 %v5406_v59, %v5406_v59  ;;  %v5461_v21 = vsel %vm485_vm7, %v5446_v8, %v5460_v61 }
 0x631   : > { %9521 = vmatprep.subr.bf16.mxu1 %v10255_v0 }
 0x632   : > { %v5454_v12 = vunpack.c.l.b16 %v5422_v56 }
 0x634   : > { %9522 = vmatpush3.bf16.msra.mxu1 %v11801_v17  ;;  %v5467_v17 = vsel %vm483_vm6, %v5453_v11, %v5466_v22 }
 0x635   : > { %9523 = vmatprep.subr.bf16.mxu1 %v10255_v0  ;;  %v5468_v58 = vsel %vm485_vm7, %v5454_v12, %v5467_v17 }
 0x636   : > { %v5469_v34 = vpack.c.b16 %v5468_v58, %v5461_v21 }
 0x638   : > { %9524 = vmatpush3.bf16.msra.mxu1 %v11814_v31  ;;  %v9995_v31 = vld [vmem:[#allocation6 + $0x540] sm:$0xff]  }
 0x639   : > { %9525 = vmatprep.subr.bf16.mxu1 %v10255_v0  ;;  %8833 = vmatprep.subr.bf16.mxu0 %v9995_v31 }
 0x63a   : > { %8834 = vmatpush3.bf16.msra.mxu0 %v9996_v5 }
 0x63b   : > { %8835 = vmatprep.subr.bf16.mxu0 %v9997_v62 }
 0x63c   : > { %9526 = vmatpush3.bf16.msra.mxu1 %v11823_v24  ;;  %v10000_v24 = vld [vmem:[#allocation6 + $0x510] sm:$0xff]  }
 0x63d   : > { %9527 = vmatprep.subr.bf16.mxu1 %v10255_v0 }
 0x63e   : > { %8836 = vmatpush3.bf16.msra.mxu0 %v9998_v23 }
 0x63f   : > { %8837 = vmatprep.subr.bf16.mxu0 %v9999_v6 }
 0x640   : > { %9528 = vmatpush3.bf16.msra.mxu1 %v11834_v42  ;;  %v10005_v42 = vld [vmem:[#allocation6 + $0x568] sm:$0xff]  }
 0x641   : > { %8855 = vmatprep.subr.bf16.mxu1 %v10011_v29  ;;  %v12014_v29 = vld [vmem:[%s12648_s1] sm:$0xff]  }
 0x642   : > { %8838 = vmatpush3.bf16.msra.mxu0 %v10000_v24 }
 0x643   : > { %9530 = vmatmul.mubr.bf16.vlgmr.msra.gmra.mrb[64].mxu1 %v5469_v34  ;;  %8839 = vmatprep.subr.bf16.mxu0 %v10001_v9 }
 0x644   : > { %8856 = vmatpush3.bf16.msra.mxu1 %v10012_v25 }
 0x645   : > { %8857 = vmatprep.subr.bf16.mxu1 %v10013_v30  ;;  %v5862_v30 = vld [vmem:[%s10452_s28 + $0x46] ss:$0 sm:$0xff] }
 0x646   : > { %8840 = vmatpush3.bf16.msra.mxu0 %v10002_v26 }
 0x647   : > { %8841 = vmatprep.subr.bf16.mxu0 %v10003_v2 }
 0x648   : > { %8858 = vmatpush3.bf16.msra.mxu1 %v10014_v33  ;;  %v5870_v33 = vld [vmem:[%s10452_s28 + $0x146] ss:$0 sm:$0xff] }
 0x649   : > { %8859 = vmatprep.subr.bf16.mxu1 %v10015_v27 }
 0x64a   : > { %8842 = vmatpush3.bf16.msra.mxu0 %v10004_v37 }
 0x64b   : > { %8843 = vmatprep.subr.bf16.mxu0 %v10005_v42  ;;  %v5860_v42 = vld [vmem:[%s10452_s28 + $0x6] ss:$0 sm:$0xff] }
 0x64c   : > { %8860 = vmatpush3.bf16.msra.mxu1 %v10016_v36  ;;  %v5876_v27 = vpack.c.bf16 %v5860_v42, %v5860_v42 }
 0x64d   : > { %8861 = vmatprep.subr.bf16.mxu1 %v10017_v52 }
 0x64e   : > { %8844 = vmatpush3.bf16.msra.mxu0 %v10006_v13  ;;  %v5861_v13 = vld [vmem:[%s10452_s28 + $0x26] ss:$0 sm:$0xff] }
 0x64f   : > { %8845 = vmatprep.subr.bf16.mxu0 %v10007_v39  ;;  %v5877_v36 = vpack.c.bf16 %v5861_v13, %v5861_v13 }
 0x650   : > { %8862 = vmatpush3.bf16.msra.mxu1 %v10018_v40 }
 0x651   : > { %8863 = vmatprep.subr.bf16.mxu1 %v10019_v18  ;;  %v12024_v18 = vld [vmem:[%s12648_s1 + $0x8] sm:$0xff]  }
 0x652   : > { %8846 = vmatpush3.bf16.msra.mxu0 %v10008_v15  ;;  %v5868_v15 = vld [vmem:[%s10452_s28 + $0x106] ss:$0 sm:$0xff] }
 0x653   : > { %8847 = vmatprep.subr.bf16.mxu0 %v10009_v16  ;;  %v5869_v16 = vld [vmem:[%s10452_s28 + $0x126] ss:$0 sm:$0xff]  ;;  %v5884_v52 = vpack.c.bf16 %v5868_v15, %v5868_v15 }
 0x654   : > { %8864 = vmatpush3.bf16.msra.mxu1 %v10020_v35  ;;  %v5885_v40 = vpack.c.bf16 %v5869_v16, %v5869_v16  ;;  %v5863_v35 = vld [vmem:[%s10452_s28 + $0x66] ss:$0 sm:$0xff] }
 0x655   : > { %8865 = vmatprep.subr.bf16.mxu1 %v10021_v60  ;;  %v5871_v60 = vld [vmem:[%s10452_s28 + $0x166] ss:$0 sm:$0xff] }
 0x656   : > { %8848 = vmatpush3.bf16.msra.mxu0 %v10010_v28 }
 0x657   : > { %9533 = vmatprep.subr.bf16.mxu0 %v10255_v0 }
 0x658   : > { %8866 = vmatpush3.bf16.msra.mxu1 %v10022_v38  ;;  %v5878_v38 = vpack.c.bf16 %v5862_v30, %v5862_v30 }
 0x659   : > { %8867 = vmatprep.subr.bf16.mxu1 %v10023_v43  ;;  %v5886_v43 = vpack.c.bf16 %v5870_v33, %v5870_v33 }
 0x65c   : > { %8868 = vmatpush3.bf16.msra.mxu1 %v10024_v32  ;;  %v5931_v32 = vunpack.c.l.b16 %v5876_v27 }
 0x65d   : > { %8869 = vmatprep.subr.bf16.mxu1 %v10025_v46  ;;  %v5932_v46 = vunpack.c.l.b16 %v5877_v36 }
 0x660   : > { %8870 = vmatpush3.bf16.msra.mxu1 %v10026_v41  ;;  %v5939_v41 = vunpack.c.l.b16 %v5884_v52 }
 0x661   : > { %9553 = vmatprep.subr.bf16.mxu1 %v10255_v0 }
 0x6b6   : > { %v8769_v47 = vpop.f32.mrb[56].mxu0 }
 0x6b7   : > { %v8770_v3 = vpop.f32.mrb[57].mxu0 }
 0x6b8   : > { %v8771_v49 = vadd.f32 %v8770_v3, %v8769_v47  ;;  %v8772_v50 = vpop.f32.mrb[58].mxu0  ;;  %v5940_v47 = vunpack.c.l.b16 %v5885_v40  ;;  %v12035_v3 = vld [vmem:[%s12648_s1 + $0x10] sm:$0xff]  }
 0x6b9   : > { %v8773_v51 = vpop.f32.mrb[59].mxu0 }
 0x6ba   : > { %v8774_v54 = vadd.f32 %v8773_v51, %v8772_v50  ;;  %v5872_v50 = vld [vmem:[%s10452_s28 + $0x186] ss:$0 sm:$0xff]  ;;  %v5879_v51 = vpack.c.bf16 %v5863_v35, %v5863_v35 }
 0x6d6   : > { %v8791_v48 = vpop.f32.mrb[56].mxu1  ;;  %v5133_v55 = vpop.f32.mrb[60].mxu0 }
 0x6d7   : > { %v8792_v59 = vpop.f32.mrb[57].mxu1  ;;  %v5134_v53 = vadd.f32 %v11993_v44, %v5133_v55  ;;  %v9471_v1 = vpop.f32.mrb[61].mxu0  ;;  %v5941_v55 = vunpack.c.l.b16 %v5886_v43 }
 0x6d8   : > { %v8793_v63 = vadd.f32 %v8792_v59, %v8791_v48  ;;  %v8794_v57 = vpop.f32.mrb[58].mxu1  ;;  %v5136_v20 = vpop.f32.mrb[62].mxu0  ;;  %v5933_v48 = vunpack.c.l.b16 %v5878_v38  ;;  %v5947_v59 = vsel %vm473_vm1, %v5932_v46, %v5931_v32  ;;  %v5865_v1 = vld [vmem:[%s10452_s28 + $0xa6] ss:$0 sm:$0xff]  ;;  %v12092_v32 = vld [vmem:[%s12648_s1 + $0x38] sm:$0xff]  }
 0x6d9   : > { %v8795_v10 = vpop.f32.mrb[59].mxu1  ;;  %v5140_v14 = vmax.f32 %v5134_v53, 0.0  ;;  %v5137_v56 = vadd.f32 %v11993_v44, %v5136_v20  ;;  %v9472_v19 = vpop.f32.mrb[63].mxu0  ;;  %v5954_v53 = vsel %vm473_vm1, %v5940_v47, %v5939_v41  ;;  %v5888_v20 = vpack.c.bf16 %v5872_v50, %v5872_v50  ;;  %v6056_v50 = vld [vmem:[%s10452_s28 + $0x2e] ss:$0 sm:$0xff] }
 0x6da   : > { %v4936_v11 = vadd.f32 %v8793_v63, %v8771_v49  ;;  %v8796_v45 = vadd.f32 %v8795_v10, %v8794_v57  ;;  %v5864_v49 = vld [vmem:[%s10452_s28 + $0x86] ss:$0 sm:$0xff]  ;;  %v12048_v10 = vld [vmem:[%s12648_s1 + $0x18] sm:$0xff]   ;;  %v5948_v19 = vsel %vm475_vm2, %v5933_v48, %v5947_v59  ;;  %v6064_v48 = vld [vmem:[%s10452_s28 + $0x12e] ss:$0 sm:$0xff] }
 0x6db   : > { %v5141_v22 = vmax.f32 %v5137_v56, 0.0  ;;  %v5873_v63 = vld [vmem:[%s10452_s28 + $0x1a6] ss:$0 sm:$0xff]  ;;  %v5880_v57 = vpack.c.bf16 %v5864_v49, %v5864_v49 }
 0x6dc   : > { %v11998_v8 = vadd.f32 %v4936_v11, %v11740_v7  ;;  %v4939_v12 = vadd.f32 %v8796_v45, %v8774_v54  ;;  %v5887_v54 = vpack.c.bf16 %v5871_v60, %v5871_v60  ;;  %v5955_v11 = vsel %vm475_vm2, %v5941_v55, %v5954_v53  ;;  %v5866_v45 = vld [vmem:[%s10452_s28 + $0xc6] ss:$0 sm:$0xff]  ;;  %v6179_v55 = vld [vmem:[%s10452_s28 + $0x16] ss:$0 sm:$0xff] }
 0x6dd   : > { %v5142_v61 = vpack.c.bf16 %v5141_v22, %v5140_v14  ;;  %v5934_v14 = vunpack.c.l.b16 %v5879_v51  ;;  %v5874_v22 = vld [vmem:[%s10452_s28 + $0x1c6] ss:$0 sm:$0xff]  ;;  %v6180_v53 = vld [vmem:[%s10452_s28 + $0x36] ss:$0 sm:$0xff] }
 0x6de   : > { %v12001_v17 = vadd.f32 %v4939_v12, %v11743_v4  ;;  %v5942_v56 = vunpack.c.l.b16 %v5887_v54  ;;  %v5881_v12 = vpack.c.bf16 %v5865_v1, %v5865_v1  ;;  %v6063_v54 = vld [vmem:[%s10452_s28 + $0x10e] ss:$0 sm:$0xff]  ;;  %v6187_v1 = vld [vmem:[%s10452_s28 + $0x116] ss:$0 sm:$0xff] }
 0x6f6   : > { %v5257_v21 = vpop.f32.mrb[60].mxu1 }
 0x6f7   : > { %v5258_v58 = vadd.f32 %v11993_v44, %v5257_v21  ;;  %v9491_v34 = vpop.f32.mrb[61].mxu1  ;;  %v5381_v31 = vpop.f32.mrb[64].mxu0  ;;  %v5935_v21 = vunpack.c.l.b16 %v5880_v57 }
 0x6f8   : > { %v5260_v5 = vpop.f32.mrb[62].mxu1  ;;  %v5382_v62 = vadd.f32 %v11993_v44, %v5381_v31  ;;  %v9511_v23 = vpop.f32.mrb[65].mxu0  ;;  %v12059_v34 = vld [vmem:[%s12648_s1 + $0x20] sm:$0xff]   ;;  %v5949_v31 = vsel %vm477_vm3, %v5934_v14, %v5948_v19  ;;  %v6057_v14 = vld [vmem:[%s10452_s28 + $0x4e] ss:$0 sm:$0xff]  ;;  %v6079_v19 = vpack.c.bf16 %v6063_v54, %v6063_v54 }
 0x6f9   : > { %v5264_v7 = vmax.f32 %v5258_v58, 0.0  ;;  %v5261_v6 = vadd.f32 %v11993_v44, %v5260_v5  ;;  %v9492_v24 = vpop.f32.mrb[63].mxu1  ;;  %v5384_v4 = vpop.f32.mrb[66].mxu0  ;;  %v5943_v58 = vunpack.c.l.b16 %v5888_v20  ;;  %v5956_v5 = vsel %vm477_vm3, %v5942_v56, %v5955_v11  ;;  %v5875_v23 = vld [vmem:[%s10452_s28 + $0x1e6] ss:$0 sm:$0xff] }
 0x6fa   : > { %v5388_v9 = vmax.f32 %v5382_v62, 0.0  ;;  %v5385_v26 = vadd.f32 %v11993_v44, %v5384_v4  ;;  %v9512_v2 = vpop.f32.mrb[67].mxu0  ;;  %v5867_v62 = vld [vmem:[%s10452_s28 + $0xe6] ss:$0 sm:$0xff]  ;;  %v5936_v24 = vunpack.c.l.b16 %v5881_v12  ;;  %v5891_v42 = vpack.c.bf16 %v5875_v23, %v5875_v23  ;;  %v6065_v56 = vld [vmem:[%s10452_s28 + $0x14e] ss:$0 sm:$0xff] }
 0x6fb   : > { %v5265_v37 = vmax.f32 %v5261_v6, 0.0  ;;  %v5890_v6 = vpack.c.bf16 %v5874_v22, %v5874_v22  ;;  %v12072_v2 = vld [vmem:[%s12648_s1 + $0x28] sm:$0xff]   ;;  %v6072_v20 = vpack.c.bf16 %v6056_v50, %v6056_v50  ;;  %v6080_v11 = vpack.c.bf16 %v6064_v48, %v6064_v48  ;;  %v6181_v22 = vld [vmem:[%s10452_s28 + $0x56] ss:$0 sm:$0xff] }
 0x6fc   : > { %v5389_v39 = vmax.f32 %v5385_v26, 0.0  ;;  %v5957_v26 = vsel %vm479_vm4, %v5943_v58, %v5956_v5  ;;  %v5946_v33 = vunpack.c.l.b16 %v5891_v42  ;;  %v6189_v12 = vld [vmem:[%s10452_s28 + $0x156] ss:$0 sm:$0xff]  ;;  %v12119_v5 = vld [vmem:[%s10452_s28 + $0x8e] ss:$0 sm:$0xff]  ;;  %v6081_v23 = vpack.c.bf16 %v6065_v56, %v6065_v56 }
 0x6fd   : > { %v5266_v28 = vpack.c.bf16 %v5265_v37, %v5264_v7  ;;  %v5882_v7 = vpack.c.bf16 %v5866_v45, %v5866_v45  ;;  %v5883_v37 = vpack.c.bf16 %v5867_v62, %v5867_v62  ;;  %v6195_v45 = vpack.c.bf16 %v6179_v55, %v6179_v55  ;;  %v6061_v50 = vld [vmem:[%s10452_s28 + $0xce] ss:$0 sm:$0xff] }
 0x6fe   : > { %v12016_v25 = vpack.c.bf16 %v5389_v39, %v5388_v9  ;;  %v5950_v9 = vsel %vm479_vm4, %v5935_v21, %v5949_v31  ;;  %v5945_v39 = vunpack.c.l.b16 %v5890_v6  ;;  %v6203_v21 = vpack.c.bf16 %v6187_v1, %v6187_v1  ;;  %v6058_v31 = vld [vmem:[%s10452_s28 + $0x6e] ss:$0 sm:$0xff] }
 0x6ff   : > { %5804 = vmatprep.mubr.bf16.mxu0 %v5266_v28  ;;  %v5937_v13 = vunpack.c.l.b16 %v5882_v7  ;;  %v5951_v15 = vsel %vm481_vm5, %v5936_v24, %v5950_v9  ;;  %v12081_v28 = vld [vmem:[%s12648_s1 + $0x30] sm:$0xff]   ;;  %v5938_v30 = vunpack.c.l.b16 %v5883_v37  ;;  %v6073_v62 = vpack.c.bf16 %v6057_v14, %v6057_v14 }
 0x700   : > { %5805 = vmatmul.mubr.bf16.vlgmr.msra.gmra.mrb[68].mxu0 %v5142_v61  ;;  %v5889_v61 = vpack.c.bf16 %v5873_v63, %v5873_v63  ;;  %v6188_v63 = vld [vmem:[%s10452_s28 + $0x136] ss:$0 sm:$0xff]  ;;  %v6104_v6 = vunpack.c.l.b16 %v6072_v20  ;;  %v6111_v24 = vunpack.c.l.b16 %v6079_v19  ;;  %v6197_v37 = vpack.c.bf16 %v6181_v22, %v6181_v22  ;;  %v6069_v22 = vld [vmem:[%s10452_s28 + $0x1ce] ss:$0 sm:$0xff] }
 0x701   : > { %9534 = vmatpush3.bf16.msra.mxu0 %v12014_v29  ;;  %9549 = vmatprep.mubr.msk.bf16.mxu0 %vm10256_vm0, %v10255_v0  ;;  %v5952_v36 = vsel %vm483_vm6, %v5937_v13, %v5951_v15  ;;  %v6204_v58 = vpack.c.bf16 %v6188_v63, %v6188_v63  ;;  %v6182_v9 = vld [vmem:[%s10452_s28 + $0x76] ss:$0 sm:$0xff]  ;;  %v6205_v42 = vpack.c.bf16 %v6189_v12, %v6189_v12  ;;  %v6227_v13 = vunpack.c.l.b16 %v6195_v45 }
 0x702   : > { %9535 = vmatprep.subr.bf16.mxu0 %v10255_v0  ;;  %v5944_v4 = vunpack.c.l.b16 %v5889_v61  ;;  %v5953_v46 = vsel %vm485_vm7, %v5938_v30, %v5952_v36  ;;  %v6196_v61 = vpack.c.bf16 %v6180_v53, %v6180_v53  ;;  %v6235_v15 = vunpack.c.l.b16 %v6203_v21  ;;  %v6060_v30 = vld [vmem:[%s10452_s28 + $0xae] ss:$0 sm:$0xff]  ;;  %v6184_v63 = vld [vmem:[%s10452_s28 + $0xb6] ss:$0 sm:$0xff] }
 0x703   : > { %v6075_v36 = vpack.c.bf16 %v12119_v5, %v12119_v5  ;;  %v6076_v54 = vpack.c.bf16 %v6060_v30, %v6060_v30  ;;  %v6077_v12 = vpack.c.bf16 %v6061_v50, %v6061_v50  ;;  %v6186_v30 = vld [vmem:[%s10452_s28 + $0xf6] ss:$0 sm:$0xff] }
 0x704   : > { %v5958_v16 = vsel %vm481_vm5, %v5944_v4, %v5957_v26  ;;  %v6112_v4 = vunpack.c.l.b16 %v6080_v11  ;;  %v6190_v26 = vld [vmem:[%s10452_s28 + $0x176] ss:$0 sm:$0xff] }
 0x705   : > { %9536 = vmatpush3.bf16.msra.mxu0 %v12024_v18  ;;  %v5959_v52 = vsel %vm483_vm6, %v5945_v39, %v5958_v16  ;;  %v6228_v39 = vunpack.c.l.b16 %v6196_v61  ;;  %v6236_v16 = vunpack.c.l.b16 %v6204_v58 }
 0x706   : > { %9537 = vmatprep.subr.bf16.mxu0 %v10255_v0  ;;  %v5960_v41 = vsel %vm485_vm7, %v5946_v33, %v5959_v52  ;;  %v6067_v33 = vld [vmem:[%s10452_s28 + $0x18e] ss:$0 sm:$0xff] }
 0x707   : > { %v5961_v51 = vpack.c.b16 %v5960_v41, %v5953_v46  ;;  %v6206_v46 = vpack.c.bf16 %v6190_v26, %v6190_v26  ;;  %v6083_v48 = vpack.c.bf16 %v6067_v33, %v6067_v33  ;;  %v6243_v55 = vsel %vm473_vm1, %v6228_v39, %v6227_v13  ;;  %v6062_v26 = vld [vmem:[%s10452_s28 + $0xee] ss:$0 sm:$0xff]  ;;  %v6194_v33 = vld [vmem:[%s10452_s28 + $0x1f6] ss:$0 sm:$0xff] }
 0x708   : > { %v6210_v50 = vpack.c.bf16 %v6194_v33, %v6194_v33  ;;  %v6307_v33 = vld [vmem:[%s10452_s28 + $0x9e] ss:$0 sm:$0xff] }
 0x709   : > { %9538 = vmatpush3.bf16.msra.mxu0 %v12035_v3  ;;  %v6238_v45 = vunpack.c.l.b16 %v6206_v46  ;;  %v6115_v5 = vunpack.c.l.b16 %v6083_v48 }
 0x70a   : > { %9539 = vmatprep.subr.bf16.mxu0 %v10255_v0 }
 0x70d   : > { %9540 = vmatpush3.bf16.msra.mxu0 %v12048_v10 }
 0x70e   : > { %9541 = vmatprep.subr.bf16.mxu0 %v10255_v0 }
 0x711   : > { %9542 = vmatpush3.bf16.msra.mxu0 %v12059_v34 }
 0x712   : > { %9543 = vmatprep.subr.bf16.mxu0 %v10255_v0 }
 0x715   : > { %9544 = vmatpush3.bf16.msra.mxu0 %v12072_v2 }
 0x716   : > { %v5505_v27 = vpop.f32.mrb[64].mxu1  ;;  %9545 = vmatprep.subr.bf16.mxu0 %v10255_v0 }
 0x717   : > { %v5506_v40 = vadd.f32 %v11993_v44, %v5505_v27  ;;  %v9531_v35 = vpop.f32.mrb[65].mxu1  ;;  %v6074_v27 = vpack.c.bf16 %v6058_v31, %v6058_v31  ;;  %v6107_v31 = vunpack.c.l.b16 %v6075_v36 }
 0x718   : > { %v5508_v60 = vpop.f32.mrb[66].mxu1  ;;  %v6113_v35 = vunpack.c.l.b16 %v6081_v23  ;;  %v6200_v23 = vpack.c.bf16 %v6184_v63, %v6184_v63 }
 0x719   : > { %v5509_v38 = vadd.f32 %v11993_v44, %v5508_v60  ;;  %v9532_v43 = vpop.f32.mrb[67].mxu1  ;;  %9546 = vmatpush3.bf16.msra.mxu0 %v12081_v28  ;;  %v5512_v47 = vmax.f32 %v5506_v40, 0.0  ;;  %v6055_v44 = vld [vmem:[%s10452_s28 + $0xe] ss:$0 sm:$0xff]  ;;  %v6105_v40 = vunpack.c.l.b16 %v6073_v62  ;;  %v6183_v60 = vld [vmem:[%s10452_s28 + $0x96] ss:$0 sm:$0xff]  ;;  %v6106_v53 = vunpack.c.l.b16 %v6074_v27 }
 0x71a   : > { %9547 = vmatprep.subr.bf16.mxu0 %v10255_v0  ;;  %v6071_v57 = vpack.c.bf16 %v6055_v44, %v6055_v44  ;;  %v6198_v43 = vpack.c.bf16 %v6182_v9, %v6182_v9  ;;  %v6237_v44 = vunpack.c.l.b16 %v6205_v42  ;;  %v6199_v20 = vpack.c.bf16 %v6183_v60, %v6183_v60  ;;  %v6193_v62 = vld [vmem:[%s10452_s28 + $0x1d6] ss:$0 sm:$0xff] }
 0x71b   : > { %v5513_v49 = vmax.f32 %v5509_v38, 0.0  ;;  %v6191_v38 = vld [vmem:[%s10452_s28 + $0x196] ss:$0 sm:$0xff]  ;;  %v6085_v42 = vpack.c.bf16 %v6069_v22, %v6069_v22  ;;  %v6209_v36 = vpack.c.bf16 %v6193_v62, %v6193_v62 }
 0x71c   : > { %v6103_v7 = vunpack.c.l.b16 %v6071_v57  ;;  %v6192_v57 = vld [vmem:[%s10452_s28 + $0x1b6] ss:$0 sm:$0xff]  ;;  %v6207_v14 = vpack.c.bf16 %v6191_v38, %v6191_v38  ;;  %v6230_v11 = vunpack.c.l.b16 %v6198_v43  ;;  %v6078_v38 = vpack.c.bf16 %v6062_v26, %v6062_v26  ;;  %v6306_v26 = vld [vmem:[%s10452_s28 + $0x7e] ss:$0 sm:$0xff] }
 0x71d   : > { %v5514_v59 = vpack.c.bf16 %v5513_v49, %v5512_v47  ;;  %9548 = vmatpush3.bf16.msra.mxu0 %v12092_v32  ;;  %v6126_v47 = vsel %vm473_vm1, %v6112_v4, %v6111_v24  ;;  %v6229_v49 = vunpack.c.l.b16 %v6197_v37  ;;  %v6231_v4 = vunpack.c.l.b16 %v6199_v20  ;;  %v6070_v37 = vld [vmem:[%s10452_s28 + $0x1ee] ss:$0 sm:$0xff] }
 0x71e   : > { %9573 = vmatprep.subr.bf16.mxu0 %v10255_v0  ;;  %v6119_v41 = vsel %vm473_vm1, %v6104_v6, %v6103_v7  ;;  %v6127_v19 = vsel %vm475_vm2, %v6113_v35, %v6126_v47  ;;  %v6208_v7 = vpack.c.bf16 %v6192_v57, %v6192_v57  ;;  %v6239_v9 = vunpack.c.l.b16 %v6207_v14 }
 0x71f   : > { %5845 = vmatprep.mubr.bf16.mxu1 %v5514_v59  ;;  %v6250_v59 = vsel %vm473_vm1, %v6236_v16, %v6235_v15  ;;  %v6120_v56 = vsel %vm475_vm2, %v6105_v40, %v6119_v41  ;;  %v6244_v21 = vsel %vm475_vm2, %v6229_v49, %v6243_v55  ;;  %v6108_v15 = vunpack.c.l.b16 %v6076_v54 }
 0x720   : > { %5846 = vmatmul.mubr.bf16.vlgmr.msra.gmra.mrb[68].mxu1 %v12016_v25  ;;  %9550 = vmatmul.mubr.bf16.vlgmr.msra.gmra.mrb[72].mxu0 %v5961_v51  ;;  %v6066_v25 = vld [vmem:[%s10452_s28 + $0x16e] ss:$0 sm:$0xff]  ;;  %v6251_v58 = vsel %vm475_vm2, %v6237_v44, %v6250_v59  ;;  %v6121_v6 = vsel %vm477_vm3, %v6106_v53, %v6120_v56  ;;  %v6245_v13 = vsel %vm477_vm3, %v6230_v11, %v6244_v21  ;;  %v6232_v35 = vunpack.c.l.b16 %v6200_v23  ;;  %v6303_v21 = vld [vmem:[%s10452_s28 + $0x1e] ss:$0 sm:$0xff] }
 0x721   : > { %9554 = vmatpush3.bf16.msra.mxu1 %v12014_v29  ;;  %9569 = vmatprep.mubr.msk.bf16.mxu1 %vm10256_vm0, %v10255_v0  ;;  %v6082_v52 = vpack.c.bf16 %v6066_v25, %v6066_v25  ;;  %v6068_v51 = vld [vmem:[%s10452_s28 + $0x1ae] ss:$0 sm:$0xff]  ;;  %v6185_v25 = vld [vmem:[%s10452_s28 + $0xd6] ss:$0 sm:$0xff]  ;;  %v6252_v39 = vsel %vm477_vm3, %v6238_v45, %v6251_v58  ;;  %v6240_v60 = vunpack.c.l.b16 %v6208_v7  ;;  %v6086_v43 = vpack.c.bf16 %v6070_v37, %v6070_v37  ;;  %v6305_v23 = vld [vmem:[%s10452_s28 + $0x5e] ss:$0 sm:$0xff] }
 0x722   : > { %9555 = vmatprep.subr.bf16.mxu1 %v10255_v0  ;;  %9574 = vmatpush3.bf16.msra.mxu0 %v12014_v29  ;;  %v6084_v61 = vpack.c.bf16 %v6068_v51, %v6068_v51  ;;  %v6201_v27 = vpack.c.bf16 %v6185_v25, %v6185_v25  ;;  %v6246_v46 = vsel %vm479_vm4, %v6231_v4, %v6245_v13  ;;  %v6109_v47 = vunpack.c.l.b16 %v6077_v12  ;;  %v6312_v25 = vld [vmem:[%s10452_s28 + $0x13e] ss:$0 sm:$0xff] }
 0x723   : > { %9575 = vmatprep.subr.bf16.mxu0 %v10255_v0  ;;  %9589 = vmatprep.mubr.msk.bf16.mxu0 %vm10256_vm0, %v10255_v0  ;;  %v6114_v1 = vunpack.c.l.b16 %v6082_v52  ;;  %v6122_v52 = vsel %vm479_vm4, %v6107_v31, %v6121_v6  ;;  %v6253_v41 = vsel %vm479_vm4, %v6239_v9, %v6252_v39  ;;  %v6117_v49 = vunpack.c.l.b16 %v6085_v42  ;;  %v6304_v31 = vld [vmem:[%s10452_s28 + $0x3e] ss:$0 sm:$0xff] }
 0x724   : > { %v6116_v16 = vunpack.c.l.b16 %v6084_v61  ;;  %v6202_v44 = vpack.c.bf16 %v6186_v30, %v6186_v30  ;;  %v6123_v51 = vsel %vm481_vm5, %v6108_v15, %v6122_v52  ;;  %v6233_v48 = vunpack.c.l.b16 %v6201_v27  ;;  %v6313_v7 = vld [vmem:[%s10452_s28 + $0x15e] ss:$0 sm:$0xff] }
 0x725   : > { %9556 = vmatpush3.bf16.msra.mxu1 %v12024_v18  ;;  %v6128_v24 = vsel %vm477_vm3, %v6114_v1, %v6127_v19  ;;  %v6241_v55 = vunpack.c.l.b16 %v6209_v36  ;;  %v6247_v59 = vsel %vm481_vm5, %v6232_v35, %v6246_v46  ;;  %v6254_v53 = vsel %vm481_vm5, %v6240_v60, %v6253_v41  ;;  %v6314_v37 = vld [vmem:[%s10452_s28 + $0x17e] ss:$0 sm:$0xff] }
 0x726   : > { %9557 = vmatprep.subr.bf16.mxu1 %v10255_v0  ;;  %9576 = vmatpush3.bf16.msra.mxu0 %v12024_v18  ;;  %v6129_v40 = vsel %vm479_vm4, %v6115_v5, %v6128_v24  ;;  %v6110_v1 = vunpack.c.l.b16 %v6078_v38  ;;  %v6118_v63 = vunpack.c.l.b16 %v6086_v43  ;;  %v6124_v57 = vsel %vm483_vm6, %v6109_v47, %v6123_v51  ;;  %v6311_v5 = vld [vmem:[%s10452_s28 + $0x11e] ss:$0 sm:$0xff] }
 0x727   : > { %9577 = vmatprep.subr.bf16.mxu0 %v10255_v0  ;;  %v6130_v54 = vsel %vm481_vm5, %v6116_v16, %v6129_v40  ;;  %v6234_v14 = vunpack.c.l.b16 %v6202_v44  ;;  %v6242_v56 = vunpack.c.l.b16 %v6210_v50  ;;  %v6248_v19 = vsel %vm483_vm6, %v6233_v48, %v6247_v59  ;;  %v6308_v38 = vld [vmem:[%s10452_s28 + $0xbe] ss:$0 sm:$0xff] }
 0x728   : > { %v6131_v20 = vsel %vm483_vm6, %v6117_v49, %v6130_v54  ;;  %v6255_v11 = vsel %vm483_vm6, %v6241_v55, %v6254_v53  ;;  %v6125_v45 = vsel %vm485_vm7, %v6110_v1, %v6124_v57  ;;  %v6319_v6 = vpack.c.bf16 %v6303_v21, %v6303_v21  ;;  %v6316_v43 = vld [vmem:[%s10452_s28 + $0x1be] ss:$0 sm:$0xff] }
 0x729   : > { %9558 = vmatpush3.bf16.msra.mxu1 %v12035_v3  ;;  %v6132_v22 = vsel %vm485_vm7, %v6118_v63, %v6131_v20  ;;  %v6249_v12 = vsel %vm485_vm7, %v6234_v14, %v6248_v19  ;;  %v6256_v61 = vsel %vm485_vm7, %v6242_v56, %v6255_v11  ;;  %v6320_v24 = vpack.c.bf16 %v6304_v31, %v6304_v31  ;;  %v6309_v50 = vld [vmem:[%s10452_s28 + $0xde] ss:$0 sm:$0xff] }
 0x72a   : > { %9559 = vmatprep.subr.bf16.mxu1 %v10255_v0  ;;  %9578 = vmatpush3.bf16.msra.mxu0 %v12035_v3  ;;  %v6133_v58 = vpack.c.b16 %v6132_v22, %v6125_v45  ;;  %v6257_v62 = vpack.c.b16 %v6256_v61, %v6249_v12  ;;  %v6327_v4 = vpack.c.bf16 %v6311_v5, %v6311_v5  ;;  %v6351_v39 = vunpack.c.l.b16 %v6319_v6  ;;  %v6317_v51 = vld [vmem:[%s10452_s28 + $0x1de] ss:$0 sm:$0xff]  ;;  %v10037_v6 = vld [vmem:[#allocation6 + $0x648] sm:$0xff]  }
 0x72b   : > { %9579 = vmatprep.subr.bf16.mxu0 %v10255_v0  ;;  %v6328_v9 = vpack.c.bf16 %v6312_v25, %v6312_v25  ;;  %v6321_v42 = vpack.c.bf16 %v6305_v23, %v6305_v23  ;;  %v6329_v13 = vpack.c.bf16 %v6313_v7, %v6313_v7  ;;  %v6352_v15 = vunpack.c.l.b16 %v6320_v24  ;;  %v6310_v1 = vld [vmem:[%s10452_s28 + $0xfe] ss:$0 sm:$0xff]  ;;  %v10036_v7 = vld [vmem:[#allocation6 + $0x600] sm:$0xff]   ;;  %v10038_v24 = vld [vmem:[#allocation6 + $0x608] sm:$0xff]  }
 0x72c   : > { %v6359_v16 = vunpack.c.l.b16 %v6327_v4  ;;  %v6322_v27 = vpack.c.bf16 %v6306_v26, %v6306_v26  ;;  %v6330_v36 = vpack.c.bf16 %v6314_v37, %v6314_v37  ;;  %v6323_v46 = vpack.c.bf16 %v6307_v33, %v6307_v33  ;;  %v6318_v63 = vld [vmem:[%s10452_s28 + $0x1fe] ss:$0 sm:$0xff]  ;;  %v10039_v4 = vld [vmem:[#allocation6 + $0x650] sm:$0xff]   ;;  %v10043_v37 = vld [vmem:[#allocation6 + $0x660] sm:$0xff]  }
 0x72d   : > { %9560 = vmatpush3.bf16.msra.mxu1 %v12048_v10  ;;  %v6360_v30 = vunpack.c.l.b16 %v6328_v9  ;;  %v6353_v52 = vunpack.c.l.b16 %v6321_v42  ;;  %v6361_v40 = vunpack.c.l.b16 %v6329_v13  ;;  %v6367_v35 = vsel %vm473_vm1, %v6352_v15, %v6351_v39  ;;  %v10041_v9 = vld [vmem:[#allocation6 + $0x658] sm:$0xff]   ;;  %v10044_v42 = vld [vmem:[#allocation6 + $0x620] sm:$0xff]   ;;  %v10046_v13 = vld [vmem:[#allocation6 + $0x628] sm:$0xff]  }
 0x72e   : > { %9561 = vmatprep.subr.bf16.mxu1 %v10255_v0  ;;  %9580 = vmatpush3.bf16.msra.mxu0 %v12048_v10  ;;  %v6362_v47 = vunpack.c.l.b16 %v6330_v36  ;;  %v6324_v54 = vpack.c.bf16 %v6308_v38, %v6308_v38  ;;  %v6332_v48 = vpack.c.bf16 %v6316_v43, %v6316_v43  ;;  %v6355_v55 = vunpack.c.l.b16 %v6323_v46  ;;  %v10042_v26 = vld [vmem:[#allocation6 + $0x618] sm:$0xff]   ;;  %v10047_v39 = vld [vmem:[#allocation6 + $0x670] sm:$0xff]   ;;  %v10051_v33 = vld [vmem:[#allocation6 + $0x6c0] sm:$0xff]  }
 0x72f   : > { %9581 = vmatprep.subr.bf16.mxu0 %v10255_v0  ;;  %v6374_v60 = vsel %vm473_vm1, %v6360_v30, %v6359_v16  ;;  %v6368_v49 = vsel %vm475_vm2, %v6353_v52, %v6367_v35  ;;  %v6325_v57 = vpack.c.bf16 %v6309_v50, %v6309_v50  ;;  %v6333_v20 = vpack.c.bf16 %v6317_v51, %v6317_v51  ;;  %v10048_v15 = vld [vmem:[#allocation6 + $0x630] sm:$0xff]   ;;  %v10049_v16 = vld [vmem:[#allocation6 + $0x678] sm:$0xff]   ;;  %v10054_v36 = vld [vmem:[#allocation6 + $0x688] sm:$0xff]  }
 0x730   : > { %v6375_v44 = vsel %vm475_vm2, %v6361_v40, %v6374_v60  ;;  %v6356_v14 = vunpack.c.l.b16 %v6324_v54  ;;  %v6364_v56 = vunpack.c.l.b16 %v6332_v48  ;;  %v6326_v45 = vpack.c.bf16 %v6310_v1, %v6310_v1  ;;  %v10050_v30 = vld [vmem:[#allocation6 + $0x638] sm:$0xff]   ;;  %v10055_v52 = vld [vmem:[#allocation6 + $0x6d0] sm:$0xff]   ;;  %v10059_v38 = vld [vmem:[#allocation6 + $0x6e0] sm:$0xff]  }
 0x731   : > { %9562 = vmatpush3.bf16.msra.mxu1 %v12059_v34  ;;  %v6376_v53 = vsel %vm477_vm3, %v6362_v47, %v6375_v44  ;;  %v6357_v22 = vunpack.c.l.b16 %v6325_v57  ;;  %v6365_v12 = vunpack.c.l.b16 %v6333_v20  ;;  %v10056_v40 = vld [vmem:[#allocation6 + $0x690] sm:$0xff]   ;;  %v10057_v35 = vld [vmem:[#allocation6 + $0x6d8] sm:$0xff]   ;;  %v10060_v43 = vld [vmem:[#allocation6 + $0x6a0] sm:$0xff]  }
 0x732   : > { %9563 = vmatprep.subr.bf16.mxu1 %v10255_v0  ;;  %9582 = vmatpush3.bf16.msra.mxu0 %v12059_v34  ;;  %v10058_v60 = vld [vmem:[#allocation6 + $0x698] sm:$0xff]   ;;  %v10061_v46 = vld [vmem:[#allocation6 + $0x6e8] sm:$0xff]   ;;  %v10064_v47 = vld [vmem:[#allocation6 + $0x6b0] sm:$0xff]  }
 0x733   : > { %9583 = vmatprep.subr.bf16.mxu0 %v10255_v0  ;;  %v10066_v44 = vld [vmem:[#allocation6 + $0x6b8] sm:$0xff]  }
 0x735   : > { %9564 = vmatpush3.bf16.msra.mxu1 %v12072_v2 }
 0x736   : > { %9565 = vmatprep.subr.bf16.mxu1 %v10255_v0  ;;  %9584 = vmatpush3.bf16.msra.mxu0 %v12072_v2 }
 0x737   : > { %9585 = vmatprep.subr.bf16.mxu0 %v10255_v0 }
 0x739   : > { %9566 = vmatpush3.bf16.msra.mxu1 %v12081_v28 }
 0x73a   : > { %9567 = vmatprep.subr.bf16.mxu1 %v10255_v0  ;;  %9586 = vmatpush3.bf16.msra.mxu0 %v12081_v28 }
 0x73b   : > { %9587 = vmatprep.subr.bf16.mxu0 %v10255_v0 }
 0x73d   : > { %9568 = vmatpush3.bf16.msra.mxu1 %v12092_v32 }
 0x73e   : > { %9593 = vmatprep.subr.bf16.mxu1 %v10255_v0  ;;  %9588 = vmatpush3.bf16.msra.mxu0 %v12092_v32 }
 0x740   : > { %9570 = vmatmul.mubr.bf16.vlgmr.msra.gmra.mrb[72].mxu1 %v6133_v58  ;;  %v6358_v58 = vunpack.c.l.b16 %v6326_v45 }
 0x741   : > { %9594 = vmatpush3.bf16.msra.mxu1 %v12014_v29  ;;  %9590 = vmatmul.mubr.bf16.vlgmr.msra.gmra.mrb[76].mxu0 %v6257_v62  ;;  %v6315_v29 = vld [vmem:[%s10452_s28 + $0x19e] ss:$0 sm:$0xff] }
 0x742   : > { %9595 = vmatprep.subr.bf16.mxu1 %v10255_v0  ;;  %9609 = vmatprep.mubr.msk.bf16.mxu1 %vm10256_vm0, %v10255_v0  ;;  %v6331_v41 = vpack.c.bf16 %v6315_v29, %v6315_v29  ;;  %v10052_v29 = vld [vmem:[#allocation6 + $0x680] sm:$0xff]  }
 0x744   : > { %v6363_v59 = vunpack.c.l.b16 %v6331_v41  ;;  %v10062_v41 = vld [vmem:[#allocation6 + $0x6a8] sm:$0xff]  }
 0x745   : > { %9596 = vmatpush3.bf16.msra.mxu1 %v12024_v18  ;;  %v6354_v18 = vunpack.c.l.b16 %v6322_v27  ;;  %v10053_v27 = vld [vmem:[#allocation6 + $0x6c8] sm:$0xff]  }
 0x746   : > { %9597 = vmatprep.subr.bf16.mxu1 %v10255_v0  ;;  %v6377_v11 = vsel %vm479_vm4, %v6363_v59, %v6376_v53 }
 0x747   : > { %v6378_v21 = vsel %vm481_vm5, %v6364_v56, %v6377_v11 }
 0x749   : > { %9598 = vmatpush3.bf16.msra.mxu1 %v12035_v3  ;;  %v6369_v3 = vsel %vm477_vm3, %v6354_v18, %v6368_v49  ;;  %v10063_v18 = vld [vmem:[#allocation6 + $0x6f0] sm:$0xff]   ;;  %v10065_v49 = vld [vmem:[#allocation6 + $0x6f8] sm:$0xff]  }
 0x74a   : > { %9599 = vmatprep.subr.bf16.mxu1 %v10255_v0  ;;  %v6370_v19 = vsel %vm479_vm4, %v6355_v55, %v6369_v3  ;;  %v12251_v3 = vld [vmem:[%s12649_s2] ss:$0 sm:$0xff] }
 0x74b   : > { %v6371_v61 = vsel %vm481_vm5, %v6356_v14, %v6370_v19 }
 0x74c   : > { %v6372_v5 = vsel %vm483_vm6, %v6357_v22, %v6371_v61 }
 0x74d   : > { %9600 = vmatpush3.bf16.msra.mxu1 %v12048_v10  ;;  %v6334_v10 = vpack.c.bf16 %v6318_v63, %v6318_v63  ;;  %v6373_v25 = vsel %vm485_vm7, %v6358_v58, %v6372_v5 }
 0x74e   : > { %9601 = vmatprep.subr.bf16.mxu1 %v10255_v0 }
 0x74f   : > { %v6366_v31 = vunpack.c.l.b16 %v6334_v10 }
 0x751   : > { %9602 = vmatpush3.bf16.msra.mxu1 %v12059_v34  ;;  %v6379_v34 = vsel %vm483_vm6, %v6365_v12, %v6378_v21 }
 0x752   : > { %9603 = vmatprep.subr.bf16.mxu1 %v10255_v0  ;;  %v6380_v62 = vsel %vm485_vm7, %v6366_v31, %v6379_v34 }
 0x753   : > { %v6381_v23 = vpack.c.b16 %v6380_v62, %v6373_v25 }
 0x755   : > { %9604 = vmatpush3.bf16.msra.mxu1 %v12072_v2  ;;  %v10035_v2 = vld [vmem:[#allocation6 + $0x640] sm:$0xff]  }
 0x756   : > { %9605 = vmatprep.subr.bf16.mxu1 %v10255_v0  ;;  %8913 = vmatprep.subr.bf16.mxu0 %v10035_v2 }
 0x757   : > { %8914 = vmatpush3.bf16.msra.mxu0 %v10036_v7 }
 0x758   : > { %8915 = vmatprep.subr.bf16.mxu0 %v10037_v6 }
 0x759   : > { %9606 = vmatpush3.bf16.msra.mxu1 %v12081_v28  ;;  %v10040_v28 = vld [vmem:[#allocation6 + $0x610] sm:$0xff]  }
 0x75a   : > { %9607 = vmatprep.subr.bf16.mxu1 %v10255_v0 }
 0x75b   : > { %8916 = vmatpush3.bf16.msra.mxu0 %v10038_v24 }
 0x75c   : > { %8917 = vmatprep.subr.bf16.mxu0 %v10039_v4 }
 0x75d   : > { %9608 = vmatpush3.bf16.msra.mxu1 %v12092_v32  ;;  %v10045_v32 = vld [vmem:[#allocation6 + $0x668] sm:$0xff]  }
 0x75e   : > { %8935 = vmatprep.subr.bf16.mxu1 %v10051_v33  ;;  %v12272_v33 = vld [vmem:[%s12648_s1] sm:$0xff]  }
 0x75f   : > { %8918 = vmatpush3.bf16.msra.mxu0 %v10040_v28 }
 0x760   : > { %9610 = vmatmul.mubr.bf16.vlgmr.msra.gmra.mrb[76].mxu1 %v6381_v23  ;;  %8919 = vmatprep.subr.bf16.mxu0 %v10041_v9 }
 0x761   : > { %8936 = vmatpush3.bf16.msra.mxu1 %v10052_v29 }
 0x762   : > { %8937 = vmatprep.subr.bf16.mxu1 %v10053_v27  ;;  %v6774_v27 = vld [vmem:[%s10452_s28 + $0x47] ss:$0 sm:$0xff] }
 0x763   : > { %8920 = vmatpush3.bf16.msra.mxu0 %v10042_v26 }
 0x764   : > { %8921 = vmatprep.subr.bf16.mxu0 %v10043_v37 }
 0x765   : > { %8938 = vmatpush3.bf16.msra.mxu1 %v10054_v36  ;;  %v6782_v36 = vld [vmem:[%s10452_s28 + $0x147] ss:$0 sm:$0xff] }
 0x766   : > { %8939 = vmatprep.subr.bf16.mxu1 %v10055_v52 }
 0x767   : > { %8922 = vmatpush3.bf16.msra.mxu0 %v10044_v42 }
 0x768   : > { %8923 = vmatprep.subr.bf16.mxu0 %v10045_v32  ;;  %v6772_v32 = vld [vmem:[%s10452_s28 + $0x7] ss:$0 sm:$0xff] }
 0x769   : > { %8940 = vmatpush3.bf16.msra.mxu1 %v10056_v40  ;;  %v6788_v52 = vpack.c.bf16 %v6772_v32, %v6772_v32 }
 0x76a   : > { %8941 = vmatprep.subr.bf16.mxu1 %v10057_v35 }
 0x76b   : > { %8924 = vmatpush3.bf16.msra.mxu0 %v10046_v13  ;;  %v6773_v13 = vld [vmem:[%s10452_s28 + $0x27] ss:$0 sm:$0xff] }
 0x76c   : > { %8925 = vmatprep.subr.bf16.mxu0 %v10047_v39  ;;  %v6789_v40 = vpack.c.bf16 %v6773_v13, %v6773_v13 }
 0x76d   : > { %8942 = vmatpush3.bf16.msra.mxu1 %v10058_v60 }
 0x76e   : > { %8943 = vmatprep.subr.bf16.mxu1 %v10059_v38  ;;  %v12282_v38 = vld [vmem:[%s12648_s1 + $0x8] sm:$0xff]  }
 0x76f   : > { %8926 = vmatpush3.bf16.msra.mxu0 %v10048_v15  ;;  %v6780_v15 = vld [vmem:[%s10452_s28 + $0x107] ss:$0 sm:$0xff] }
 0x770   : > { %8927 = vmatprep.subr.bf16.mxu0 %v10049_v16  ;;  %v6781_v16 = vld [vmem:[%s10452_s28 + $0x127] ss:$0 sm:$0xff]  ;;  %v6796_v35 = vpack.c.bf16 %v6780_v15, %v6780_v15 }
 0x771   : > { %8944 = vmatpush3.bf16.msra.mxu1 %v10060_v43  ;;  %v6797_v60 = vpack.c.bf16 %v6781_v16, %v6781_v16  ;;  %v6775_v43 = vld [vmem:[%s10452_s28 + $0x67] ss:$0 sm:$0xff] }
 0x772   : > { %8945 = vmatprep.subr.bf16.mxu1 %v10061_v46  ;;  %v6783_v46 = vld [vmem:[%s10452_s28 + $0x167] ss:$0 sm:$0xff] }
 0x773   : > { %8928 = vmatpush3.bf16.msra.mxu0 %v10050_v30 }
 0x774   : > { %9613 = vmatprep.subr.bf16.mxu0 %v10255_v0 }
 0x775   : > { %8946 = vmatpush3.bf16.msra.mxu1 %v10062_v41  ;;  %v6790_v41 = vpack.c.bf16 %v6774_v27, %v6774_v27 }
 0x776   : > { %8947 = vmatprep.subr.bf16.mxu1 %v10063_v18  ;;  %v6798_v18 = vpack.c.bf16 %v6782_v36, %v6782_v36 }
 0x779   : > { %8948 = vmatpush3.bf16.msra.mxu1 %v10064_v47  ;;  %v6843_v47 = vunpack.c.l.b16 %v6788_v52 }
 0x77a   : > { %8949 = vmatprep.subr.bf16.mxu1 %v10065_v49  ;;  %v6844_v49 = vunpack.c.l.b16 %v6789_v40 }
 0x77d   : > { %8950 = vmatpush3.bf16.msra.mxu1 %v10066_v44  ;;  %v6851_v44 = vunpack.c.l.b16 %v6796_v35 }
 0x77e   : > { %9633 = vmatprep.subr.bf16.mxu1 %v10255_v0 }
 0x7d3   : > { %v8849_v50 = vpop.f32.mrb[68].mxu0 }
 0x7d4   : > { %v8850_v51 = vpop.f32.mrb[69].mxu0 }
 0x7d5   : > { %v8851_v54 = vadd.f32 %v8850_v51, %v8849_v50  ;;  %v8852_v48 = vpop.f32.mrb[70].mxu0  ;;  %v6852_v50 = vunpack.c.l.b16 %v6797_v60  ;;  %v12293_v51 = vld [vmem:[%s12648_s1 + $0x10] sm:$0xff]  }
 0x7d6   : > { %v8853_v55 = vpop.f32.mrb[71].mxu0 }
 0x7d7   : > { %v8854_v59 = vadd.f32 %v8853_v55, %v8852_v48  ;;  %v6784_v48 = vld [vmem:[%s10452_s28 + $0x187] ss:$0 sm:$0xff]  ;;  %v6791_v55 = vpack.c.bf16 %v6775_v43, %v6775_v43 }
 0x7f3   : > { %v8871_v53 = vpop.f32.mrb[68].mxu1  ;;  %v6045_v1 = vpop.f32.mrb[72].mxu0 }
 0x7f4   : > { %v8872_v63 = vpop.f32.mrb[69].mxu1  ;;  %v6046_v57 = vadd.f32 %v12251_v3, %v6045_v1  ;;  %v9551_v20 = vpop.f32.mrb[73].mxu0  ;;  %v6853_v1 = vunpack.c.l.b16 %v6798_v18 }
 0x7f5   : > { %v8873_v14 = vadd.f32 %v8872_v63, %v8871_v53  ;;  %v8874_v56 = vpop.f32.mrb[70].mxu1  ;;  %v6048_v19 = vpop.f32.mrb[74].mxu0  ;;  %v6845_v53 = vunpack.c.l.b16 %v6790_v41  ;;  %v6859_v63 = vsel %vm473_vm1, %v6844_v49, %v6843_v47  ;;  %v6777_v20 = vld [vmem:[%s10452_s28 + $0xa7] ss:$0 sm:$0xff]  ;;  %v12350_v47 = vld [vmem:[%s12648_s1 + $0x38] sm:$0xff]  }
 0x7f6   : > { %v8875_v11 = vpop.f32.mrb[71].mxu1  ;;  %v6052_v45 = vmax.f32 %v6046_v57, 0.0  ;;  %v6049_v10 = vadd.f32 %v12251_v3, %v6048_v19  ;;  %v9552_v22 = vpop.f32.mrb[75].mxu0  ;;  %v6866_v57 = vsel %vm473_vm1, %v6852_v50, %v6851_v44  ;;  %v6800_v19 = vpack.c.bf16 %v6784_v48, %v6784_v48  ;;  %v6968_v48 = vld [vmem:[%s10452_s28 + $0x2f] ss:$0 sm:$0xff] }
 0x7f7   : > { %v5848_v12 = vadd.f32 %v8873_v14, %v8851_v54  ;;  %v8876_v61 = vadd.f32 %v8875_v11, %v8874_v56  ;;  %v6776_v54 = vld [vmem:[%s10452_s28 + $0x87] ss:$0 sm:$0xff]  ;;  %v12306_v11 = vld [vmem:[%s12648_s1 + $0x18] sm:$0xff]   ;;  %v6860_v22 = vsel %vm475_vm2, %v6845_v53, %v6859_v63  ;;  %v6976_v53 = vld [vmem:[%s10452_s28 + $0x12f] ss:$0 sm:$0xff] }
 0x7f8   : > { %v6053_v21 = vmax.f32 %v6049_v10, 0.0  ;;  %v6785_v14 = vld [vmem:[%s10452_s28 + $0x1a7] ss:$0 sm:$0xff]  ;;  %v6792_v56 = vpack.c.bf16 %v6776_v54, %v6776_v54 }
 0x7f9   : > { %v12256_v58 = vadd.f32 %v5848_v12, %v11998_v8  ;;  %v5851_v31 = vadd.f32 %v8876_v61, %v8854_v59  ;;  %v6799_v59 = vpack.c.bf16 %v6783_v46, %v6783_v46  ;;  %v6867_v12 = vsel %vm475_vm2, %v6853_v1, %v6866_v57  ;;  %v6778_v61 = vld [vmem:[%s10452_s28 + $0xc7] ss:$0 sm:$0xff]  ;;  %v7091_v1 = vld [vmem:[%s10452_s28 + $0x17] ss:$0 sm:$0xff] }
 0x7fa   : > { %v6054_v5 = vpack.c.bf16 %v6053_v21, %v6052_v45  ;;  %v6846_v45 = vunpack.c.l.b16 %v6791_v55  ;;  %v6786_v21 = vld [vmem:[%s10452_s28 + $0x1c7] ss:$0 sm:$0xff]  ;;  %v7092_v57 = vld [vmem:[%s10452_s28 + $0x37] ss:$0 sm:$0xff] }
 0x7fb   : > { %v12259_v34 = vadd.f32 %v5851_v31, %v12001_v17  ;;  %v6854_v10 = vunpack.c.l.b16 %v6799_v59  ;;  %v6793_v31 = vpack.c.bf16 %v6777_v20, %v6777_v20  ;;  %v6975_v59 = vld [vmem:[%s10452_s28 + $0x10f] ss:$0 sm:$0xff]  ;;  %v7099_v20 = vld [vmem:[%s10452_s28 + $0x117] ss:$0 sm:$0xff] }
 0x813   : > { %v6169_v25 = vpop.f32.mrb[72].mxu1 }
 0x814   : > { %v6170_v62 = vadd.f32 %v12251_v3, %v6169_v25  ;;  %v9571_v23 = vpop.f32.mrb[73].mxu1  ;;  %v6293_v2 = vpop.f32.mrb[76].mxu0  ;;  %v6847_v25 = vunpack.c.l.b16 %v6792_v56 }
 0x815   : > { %v6172_v7 = vpop.f32.mrb[74].mxu1  ;;  %v6294_v6 = vadd.f32 %v12251_v3, %v6293_v2  ;;  %v9591_v24 = vpop.f32.mrb[77].mxu0  ;;  %v12317_v23 = vld [vmem:[%s12648_s1 + $0x20] sm:$0xff]   ;;  %v6861_v2 = vsel %vm477_vm3, %v6846_v45, %v6860_v22  ;;  %v6969_v45 = vld [vmem:[%s10452_s28 + $0x4f] ss:$0 sm:$0xff]  ;;  %v6991_v22 = vpack.c.bf16 %v6975_v59, %v6975_v59 }
 0x816   : > { %v6176_v8 = vmax.f32 %v6170_v62, 0.0  ;;  %v6173_v4 = vadd.f32 %v12251_v3, %v6172_v7  ;;  %v9572_v28 = vpop.f32.mrb[75].mxu1  ;;  %v6296_v17 = vpop.f32.mrb[78].mxu0  ;;  %v6855_v62 = vunpack.c.l.b16 %v6800_v19  ;;  %v6868_v7 = vsel %vm477_vm3, %v6854_v10, %v6867_v12  ;;  %v6787_v24 = vld [vmem:[%s10452_s28 + $0x1e7] ss:$0 sm:$0xff] }
 0x817   : > { %v6300_v9 = vmax.f32 %v6294_v6, 0.0  ;;  %v6297_v26 = vadd.f32 %v12251_v3, %v6296_v17  ;;  %v9592_v37 = vpop.f32.mrb[79].mxu0  ;;  %v6779_v6 = vld [vmem:[%s10452_s28 + $0xe7] ss:$0 sm:$0xff]  ;;  %v6848_v28 = vunpack.c.l.b16 %v6793_v31  ;;  %v6803_v32 = vpack.c.bf16 %v6787_v24, %v6787_v24  ;;  %v6977_v10 = vld [vmem:[%s10452_s28 + $0x14f] ss:$0 sm:$0xff] }
 0x818   : > { %v6177_v42 = vmax.f32 %v6173_v4, 0.0  ;;  %v6802_v4 = vpack.c.bf16 %v6786_v21, %v6786_v21  ;;  %v12330_v37 = vld [vmem:[%s12648_s1 + $0x28] sm:$0xff]   ;;  %v6984_v19 = vpack.c.bf16 %v6968_v48, %v6968_v48  ;;  %v6992_v12 = vpack.c.bf16 %v6976_v53, %v6976_v53  ;;  %v7093_v21 = vld [vmem:[%s10452_s28 + $0x57] ss:$0 sm:$0xff] }
 0x819   : > { %v6301_v39 = vmax.f32 %v6297_v26, 0.0  ;;  %v6869_v26 = vsel %vm479_vm4, %v6855_v62, %v6868_v7  ;;  %v6858_v36 = vunpack.c.l.b16 %v6803_v32  ;;  %v7101_v31 = vld [vmem:[%s10452_s28 + $0x157] ss:$0 sm:$0xff]  ;;  %v12377_v7 = vld [vmem:[%s10452_s28 + $0x8f] ss:$0 sm:$0xff]  ;;  %v6993_v24 = vpack.c.bf16 %v6977_v10, %v6977_v10 }
 0x81a   : > { %v6178_v30 = vpack.c.bf16 %v6177_v42, %v6176_v8  ;;  %v6794_v8 = vpack.c.bf16 %v6778_v61, %v6778_v61  ;;  %v6795_v42 = vpack.c.bf16 %v6779_v6, %v6779_v6  ;;  %v7107_v61 = vpack.c.bf16 %v7091_v1, %v7091_v1  ;;  %v6973_v48 = vld [vmem:[%s10452_s28 + $0xcf] ss:$0 sm:$0xff] }
 0x81b   : > { %v12274_v29 = vpack.c.bf16 %v6301_v39, %v6300_v9  ;;  %v6862_v9 = vsel %vm479_vm4, %v6847_v25, %v6861_v2  ;;  %v6857_v39 = vunpack.c.l.b16 %v6802_v4  ;;  %v7115_v25 = vpack.c.bf16 %v7099_v20, %v7099_v20  ;;  %v6970_v2 = vld [vmem:[%s10452_s28 + $0x6f] ss:$0 sm:$0xff] }
 0x81c   : > { %6716 = vmatprep.mubr.bf16.mxu0 %v6178_v30  ;;  %v6849_v13 = vunpack.c.l.b16 %v6794_v8  ;;  %v6863_v15 = vsel %vm481_vm5, %v6848_v28, %v6862_v9  ;;  %v12339_v30 = vld [vmem:[%s12648_s1 + $0x30] sm:$0xff]   ;;  %v6850_v27 = vunpack.c.l.b16 %v6795_v42  ;;  %v6985_v6 = vpack.c.bf16 %v6969_v45, %v6969_v45 }
 0x81d   : > { %6717 = vmatmul.mubr.bf16.vlgmr.msra.gmra.mrb[80].mxu0 %v6054_v5  ;;  %v6801_v5 = vpack.c.bf16 %v6785_v14, %v6785_v14  ;;  %v7100_v14 = vld [vmem:[%s10452_s28 + $0x137] ss:$0 sm:$0xff]  ;;  %v7016_v4 = vunpack.c.l.b16 %v6984_v19  ;;  %v7023_v28 = vunpack.c.l.b16 %v6991_v22  ;;  %v7109_v42 = vpack.c.bf16 %v7093_v21, %v7093_v21  ;;  %v6981_v21 = vld [vmem:[%s10452_s28 + $0x1cf] ss:$0 sm:$0xff] }
 0x81e   : > { %9614 = vmatpush3.bf16.msra.mxu0 %v12272_v33  ;;  %9629 = vmatprep.mubr.msk.bf16.mxu0 %vm10256_vm0, %v10255_v0  ;;  %v6864_v40 = vsel %vm483_vm6, %v6849_v13, %v6863_v15  ;;  %v7116_v62 = vpack.c.bf16 %v7100_v14, %v7100_v14  ;;  %v7094_v9 = vld [vmem:[%s10452_s28 + $0x77] ss:$0 sm:$0xff]  ;;  %v7117_v32 = vpack.c.bf16 %v7101_v31, %v7101_v31  ;;  %v7139_v13 = vunpack.c.l.b16 %v7107_v61 }
 0x81f   : > { %9615 = vmatprep.subr.bf16.mxu0 %v10255_v0  ;;  %v6856_v17 = vunpack.c.l.b16 %v6801_v5  ;;  %v6865_v49 = vsel %vm485_vm7, %v6850_v27, %v6864_v40  ;;  %v7108_v5 = vpack.c.bf16 %v7092_v57, %v7092_v57  ;;  %v7147_v15 = vunpack.c.l.b16 %v7115_v25  ;;  %v6972_v27 = vld [vmem:[%s10452_s28 + $0xaf] ss:$0 sm:$0xff]  ;;  %v7096_v14 = vld [vmem:[%s10452_s28 + $0xb7] ss:$0 sm:$0xff] }
 0x820   : > { %v6987_v40 = vpack.c.bf16 %v12377_v7, %v12377_v7  ;;  %v6988_v59 = vpack.c.bf16 %v6972_v27, %v6972_v27  ;;  %v6989_v31 = vpack.c.bf16 %v6973_v48, %v6973_v48  ;;  %v7098_v27 = vld [vmem:[%s10452_s28 + $0xf7] ss:$0 sm:$0xff] }
 0x821   : > { %v6870_v16 = vsel %vm481_vm5, %v6856_v17, %v6869_v26  ;;  %v7024_v17 = vunpack.c.l.b16 %v6992_v12  ;;  %v7102_v26 = vld [vmem:[%s10452_s28 + $0x177] ss:$0 sm:$0xff] }
 0x822   : > { %9616 = vmatpush3.bf16.msra.mxu0 %v12282_v38  ;;  %v6871_v35 = vsel %vm483_vm6, %v6857_v39, %v6870_v16  ;;  %v7140_v39 = vunpack.c.l.b16 %v7108_v5  ;;  %v7148_v16 = vunpack.c.l.b16 %v7116_v62 }
 0x823   : > { %9617 = vmatprep.subr.bf16.mxu0 %v10255_v0  ;;  %v6872_v44 = vsel %vm485_vm7, %v6858_v36, %v6871_v35  ;;  %v6979_v36 = vld [vmem:[%s10452_s28 + $0x18f] ss:$0 sm:$0xff] }
 0x824   : > { %v6873_v55 = vpack.c.b16 %v6872_v44, %v6865_v49  ;;  %v7118_v49 = vpack.c.bf16 %v7102_v26, %v7102_v26  ;;  %v6995_v53 = vpack.c.bf16 %v6979_v36, %v6979_v36  ;;  %v7155_v1 = vsel %vm473_vm1, %v7140_v39, %v7139_v13  ;;  %v6974_v26 = vld [vmem:[%s10452_s28 + $0xef] ss:$0 sm:$0xff]  ;;  %v7106_v36 = vld [vmem:[%s10452_s28 + $0x1f7] ss:$0 sm:$0xff] }
 0x825   : > { %v7122_v48 = vpack.c.bf16 %v7106_v36, %v7106_v36  ;;  %v7219_v36 = vld [vmem:[%s10452_s28 + $0x9f] ss:$0 sm:$0xff] }
 0x826   : > { %9618 = vmatpush3.bf16.msra.mxu0 %v12293_v51  ;;  %v7150_v61 = vunpack.c.l.b16 %v7118_v49  ;;  %v7027_v7 = vunpack.c.l.b16 %v6995_v53 }
 0x827   : > { %9619 = vmatprep.subr.bf16.mxu0 %v10255_v0 }
 0x82a   : > { %9620 = vmatpush3.bf16.msra.mxu0 %v12306_v11 }
 0x82b   : > { %9621 = vmatprep.subr.bf16.mxu0 %v10255_v0 }
 0x82e   : > { %9622 = vmatpush3.bf16.msra.mxu0 %v12317_v23 }
 0x82f   : > { %9623 = vmatprep.subr.bf16.mxu0 %v10255_v0 }
 0x832   : > { %9624 = vmatpush3.bf16.msra.mxu0 %v12330_v37 }
 0x833   : > { %v6417_v52 = vpop.f32.mrb[76].mxu1  ;;  %9625 = vmatprep.subr.bf16.mxu0 %v10255_v0 }
 0x834   : > { %v6418_v60 = vadd.f32 %v12251_v3, %v6417_v52  ;;  %v9611_v43 = vpop.f32.mrb[77].mxu1  ;;  %v6986_v52 = vpack.c.bf16 %v6970_v2, %v6970_v2  ;;  %v7019_v2 = vunpack.c.l.b16 %v6987_v40 }
 0x835   : > { %v6420_v46 = vpop.f32.mrb[78].mxu1  ;;  %v7025_v43 = vunpack.c.l.b16 %v6993_v24  ;;  %v7112_v24 = vpack.c.bf16 %v7096_v14, %v7096_v14 }
 0x836   : > { %v6421_v41 = vadd.f32 %v12251_v3, %v6420_v46  ;;  %v9612_v18 = vpop.f32.mrb[79].mxu1  ;;  %9626 = vmatpush3.bf16.msra.mxu0 %v12339_v30  ;;  %v6424_v50 = vmax.f32 %v6418_v60, 0.0  ;;  %v6967_v3 = vld [vmem:[%s10452_s28 + $0xf] ss:$0 sm:$0xff]  ;;  %v7017_v60 = vunpack.c.l.b16 %v6985_v6  ;;  %v7095_v46 = vld [vmem:[%s10452_s28 + $0x97] ss:$0 sm:$0xff]  ;;  %v7018_v57 = vunpack.c.l.b16 %v6986_v52 }
 0x837   : > { %9627 = vmatprep.subr.bf16.mxu0 %v10255_v0  ;;  %v6983_v56 = vpack.c.bf16 %v6967_v3, %v6967_v3  ;;  %v7110_v18 = vpack.c.bf16 %v7094_v9, %v7094_v9  ;;  %v7149_v3 = vunpack.c.l.b16 %v7117_v32  ;;  %v7111_v19 = vpack.c.bf16 %v7095_v46, %v7095_v46  ;;  %v7105_v6 = vld [vmem:[%s10452_s28 + $0x1d7] ss:$0 sm:$0xff] }
 0x838   : > { %v6425_v54 = vmax.f32 %v6421_v41, 0.0  ;;  %v7103_v41 = vld [vmem:[%s10452_s28 + $0x197] ss:$0 sm:$0xff]  ;;  %v6997_v32 = vpack.c.bf16 %v6981_v21, %v6981_v21  ;;  %v7121_v40 = vpack.c.bf16 %v7105_v6, %v7105_v6 }
 0x839   : > { %v7015_v8 = vunpack.c.l.b16 %v6983_v56  ;;  %v7104_v56 = vld [vmem:[%s10452_s28 + $0x1b7] ss:$0 sm:$0xff]  ;;  %v7119_v45 = vpack.c.bf16 %v7103_v41, %v7103_v41  ;;  %v7142_v12 = vunpack.c.l.b16 %v7110_v18  ;;  %v6990_v41 = vpack.c.bf16 %v6974_v26, %v6974_v26  ;;  %v7218_v26 = vld [vmem:[%s10452_s28 + $0x7f] ss:$0 sm:$0xff] }
 0x83a   : > { %v6426_v63 = vpack.c.bf16 %v6425_v54, %v6424_v50  ;;  %9628 = vmatpush3.bf16.msra.mxu0 %v12350_v47  ;;  %v7038_v50 = vsel %vm473_vm1, %v7024_v17, %v7023_v28  ;;  %v7141_v54 = vunpack.c.l.b16 %v7109_v42  ;;  %v7143_v17 = vunpack.c.l.b16 %v7111_v19  ;;  %v6982_v42 = vld [vmem:[%s10452_s28 + $0x1ef] ss:$0 sm:$0xff] }
 0x83b   : > { %9653 = vmatprep.subr.bf16.mxu0 %v10255_v0  ;;  %v7031_v44 = vsel %vm473_vm1, %v7016_v4, %v7015_v8  ;;  %v7039_v22 = vsel %vm475_vm2, %v7025_v43, %v7038_v50  ;;  %v7120_v8 = vpack.c.bf16 %v7104_v56, %v7104_v56  ;;  %v7151_v9 = vunpack.c.l.b16 %v7119_v45 }
 0x83c   : > { %6757 = vmatprep.mubr.bf16.mxu1 %v6426_v63  ;;  %v7162_v63 = vsel %vm473_vm1, %v7148_v16, %v7147_v15  ;;  %v7032_v10 = vsel %vm475_vm2, %v7017_v60, %v7031_v44  ;;  %v7156_v25 = vsel %vm475_vm2, %v7141_v54, %v7155_v1  ;;  %v7020_v15 = vunpack.c.l.b16 %v6988_v59 }
 0x83d   : > { %6758 = vmatmul.mubr.bf16.vlgmr.msra.gmra.mrb[80].mxu1 %v12274_v29  ;;  %9630 = vmatmul.mubr.bf16.vlgmr.msra.gmra.mrb[84].mxu0 %v6873_v55  ;;  %v6978_v29 = vld [vmem:[%s10452_s28 + $0x16f] ss:$0 sm:$0xff]  ;;  %v7163_v62 = vsel %vm475_vm2, %v7149_v3, %v7162_v63  ;;  %v7033_v4 = vsel %vm477_vm3, %v7018_v57, %v7032_v10  ;;  %v7157_v13 = vsel %vm477_vm3, %v7142_v12, %v7156_v25  ;;  %v7144_v43 = vunpack.c.l.b16 %v7112_v24  ;;  %v7215_v25 = vld [vmem:[%s10452_s28 + $0x1f] ss:$0 sm:$0xff] }
 0x83e   : > { %9634 = vmatpush3.bf16.msra.mxu1 %v12272_v33  ;;  %9649 = vmatprep.mubr.msk.bf16.mxu1 %vm10256_vm0, %v10255_v0  ;;  %v6994_v35 = vpack.c.bf16 %v6978_v29, %v6978_v29  ;;  %v6980_v55 = vld [vmem:[%s10452_s28 + $0x1af] ss:$0 sm:$0xff]  ;;  %v7097_v29 = vld [vmem:[%s10452_s28 + $0xd7] ss:$0 sm:$0xff]  ;;  %v7164_v39 = vsel %vm477_vm3, %v7150_v61, %v7163_v62  ;;  %v7152_v46 = vunpack.c.l.b16 %v7120_v8  ;;  %v6998_v18 = vpack.c.bf16 %v6982_v42, %v6982_v42  ;;  %v7217_v24 = vld [vmem:[%s10452_s28 + $0x5f] ss:$0 sm:$0xff] }
 0x83f   : > { %9635 = vmatprep.subr.bf16.mxu1 %v10255_v0  ;;  %9654 = vmatpush3.bf16.msra.mxu0 %v12272_v33  ;;  %v6996_v5 = vpack.c.bf16 %v6980_v55, %v6980_v55  ;;  %v7113_v52 = vpack.c.bf16 %v7097_v29, %v7097_v29  ;;  %v7158_v49 = vsel %vm479_vm4, %v7143_v17, %v7157_v13  ;;  %v7021_v50 = vunpack.c.l.b16 %v6989_v31  ;;  %v7224_v29 = vld [vmem:[%s10452_s28 + $0x13f] ss:$0 sm:$0xff] }
 0x840   : > { %9655 = vmatprep.subr.bf16.mxu0 %v10255_v0  ;;  %9669 = vmatprep.mubr.msk.bf16.mxu0 %vm10256_vm0, %v10255_v0  ;;  %v7026_v20 = vunpack.c.l.b16 %v6994_v35  ;;  %v7034_v35 = vsel %vm479_vm4, %v7019_v2, %v7033_v4  ;;  %v7165_v44 = vsel %vm479_vm4, %v7151_v9, %v7164_v39  ;;  %v7029_v54 = vunpack.c.l.b16 %v6997_v32  ;;  %v7216_v2 = vld [vmem:[%s10452_s28 + $0x3f] ss:$0 sm:$0xff] }
 0x841   : > { %v7028_v16 = vunpack.c.l.b16 %v6996_v5  ;;  %v7114_v3 = vpack.c.bf16 %v7098_v27, %v7098_v27  ;;  %v7035_v55 = vsel %vm481_vm5, %v7020_v15, %v7034_v35  ;;  %v7145_v53 = vunpack.c.l.b16 %v7113_v52  ;;  %v7225_v8 = vld [vmem:[%s10452_s28 + $0x15f] ss:$0 sm:$0xff] }
 0x842   : > { %9636 = vmatpush3.bf16.msra.mxu1 %v12282_v38  ;;  %v7040_v28 = vsel %vm477_vm3, %v7026_v20, %v7039_v22  ;;  %v7153_v1 = vunpack.c.l.b16 %v7121_v40  ;;  %v7159_v63 = vsel %vm481_vm5, %v7144_v43, %v7158_v49  ;;  %v7166_v57 = vsel %vm481_vm5, %v7152_v46, %v7165_v44  ;;  %v7226_v42 = vld [vmem:[%s10452_s28 + $0x17f] ss:$0 sm:$0xff] }
 0x843   : > { %9637 = vmatprep.subr.bf16.mxu1 %v10255_v0  ;;  %9656 = vmatpush3.bf16.msra.mxu0 %v12282_v38  ;;  %v7041_v60 = vsel %vm479_vm4, %v7027_v7, %v7040_v28  ;;  %v7022_v20 = vunpack.c.l.b16 %v6990_v41  ;;  %v7030_v14 = vunpack.c.l.b16 %v6998_v18  ;;  %v7036_v56 = vsel %vm483_vm6, %v7021_v50, %v7035_v55  ;;  %v7223_v7 = vld [vmem:[%s10452_s28 + $0x11f] ss:$0 sm:$0xff] }
 0x844   : > { %9657 = vmatprep.subr.bf16.mxu0 %v10255_v0  ;;  %v7042_v59 = vsel %vm481_vm5, %v7028_v16, %v7041_v60  ;;  %v7146_v45 = vunpack.c.l.b16 %v7114_v3  ;;  %v7154_v10 = vunpack.c.l.b16 %v7122_v48  ;;  %v7160_v22 = vsel %vm483_vm6, %v7145_v53, %v7159_v63  ;;  %v7220_v41 = vld [vmem:[%s10452_s28 + $0xbf] ss:$0 sm:$0xff] }
 0x845   : > { %v7043_v19 = vsel %vm483_vm6, %v7029_v54, %v7042_v59  ;;  %v7167_v12 = vsel %vm483_vm6, %v7153_v1, %v7166_v57  ;;  %v7037_v61 = vsel %vm485_vm7, %v7022_v20, %v7036_v56  ;;  %v7231_v4 = vpack.c.bf16 %v7215_v25, %v7215_v25  ;;  %v7228_v18 = vld [vmem:[%s10452_s28 + $0x1bf] ss:$0 sm:$0xff] }
 0x846   : > { %9638 = vmatpush3.bf16.msra.mxu1 %v12293_v51  ;;  %v7044_v21 = vsel %vm485_vm7, %v7030_v14, %v7043_v19  ;;  %v7161_v31 = vsel %vm485_vm7, %v7146_v45, %v7160_v22  ;;  %v7168_v5 = vsel %vm485_vm7, %v7154_v10, %v7167_v12  ;;  %v7232_v28 = vpack.c.bf16 %v7216_v2, %v7216_v2  ;;  %v7221_v48 = vld [vmem:[%s10452_s28 + $0xdf] ss:$0 sm:$0xff] }
 0x847   : > { %9639 = vmatprep.subr.bf16.mxu1 %v10255_v0  ;;  %9658 = vmatpush3.bf16.msra.mxu0 %v12293_v51  ;;  %v7045_v62 = vpack.c.b16 %v7044_v21, %v7037_v61  ;;  %v7169_v6 = vpack.c.b16 %v7168_v5, %v7161_v31  ;;  %v7239_v17 = vpack.c.bf16 %v7223_v7, %v7223_v7  ;;  %v7263_v39 = vunpack.c.l.b16 %v7231_v4  ;;  %v7229_v55 = vld [vmem:[%s10452_s28 + $0x1df] ss:$0 sm:$0xff]  ;;  %v10077_v4 = vld [vmem:[#allocation6 + $0x748] sm:$0xff]  }
 0x848   : > { %9659 = vmatprep.subr.bf16.mxu0 %v10255_v0  ;;  %v7240_v9 = vpack.c.bf16 %v7224_v29, %v7224_v29  ;;  %v7233_v32 = vpack.c.bf16 %v7217_v24, %v7217_v24  ;;  %v7241_v13 = vpack.c.bf16 %v7225_v8, %v7225_v8  ;;  %v7264_v15 = vunpack.c.l.b16 %v7232_v28  ;;  %v7222_v20 = vld [vmem:[%s10452_s28 + $0xff] ss:$0 sm:$0xff]  ;;  %v10076_v8 = vld [vmem:[#allocation6 + $0x700] sm:$0xff]   ;;  %v10078_v28 = vld [vmem:[#allocation6 + $0x708] sm:$0xff]  }
 0x849   : > { %v7271_v16 = vunpack.c.l.b16 %v7239_v17  ;;  %v7234_v52 = vpack.c.bf16 %v7218_v26, %v7218_v26  ;;  %v7242_v40 = vpack.c.bf16 %v7226_v42, %v7226_v42  ;;  %v7235_v49 = vpack.c.bf16 %v7219_v36, %v7219_v36  ;;  %v7230_v14 = vld [vmem:[%s10452_s28 + $0x1ff] ss:$0 sm:$0xff]  ;;  %v10079_v17 = vld [vmem:[#allocation6 + $0x750] sm:$0xff]   ;;  %v10083_v42 = vld [vmem:[#allocation6 + $0x760] sm:$0xff]  }
 0x84a   : > { %9640 = vmatpush3.bf16.msra.mxu1 %v12306_v11  ;;  %v7272_v27 = vunpack.c.l.b16 %v7240_v9  ;;  %v7265_v35 = vunpack.c.l.b16 %v7233_v32  ;;  %v7273_v60 = vunpack.c.l.b16 %v7241_v13  ;;  %v7279_v43 = vsel %vm473_vm1, %v7264_v15, %v7263_v39  ;;  %v10081_v9 = vld [vmem:[#allocation6 + $0x758] sm:$0xff]   ;;  %v10084_v32 = vld [vmem:[#allocation6 + $0x720] sm:$0xff]   ;;  %v10086_v13 = vld [vmem:[#allocation6 + $0x728] sm:$0xff]  }
 0x84b   : > { %9641 = vmatprep.subr.bf16.mxu1 %v10255_v0  ;;  %9660 = vmatpush3.bf16.msra.mxu0 %v12306_v11  ;;  %v7274_v50 = vunpack.c.l.b16 %v7242_v40  ;;  %v7236_v59 = vpack.c.bf16 %v7220_v41, %v7220_v41  ;;  %v7244_v53 = vpack.c.bf16 %v7228_v18, %v7228_v18  ;;  %v7267_v1 = vunpack.c.l.b16 %v7235_v49  ;;  %v10082_v26 = vld [vmem:[#allocation6 + $0x718] sm:$0xff]   ;;  %v10087_v39 = vld [vmem:[#allocation6 + $0x770] sm:$0xff]   ;;  %v10091_v36 = vld [vmem:[#allocation6 + $0x7c0] sm:$0xff]  }
 0x84c   : > { %9661 = vmatprep.subr.bf16.mxu0 %v10255_v0  ;;  %v7286_v46 = vsel %vm473_vm1, %v7272_v27, %v7271_v16  ;;  %v7280_v54 = vsel %vm475_vm2, %v7265_v35, %v7279_v43  ;;  %v7237_v56 = vpack.c.bf16 %v7221_v48, %v7221_v48  ;;  %v7245_v19 = vpack.c.bf16 %v7229_v55, %v7229_v55  ;;  %v10088_v15 = vld [vmem:[#allocation6 + $0x730] sm:$0xff]   ;;  %v10089_v16 = vld [vmem:[#allocation6 + $0x778] sm:$0xff]   ;;  %v10094_v40 = vld [vmem:[#allocation6 + $0x788] sm:$0xff]  }
 0x84d   : > { %v7287_v3 = vsel %vm475_vm2, %v7273_v60, %v7286_v46  ;;  %v7268_v45 = vunpack.c.l.b16 %v7236_v59  ;;  %v7276_v10 = vunpack.c.l.b16 %v7244_v53  ;;  %v7238_v61 = vpack.c.bf16 %v7222_v20, %v7222_v20  ;;  %v10090_v27 = vld [vmem:[#allocation6 + $0x738] sm:$0xff]   ;;  %v10095_v35 = vld [vmem:[#allocation6 + $0x7d0] sm:$0xff]   ;;  %v10099_v41 = vld [vmem:[#allocation6 + $0x7e0] sm:$0xff]  }
 0x84e   : > { %9642 = vmatpush3.bf16.msra.mxu1 %v12317_v23  ;;  %v7288_v57 = vsel %vm477_vm3, %v7274_v50, %v7287_v3  ;;  %v7269_v21 = vunpack.c.l.b16 %v7237_v56  ;;  %v7277_v31 = vunpack.c.l.b16 %v7245_v19  ;;  %v10096_v60 = vld [vmem:[#allocation6 + $0x790] sm:$0xff]   ;;  %v10097_v43 = vld [vmem:[#allocation6 + $0x7d8] sm:$0xff]   ;;  %v10100_v18 = vld [vmem:[#allocation6 + $0x7a0] sm:$0xff]  }
 0x84f   : > { %9643 = vmatprep.subr.bf16.mxu1 %v10255_v0  ;;  %9662 = vmatpush3.bf16.msra.mxu0 %v12317_v23  ;;  %v10098_v46 = vld [vmem:[#allocation6 + $0x798] sm:$0xff]   ;;  %v10101_v49 = vld [vmem:[#allocation6 + $0x7e8] sm:$0xff]   ;;  %v10104_v50 = vld [vmem:[#allocation6 + $0x7b0] sm:$0xff]  }
 0x850   : > { %9663 = vmatprep.subr.bf16.mxu0 %v10255_v0  ;;  %v10106_v3 = vld [vmem:[#allocation6 + $0x7b8] sm:$0xff]  }
 0x852   : > { %9644 = vmatpush3.bf16.msra.mxu1 %v12330_v37 }
 0x853   : > { %9645 = vmatprep.subr.bf16.mxu1 %v10255_v0  ;;  %9664 = vmatpush3.bf16.msra.mxu0 %v12330_v37 }
 0x854   : > { %9665 = vmatprep.subr.bf16.mxu0 %v10255_v0 }
 0x856   : > { %9646 = vmatpush3.bf16.msra.mxu1 %v12339_v30 }
 0x857   : > { %9647 = vmatprep.subr.bf16.mxu1 %v10255_v0  ;;  %9666 = vmatpush3.bf16.msra.mxu0 %v12339_v30 }
 0x858   : > { %9667 = vmatprep.subr.bf16.mxu0 %v10255_v0 }
 0x85a   : > { %9648 = vmatpush3.bf16.msra.mxu1 %v12350_v47 }
 0x85b   : > { %9673 = vmatprep.subr.bf16.mxu1 %v10255_v0  ;;  %9668 = vmatpush3.bf16.msra.mxu0 %v12350_v47 }
 0x85d   : > { %9650 = vmatmul.mubr.bf16.vlgmr.msra.gmra.mrb[84].mxu1 %v7045_v62  ;;  %v7270_v62 = vunpack.c.l.b16 %v7238_v61 }
 0x85e   : > { %9674 = vmatpush3.bf16.msra.mxu1 %v12272_v33  ;;  %9670 = vmatmul.mubr.bf16.vlgmr.msra.gmra.mrb[88].mxu0 %v7169_v6  ;;  %v7227_v33 = vld [vmem:[%s10452_s28 + $0x19f] ss:$0 sm:$0xff] }
 0x85f   : > { %9675 = vmatprep.subr.bf16.mxu1 %v10255_v0  ;;  %9689 = vmatprep.mubr.msk.bf16.mxu1 %vm10256_vm0, %v10255_v0  ;;  %v7243_v44 = vpack.c.bf16 %v7227_v33, %v7227_v33  ;;  %v10092_v33 = vld [vmem:[#allocation6 + $0x780] sm:$0xff]  }
 0x861   : > { %v7275_v63 = vunpack.c.l.b16 %v7243_v44  ;;  %v10102_v44 = vld [vmem:[#allocation6 + $0x7a8] sm:$0xff]  }
 0x862   : > { %9676 = vmatpush3.bf16.msra.mxu1 %v12282_v38  ;;  %v7266_v38 = vunpack.c.l.b16 %v7234_v52  ;;  %v10093_v52 = vld [vmem:[#allocation6 + $0x7c8] sm:$0xff]  }
 0x863   : > { %9677 = vmatprep.subr.bf16.mxu1 %v10255_v0  ;;  %v7289_v12 = vsel %vm479_vm4, %v7275_v63, %v7288_v57 }
 0x864   : > { %v7290_v25 = vsel %vm481_vm5, %v7276_v10, %v7289_v12 }
 0x866   : > { %9678 = vmatpush3.bf16.msra.mxu1 %v12293_v51  ;;  %v7281_v51 = vsel %vm477_vm3, %v7266_v38, %v7280_v54  ;;  %v10103_v38 = vld [vmem:[#allocation6 + $0x7f0] sm:$0xff]   ;;  %v10105_v54 = vld [vmem:[#allocation6 + $0x7f8] sm:$0xff]  }
 0x867   : > { %9679 = vmatprep.subr.bf16.mxu1 %v10255_v0  ;;  %v7282_v22 = vsel %vm479_vm4, %v7267_v1, %v7281_v51  ;;  %v8325_v51 = vld [vmem:[%s12649_s2] ss:$0 sm:$0xff] }
 0x868   : > { %v7283_v5 = vsel %vm481_vm5, %v7268_v45, %v7282_v22 }
 0x869   : > { %v7284_v7 = vsel %vm483_vm6, %v7269_v21, %v7283_v5 }
 0x86a   : > { %9680 = vmatpush3.bf16.msra.mxu1 %v12306_v11  ;;  %v7246_v11 = vpack.c.bf16 %v7230_v14, %v7230_v14  ;;  %v7285_v29 = vsel %vm485_vm7, %v7270_v62, %v7284_v7 }
 0x86b   : > { %9681 = vmatprep.subr.bf16.mxu1 %v10255_v0 }
 0x86c   : > { %v7278_v2 = vunpack.c.l.b16 %v7246_v11 }
 0x86e   : > { %9682 = vmatpush3.bf16.msra.mxu1 %v12317_v23  ;;  %v7291_v23 = vsel %vm483_vm6, %v7277_v31, %v7290_v25 }
 0x86f   : > { %9683 = vmatprep.subr.bf16.mxu1 %v10255_v0  ;;  %v7292_v6 = vsel %vm485_vm7, %v7278_v2, %v7291_v23 }
 0x870   : > { %v7293_v24 = vpack.c.b16 %v7292_v6, %v7285_v29 }
 0x872   : > { %9684 = vmatpush3.bf16.msra.mxu1 %v12330_v37  ;;  %v10075_v37 = vld [vmem:[#allocation6 + $0x740] sm:$0xff]  }
 0x873   : > { %9685 = vmatprep.subr.bf16.mxu1 %v10255_v0  ;;  %8993 = vmatprep.subr.bf16.mxu0 %v10075_v37 }
 0x874   : > { %8994 = vmatpush3.bf16.msra.mxu0 %v10076_v8 }
 0x875   : > { %8995 = vmatprep.subr.bf16.mxu0 %v10077_v4 }
 0x876   : > { %9686 = vmatpush3.bf16.msra.mxu1 %v12339_v30  ;;  %v10080_v30 = vld [vmem:[#allocation6 + $0x710] sm:$0xff]  }
 0x877   : > { %9687 = vmatprep.subr.bf16.mxu1 %v10255_v0 }
 0x878   : > { %8996 = vmatpush3.bf16.msra.mxu0 %v10078_v28 }
 0x879   : > { %8997 = vmatprep.subr.bf16.mxu0 %v10079_v17 }
 0x87a   : > { %9688 = vmatpush3.bf16.msra.mxu1 %v12350_v47  ;;  %v10085_v47 = vld [vmem:[#allocation6 + $0x768] sm:$0xff]  }
 0x87b   : > { %9015 = vmatprep.subr.bf16.mxu1 %v10091_v36 }
 0x87c   : > { %8998 = vmatpush3.bf16.msra.mxu0 %v10080_v30 }
 0x87d   : > { %9690 = vmatmul.mubr.bf16.vlgmr.msra.gmra.mrb[88].mxu1 %v7293_v24  ;;  %8999 = vmatprep.subr.bf16.mxu0 %v10081_v9 }
 0x87e   : > { %9016 = vmatpush3.bf16.msra.mxu1 %v10092_v33 }
 0x87f   : > { %9017 = vmatprep.subr.bf16.mxu1 %v10093_v52 }
 0x880   : > { %9000 = vmatpush3.bf16.msra.mxu0 %v10082_v26 }
 0x881   : > { %9001 = vmatprep.subr.bf16.mxu0 %v10083_v42 }
 0x882   : > { %9018 = vmatpush3.bf16.msra.mxu1 %v10094_v40 }
 0x883   : > { %9019 = vmatprep.subr.bf16.mxu1 %v10095_v35 }
 0x884   : > { %9002 = vmatpush3.bf16.msra.mxu0 %v10084_v32 }
 0x885   : > { %9003 = vmatprep.subr.bf16.mxu0 %v10085_v47 }
 0x886   : > { %9020 = vmatpush3.bf16.msra.mxu1 %v10096_v60 }
 0x887   : > { %9021 = vmatprep.subr.bf16.mxu1 %v10097_v43  ;;  %v10107_v43 = vld [vmem:[%s12652_s5] sm:$0xff]  }
 0x888   : > { %9004 = vmatpush3.bf16.msra.mxu0 %v10086_v13 }
 0x889   : > { %9005 = vmatprep.subr.bf16.mxu0 %v10087_v39 }
 0x88a   : > { %9022 = vmatpush3.bf16.msra.mxu1 %v10098_v46  ;;  %v10108_v46 = vld [vmem:[%s12652_s5 + $0x8] sm:$0xff]  }
 0x88b   : > { %9023 = vmatprep.subr.bf16.mxu1 %v10099_v41  ;;  %v10109_v41 = vld [vmem:[%s12652_s5 + $0x10] sm:$0xff]  }
 0x88c   : > { %9006 = vmatpush3.bf16.msra.mxu0 %v10088_v15 }
 0x88d   : > { %9007 = vmatprep.subr.bf16.mxu0 %v10089_v16 }
 0x88e   : > { %9024 = vmatpush3.bf16.msra.mxu1 %v10100_v18  ;;  %v10110_v18 = vld [vmem:[%s12652_s5 + $0x18] sm:$0xff]  }
 0x88f   : > { %9025 = vmatprep.subr.bf16.mxu1 %v10101_v49  ;;  %v10111_v49 = vld [vmem:[%s12652_s5 + $0x20] sm:$0xff]  }
 0x890   : > { %9008 = vmatpush3.bf16.msra.mxu0 %v10090_v27 }
 0x891   : > { %9693 = vmatprep.subr.bf16.mxu0 %v10255_v0 }
 0x892   : > { %9026 = vmatpush3.bf16.msra.mxu1 %v10102_v44  ;;  %v10112_v44 = vld [vmem:[%s12652_s5 + $0x28] sm:$0xff]  }
 0x893   : > { %9027 = vmatprep.subr.bf16.mxu1 %v10103_v38  ;;  %v10113_v38 = vld [vmem:[%s12652_s5 + $0x30] sm:$0xff]  }
 0x896   : > { %9028 = vmatpush3.bf16.msra.mxu1 %v10104_v50  ;;  %v10114_v50 = vld [vmem:[%s12652_s5 + $0x38] sm:$0xff]  }
 0x897   : > { %9029 = vmatprep.subr.bf16.mxu1 %v10105_v54  ;;  %v10115_v54 = vld [vmem:[%s12654_s7] sm:$0xff]  }
 0x89a   : > { %9030 = vmatpush3.bf16.msra.mxu1 %v10106_v3  ;;  %v10116_v3 = vld [vmem:[%s12654_s7 + $0x8] sm:$0xff]  }
 0x89b   : > { %9713 = vmatprep.subr.bf16.mxu1 %v10255_v0 }
 0x8f0   : > { %v8929_v48 = vpop.f32.mrb[80].mxu0 }
 0x8f1   : > { %v8930_v55 = vpop.f32.mrb[81].mxu0 }
 0x8f2   : > { %v8931_v59 = vadd.f32 %v8930_v55, %v8929_v48  ;;  %v8932_v53 = vpop.f32.mrb[82].mxu0  ;;  %v10117_v48 = vld [vmem:[%s12654_s7 + $0x10] sm:$0xff]   ;;  %v10118_v55 = vld [vmem:[%s12654_s7 + $0x18] sm:$0xff]  }
 0x8f3   : > { %v8933_v1 = vpop.f32.mrb[83].mxu0 }
 0x8f4   : > { %v8934_v63 = vadd.f32 %v8933_v1, %v8932_v53 }
 0x910   : > { %v8951_v57 = vpop.f32.mrb[80].mxu1  ;;  %v6957_v20 = vpop.f32.mrb[84].mxu0 }
 0x911   : > { %v8952_v14 = vpop.f32.mrb[81].mxu1  ;;  %v6958_v56 = vadd.f32 %v8325_v51, %v6957_v20  ;;  %v9631_v19 = vpop.f32.mrb[85].mxu0 }
 0x912   : > { %v8953_v45 = vadd.f32 %v8952_v14, %v8951_v57  ;;  %v8954_v10 = vpop.f32.mrb[82].mxu1  ;;  %v6960_v22 = vpop.f32.mrb[86].mxu0 }
 0x913   : > { %v8955_v12 = vpop.f32.mrb[83].mxu1  ;;  %v6964_v61 = vmax.f32 %v6958_v56, 0.0  ;;  %v6961_v11 = vadd.f32 %v8325_v51, %v6960_v22  ;;  %v9632_v21 = vpop.f32.mrb[87].mxu0 }
 0x914   : > { %v6760_v31 = vadd.f32 %v8953_v45, %v8931_v59  ;;  %v8956_v5 = vadd.f32 %v8955_v12, %v8954_v10  ;;  %v8366_v12 = vld [vmem:[%s12651_s4] ss:$0 sm:$0xff] }
 0x915   : > { %v6965_v25 = vmax.f32 %v6961_v11, 0.0 }
 0x916   : > { %v12510_v62 = vadd.f32 %v6760_v31, %v12256_v58  ;;  %v6763_v2 = vadd.f32 %v8956_v5, %v8934_v63 }
 0x917   : > { %v6966_v7 = vpack.c.bf16 %v6965_v25, %v6964_v61 }
 0x918   : > { %v12513_v23 = vadd.f32 %v6763_v2, %v12259_v34 }
 0x930   : > { %v7081_v29 = vpop.f32.mrb[84].mxu1 }
 0x931   : > { %v7082_v6 = vadd.f32 %v8325_v51, %v7081_v29  ;;  %v9651_v24 = vpop.f32.mrb[85].mxu1  ;;  %v7205_v37 = vpop.f32.mrb[88].mxu0  ;;  %v10119_v29 = vld [vmem:[%s12654_s7 + $0x20] sm:$0xff]  }
 0x932   : > { %v7084_v8 = vpop.f32.mrb[86].mxu1  ;;  %v7206_v4 = vadd.f32 %v8325_v51, %v7205_v37  ;;  %v9671_v28 = vpop.f32.mrb[89].mxu0 }
 0x933   : > { %v7088_v17 = vmax.f32 %v7082_v6, 0.0  ;;  %v7085_v30 = vadd.f32 %v8325_v51, %v7084_v8  ;;  %v9652_v9 = vpop.f32.mrb[87].mxu1  ;;  %v7208_v26 = vpop.f32.mrb[90].mxu0 }
 0x934   : > { %v7212_v42 = vmax.f32 %v7206_v4, 0.0  ;;  %v7209_v32 = vadd.f32 %v8325_v51, %v7208_v26  ;;  %v9672_v58 = vpop.f32.mrb[91].mxu0  ;;  %v8376_v9 = vld [vmem:[%s12655_s8] ss:$0 sm:$0xff] }
 0x935   : > { %v7089_v47 = vmax.f32 %v7085_v30, 0.0 }
 0x936   : > { %v7213_v13 = vmax.f32 %v7209_v32, 0.0 }
 0x937   : > { %v7090_v39 = vpack.c.bf16 %v7089_v47, %v7088_v17 }
 0x938   : > { %v7214_v15 = vpack.c.bf16 %v7213_v13, %v7212_v42 }
 0x939   : > { %7628 = vmatprep.mubr.bf16.mxu0 %v7090_v39 }
 0x93a   : > { %7629 = vmatmul.mubr.bf16.vlgmr.msra.gmra.mrb[92].mxu0 %v6966_v7 }
 0x93b   : > { %9709 = vmatprep.mubr.msk.bf16.mxu0 %vm10256_vm0, %v10255_v0  ;;  %9694 = vmatpush3.bf16.msra.mxu0 %v10107_v43 }
 0x93c   : > { %9695 = vmatprep.subr.bf16.mxu0 %v10255_v0 }
 0x93f   : > { %9696 = vmatpush3.bf16.msra.mxu0 %v10108_v46 }
 0x940   : > { %9697 = vmatprep.subr.bf16.mxu0 %v10255_v0 }
 0x943   : > { %9698 = vmatpush3.bf16.msra.mxu0 %v10109_v41 }
 0x944   : > { %9699 = vmatprep.subr.bf16.mxu0 %v10255_v0 }
 0x947   : > { %9700 = vmatpush3.bf16.msra.mxu0 %v10110_v18 }
 0x948   : > { %9701 = vmatprep.subr.bf16.mxu0 %v10255_v0 }
 0x94b   : > { %9702 = vmatpush3.bf16.msra.mxu0 %v10111_v49 }
 0x94c   : > { %9703 = vmatprep.subr.bf16.mxu0 %v10255_v0 }
 0x94f   : > { %9704 = vmatpush3.bf16.msra.mxu0 %v10112_v44 }
 0x950   : > { %v7329_v34 = vpop.f32.mrb[88].mxu1  ;;  %9705 = vmatprep.subr.bf16.mxu0 %v10255_v0 }
 0x951   : > { %v7330_v16 = vadd.f32 %v8325_v51, %v7329_v34  ;;  %v9691_v27 = vpop.f32.mrb[89].mxu1 }
 0x952   : > { %v7332_v36 = vpop.f32.mrb[90].mxu1 }
 0x953   : > { %v7333_v33 = vadd.f32 %v8325_v51, %v7332_v36  ;;  %v9692_v52 = vpop.f32.mrb[91].mxu1  ;;  %v7336_v40 = vmax.f32 %v7330_v16, 0.0  ;;  %9706 = vmatpush3.bf16.msra.mxu0 %v10113_v38 }
 0x954   : > { %9707 = vmatprep.subr.bf16.mxu0 %v10255_v0 }
 0x955   : > { %v7337_v35 = vmax.f32 %v7333_v33, 0.0 }
 0x957   : > { %v7338_v60 = vpack.c.bf16 %v7337_v35, %v7336_v40  ;;  %9708 = vmatpush3.bf16.msra.mxu0 %v10114_v50 }
 0x959   : > { %7669 = vmatprep.mubr.bf16.mxu1 %v7338_v60 }
 0x95a   : > { %7670 = vmatmul.mubr.bf16.vlgmr.msra.gmra.mrb[92].mxu1 %v7214_v15 }
 0x95b   : > { %9725 = vmatprep.mubr.msk.bf16.mxu1 %vm10256_vm0, %v10255_v0  ;;  %9714 = vmatpush3.bf16.msra.mxu1 %v10115_v54 }
 0x95c   : > { %9715 = vmatprep.subr.bf16.mxu1 %v10255_v0 }
 0x95f   : > { %9716 = vmatpush3.bf16.msra.mxu1 %v10116_v3 }
 0x960   : > { %9717 = vmatprep.subr.bf16.mxu1 %v10255_v0 }
 0x963   : > { %9718 = vmatpush3.bf16.msra.mxu1 %v10117_v48 }
 0x964   : > { %9719 = vmatprep.subr.bf16.mxu1 %v10255_v0 }
 0x967   : > { %9720 = vmatpush3.bf16.msra.mxu1 %v10118_v55 }
 0x968   : > { %9721 = vmatprep.subr.bf16.mxu1 %v10255_v0 }
 0x96b   : > { %9722 = vmatpush3.bf16.msra.mxu1 %v10119_v29 }
 0x96c   : > { %9723 = vmatprep.subr.bf16.mxu1 %v10255_v0 }
 0xa0d   : > { %v9009_v59 = vpop.f32.mrb[92].mxu0 }
 0xa0e   : > { %v9010_v53 = vpop.f32.mrb[93].mxu0 }
 0xa0f   : > { %v9011_v1 = vadd.f32 %v9010_v53, %v9009_v59  ;;  %v9012_v63 = vpop.f32.mrb[94].mxu0 }
 0xa10   : > { %v9013_v51 = vpop.f32.mrb[95].mxu0 }
 0xa11   : > { %v9014_v57 = vadd.f32 %v9013_v51, %v9012_v63 }
 0xa2d   : > { %v9031_v20 = vpop.f32.mrb[92].mxu1 }
 0xa2e   : > { %v9032_v14 = vpop.f32.mrb[93].mxu1 }
 0xa2f   : > { %v9033_v56 = vadd.f32 %v9032_v14, %v9031_v20  ;;  %v9034_v19 = vpop.f32.mrb[94].mxu1 }
 0xa30   : > { %v9035_v45 = vpop.f32.mrb[95].mxu1 }
 0xa31   : > { %v7672_v10 = vadd.f32 %v9033_v56, %v9011_v1  ;;  %v9036_v22 = vadd.f32 %v9035_v45, %v9034_v19 }
 0xa33   : > { %v7680_v61 = vadd.f32 %v7672_v10, %v12510_v62  ;;  %v7675_v11 = vadd.f32 %v9036_v22, %v9014_v57  ;;  %v10120_v62 = vld [vmem:[%s12654_s7 + $0x28] sm:$0xff]  }
 0xa34   : > { %9724 = vmatpush3.bf16.msra.mxu1 %v10120_v62 }
 0xa35   : > { %v7693_v21 = vadd.f32 %v8366_v12, %v7680_v61  ;;  %v7681_v31 = vadd.f32 %v7675_v11, %v12513_v23  ;;  %v8367_v23 = vld [vmem:[%s12653_s6] ss:$0 sm:$0xff] }
 0xa37   : > { %v7694_v5 = vadd.f32 %v8366_v12, %v7681_v31  ;;  %v7695_v25 = vmax.f32 %v7693_v21, 0.0 }
 0xa39   : > { %v7696_v2 = vmax.f32 %v7694_v5, 0.0 }
 0xa3b   : > { %v7697_v7 = vpack.c.bf16 %v7696_v2, %v7695_v25 }
 0xa3d   : > { %9710 = vmatmul.mubr.bf16.vlgmr.msra.gmra.mrb[96].mxu0 %v7697_v7 }
 0xb10   : > { %v7803_v6 = vpop.f32.mrb[96].mxu0 }
 0xb11   : > { %v7804_v24 = vadd.f32 %v8367_v23, %v7803_v6  ;;  %v9711_v37 = vpop.f32.mrb[97].mxu0 }
 0xb12   : > { %v7806_v8 = vpop.f32.mrb[98].mxu0 }
 0xb13   : > { %v7807_v4 = vadd.f32 %v8367_v23, %v7806_v8  ;;  %v9712_v28 = vpop.f32.mrb[99].mxu0  ;;  %v7810_v17 = vmax.f32 %v7804_v24, 0.0 }
 0xb15   : > { %v7811_v30 = vmax.f32 %v7807_v4, 0.0 }
 0xb17   : > { %v7812_v0 = vpack.c.bf16 %v7811_v30, %v7810_v17 }
 0xb19   : > { %9726 = vmatmul.mubr.msk.bf16.vlgmr.msra.gmra.mrb[96].mxu1 %vm7868_vm8, %v7812_v0 }
 0xbec   : > { %v7906_v26 = vpop.f32.mrb[96].mxu1 }
 0xbed   : > { %v7907_v42 = vadd.f32 %v8376_v9, %v7906_v26  ;;  %v9727_v32 = vpop.f32.mrb[97].mxu1  ;;  %7925 = sbr.rel (!%p12676_p9) target bundleno = 3088 (0xc10), region = 68 }
 0xbee   : > { %v7909_v58 = vpop.f32.mrb[98].mxu1 }
 0xbef   : > { %v7913_v47 = vmax.f32 %v7907_v42, 0.0  ;;  %v7910_v13 = vadd.f32 %v8376_v9, %v7909_v58  ;;  %v9728_v39 = vpop.f32.mrb[99].mxu1 }
 0xbf1   : > { %7916 = vst.msk [vmem:[%s373_s16] sm:$0xff] %vm7915_vm9, %v7913_v47  ;;  %v7914_v15 = vmax.f32 %v7910_v13, 0.0 }
 0xbf3   : > { %7917 = vst.msk [vmem:[%s373_s16 + $0x8] sm:$0xff] %vm7915_vm9, %v7914_v15 }
 0xbf4   : > { %s12686_s17 = smov (!%p7928_p10, %s7927_s17), 2 }
 0xbf5   : > { %s12589_s25 = sshll.u32 %s12686_s17, 7 }
 0xbf6   : > { %s7932_s28 = ssub.s32 256, %s12589_s25 }
 0xbf7   : > { %7933 = vsyncadd %s7919_s11, %s7932_s28  ;;  %p8387_p1 = scmp.ne.s32.totalorder %s12589_s25, 0  ;;  %s8396_s14 = sshll.u32 %s10331_s13, 8 }
 0xbf8   : > { %s12599_s23 = scalar_lea.hbm %s12656_s9, %s8396_s14  ;;  %s7938_s26 = sshll.u32 %s373_s16, 4  ;;  %s12601_s26 = int_to_ptr.vmem [resolvable:$true] %s7938_s26 }
 0xbf9   : > { %s10177_s27 = scalar_lea.vmem %s12601_s26, %s12589_s25  ;;  %s10257_s29 = smov [#allocation8]  }
 0xbfa   : > { %p10178_p4 = scmp.ne.s32.totalorder %s12601_s26, %s10177_s27  ;;  %s10181_s18 = sshll.u32 %s10257_s29, 4  ;;  %s10182_s18 = int_to_ptr.vmem [resolvable:$false] %s10181_s18 }
 0xbfb   : > { %s10183_s13 = scalar_lea.vmem %s10182_s18, 512  ;;  %p10184_p12 = scmp.lt.s32.totalorder %s12601_s26, %s10182_s18 }
 0xbfc   : > { %p10179_p5 = pnand %p10178_p4, %p8387_p1  ;;  %p10185_p2 = scmp.lt.s32.totalorder %s10183_s13, %s10177_s27 }
 0xbfe   : > { %p10180_p11 = pneg %p10179_p5  ;;  %p10186_p3 = por %p10185_p2, %p10184_p12 }
 0xc00   : > { %p10187_p13 = pnand %p10186_p3, %p10180_p11 }
 0xc02   : > { %10190 = shalt.err (!%p10187_p13)
}
 0xc03   : > { %s10191_s19 = scalar_lea.hbm %s12599_s23, %s12589_s25  ;;  %s10195_s17 = scalar_lea.hbm %s12656_s9, 384 }
 0xc04   : > { %p10192_p7 = scmp.ne.s32.totalorder %s12599_s23, %s10191_s19  ;;  %p10196_p9 = scmp.lt.u32.totalorder %s12599_s23, %s12656_s9 }
 0xc05   : > { %p10197_p10 = scmp.lt.u32.totalorder %s10195_s17, %s10191_s19  ;;  %p10199_p5 = scmp.lt.u32.totalorder %s10191_s19, %s12599_s23 }
 0xc06   : > { %p10193_p6 = pnand %p10192_p7, %p8387_p1 }
 0xc07   : > { %p10198_p4 = por %p10197_p10, %p10196_p9 }
 0xc08   : > { %p10194_p8 = pneg %p10193_p6 }
 0xc09   : > { %p10200_p11 = por %p10199_p5, %p10198_p4 }
 0xc0b   : > { %p10201_p12 = pnand %p10200_p11, %p10194_p8 }
 0xc0d   : > { %10204 = shalt.err (!%p10201_p12)
}
 0xc0e   : > { %s10258_s21 = smov 128   ;;  %s10259_s20 = smov 8  }
 0xc0f   : > { %7944 = dma.vmem_to_hbm [thread:$0]  (%p8387_p1), %s12601_s26, %s12589_s25, %s12599_s23, %s7919_s11, %s10258_s21, %s10258_s21, %s10259_s20  }
 0xc10 PF: > { %s7953_s27 = sand.u32 1, %s10235_s30   ;;  %p12677_p2 = scmp.ne.s32.totalorder %s12667_s22, 0 }
 0xc11   : > { %s7954_s29 = scalar_lea.sflag [#allocation5], %s7953_s27 }
 0xc12   : > { %p9740_p3 = pnand %p8024_p0, %p12677_p2 }
 0xc14   : > { %10230 = dma.done.wait (!%p9740_p3), %s7954_s29, 256  }
 0xc15   : > { %10232 = vsyncadd (!%p9740_p3), %s7954_s29, 4294967040  ;;  %s12678_s18 = sld [smem:[#allocation12_spill]]  ;;  %s12679_s11 = sld [smem:[#allocation13_spill]] }
 0xc16   : > { %p23_p13 = scmp.ge.s32.totalorder %s10335_s15, 4   ;;  %s12680_s30 = smov %s10239_s10 }
 0xc17   : > { %s12682_s12 = smov %s10335_s15 }
 0xc18   :  { %25 = sbr.rel (!%p23_p13) target bundleno = 8 (0x8), region = 112 }
 0xc1b   : > { %s12681_s10 = smov %s12678_s18 }
 0xc1f   :  { %7959 = vsyncpa [#allocation4], 1 }
 0xc20   :  { %7961 = vsyncpa [#allocation4 + $0x1], 1 }
 0xc21   :  { %7962 = vsyncpa [#allocation7], 1 }
 0xc22   :  { %7963 = vsyncpa [#allocation5], 1 }
 0xc23   :  { %7965 = vsyncpa [#allocation5 + $0x1], 1 }

</bundles_post_ra>
